<compile_context>
chip_gen: v5e
topology: v5e:2x2
jax: 0.10.0
libtpu: 0.0.40
codegen_flags: <defaults>
</compile_context>

<pallas_src>
import jax
import jax.numpy as jnp
from jax.experimental import pallas as pl
from jax.experimental.pallas import tpu as pltpu

INPUT_DIM = 768
HIDDEN_DIM = 1024
BN_EPS = 1e-5


def _round_up(n, m):
    return (n + m - 1) // m * m


def _hear_kernel(x_ref, w1_ref, b1_ref, s1_ref, t1_ref,
                 w2_ref, b2_ref, s2_ref, t2_ref, o_ref):
    # --- block 1: Linear -> ReLU -> BN(affine, eval) -> ReLU ---
    # (eval-mode Dropout is identity; relu(relu(y)) == relu(y), so no 3rd relu)
    h = jnp.dot(x_ref[...], w1_ref[...], preferred_element_type=jnp.float32)
    h = jnp.maximum(h + b1_ref[...], 0.0)
    h = jnp.maximum(h * s1_ref[...] + t1_ref[...], 0.0)

    # --- block 2 ---
    h2 = jnp.dot(h.astype(jnp.bfloat16), w2_ref[...],
                 preferred_element_type=jnp.float32)
    h2 = jnp.maximum(h2 + b2_ref[...], 0.0)
    h2 = jnp.maximum(h2 * s2_ref[...] + t2_ref[...], 0.0)

    o_ref[...] = h2.astype(o_ref.dtype)


def hear_eval_nn(x, params, *, tile_b=256):
    """x: (B, 768) -> (B, 1024) float32."""
    B, F = x.shape
    assert F == INPUT_DIM
    w1, b1, s1, t1, w2, b2, s2, t2 = params

    # Cast once in the wrapper (not per grid step): bf16 operands, f32 acc.
    x = x.astype(jnp.bfloat16)
    w1 = w1.astype(jnp.bfloat16)
    w2 = w2.astype(jnp.bfloat16)

    # Adaptive batch tile: shrink for tiny batches, pad ragged batches up to a
    # tile multiple.  Large batches naturally yield >=2 parallel grid steps so
    # both v7x TensorCores get work.
    tile = min(tile_b, _round_up(B, 8))
    b_pad = _round_up(B, tile)
    if b_pad != B:
        x = jnp.pad(x, ((0, b_pad - B), (0, 0)))
    grid = (b_pad // tile,)

    # Constant-index blocks (weights / biases / BN affines): single-buffered,
    # there is nothing to pipeline across grid steps.
    def const_spec(shape):
        return pl.BlockSpec(shape, lambda i: (0, 0), pipeline_mode=pl.Buffered(1))

    flops = 2 * b_pad * (INPUT_DIM + HIDDEN_DIM) * HIDDEN_DIM
    bytes_accessed = (
        b_pad * INPUT_DIM * 2                       # x (bf16)
        + (INPUT_DIM + HIDDEN_DIM) * HIDDEN_DIM * 2  # W1 + W2 (bf16)
        + 6 * HIDDEN_DIM * 4                         # biases / scales / shifts
        + b_pad * HIDDEN_DIM * 4                     # output (f32)
    )

    out = pl.pallas_call(
        _hear_kernel,
        out_shape=jax.ShapeDtypeStruct((b_pad, HIDDEN_DIM), jnp.float32),
        grid_spec=pltpu.PrefetchScalarGridSpec(
            num_scalar_prefetch=0,
            grid=grid,
            in_specs=[
                pl.BlockSpec((tile, INPUT_DIM), lambda i: (i, 0)),  # x tile
                const_spec((INPUT_DIM, HIDDEN_DIM)),                # W1 (in, out)
                const_spec((1, HIDDEN_DIM)),                        # b1
                const_spec((1, HIDDEN_DIM)),                        # bn1 scale
                const_spec((1, HIDDEN_DIM)),                        # bn1 shift
                const_spec((HIDDEN_DIM, HIDDEN_DIM)),               # W2 (in, out)
                const_spec((1, HIDDEN_DIM)),                        # b2
                const_spec((1, HIDDEN_DIM)),                        # bn2 scale
                const_spec((1, HIDDEN_DIM)),                        # bn2 shift
            ],
            out_specs=pl.BlockSpec((tile, HIDDEN_DIM), lambda i: (i, 0)),
        ),
        compiler_params=pltpu.CompilerParams(
            dimension_semantics=("parallel",),
            vmem_limit_bytes=32 * 1024 * 1024,
        ),
        cost_estimate=pl.CostEstimate(
            flops=flops, transcendentals=0, bytes_accessed=bytes_accessed),
    )(x, w1, b1, s1, t1, w2, b2, s2, t2)

    return out[:B] if b_pad != B else out


def init_params(key):
    """Deterministic params matching HearEvalNN.__init__ shapes.

    Linear weights: xavier_normal_ (std = sqrt(2/(fan_in+fan_out))), stored as
    (in, out) in bfloat16.  Linear biases: PyTorch default uniform.  BatchNorm:
    default gamma=1, beta=0, running stats -> folded per-feature scale/shift.
    """
    k1, k2, k3, k4 = jax.random.split(key, 4)

    std1 = (2.0 / (INPUT_DIM + HIDDEN_DIM)) ** 0.5
    std2 = (2.0 / (HIDDEN_DIM + HIDDEN_DIM)) ** 0.5
    w1 = (std1 * jax.random.normal(k1, (INPUT_DIM, HIDDEN_DIM), jnp.float32)
          ).astype(jnp.bfloat16)
    w2 = (std2 * jax.random.normal(k2, (HIDDEN_DIM, HIDDEN_DIM), jnp.float32)
          ).astype(jnp.bfloat16)
    b1 = jax.random.uniform(k3, (1, HIDDEN_DIM), jnp.float32,
                            -1.0 / INPUT_DIM ** 0.5, 1.0 / INPUT_DIM ** 0.5)
    b2 = jax.random.uniform(k4, (1, HIDDEN_DIM), jnp.float32,
                            -1.0 / HIDDEN_DIM ** 0.5, 1.0 / HIDDEN_DIM ** 0.5)

    # Fold eval-mode BatchNorm1d (default stats) into scale/shift.
    gamma = jnp.ones((1, HIDDEN_DIM), jnp.float32)
    beta = jnp.zeros((1, HIDDEN_DIM), jnp.float32)
    running_mean = jnp.zeros((1, HIDDEN_DIM), jnp.float32)
    running_var = jnp.ones((1, HIDDEN_DIM), jnp.float32)
    scale = gamma / jnp.sqrt(running_var + BN_EPS)
    shift = beta - running_mean * scale
    # TODO(synk): training-mode BatchNorm (batch stats) / Dropout RNG not implemented; eval semantics used.
    return (w1, b1, scale, shift, w2, b2, scale, shift)


def reference(x, params):
    """Pure-JAX reference with the same bf16-operand / f32-accumulate math."""
    w1, b1, s1, t1, w2, b2, s2, t2 = params
    xb = x.astype(jnp.bfloat16)
    h = jnp.dot(xb, w1.astype(jnp.bfloat16),
                preferred_element_type=jnp.float32) + b1
    h = jnp.maximum(h, 0.0)
    h = jnp.maximum(h * s1 + t1, 0.0)
    h2 = jnp.dot(h.astype(jnp.bfloat16), w2.astype(jnp.bfloat16),
                 preferred_element_type=jnp.float32) + b2
    h2 = jnp.maximum(h2, 0.0)
    h2 = jnp.maximum(h2 * s2 + t2, 0.0)
    return h2


if __name__ == "__main__":
    key = jax.random.PRNGKey(0)
    kx, kp = jax.random.split(key)
    B = 8
    x = jax.random.normal(kx, (B, INPUT_DIM), jnp.float32)
    params = init_params(kp)

    out = hear_eval_nn(x, params)
    out = jax.block_until_ready(out)

    ref = reference(x, params)
    assert out.shape == (B, HIDDEN_DIM)
    assert jnp.allclose(out, ref, atol=2e-2, rtol=2e-2)
    print("KERNEL_OK")
</pallas_src>

<mosaic_0001>
module attributes {stable_mosaic.version = 11 : i64} {
  func.func @_hear_kernel(%arg0: i32, %arg1: memref<8x768xbf16, #tpu.memory_space<vmem>>, %arg2: memref<768x1024xbf16, #tpu.memory_space<vmem>>, %arg3: memref<1x1024xf32, #tpu.memory_space<vmem>>, %arg4: memref<1x1024xf32, #tpu.memory_space<vmem>>, %arg5: memref<1x1024xf32, #tpu.memory_space<vmem>>, %arg6: memref<1024x1024xbf16, #tpu.memory_space<vmem>>, %arg7: memref<1x1024xf32, #tpu.memory_space<vmem>>, %arg8: memref<1x1024xf32, #tpu.memory_space<vmem>>, %arg9: memref<1x1024xf32, #tpu.memory_space<vmem>>, %arg10: memref<8x1024xf32, #tpu.memory_space<vmem>>) attributes {dimension_semantics = [#tpu.dimension_semantics<parallel>], iteration_bounds = array<i64: 1>, scalar_prefetch = 0 : i64, scratch_operands = 0 : i64, tpu.core_type = #tpu.core_type<tc>, window_params = [{transform_indices = @transform_0, window_bounds = array<i64: 8, 768>}, {pipeline_mode = #tpu.pipeline_mode<synchronous>, transform_indices = @transform_1, window_bounds = array<i64: 768, 1024>}, {pipeline_mode = #tpu.pipeline_mode<synchronous>, transform_indices = @transform_2, window_bounds = array<i64: 1, 1024>}, {pipeline_mode = #tpu.pipeline_mode<synchronous>, transform_indices = @transform_3, window_bounds = array<i64: 1, 1024>}, {pipeline_mode = #tpu.pipeline_mode<synchronous>, transform_indices = @transform_4, window_bounds = array<i64: 1, 1024>}, {pipeline_mode = #tpu.pipeline_mode<synchronous>, transform_indices = @transform_5, window_bounds = array<i64: 1024, 1024>}, {pipeline_mode = #tpu.pipeline_mode<synchronous>, transform_indices = @transform_6, window_bounds = array<i64: 1, 1024>}, {pipeline_mode = #tpu.pipeline_mode<synchronous>, transform_indices = @transform_7, window_bounds = array<i64: 1, 1024>}, {pipeline_mode = #tpu.pipeline_mode<synchronous>, transform_indices = @transform_8, window_bounds = array<i64: 1, 1024>}, {transform_indices = @transform_9, window_bounds = array<i64: 8, 1024>}]} {
    %c0 = arith.constant 0 : index
    %c0_0 = arith.constant 0 : index
    %0 = vector.load %arg1[%c0, %c0_0] : memref<8x768xbf16, #tpu.memory_space<vmem>>, vector<8x768xbf16>
    %c0_1 = arith.constant 0 : index
    %c0_2 = arith.constant 0 : index
    %1 = vector.load %arg2[%c0_1, %c0_2] : memref<768x1024xbf16, #tpu.memory_space<vmem>>, vector<768x1024xbf16>
    %cst = arith.constant dense<0.000000e+00> : vector<8x1024xf32>
    %2 = tpu.matmul %0, %1, %cst {dimension_numbers = #tpu.dot_dimension_numbers<[1], [0], [0], [1], [0, 0, 1, 1], [], []>} : vector<8x768xbf16>, vector<768x1024xbf16>, vector<8x1024xf32> -> vector<8x1024xf32>
    %c0_3 = arith.constant 0 : index
    %c0_4 = arith.constant 0 : index
    %3 = vector.load %arg3[%c0_3, %c0_4] : memref<1x1024xf32, #tpu.memory_space<vmem>>, vector<1x1024xf32>
    %4 = vector.broadcast %3 : vector<1x1024xf32> to vector<8x1024xf32>
    %5 = arith.addf %2, %4 : vector<8x1024xf32>
    %cst_5 = arith.constant 0.000000e+00 : f32
    %6 = vector.broadcast %cst_5 : f32 to vector<8x1024xf32>
    %7 = arith.maximumf %5, %6 : vector<8x1024xf32>
    %c0_6 = arith.constant 0 : index
    %c0_7 = arith.constant 0 : index
    %8 = vector.load %arg4[%c0_6, %c0_7] : memref<1x1024xf32, #tpu.memory_space<vmem>>, vector<1x1024xf32>
    %9 = vector.broadcast %8 : vector<1x1024xf32> to vector<8x1024xf32>
    %10 = arith.mulf %7, %9 : vector<8x1024xf32>
    %c0_8 = arith.constant 0 : index
    %c0_9 = arith.constant 0 : index
    %11 = vector.load %arg5[%c0_8, %c0_9] : memref<1x1024xf32, #tpu.memory_space<vmem>>, vector<1x1024xf32>
    %12 = vector.broadcast %11 : vector<1x1024xf32> to vector<8x1024xf32>
    %13 = arith.addf %10, %12 : vector<8x1024xf32>
    %cst_10 = arith.constant 0.000000e+00 : f32
    %14 = vector.broadcast %cst_10 : f32 to vector<8x1024xf32>
    %15 = arith.maximumf %13, %14 : vector<8x1024xf32>
    %16 = arith.truncf %15 : vector<8x1024xf32> to vector<8x1024xbf16>
    %c0_11 = arith.constant 0 : index
    %c0_12 = arith.constant 0 : index
    %17 = vector.load %arg6[%c0_11, %c0_12] : memref<1024x1024xbf16, #tpu.memory_space<vmem>>, vector<1024x1024xbf16>
    %cst_13 = arith.constant dense<0.000000e+00> : vector<8x1024xf32>
    %18 = tpu.matmul %16, %17, %cst_13 {dimension_numbers = #tpu.dot_dimension_numbers<[1], [0], [0], [1], [0, 0, 1, 1], [], []>} : vector<8x1024xbf16>, vector<1024x1024xbf16>, vector<8x1024xf32> -> vector<8x1024xf32>
    %c0_14 = arith.constant 0 : index
    %c0_15 = arith.constant 0 : index
    %19 = vector.load %arg7[%c0_14, %c0_15] : memref<1x1024xf32, #tpu.memory_space<vmem>>, vector<1x1024xf32>
    %20 = vector.broadcast %19 : vector<1x1024xf32> to vector<8x1024xf32>
    %21 = arith.addf %18, %20 : vector<8x1024xf32>
    %cst_16 = arith.constant 0.000000e+00 : f32
    %22 = vector.broadcast %cst_16 : f32 to vector<8x1024xf32>
    %23 = arith.maximumf %21, %22 : vector<8x1024xf32>
    %c0_17 = arith.constant 0 : index
    %c0_18 = arith.constant 0 : index
    %24 = vector.load %arg8[%c0_17, %c0_18] : memref<1x1024xf32, #tpu.memory_space<vmem>>, vector<1x1024xf32>
    %25 = vector.broadcast %24 : vector<1x1024xf32> to vector<8x1024xf32>
    %26 = arith.mulf %23, %25 : vector<8x1024xf32>
    %c0_19 = arith.constant 0 : index
    %c0_20 = arith.constant 0 : index
    %27 = vector.load %arg9[%c0_19, %c0_20] : memref<1x1024xf32, #tpu.memory_space<vmem>>, vector<1x1024xf32>
    %28 = vector.broadcast %27 : vector<1x1024xf32> to vector<8x1024xf32>
    %29 = arith.addf %26, %28 : vector<8x1024xf32>
    %cst_21 = arith.constant 0.000000e+00 : f32
    %30 = vector.broadcast %cst_21 : f32 to vector<8x1024xf32>
    %31 = arith.maximumf %29, %30 : vector<8x1024xf32>
    %c0_22 = arith.constant 0 : index
    %c0_23 = arith.constant 0 : index
    %32 = vector.load %arg10[%c0_22, %c0_23] : memref<8x1024xf32, #tpu.memory_space<vmem>>, vector<8x1024xf32>
    tpu.vector_store %arg10[%c0_22, %c0_23], %31 {strides = array<i32>} : memref<8x1024xf32, #tpu.memory_space<vmem>>, vector<8x1024xf32>,
    return
  }
  func.func @transform_0(%arg0: i32) -> (i32, i32) {
    %c0_i32 = arith.constant 0 : i32
    %c0_i32_0 = arith.constant 0 : i32
    return %arg0, %c0_i32 : i32, i32
  }
  func.func @transform_1(%arg0: i32) -> (i32, i32) {
    %c0_i32 = arith.constant 0 : i32
    %c0_i32_0 = arith.constant 0 : i32
    %c0_i32_1 = arith.constant 0 : i32
    return %c0_i32, %c0_i32_0 : i32, i32
  }
  func.func @transform_2(%arg0: i32) -> (i32, i32) {
    %c0_i32 = arith.constant 0 : i32
    %c0_i32_0 = arith.constant 0 : i32
    %c0_i32_1 = arith.constant 0 : i32
    return %c0_i32, %c0_i32_0 : i32, i32
  }
  func.func @transform_3(%arg0: i32) -> (i32, i32) {
    %c0_i32 = arith.constant 0 : i32
    %c0_i32_0 = arith.constant 0 : i32
    %c0_i32_1 = arith.constant 0 : i32
    return %c0_i32, %c0_i32_0 : i32, i32
  }
  func.func @transform_4(%arg0: i32) -> (i32, i32) {
    %c0_i32 = arith.constant 0 : i32
    %c0_i32_0 = arith.constant 0 : i32
    %c0_i32_1 = arith.constant 0 : i32
    return %c0_i32, %c0_i32_0 : i32, i32
  }
  func.func @transform_5(%arg0: i32) -> (i32, i32) {
    %c0_i32 = arith.constant 0 : i32
    %c0_i32_0 = arith.constant 0 : i32
    %c0_i32_1 = arith.constant 0 : i32
    return %c0_i32, %c0_i32_0 : i32, i32
  }
  func.func @transform_6(%arg0: i32) -> (i32, i32) {
    %c0_i32 = arith.constant 0 : i32
    %c0_i32_0 = arith.constant 0 : i32
    %c0_i32_1 = arith.constant 0 : i32
    return %c0_i32, %c0_i32_0 : i32, i32
  }
  func.func @transform_7(%arg0: i32) -> (i32, i32) {
    %c0_i32 = arith.constant 0 : i32
    %c0_i32_0 = arith.constant 0 : i32
    %c0_i32_1 = arith.constant 0 : i32
    return %c0_i32, %c0_i32_0 : i32, i32
  }
  func.func @transform_8(%arg0: i32) -> (i32, i32) {
    %c0_i32 = arith.constant 0 : i32
    %c0_i32_0 = arith.constant 0 : i32
    %c0_i32_1 = arith.constant 0 : i32
    return %c0_i32, %c0_i32_0 : i32, i32
  }
  func.func @transform_9(%arg0: i32) -> (i32, i32) {
    %c0_i32 = arith.constant 0 : i32
    %c0_i32_0 = arith.constant 0 : i32
    return %arg0, %c0_i32 : i32, i32
  }
}

</mosaic_0001>

<bundles_post_ra>
// kernel: tpu_custom_call.1
= control target key start
LH: loop header
LB: loop body
LE: loop exit
PB: predicated region body
PF: predicated region fallthrough
CT: control target
= control target key end

     0   :  { %14 = vsyncpa [#allocation3], 0  ;;  %s12434_s0 = inlined_call_operand.hbm [shape: bf16[8,768], index: 0, kind: input, shape index: {}]   ;;  %s12435_s1 = inlined_call_operand.hbm [shape: bf16[768,1024], index: 1, kind: input, shape index: {}]   ;;  %s12436_s2 = inlined_call_operand.hbm [shape: f32[1,1024], index: 2, kind: input, shape index: {}]   ;;  %s12437_s3 = inlined_call_operand.hbm [shape: f32[1,1024], index: 3, kind: input, shape index: {}]   ;;  %s12438_s4 = inlined_call_operand.hbm [shape: f32[1,1024], index: 4, kind: input, shape index: {}]   ;;  %s12439_s5 = inlined_call_operand.hbm [shape: bf16[1024,1024], index: 5, kind: input, shape index: {}]   ;;  %s12440_s6 = inlined_call_operand.hbm [shape: f32[1,1024], index: 6, kind: input, shape index: {}]   ;;  %s12441_s7 = inlined_call_operand.hbm [shape: f32[1,1024], index: 7, kind: input, shape index: {}]   ;;  %s12442_s8 = inlined_call_operand.hbm [shape: f32[1,1024], index: 8, kind: input, shape index: {}]   ;;  %s12443_s9 = inlined_call_operand.hbm [shape: f32[8,1024], index: 9, kind: output, shape index: {}]  }
   0x1   :  { %15 = vsyncpa [#allocation6], 0 }
   0x2   :  { %16 = vsyncpa [#allocation9], 0 }
   0x3   :  { %17 = vsyncpa [#allocation12], 0 }
   0x4   :  { %18 = vsyncpa [#allocation15], 0  ;;  %s35_s11 = sshll.u32 %s12435_s1, 4  ;;  %s36_s11 = int_to_ptr.hbm [resolvable:$true] %s35_s11 }
   0x5   :  { %19 = vsyncpa [#allocation4], 0  ;;  %s11977_s12 = smov [#allocation5]   ;;  %s60_s16 = sshll.u32 %s12437_s3, 4  ;;  %s61_s16 = int_to_ptr.hbm [resolvable:$true] %s60_s16 }
   0x6   :  { %s37_s13 = sshll.u32 %s11977_s12, 4  ;;  %s11978_s17 = smov 512   ;;  %s38_s13 = int_to_ptr.vmem [resolvable:$true] %s37_s13 }
   0x7   :  { %s11979_s18 = smov 32   ;;  %s11980_s19 = smov [#allocation8]  }
   0x8   :  { %43 = dma.hbm_to_vmem [thread:$0]  %s36_s11, 49152, %s38_s13, [#allocation6], %s11978_s17, %s11978_s17, %s11979_s18  }
   0x9   :  { %s62_s20 = sshll.u32 %s11980_s19, 4  ;;  %s81_s23 = sshll.u32 %s12439_s5, 4  ;;  %s63_s20 = int_to_ptr.vmem [resolvable:$true] %s62_s20  ;;  %s82_s23 = int_to_ptr.hbm [resolvable:$true] %s81_s23 }
   0xa   :  { %65 = dma.hbm_to_vmem [thread:$0]  %s61_s16, 128, %s63_s20, [#allocation9]  }
   0xb   :  { %s106_s25 = sshll.u32 %s12441_s7, 4  ;;  %s11981_s26 = smov [#allocation11]   ;;  %s107_s25 = int_to_ptr.hbm [resolvable:$true] %s106_s25 }
   0xc   :  { %s83_s27 = sshll.u32 %s11981_s26, 4  ;;  %s11982_s3 = smov [#allocation14]   ;;  %s84_s27 = int_to_ptr.vmem [resolvable:$true] %s83_s27 }
   0xd   :  { %89 = dma.hbm_to_vmem [thread:$0]  %s82_s23, 65536, %s84_s27, [#allocation12], %s11978_s17, %s11978_s17, %s11979_s18  }
   0xe   :  { %s108_s28 = sshll.u32 %s11982_s3, 4  ;;  %s25_s10 = sshll.u32 %s12434_s0, 4  ;;  %s109_s28 = int_to_ptr.vmem [resolvable:$true] %s108_s28  ;;  %s26_s10 = int_to_ptr.hbm [resolvable:$true] %s25_s10 }
   0xf   :  { %111 = dma.hbm_to_vmem [thread:$0]  %s107_s25, 128, %s109_s28, [#allocation15]  }
  0x10   :  { %s49_s12 = sshll.u32 %s12436_s2, 4  ;;  %s11983_s13 = smov [#allocation2]   ;;  %s50_s12 = int_to_ptr.hbm [resolvable:$true] %s49_s12 }
  0x11   :  { %s27_s7 = sshll.u32 %s11983_s13, 4  ;;  %s11984_s14 = smov [#allocation7]   ;;  %s28_s7 = int_to_ptr.vmem [resolvable:$true] %s27_s7 }
  0x12   :  { %30 = dma.hbm_to_vmem [thread:$0]  %s26_s10, 384, %s28_s7, [#allocation3]  }
  0x13   :  { %s51_s15 = sshll.u32 %s11984_s14, 4  ;;  %s71_s18 = sshll.u32 %s12438_s4, 4  ;;  %s52_s15 = int_to_ptr.vmem [resolvable:$true] %s51_s15  ;;  %s72_s18 = int_to_ptr.hbm [resolvable:$true] %s71_s18 }
  0x14   :  { %54 = dma.hbm_to_vmem [thread:$0]  %s50_s12, 128, %s52_s15, [#allocation6]  }
  0x15   :  { %s95_s20 = sshll.u32 %s12440_s6, 4  ;;  %s11985_s21 = smov [#allocation10]   ;;  %s96_s20 = int_to_ptr.hbm [resolvable:$true] %s95_s20 }
  0x16   :  { %s73_s2 = sshll.u32 %s11985_s21, 4  ;;  %s11986_s22 = smov [#allocation13]   ;;  %s74_s2 = int_to_ptr.vmem [resolvable:$true] %s73_s2 }
  0x17   :  { %76 = dma.hbm_to_vmem [thread:$0]  %s72_s18, 128, %s74_s2, [#allocation9]  }
  0x18   :  { %s97_s23 = sshll.u32 %s11986_s22, 4  ;;  %s117_s25 = sshll.u32 %s12442_s8, 4  ;;  %s98_s23 = int_to_ptr.vmem [resolvable:$true] %s97_s23  ;;  %s118_s25 = int_to_ptr.hbm [resolvable:$true] %s117_s25 }
  0x19   :  { %100 = dma.hbm_to_vmem [thread:$0]  %s96_s20, 128, %s98_s23, [#allocation12]  }
  0x1a   :  { %s11987_s4 = smov [#allocation16]  }
  0x1b   :  { %s119_s26 = sshll.u32 %s11987_s4, 4  ;;  %s120_s26 = int_to_ptr.vmem [resolvable:$true] %s119_s26 }
  0x1c   :  { %122 = dma.hbm_to_vmem [thread:$0]  %s118_s25, 128, %s120_s26, [#allocation15]  }
  0x1d   :  { %11965 = dma.done.wait [#allocation3], 384  }
  0x1e   :  { %11966 = vsyncadd [#allocation3], 4294966912 }
  0x1f   :  { %11967 = dma.done.wait [#allocation6], 49280  }
  0x20   :  { %11968 = vsyncadd [#allocation6], 4294918016 }
  0x21   :  { %11969 = dma.done.wait [#allocation9], 256  }
  0x22   :  { %11970 = vsyncadd [#allocation9], 4294967040 }
  0x23   :  { %11971 = dma.done.wait [#allocation12], 65664  }
  0x24   :  { %11972 = vsyncadd [#allocation12], 4294901632 }
  0x25   :  { %11973 = dma.done.wait [#allocation15], 256  }
  0x26   :  { %11974 = vsyncadd [#allocation15], 4294967040  ;;  %v7450_v0 = vld [vmem:[#allocation5 + $0x1c0] sm:$0xf]  ;;  %s11988_s6 = smov [#allocation17]   ;;  %s7210_s28 = sshll.u32 %s12443_s9, 4  ;;  %s7211_s28 = int_to_ptr.hbm [resolvable:$true] %s7210_s28 }
  0x27   :  { %v10868_v1 = vld [vmem:[#allocation5 + $0x1dc] sm:$0xf0]  ;;  %s7208_s8 = sshll.u32 %s11988_s6, 4  ;;  %s7209_s8 = int_to_ptr.vmem [resolvable:$true] %s7208_s8 }
  0x28   :  { %v7706_v2 = vld [vmem:[#allocation5 + $0x3c0] sm:$0xf]  ;;  %v7451_v3 = vor.u32 %v10868_v1, %v7450_v0 }
  0x29   :  { %v10932_v4 = vld [vmem:[#allocation5 + $0x3dc] sm:$0xf0] }
  0x2a   :  { %v7962_v5 = vld [vmem:[#allocation5 + $0x5c0] sm:$0xf]  ;;  %v7707_v7 = vor.u32 %v10932_v4, %v7706_v2  ;;  %2505 = vmatpush.bf16.msra.mxu0 %v7451_v3 }
  0x2b   :  { %v10996_v6 = vld [vmem:[#allocation5 + $0x5dc] sm:$0xf0] }
  0x2c   :  { %v7963_v8 = vor.u32 %v10996_v6, %v7962_v5  ;;  %v8218_v9 = vld [vmem:[#allocation5 + $0x7c0] sm:$0xf]  ;;  %2518 = vmatpush.bf16.msra.mxu1 %v7707_v7 }
  0x2d   :  { %v11060_v10 = vld [vmem:[#allocation5 + $0x7dc] sm:$0xf0] }
  0x2e   :  { %v7418_v11 = vld [vmem:[#allocation5 + $0x180] sm:$0xf]  ;;  %v8219_v12 = vor.u32 %v11060_v10, %v8218_v9  ;;  %2531 = vmatpush.bf16.msra.mxu2 %v7963_v8 }
  0x2f   :  { %v10860_v13 = vld [vmem:[#allocation5 + $0x19c] sm:$0xf0] }
  0x30   :  { %v7674_v14 = vld [vmem:[#allocation5 + $0x380] sm:$0xf]  ;;  %v7419_v16 = vor.u32 %v10860_v13, %v7418_v11  ;;  %2544 = vmatpush.bf16.msra.mxu3 %v8219_v12 }
  0x31   :  { %v10924_v15 = vld [vmem:[#allocation5 + $0x39c] sm:$0xf0] }
  0x32   :  { %v7675_v17 = vor.u32 %v10924_v15, %v7674_v14  ;;  %v7930_v18 = vld [vmem:[#allocation5 + $0x580] sm:$0xf]  ;;  %2506 = vmatpush.bf16.msra.mxu0 %v7419_v16 }
  0x33   :  { %v10988_v19 = vld [vmem:[#allocation5 + $0x59c] sm:$0xf0] }
  0x34   :  { %v8186_v20 = vld [vmem:[#allocation5 + $0x780] sm:$0xf]  ;;  %v7931_v21 = vor.u32 %v10988_v19, %v7930_v18  ;;  %2519 = vmatpush.bf16.msra.mxu1 %v7675_v17 }
  0x35   :  { %v11052_v22 = vld [vmem:[#allocation5 + $0x79c] sm:$0xf0] }
  0x36   :  { %v7386_v23 = vld [vmem:[#allocation5 + $0x140] sm:$0xf]  ;;  %v8187_v25 = vor.u32 %v11052_v22, %v8186_v20  ;;  %2532 = vmatpush.bf16.msra.mxu2 %v7931_v21 }
  0x37   :  { %v10852_v24 = vld [vmem:[#allocation5 + $0x15c] sm:$0xf0] }
  0x38   :  { %v7642_v26 = vld [vmem:[#allocation5 + $0x340] sm:$0xf]  ;;  %v7387_v29 = vor.u32 %v10852_v24, %v7386_v23  ;;  %2545 = vmatpush.bf16.msra.mxu3 %v8187_v25 }
  0x39   :  { %v10916_v27 = vld [vmem:[#allocation5 + $0x35c] sm:$0xf0] }
  0x3a   :  { %v7898_v28 = vld [vmem:[#allocation5 + $0x540] sm:$0xf]  ;;  %v7643_v33 = vor.u32 %v10916_v27, %v7642_v26  ;;  %2507 = vmatpush.bf16.msra.mxu0 %v7387_v29 }
  0x3b   :  { %v10980_v30 = vld [vmem:[#allocation5 + $0x55c] sm:$0xf0] }
  0x3c   :  { %v8154_v31 = vld [vmem:[#allocation5 + $0x740] sm:$0xf]  ;;  %v7899_v34 = vor.u32 %v10980_v30, %v7898_v28  ;;  %2520 = vmatpush.bf16.msra.mxu1 %v7643_v33  ;;  %v10864_v33 = vld [vmem:[#allocation5 + $0x1c4] sm:$0xf] }
  0x3d   :  { %v11044_v32 = vld [vmem:[#allocation5 + $0x75c] sm:$0xf0] }
  0x3e   :  { %v7354_v35 = vld [vmem:[#allocation5 + $0x100] sm:$0xf]  ;;  %v8155_v38 = vor.u32 %v11044_v32, %v8154_v31  ;;  %2533 = vmatpush.bf16.msra.mxu2 %v7899_v34  ;;  %v7452_v34 = vld [vmem:[#allocation5 + $0x1e0] sm:$0xf0] }
  0x3f   :  { %v10844_v36 = vld [vmem:[#allocation5 + $0x11c] sm:$0xf0] }
  0x40   :  { %v7610_v37 = vld [vmem:[#allocation5 + $0x300] sm:$0xf]  ;;  %v7355_v44 = vor.u32 %v10844_v36, %v7354_v35  ;;  %2546 = vmatpush.bf16.msra.mxu3 %v8155_v38  ;;  %v7708_v38 = vld [vmem:[#allocation5 + $0x3e0] sm:$0xf0] }
  0x41   :  { %v10908_v39 = vld [vmem:[#allocation5 + $0x31c] sm:$0xf0] }
  0x42   :  { %v7866_v40 = vld [vmem:[#allocation5 + $0x500] sm:$0xf]  ;;  %v7611_v45 = vor.u32 %v10908_v39, %v7610_v37  ;;  %2508 = vmatpush.bf16.msra.mxu0 %v7355_v44  ;;  %v10928_v37 = vld [vmem:[#allocation5 + $0x3c4] sm:$0xf] }
  0x43   :  { %v10972_v41 = vld [vmem:[#allocation5 + $0x51c] sm:$0xf0] }
  0x44   :  { %v8122_v42 = vld [vmem:[#allocation5 + $0x700] sm:$0xf]  ;;  %v7867_v46 = vor.u32 %v10972_v41, %v7866_v40  ;;  %2521 = vmatpush.bf16.msra.mxu1 %v7611_v45 }
  0x45   :  { %v11036_v43 = vld [vmem:[#allocation5 + $0x71c] sm:$0xf0] }
  0x46   :  { %v7322_v47 = vld [vmem:[#allocation5 + $0xc0] sm:$0xf]  ;;  %v8123_v50 = vor.u32 %v11036_v43, %v8122_v42  ;;  %2534 = vmatpush.bf16.msra.mxu2 %v7867_v46  ;;  %v7455_v42 = vor.u32 %v10864_v33, %v7452_v34  ;;  %v7711_v46 = vor.u32 %v10928_v37, %v7708_v38  ;;  %v7580_v33 = vld [vmem:[#allocation5 + $0x2e0] sm:$0xf0] }
  0x47   :  { %v10836_v48 = vld [vmem:[#allocation5 + $0xdc] sm:$0xf0] }
  0x48   :  { %v7578_v49 = vld [vmem:[#allocation5 + $0x2c0] sm:$0xf]  ;;  %v7323_v56 = vor.u32 %v10836_v48, %v7322_v47  ;;  %2547 = vmatpush.bf16.msra.mxu3 %v8123_v50  ;;  %v10856_v48 = vld [vmem:[#allocation5 + $0x184] sm:$0xf] }
  0x49   :  { %v10900_v51 = vld [vmem:[#allocation5 + $0x2dc] sm:$0xf0]  ;;  %v10920_v50 = vld [vmem:[#allocation5 + $0x384] sm:$0xf] }
  0x4a   :  { %v7834_v52 = vld [vmem:[#allocation5 + $0x4c0] sm:$0xf]  ;;  %v7579_v57 = vor.u32 %v10900_v51, %v7578_v49  ;;  %2509 = vmatpush.bf16.msra.mxu0 %v7323_v56  ;;  %v7420_v49 = vld [vmem:[#allocation5 + $0x1a0] sm:$0xf0] }
  0x4b   :  { %v10964_v53 = vld [vmem:[#allocation5 + $0x4dc] sm:$0xf0]  ;;  %v7676_v51 = vld [vmem:[#allocation5 + $0x3a0] sm:$0xf0] }
  0x4c   :  { %v8090_v54 = vld [vmem:[#allocation5 + $0x6c0] sm:$0xf]  ;;  %v7835_v58 = vor.u32 %v10964_v53, %v7834_v52  ;;  %2522 = vmatpush.bf16.msra.mxu1 %v7579_v57 }
  0x4d   :  { %v11028_v55 = vld [vmem:[#allocation5 + $0x6dc] sm:$0xf0] }
  0x4e   :  { %v7290_v59 = vld [vmem:[#allocation5 + $0x80] sm:$0xf]  ;;  %v8091_v62 = vor.u32 %v11028_v55, %v8090_v54  ;;  %2535 = vmatpush.bf16.msra.mxu2 %v7835_v58  ;;  %v7423_v55 = vor.u32 %v10856_v48, %v7420_v49 }
  0x4f   :  { %v10828_v60 = vld [vmem:[#allocation5 + $0x9c] sm:$0xf0] }
  0x50   :  { %v7546_v61 = vld [vmem:[#allocation5 + $0x280] sm:$0xf]  ;;  %v7291_v4 = vor.u32 %v10828_v60, %v7290_v59  ;;  %2548 = vmatpush.bf16.msra.mxu3 %v8091_v62  ;;  %v7679_v59 = vor.u32 %v10920_v50, %v7676_v51  ;;  %v10848_v60 = vld [vmem:[#allocation5 + $0x144] sm:$0xf] }
  0x51   :  { %v10892_v63 = vld [vmem:[#allocation5 + $0x29c] sm:$0xf0]  ;;  %v10912_v62 = vld [vmem:[#allocation5 + $0x344] sm:$0xf] }
  0x52   :  { %v7802_v0 = vld [vmem:[#allocation5 + $0x480] sm:$0xf]  ;;  %v7547_v5 = vor.u32 %v10892_v63, %v7546_v61  ;;  %2510 = vmatpush.bf16.msra.mxu0 %v7291_v4  ;;  %v7388_v61 = vld [vmem:[#allocation5 + $0x160] sm:$0xf0] }
  0x53   :  { %v10956_v1 = vld [vmem:[#allocation5 + $0x49c] sm:$0xf0]  ;;  %v7644_v63 = vld [vmem:[#allocation5 + $0x360] sm:$0xf0]  ;;  %v7391_v4 = vor.u32 %v10848_v60, %v7388_v61 }
  0x54   :  { %v8058_v2 = vld [vmem:[#allocation5 + $0x680] sm:$0xf]  ;;  %v7803_v6 = vor.u32 %v10956_v1, %v7802_v0  ;;  %2523 = vmatpush.bf16.msra.mxu1 %v7547_v5 }
  0x55   :  { %v11020_v3 = vld [vmem:[#allocation5 + $0x69c] sm:$0xf0] }
  0x56   :  { %v7258_v7 = vld [vmem:[#allocation5 + $0x40] sm:$0xf]  ;;  %v8059_v10 = vor.u32 %v11020_v3, %v8058_v2  ;;  %2536 = vmatpush.bf16.msra.mxu2 %v7803_v6  ;;  %v160_v2 = vld [vmem:[#allocation2 + $0x8] sm:$0xff]  ;;  %v159_v3 = vld [vmem:[#allocation2] sm:$0xff] }
  0x57   :  { %v10820_v8 = vld [vmem:[#allocation5 + $0x5c] sm:$0xf0] }
  0x58   :  { %v7514_v9 = vld [vmem:[#allocation5 + $0x240] sm:$0xf]  ;;  %v7259_v16 = vor.u32 %v10820_v8, %v7258_v7  ;;  %2549 = vmatpush.bf16.msra.mxu3 %v8059_v10  ;;  %v569_v8 = vunpack.c.l.b16 %v160_v2  ;;  %v570_v10 = vunpack.c.h.b16 %v160_v2  ;;  %v161_v2 = vld [vmem:[#allocation2 + $0x10] sm:$0xff] }
  0x59   :  { %v10884_v11 = vld [vmem:[#allocation5 + $0x25c] sm:$0xf0] }
  0x5a   :  { %v7770_v12 = vld [vmem:[#allocation5 + $0x440] sm:$0xf]  ;;  %v7515_v19 = vor.u32 %v10884_v11, %v7514_v9  ;;  %2511 = vmatpush.bf16.msra.mxu0 %v7259_v16  ;;  %v567_v9 = vunpack.c.l.b16 %v159_v3  ;;  %v7647_v11 = vor.u32 %v10912_v62, %v7644_v63  ;;  %v10904_v16 = vld [vmem:[#allocation5 + $0x304] sm:$0xf] }
  0x5b   :  { %v10948_v13 = vld [vmem:[#allocation5 + $0x45c] sm:$0xf0] }
  0x5c   :  { %v8026_v14 = vld [vmem:[#allocation5 + $0x640] sm:$0xf]  ;;  %v7771_v20 = vor.u32 %v10948_v13, %v7770_v12  ;;  %2524 = vmatpush.bf16.msra.mxu1 %v7515_v19  ;;  %v10840_v13 = vld [vmem:[#allocation5 + $0x104] sm:$0xf]  ;;  %v12068_v19 = vpack.c.b16 %v567_v9, %v567_v9 }
  0x5d   :  { %v11012_v15 = vld [vmem:[#allocation5 + $0x65c] sm:$0xf0]  ;;  %v11056_v9 = vld [vmem:[#allocation5 + $0x7c4] sm:$0xf] }
  0x5e   :  { %v7226_v17 = vld [vmem:[#allocation5] sm:$0xf]  ;;  %v8027_v24 = vor.u32 %v11012_v15, %v8026_v14  ;;  %2537 = vmatpush.bf16.msra.mxu2 %v7771_v20  ;;  %v7356_v14 = vld [vmem:[#allocation5 + $0x120] sm:$0xf0]  ;;  %v568_v15 = vunpack.c.h.b16 %v159_v3  ;;  %v12070_v20 = vpack.c.b16 %v570_v10, %v570_v10 }
  0x5f   :  { %v10812_v18 = vld [vmem:[#allocation5 + $0x1c] sm:$0xf0] }
  0x60   :  { %v7482_v21 = vld [vmem:[#allocation5 + $0x200] sm:$0xf]  ;;  %v7227_v31 = vor.u32 %v10812_v18, %v7226_v17  ;;  %2550 = vmatpush.bf16.msra.mxu3 %v8027_v24  ;;  %v7612_v17 = vld [vmem:[#allocation5 + $0x320] sm:$0xf0]  ;;  %v12066_v18 = vpack.c.b16 %v569_v8, %v569_v8  ;;  %v7359_v24 = vor.u32 %v10840_v13, %v7356_v14  ;;  %v571_v14 = vunpack.c.l.b16 %v161_v2 }
  0x61   :  { %v10876_v22 = vld [vmem:[#allocation5 + $0x21c] sm:$0xf0]  ;;  %v7964_v8 = vld [vmem:[#allocation5 + $0x5e0] sm:$0xf0] }
  0x62   :  { %v7738_v23 = vld [vmem:[#allocation5 + $0x400] sm:$0xf]  ;;  %v7483_v35 = vor.u32 %v10876_v22, %v7482_v21  ;;  %2512 = vmatpush.bf16.msra.mxu0 %v7227_v31  ;;  %v12072_v22 = vpack.c.b16 %v568_v15, %v568_v15  ;;  %v7324_v31 = vld [vmem:[#allocation5 + $0xe0] sm:$0xf0] }
  0x63   :  { %v10940_v25 = vld [vmem:[#allocation5 + $0x41c] sm:$0xf0]  ;;  %v8476_v13 = vld [vmem:[#allocation5 + $0x9e0] sm:$0xf0] }
  0x64   :  { %v7994_v26 = vld [vmem:[#allocation5 + $0x600] sm:$0xf]  ;;  %v7739_v36 = vor.u32 %v10940_v25, %v7738_v23  ;;  %2525 = vmatpush.bf16.msra.mxu1 %v7483_v35 }
  0x65   :  { %v11004_v27 = vld [vmem:[#allocation5 + $0x61c] sm:$0xf0]  ;;  %2513 = vmatmul.bf16.vlgmr.msra.gmra.mxu0 %v12068_v19 }
  0x66   :  { %v8474_v28 = vld [vmem:[#allocation5 + $0x9c0] sm:$0xf]  ;;  %v7995_v39 = vor.u32 %v11004_v27, %v7994_v26  ;;  %2538 = vmatpush.bf16.msra.mxu2 %v7739_v36 }
  0x67   :  { %v11124_v29 = vld [vmem:[#allocation5 + $0x9dc] sm:$0xf0]  ;;  %2526 = vmatmul.bf16.vlgmr.msra.gmra.mxu1 %v12072_v22 }
  0x68   :  { %v8730_v30 = vld [vmem:[#allocation5 + $0xbc0] sm:$0xf]  ;;  %v8475_v40 = vor.u32 %v11124_v29, %v8474_v28  ;;  %2551 = vmatpush.bf16.msra.mxu3 %v7995_v39  ;;  %v7615_v28 = vor.u32 %v10904_v16, %v7612_v17  ;;  %v11184_v17 = vld [vmem:[#allocation5 + $0xbc4] sm:$0xf] }
  0x69   :  { %v11188_v32 = vld [vmem:[#allocation5 + $0xbdc] sm:$0xf0]  ;;  %2539 = vmatmul.bf16.vlgmr.msra.gmra.mxu2 %v12066_v18 }
  0x6a   :  { %v8731_v41 = vor.u32 %v11188_v32, %v8730_v30  ;;  %v8442_v43 = vld [vmem:[#allocation5 + $0x980] sm:$0xf]  ;;  %2557 = vmatpush.bf16.msrb.mxu0 %v8475_v40  ;;  %2583 = vmatpush.bf16.msrb.mxu2 %v7455_v42  ;;  %v10832_v30 = vld [vmem:[#allocation5 + $0xc4] sm:$0xf] }
  0x6b   :  { %v11116_v44 = vld [vmem:[#allocation5 + $0x99c] sm:$0xf0]  ;;  %v10896_v32 = vld [vmem:[#allocation5 + $0x2c4] sm:$0xf]  ;;  %2552 = vmatmul.bf16.vlgmr.msra.gmra.mxu3 %v12070_v20  ;;  %v7327_v36 = vor.u32 %v10832_v30, %v7324_v31 }
  0x6c   :  { %v8698_v45 = vld [vmem:[#allocation5 + $0xb80] sm:$0xf]  ;;  %v8443_v52 = vor.u32 %v11116_v44, %v8442_v43  ;;  %2570 = vmatpush.bf16.msrb.mxu1 %v8731_v41  ;;  %2596 = vmatpush.bf16.msrb.mxu3 %v7711_v46  ;;  %v7583_v40 = vor.u32 %v10896_v32, %v7580_v33  ;;  %v10824_v42 = vld [vmem:[#allocation5 + $0x84] sm:$0xf] }
  0x6d   :  { %v11180_v47 = vld [vmem:[#allocation5 + $0xb9c] sm:$0xf0]  ;;  %v7292_v43 = vld [vmem:[#allocation5 + $0xa0] sm:$0xf0] }
  0x6e   :  { %v8410_v53 = vld [vmem:[#allocation5 + $0x940] sm:$0xf]  ;;  %v8699_v54 = vor.u32 %v11180_v47, %v8698_v45  ;;  %2558 = vmatpush.bf16.msrb.mxu0 %v8443_v52  ;;  %2584 = vmatpush.bf16.msrb.mxu2 %v7423_v55  ;;  %v10888_v44 = vld [vmem:[#allocation5 + $0x284] sm:$0xf]  ;;  %v7295_v48 = vor.u32 %v10824_v42, %v7292_v43 }
  0x6f   :  { %v11108_v56 = vld [vmem:[#allocation5 + $0x95c] sm:$0xf0]  ;;  %v7548_v45 = vld [vmem:[#allocation5 + $0x2a0] sm:$0xf0] }
  0x70   :  { %v8666_v57 = vld [vmem:[#allocation5 + $0xb40] sm:$0xf]  ;;  %v8411_v0 = vor.u32 %v11108_v56, %v8410_v53  ;;  %2571 = vmatpush.bf16.msrb.mxu1 %v8699_v54  ;;  %2597 = vmatpush.bf16.msrb.mxu3 %v7679_v59  ;;  %v7551_v52 = vor.u32 %v10888_v44, %v7548_v45  ;;  %v10816_v54 = vld [vmem:[#allocation5 + $0x44] sm:$0xf] }
  0x71   :  { %v11172_v58 = vld [vmem:[#allocation5 + $0xb5c] sm:$0xf0]  ;;  %v7260_v55 = vld [vmem:[#allocation5 + $0x60] sm:$0xf0] }
  0x72   :  { %v8667_v1 = vor.u32 %v11172_v58, %v8666_v57  ;;  %v8378_v5 = vld [vmem:[#allocation5 + $0x900] sm:$0xf]  ;;  %2559 = vmatpush.bf16.msrb.mxu0 %v8411_v0  ;;  %2585 = vmatpush.bf16.msrb.mxu2 %v7391_v4  ;;  %v10880_v56 = vld [vmem:[#allocation5 + $0x244] sm:$0xf]  ;;  %v7263_v63 = vor.u32 %v10816_v54, %v7260_v55 }
  0x73   :  { %v11100_v6 = vld [vmem:[#allocation5 + $0x91c] sm:$0xf0]  ;;  %v7516_v57 = vld [vmem:[#allocation5 + $0x260] sm:$0xf0] }
  0x74   :  { %v8634_v7 = vld [vmem:[#allocation5 + $0xb00] sm:$0xf]  ;;  %v8379_v21 = vor.u32 %v11100_v6, %v8378_v5  ;;  %2572 = vmatpush.bf16.msrb.mxu1 %v8667_v1  ;;  %2598 = vmatpush.bf16.msrb.mxu3 %v7647_v11  ;;  %v10808_v1 = vld [vmem:[#allocation5 + $0x4] sm:$0xf]  ;;  %v7519_v3 = vor.u32 %v10880_v56, %v7516_v57 }
  0x75   :  { %v11164_v12 = vld [vmem:[#allocation5 + $0xb1c] sm:$0xf0]  ;;  %v7228_v4 = vld [vmem:[#allocation5 + $0x20] sm:$0xf0] }
  0x76   :  { %v8635_v23 = vor.u32 %v11164_v12, %v8634_v7  ;;  %v8346_v25 = vld [vmem:[#allocation5 + $0x8c0] sm:$0xf]  ;;  %2560 = vmatpush.bf16.msrb.mxu0 %v8379_v21  ;;  %2586 = vmatpush.bf16.msrb.mxu2 %v7359_v24  ;;  %v10872_v5 = vld [vmem:[#allocation5 + $0x204] sm:$0xf]  ;;  %v7231_v16 = vor.u32 %v10808_v1, %v7228_v4 }
  0x77   :  { %v11092_v26 = vld [vmem:[#allocation5 + $0x8dc] sm:$0xf0]  ;;  %v7484_v6 = vld [vmem:[#allocation5 + $0x220] sm:$0xf0] }
  0x78   :  { %v8602_v27 = vld [vmem:[#allocation5 + $0xac0] sm:$0xf]  ;;  %v8347_v34 = vor.u32 %v11092_v26, %v8346_v25  ;;  %2573 = vmatpush.bf16.msrb.mxu1 %v8635_v23  ;;  %2599 = vmatpush.bf16.msrb.mxu3 %v7615_v28  ;;  %v10992_v7 = vld [vmem:[#allocation5 + $0x5c4] sm:$0xf]  ;;  %v572_v23 = vunpack.c.h.b16 %v161_v2  ;;  %v7487_v24 = vor.u32 %v10872_v5, %v7484_v6 }
  0x79   :  { %v11156_v29 = vld [vmem:[#allocation5 + $0xadc] sm:$0xf0]  ;;  %v8220_v11 = vld [vmem:[#allocation5 + $0x7e0] sm:$0xf0]  ;;  %v7967_v25 = vor.u32 %v10992_v7, %v7964_v8 }
  0x7a   :  { %v8603_v35 = vor.u32 %v11156_v29, %v8602_v27  ;;  %v8314_v37 = vld [vmem:[#allocation5 + $0x880] sm:$0xf]  ;;  %2561 = vmatpush.bf16.msrb.mxu0 %v8347_v34  ;;  %2587 = vmatpush.bf16.msrb.mxu2 %v7327_v36  ;;  %v11120_v12 = vld [vmem:[#allocation5 + $0x9c4] sm:$0xf]  ;;  %v8223_v26 = vor.u32 %v11056_v9, %v8220_v11 }
  0x7b   :  { %v11084_v38 = vld [vmem:[#allocation5 + $0x89c] sm:$0xf0]  ;;  %v8732_v21 = vld [vmem:[#allocation5 + $0xbe0] sm:$0xf0]  ;;  %v8479_v27 = vor.u32 %v11120_v12, %v8476_v13 }
  0x7c   :  { %v8570_v39 = vld [vmem:[#allocation5 + $0xa80] sm:$0xf]  ;;  %v8315_v46 = vor.u32 %v11084_v38, %v8314_v37  ;;  %2574 = vmatpush.bf16.msrb.mxu1 %v8603_v35  ;;  %2600 = vmatpush.bf16.msrb.mxu3 %v7583_v40  ;;  %v10984_v28 = vld [vmem:[#allocation5 + $0x584] sm:$0xf]  ;;  %v8735_v31 = vor.u32 %v11184_v17, %v8732_v21  ;;  %v12078_v35 = vpack.c.b16 %v571_v14, %v571_v14 }
  0x7d   :  { %v11148_v41 = vld [vmem:[#allocation5 + $0xa9c] sm:$0xf0]  ;;  %v7932_v29 = vld [vmem:[#allocation5 + $0x5a0] sm:$0xf0]  ;;  %v12080_v38 = vpack.c.b16 %v572_v23, %v572_v23 }
  0x7e   :  { %v8571_v47 = vor.u32 %v11148_v41, %v8570_v39  ;;  %v8282_v49 = vld [vmem:[#allocation5 + $0x840] sm:$0xf]  ;;  %2562 = vmatpush.bf16.msrb.mxu0 %v8315_v46  ;;  %2588 = vmatpush.bf16.msrb.mxu2 %v7295_v48  ;;  %v11048_v30 = vld [vmem:[#allocation5 + $0x784] sm:$0xf]  ;;  %v7935_v39 = vor.u32 %v10984_v28, %v7932_v29 }
  0x7f   :  { %v11076_v50 = vld [vmem:[#allocation5 + $0x85c] sm:$0xf0]  ;;  %v8188_v32 = vld [vmem:[#allocation5 + $0x7a0] sm:$0xf0] }
  0x80   :  { %v8538_v51 = vld [vmem:[#allocation5 + $0xa40] sm:$0xf]  ;;  %v8283_v58 = vor.u32 %v11076_v50, %v8282_v49  ;;  %2575 = vmatpush.bf16.msrb.mxu1 %v8571_v47  ;;  %2601 = vmatpush.bf16.msrb.mxu3 %v7551_v52  ;;  %v11112_v33 = vld [vmem:[#allocation5 + $0x984] sm:$0xf]  ;;  %v8191_v40 = vor.u32 %v11048_v30, %v8188_v32 }
  0x81   :  { %v11140_v53 = vld [vmem:[#allocation5 + $0xa5c] sm:$0xf0]  ;;  %v8444_v34 = vld [vmem:[#allocation5 + $0x9a0] sm:$0xf0] }
  0x82   :  { %v8250_v59 = vld [vmem:[#allocation5 + $0x800] sm:$0xf]  ;;  %v8539_v62 = vor.u32 %v11140_v53, %v8538_v51  ;;  %2563 = vmatpush.bf16.msrb.mxu0 %v8283_v58  ;;  %2589 = vmatpush.bf16.msrb.mxu2 %v7263_v63  ;;  %v11176_v36 = vld [vmem:[#allocation5 + $0xb84] sm:$0xf]  ;;  %v8447_v41 = vor.u32 %v11112_v33, %v8444_v34 }
  0x83   :  { %v11068_v60 = vld [vmem:[#allocation5 + $0x81c] sm:$0xf0]  ;;  %v8700_v37 = vld [vmem:[#allocation5 + $0xba0] sm:$0xf0] }
  0x84   :  { %v8506_v61 = vld [vmem:[#allocation5 + $0xa00] sm:$0xf]  ;;  %v8251_v10 = vor.u32 %v11068_v60, %v8250_v59  ;;  %2576 = vmatpush.bf16.msrb.mxu1 %v8539_v62  ;;  %2602 = vmatpush.bf16.msrb.mxu3 %v7519_v3  ;;  %v10976_v42 = vld [vmem:[#allocation5 + $0x544] sm:$0xf]  ;;  %v8703_v45 = vor.u32 %v11176_v36, %v8700_v37 }
  0x85   :  { %v11132_v0 = vld [vmem:[#allocation5 + $0xa1c] sm:$0xf0]  ;;  %v7900_v43 = vld [vmem:[#allocation5 + $0x560] sm:$0xf0] }
  0x86   :  { %v8507_v15 = vor.u32 %v11132_v0, %v8506_v61  ;;  %2564 = vmatpush.bf16.msrb.mxu0 %v8251_v10  ;;  %2590 = vmatpush.bf16.msrb.mxu2 %v7231_v16  ;;  %v11040_v44 = vld [vmem:[#allocation5 + $0x744] sm:$0xf]  ;;  %v7903_v51 = vor.u32 %v10976_v42, %v7900_v43 }
  0x87   :  { %v8156_v46 = vld [vmem:[#allocation5 + $0x760] sm:$0xf0] }
  0x88   :  { %2577 = vmatpush.bf16.msrb.mxu1 %v8507_v15  ;;  %2603 = vmatpush.bf16.msrb.mxu3 %v7487_v24  ;;  %v11104_v47 = vld [vmem:[#allocation5 + $0x944] sm:$0xf]  ;;  %v8159_v52 = vor.u32 %v11040_v44, %v8156_v46 }
  0x89   :  { %v8412_v48 = vld [vmem:[#allocation5 + $0x960] sm:$0xf0]  ;;  %2565 = vmatmul.bf16.vlgmr.msrb.gmra.mxu0 %v12078_v35  ;;  %2591 = vmatmul.bf16.vlgmr.msrb.gmra.mxu2 %v12068_v19 }
  0x8a   :  { %2609 = vmatpush.bf16.msra.mxu0 %v7967_v25  ;;  %2635 = vmatpush.bf16.msra.mxu2 %v8479_v27  ;;  %v11168_v49 = vld [vmem:[#allocation5 + $0xb44] sm:$0xf]  ;;  %v8415_v53 = vor.u32 %v11104_v47, %v8412_v48 }
  0x8b   :  { %v8668_v50 = vld [vmem:[#allocation5 + $0xb60] sm:$0xf0]  ;;  %2578 = vmatmul.bf16.vlgmr.msrb.gmra.mxu1 %v12080_v38  ;;  %2604 = vmatmul.bf16.vlgmr.msrb.gmra.mxu3 %v12072_v22 }
  0x8c   :  { %2622 = vmatpush.bf16.msra.mxu1 %v8223_v26  ;;  %2648 = vmatpush.bf16.msra.mxu3 %v8735_v31  ;;  %v10968_v54 = vld [vmem:[#allocation5 + $0x504] sm:$0xf]  ;;  %v8671_v57 = vor.u32 %v11168_v49, %v8668_v50 }
  0x8d   :  { %v7868_v55 = vld [vmem:[#allocation5 + $0x520] sm:$0xf0] }
  0x8e   :  { %2610 = vmatpush.bf16.msra.mxu0 %v7935_v39  ;;  %2636 = vmatpush.bf16.msra.mxu2 %v8447_v41  ;;  %v11032_v56 = vld [vmem:[#allocation5 + $0x704] sm:$0xf]  ;;  %v7871_v63 = vor.u32 %v10968_v54, %v7868_v55  ;;  %v10869_v54 = vld [vmem:[#allocation5 + $0x1e4] sm:$0xf0] }
  0x8f   :  { %v8124_v58 = vld [vmem:[#allocation5 + $0x720] sm:$0xf0]  ;;  %v7714_v55 = vld [vmem:[#allocation5 + $0x3c8] sm:$0xf] }
  0x90   :  { %2623 = vmatpush.bf16.msra.mxu1 %v8191_v40  ;;  %2649 = vmatpush.bf16.msra.mxu3 %v8703_v45  ;;  %v11096_v59 = vld [vmem:[#allocation5 + $0x904] sm:$0xf]  ;;  %v8127_v0 = vor.u32 %v11032_v56, %v8124_v58  ;;  %v7970_v58 = vld [vmem:[#allocation5 + $0x5c8] sm:$0xf] }
  0x91   :  { %v8380_v60 = vld [vmem:[#allocation5 + $0x920] sm:$0xf0] }
  0x92   :  { %v11160_v61 = vld [vmem:[#allocation5 + $0xb04] sm:$0xf]  ;;  %2611 = vmatpush.bf16.msra.mxu0 %v7903_v51  ;;  %2637 = vmatpush.bf16.msra.mxu2 %v8415_v53  ;;  %v8383_v1 = vor.u32 %v11096_v59, %v8380_v60  ;;  %v7458_v53 = vld [vmem:[#allocation5 + $0x1c8] sm:$0xf] }
  0x93   :  { %v8636_v62 = vld [vmem:[#allocation5 + $0xb20] sm:$0xf0]  ;;  %v10997_v59 = vld [vmem:[#allocation5 + $0x5e4] sm:$0xf0] }
  0x94   :  { %2624 = vmatpush.bf16.msra.mxu1 %v8159_v52  ;;  %v10960_v2 = vld [vmem:[#allocation5 + $0x4c4] sm:$0xf]  ;;  %2650 = vmatpush.bf16.msra.mxu3 %v8671_v57  ;;  %v8639_v5 = vor.u32 %v11160_v61, %v8636_v62  ;;  %v10933_v57 = vld [vmem:[#allocation5 + $0x3e4] sm:$0xf0] }
  0x95   :  { %v7836_v3 = vld [vmem:[#allocation5 + $0x4e0] sm:$0xf0]  ;;  %v8226_v62 = vld [vmem:[#allocation5 + $0x7c8] sm:$0xf] }
  0x96   :  { %v11024_v4 = vld [vmem:[#allocation5 + $0x6c4] sm:$0xf]  ;;  %2612 = vmatpush.bf16.msra.mxu0 %v7871_v63  ;;  %v7839_v11 = vor.u32 %v10960_v2, %v7836_v3  ;;  %2638 = vmatpush.bf16.msra.mxu2 %v8383_v1  ;;  %v11061_v63 = vld [vmem:[#allocation5 + $0x7e4] sm:$0xf0]  ;;  %v7459_v1 = vor.u32 %v10869_v54, %v7458_v53  ;;  %v7715_v2 = vor.u32 %v10933_v57, %v7714_v55 }
  0x97   :  { %v8092_v6 = vld [vmem:[#allocation5 + $0x6e0] sm:$0xf0]  ;;  %v7971_v3 = vor.u32 %v10997_v59, %v7970_v58  ;;  %v8098_v53 = vld [vmem:[#allocation5 + $0x6c8] sm:$0xf] }
  0x98   :  { %v11088_v7 = vld [vmem:[#allocation5 + $0x8c4] sm:$0xf]  ;;  %2625 = vmatpush.bf16.msra.mxu1 %v8127_v0  ;;  %v8095_v12 = vor.u32 %v11024_v4, %v8092_v6  ;;  %2651 = vmatpush.bf16.msra.mxu3 %v8639_v5  ;;  %v7426_v4 = vld [vmem:[#allocation5 + $0x188] sm:$0xf] }
  0x99   :  { %v8348_v8 = vld [vmem:[#allocation5 + $0x8e0] sm:$0xf0]  ;;  %v10861_v5 = vld [vmem:[#allocation5 + $0x1a4] sm:$0xf0] }
  0x9a   :  { %v11152_v9 = vld [vmem:[#allocation5 + $0xac4] sm:$0xf]  ;;  %v8351_v13 = vor.u32 %v11088_v7, %v8348_v8  ;;  %2613 = vmatpush.bf16.msra.mxu0 %v7839_v11  ;;  %v7682_v6 = vld [vmem:[#allocation5 + $0x388] sm:$0xf]  ;;  %v8227_v7 = vor.u32 %v11061_v63, %v8226_v62 }
  0x9b   :  { %v8604_v10 = vld [vmem:[#allocation5 + $0xae0] sm:$0xf0]  ;;  %v10925_v8 = vld [vmem:[#allocation5 + $0x3a4] sm:$0xf0] }
  0x9c   :  { %v10952_v14 = vld [vmem:[#allocation5 + $0x484] sm:$0xf]  ;;  %v8607_v17 = vor.u32 %v11152_v9, %v8604_v10  ;;  %2626 = vmatpush.bf16.msra.mxu1 %v8095_v12  ;;  %2639 = vmatpush.bf16.msra.mxu2 %v8351_v13  ;;  %v7938_v9 = vld [vmem:[#allocation5 + $0x588] sm:$0xf]  ;;  %v7427_v13 = vor.u32 %v10861_v5, %v7426_v4 }
  0x9d   :  { %v7804_v15 = vld [vmem:[#allocation5 + $0x4a0] sm:$0xf0]  ;;  %v10989_v10 = vld [vmem:[#allocation5 + $0x5a4] sm:$0xf0] }
  0x9e   :  { %v11016_v16 = vld [vmem:[#allocation5 + $0x684] sm:$0xf]  ;;  %v7807_v27 = vor.u32 %v10952_v14, %v7804_v15  ;;  %2652 = vmatpush.bf16.msra.mxu3 %v8607_v17  ;;  %v8194_v11 = vld [vmem:[#allocation5 + $0x788] sm:$0xf]  ;;  %v7683_v14 = vor.u32 %v10925_v8, %v7682_v6  ;;  %v7939_v15 = vor.u32 %v10989_v10, %v7938_v9 }
  0x9f   :  { %v8060_v21 = vld [vmem:[#allocation5 + $0x6a0] sm:$0xf0]  ;;  %v11053_v12 = vld [vmem:[#allocation5 + $0x7a4] sm:$0xf0] }
  0xa0   :  { %v11080_v23 = vld [vmem:[#allocation5 + $0x884] sm:$0xf]  ;;  %v8063_v28 = vor.u32 %v11016_v16, %v8060_v21  ;;  %2614 = vmatpush.bf16.msra.mxu0 %v7807_v27  ;;  %v7394_v16 = vld [vmem:[#allocation5 + $0x148] sm:$0xf] }
  0xa1   :  { %v8316_v24 = vld [vmem:[#allocation5 + $0x8a0] sm:$0xf0]  ;;  %v10853_v17 = vld [vmem:[#allocation5 + $0x164] sm:$0xf0] }
  0xa2   :  { %v11144_v25 = vld [vmem:[#allocation5 + $0xa84] sm:$0xf]  ;;  %v8319_v29 = vor.u32 %v11080_v23, %v8316_v24  ;;  %2627 = vmatpush.bf16.msra.mxu1 %v8063_v28  ;;  %v7650_v21 = vld [vmem:[#allocation5 + $0x348] sm:$0xf]  ;;  %v8195_v23 = vor.u32 %v11053_v12, %v8194_v11 }
  0xa3   :  { %v8572_v26 = vld [vmem:[#allocation5 + $0xaa0] sm:$0xf0]  ;;  %v10917_v24 = vld [vmem:[#allocation5 + $0x364] sm:$0xf0] }
  0xa4   :  { %v10944_v30 = vld [vmem:[#allocation5 + $0x444] sm:$0xf]  ;;  %v8575_v33 = vor.u32 %v11144_v25, %v8572_v26  ;;  %2640 = vmatpush.bf16.msra.mxu2 %v8319_v29  ;;  %v7906_v25 = vld [vmem:[#allocation5 + $0x548] sm:$0xf]  ;;  %v7395_v29 = vor.u32 %v10853_v17, %v7394_v16 }
  0xa5   :  { %v7772_v31 = vld [vmem:[#allocation5 + $0x460] sm:$0xf0]  ;;  %v10981_v26 = vld [vmem:[#allocation5 + $0x564] sm:$0xf0] }
  0xa6   :  { %v11008_v32 = vld [vmem:[#allocation5 + $0x644] sm:$0xf]  ;;  %v7775_v41 = vor.u32 %v10944_v30, %v7772_v31  ;;  %2653 = vmatpush.bf16.msra.mxu3 %v8575_v33  ;;  %v8162_v27 = vld [vmem:[#allocation5 + $0x748] sm:$0xf]  ;;  %v7651_v30 = vor.u32 %v10917_v24, %v7650_v21  ;;  %v7907_v31 = vor.u32 %v10981_v26, %v7906_v25 }
  0xa7   :  { %v8028_v34 = vld [vmem:[#allocation5 + $0x660] sm:$0xf0]  ;;  %v11045_v28 = vld [vmem:[#allocation5 + $0x764] sm:$0xf0] }
  0xa8   :  { %v11072_v36 = vld [vmem:[#allocation5 + $0x844] sm:$0xf]  ;;  %v8031_v44 = vor.u32 %v11008_v32, %v8028_v34  ;;  %2615 = vmatpush.bf16.msra.mxu0 %v7775_v41  ;;  %v7362_v32 = vld [vmem:[#allocation5 + $0x108] sm:$0xf] }
  0xa9   :  { %v8284_v37 = vld [vmem:[#allocation5 + $0x860] sm:$0xf0]  ;;  %v10845_v33 = vld [vmem:[#allocation5 + $0x124] sm:$0xf0] }
  0xaa   :  { %v11136_v39 = vld [vmem:[#allocation5 + $0xa44] sm:$0xf]  ;;  %v8287_v45 = vor.u32 %v11072_v36, %v8284_v37  ;;  %2628 = vmatpush.bf16.msra.mxu1 %v8031_v44  ;;  %v7618_v34 = vld [vmem:[#allocation5 + $0x308] sm:$0xf]  ;;  %v8163_v36 = vor.u32 %v11045_v28, %v8162_v27 }
  0xab   :  { %v8540_v40 = vld [vmem:[#allocation5 + $0xa60] sm:$0xf0]  ;;  %v10909_v37 = vld [vmem:[#allocation5 + $0x324] sm:$0xf0] }
  0xac   :  { %v10936_v42 = vld [vmem:[#allocation5 + $0x404] sm:$0xf]  ;;  %v8543_v49 = vor.u32 %v11136_v39, %v8540_v40  ;;  %2641 = vmatpush.bf16.msra.mxu2 %v8287_v45  ;;  %v7874_v39 = vld [vmem:[#allocation5 + $0x508] sm:$0xf]  ;;  %v7619_v44 = vor.u32 %v10909_v37, %v7618_v34  ;;  %v10865_v37 = vld [vmem:[#allocation5 + $0x1cc] sm:$0xf] }
  0xad   :  { %v7740_v43 = vld [vmem:[#allocation5 + $0x420] sm:$0xf0]  ;;  %v10973_v40 = vld [vmem:[#allocation5 + $0x524] sm:$0xf0] }
  0xae   :  { %v11000_v46 = vld [vmem:[#allocation5 + $0x604] sm:$0xf]  ;;  %v7743_v56 = vor.u32 %v10936_v42, %v7740_v43  ;;  %2654 = vmatpush.bf16.msra.mxu3 %v8543_v49  ;;  %v8130_v41 = vld [vmem:[#allocation5 + $0x708] sm:$0xf]  ;;  %v7363_v43 = vor.u32 %v10845_v33, %v7362_v32  ;;  %v7875_v45 = vor.u32 %v10973_v40, %v7874_v39  ;;  %v7460_v39 = vld [vmem:[#allocation5 + $0x1e8] sm:$0xf0] }
  0xaf   :  { %v7996_v47 = vld [vmem:[#allocation5 + $0x620] sm:$0xf0]  ;;  %v11037_v42 = vld [vmem:[#allocation5 + $0x724] sm:$0xf0] }
  0xb0   :  { %v11064_v48 = vld [vmem:[#allocation5 + $0x804] sm:$0xf]  ;;  %v7999_v60 = vor.u32 %v11000_v46, %v7996_v47  ;;  %2616 = vmatpush.bf16.msra.mxu0 %v7743_v56  ;;  %v7330_v46 = vld [vmem:[#allocation5 + $0xc8] sm:$0xf]  ;;  %v8131_v49 = vor.u32 %v11037_v42, %v8130_v41  ;;  %v10929_v42 = vld [vmem:[#allocation5 + $0x3cc] sm:$0xf] }
  0xb1   :  { %v8252_v50 = vld [vmem:[#allocation5 + $0x820] sm:$0xf0]  ;;  %v10837_v47 = vld [vmem:[#allocation5 + $0xe4] sm:$0xf0] }
  0xb2   :  { %v11128_v51 = vld [vmem:[#allocation5 + $0xa04] sm:$0xf]  ;;  %v8255_v61 = vor.u32 %v11064_v48, %v8252_v50  ;;  %2629 = vmatpush.bf16.msra.mxu1 %v7999_v60  ;;  %v7586_v48 = vld [vmem:[#allocation5 + $0x2c8] sm:$0xf]  ;;  %v7331_v55 = vor.u32 %v10837_v47, %v7330_v46  ;;  %v7463_v47 = vor.u32 %v10865_v37, %v7460_v39 }
  0xb3   :  { %v8508_v52 = vld [vmem:[#allocation5 + $0xa20] sm:$0xf0]  ;;  %2617 = vmatmul.bf16.vlgmr.msra.gmra.mxu0 %v12066_v18  ;;  %v10901_v50 = vld [vmem:[#allocation5 + $0x2e4] sm:$0xf0] }
  0xb4   :  { %v8511_v0 = vor.u32 %v11128_v51, %v8508_v52  ;;  %2642 = vmatpush.bf16.msra.mxu2 %v8255_v61  ;;  %2661 = vmatpush.bf16.msrb.mxu0 %v7459_v1  ;;  %v7842_v51 = vld [vmem:[#allocation5 + $0x4c8] sm:$0xf]  ;;  %v7587_v56 = vor.u32 %v10901_v50, %v7586_v48 }
  0xb5   :  { %2630 = vmatmul.bf16.vlgmr.msra.gmra.mxu1 %v12070_v20  ;;  %v10965_v52 = vld [vmem:[#allocation5 + $0x4e4] sm:$0xf0] }
  0xb6   :  { %2655 = vmatpush.bf16.msra.mxu3 %v8511_v0  ;;  %2674 = vmatpush.bf16.msrb.mxu1 %v7715_v2  ;;  %v11029_v54 = vld [vmem:[#allocation5 + $0x6e4] sm:$0xf0]  ;;  %v7843_v57 = vor.u32 %v10965_v52, %v7842_v51 }
  0xb7   :  { %2643 = vmatmul.bf16.vlgmr.msra.gmra.mxu2 %v12078_v35  ;;  %v7298_v58 = vld [vmem:[#allocation5 + $0x88] sm:$0xf]  ;;  %v8099_v61 = vor.u32 %v11029_v54, %v8098_v53  ;;  %v10857_v53 = vld [vmem:[#allocation5 + $0x18c] sm:$0xf] }
  0xb8   :  { %2687 = vmatpush.bf16.msrb.mxu2 %v7971_v3  ;;  %2662 = vmatpush.bf16.msrb.mxu0 %v7427_v13  ;;  %v10829_v59 = vld [vmem:[#allocation5 + $0xa4] sm:$0xf0]  ;;  %v7428_v54 = vld [vmem:[#allocation5 + $0x1a8] sm:$0xf0] }
  0xb9   :  { %2656 = vmatmul.bf16.vlgmr.msra.gmra.mxu3 %v12080_v38  ;;  %v7554_v60 = vld [vmem:[#allocation5 + $0x288] sm:$0xf]  ;;  %v7299_v3 = vor.u32 %v10829_v59, %v7298_v58  ;;  %v7431_v59 = vor.u32 %v10857_v53, %v7428_v54 }
  0xba   :  { %2700 = vmatpush.bf16.msrb.mxu3 %v8227_v7  ;;  %2675 = vmatpush.bf16.msrb.mxu1 %v7683_v14  ;;  %v10893_v62 = vld [vmem:[#allocation5 + $0x2a4] sm:$0xf0] }
  0xbb   :  { %v7810_v63 = vld [vmem:[#allocation5 + $0x488] sm:$0xf]  ;;  %v7555_v4 = vor.u32 %v10893_v62, %v7554_v60 }
  0xbc   :  { %2688 = vmatpush.bf16.msrb.mxu2 %v7939_v15  ;;  %2663 = vmatpush.bf16.msrb.mxu0 %v7395_v29  ;;  %v10957_v0 = vld [vmem:[#allocation5 + $0x4a4] sm:$0xf0] }
  0xbd   :  { %v8066_v1 = vld [vmem:[#allocation5 + $0x688] sm:$0xf]  ;;  %v7811_v5 = vor.u32 %v10957_v0, %v7810_v63 }
  0xbe   :  { %2701 = vmatpush.bf16.msrb.mxu3 %v8195_v23  ;;  %2676 = vmatpush.bf16.msrb.mxu1 %v7651_v30  ;;  %v11021_v2 = vld [vmem:[#allocation5 + $0x6a4] sm:$0xf0] }
  0xbf   :  { %v7266_v6 = vld [vmem:[#allocation5 + $0x48] sm:$0xf]  ;;  %v8067_v9 = vor.u32 %v11021_v2, %v8066_v1  ;;  %v10849_v1 = vld [vmem:[#allocation5 + $0x14c] sm:$0xf] }
  0xc0   :  { %2689 = vmatpush.bf16.msrb.mxu2 %v7907_v31  ;;  %2664 = vmatpush.bf16.msrb.mxu0 %v7363_v43  ;;  %v10821_v7 = vld [vmem:[#allocation5 + $0x64] sm:$0xf0]  ;;  %v7716_v43 = vld [vmem:[#allocation5 + $0x3e8] sm:$0xf0] }
  0xc1   :  { %v7522_v8 = vld [vmem:[#allocation5 + $0x248] sm:$0xf]  ;;  %v7267_v15 = vor.u32 %v10821_v7, %v7266_v6  ;;  %v7719_v51 = vor.u32 %v10929_v42, %v7716_v43  ;;  %v7396_v2 = vld [vmem:[#allocation5 + $0x168] sm:$0xf0] }
  0xc2   :  { %2702 = vmatpush.bf16.msrb.mxu3 %v8163_v36  ;;  %2677 = vmatpush.bf16.msrb.mxu1 %v7619_v44  ;;  %v10885_v10 = vld [vmem:[#allocation5 + $0x264] sm:$0xf0]  ;;  %v7399_v7 = vor.u32 %v10849_v1, %v7396_v2  ;;  %v10825_v43 = vld [vmem:[#allocation5 + $0x8c] sm:$0xf] }
  0xc3   :  { %v7778_v11 = vld [vmem:[#allocation5 + $0x448] sm:$0xf]  ;;  %v7523_v21 = vor.u32 %v10885_v10, %v7522_v8  ;;  %v10809_v2 = vld [vmem:[#allocation5 + $0xc] sm:$0xf] }
  0xc4   :  { %2690 = vmatpush.bf16.msrb.mxu2 %v7875_v45  ;;  %2665 = vmatpush.bf16.msrb.mxu0 %v7331_v55  ;;  %v10949_v12 = vld [vmem:[#allocation5 + $0x464] sm:$0xf0]  ;;  %v10921_v55 = vld [vmem:[#allocation5 + $0x38c] sm:$0xf] }
  0xc5   :  { %v8034_v13 = vld [vmem:[#allocation5 + $0x648] sm:$0xf]  ;;  %v7779_v23 = vor.u32 %v10949_v12, %v7778_v11 }
  0xc6   :  { %2703 = vmatpush.bf16.msrb.mxu3 %v8131_v49  ;;  %2678 = vmatpush.bf16.msrb.mxu1 %v7587_v56  ;;  %v11013_v14 = vld [vmem:[#allocation5 + $0x664] sm:$0xf0]  ;;  %v7684_v56 = vld [vmem:[#allocation5 + $0x3a8] sm:$0xf0] }
  0xc7   :  { %v7234_v16 = vld [vmem:[#allocation5 + $0x8] sm:$0xf]  ;;  %v8035_v27 = vor.u32 %v11013_v14, %v8034_v13  ;;  %v7687_v63 = vor.u32 %v10921_v55, %v7684_v56  ;;  %v10841_v13 = vld [vmem:[#allocation5 + $0x10c] sm:$0xf] }
  0xc8   :  { %2691 = vmatpush.bf16.msrb.mxu2 %v7843_v57  ;;  %2666 = vmatpush.bf16.msrb.mxu0 %v7299_v3  ;;  %v10813_v17 = vld [vmem:[#allocation5 + $0x24] sm:$0xf0]  ;;  %v10913_v3 = vld [vmem:[#allocation5 + $0x34c] sm:$0xf] }
  0xc9   :  { %v7490_v24 = vld [vmem:[#allocation5 + $0x208] sm:$0xf]  ;;  %v7235_v34 = vor.u32 %v10813_v17, %v7234_v16  ;;  %v7364_v14 = vld [vmem:[#allocation5 + $0x128] sm:$0xf0] }
  0xca   :  { %2704 = vmatpush.bf16.msrb.mxu3 %v8099_v61  ;;  %2679 = vmatpush.bf16.msrb.mxu1 %v7555_v4  ;;  %v10877_v25 = vld [vmem:[#allocation5 + $0x224] sm:$0xf0]  ;;  %v7652_v4 = vld [vmem:[#allocation5 + $0x368] sm:$0xf0] }
  0xcb   :  { %v7746_v26 = vld [vmem:[#allocation5 + $0x408] sm:$0xf]  ;;  %v7491_v40 = vor.u32 %v10877_v25, %v7490_v24  ;;  %v7655_v11 = vor.u32 %v10913_v3, %v7652_v4  ;;  %v7620_v16 = vld [vmem:[#allocation5 + $0x328] sm:$0xf0] }
  0xcc   :  { %2692 = vmatpush.bf16.msrb.mxu2 %v7811_v5  ;;  %v10941_v28 = vld [vmem:[#allocation5 + $0x424] sm:$0xf0]  ;;  %2667 = vmatpush.bf16.msrb.mxu0 %v7267_v15  ;;  %v10905_v15 = vld [vmem:[#allocation5 + $0x30c] sm:$0xf] }
  0xcd   :  { %v8002_v29 = vld [vmem:[#allocation5 + $0x608] sm:$0xf]  ;;  %v7747_v41 = vor.u32 %v10941_v28, %v7746_v26  ;;  %v10817_v55 = vld [vmem:[#allocation5 + $0x4c] sm:$0xf] }
  0xce   :  { %2705 = vmatpush.bf16.msrb.mxu3 %v8067_v9  ;;  %v11005_v30 = vld [vmem:[#allocation5 + $0x624] sm:$0xf0]  ;;  %2680 = vmatpush.bf16.msrb.mxu1 %v7523_v21  ;;  %v7268_v56 = vld [vmem:[#allocation5 + $0x68] sm:$0xf0] }
  0xcf   :  { %v8482_v31 = vld [vmem:[#allocation5 + $0x9c8] sm:$0xf]  ;;  %v8003_v44 = vor.u32 %v11005_v30, %v8002_v29  ;;  %v10833_v29 = vld [vmem:[#allocation5 + $0xcc] sm:$0xf] }
  0xd0   :  { %v11125_v32 = vld [vmem:[#allocation5 + $0x9e4] sm:$0xf0]  ;;  %2693 = vmatpush.bf16.msrb.mxu2 %v7779_v23  ;;  %2668 = vmatpush.bf16.msrb.mxu0 %v7235_v34  ;;  %v7367_v23 = vor.u32 %v10841_v13, %v7364_v14  ;;  %v7332_v30 = vld [vmem:[#allocation5 + $0xe8] sm:$0xf0] }
  0xd1   :  { %v8738_v33 = vld [vmem:[#allocation5 + $0xbc8] sm:$0xf]  ;;  %v8483_v45 = vor.u32 %v11125_v32, %v8482_v31  ;;  %v10897_v31 = vld [vmem:[#allocation5 + $0x2cc] sm:$0xf] }
  0xd2   :  { %v11189_v36 = vld [vmem:[#allocation5 + $0xbe4] sm:$0xf0]  ;;  %2706 = vmatpush.bf16.msrb.mxu3 %v8035_v27  ;;  %2681 = vmatpush.bf16.msrb.mxu1 %v7491_v40  ;;  %v7623_v27 = vor.u32 %v10905_v15, %v7620_v16  ;;  %v7588_v32 = vld [vmem:[#allocation5 + $0x2e8] sm:$0xf0] }
  0xd3   :  { %v8739_v46 = vor.u32 %v11189_v36, %v8738_v33  ;;  %v8450_v48 = vld [vmem:[#allocation5 + $0x988] sm:$0xf]  ;;  %2669 = vmatmul.bf16.vlgmr.msrb.gmra.mxu0 %v12068_v19  ;;  %v7335_v36 = vor.u32 %v10833_v29, %v7332_v30  ;;  %v7236_v4 = vld [vmem:[#allocation5 + $0x28] sm:$0xf0] }
  0xd4   :  { %v11117_v49 = vld [vmem:[#allocation5 + $0x9a4] sm:$0xf0]  ;;  %2694 = vmatpush.bf16.msrb.mxu2 %v7747_v41  ;;  %2713 = vmatpush.bf16.msra.mxu0 %v8483_v45  ;;  %v7591_v41 = vor.u32 %v10897_v31, %v7588_v32  ;;  %v10889_v45 = vld [vmem:[#allocation5 + $0x28c] sm:$0xf]  ;;  %v7239_v15 = vor.u32 %v10809_v2, %v7236_v4 }
  0xd5   :  { %v8706_v50 = vld [vmem:[#allocation5 + $0xb88] sm:$0xf]  ;;  %v8451_v57 = vor.u32 %v11117_v49, %v8450_v48  ;;  %2682 = vmatmul.bf16.vlgmr.msrb.gmra.mxu1 %v12072_v22  ;;  %v8484_v13 = vld [vmem:[#allocation5 + $0x9e8] sm:$0xf0] }
  0xd6   :  { %v11181_v52 = vld [vmem:[#allocation5 + $0xba4] sm:$0xf0]  ;;  %2707 = vmatpush.bf16.msrb.mxu3 %v8003_v44  ;;  %2726 = vmatpush.bf16.msra.mxu1 %v8739_v46  ;;  %v7300_v44 = vld [vmem:[#allocation5 + $0xa8] sm:$0xf0] }
  0xd7   :  { %v8707_v58 = vor.u32 %v11181_v52, %v8706_v50  ;;  %v8418_v60 = vld [vmem:[#allocation5 + $0x948] sm:$0xf]  ;;  %2695 = vmatmul.bf16.vlgmr.msrb.gmra.mxu2 %v12066_v18  ;;  %v7556_v46 = vld [vmem:[#allocation5 + $0x2a8] sm:$0xf0]  ;;  %v7303_v49 = vor.u32 %v10825_v43, %v7300_v44 }
  0xd8   :  { %2739 = vmatpush.bf16.msra.mxu2 %v7463_v47  ;;  %v11109_v61 = vld [vmem:[#allocation5 + $0x964] sm:$0xf0]  ;;  %2714 = vmatpush.bf16.msra.mxu0 %v8451_v57  ;;  %v7559_v53 = vor.u32 %v10889_v45, %v7556_v46  ;;  %v10881_v57 = vld [vmem:[#allocation5 + $0x24c] sm:$0xf] }
  0xd9   :  { %v8674_v62 = vld [vmem:[#allocation5 + $0xb48] sm:$0xf]  ;;  %2708 = vmatmul.bf16.vlgmr.msrb.gmra.mxu3 %v12070_v20  ;;  %v8419_v5 = vor.u32 %v11109_v61, %v8418_v60  ;;  %v11185_v16 = vld [vmem:[#allocation5 + $0xbcc] sm:$0xf] }
  0xda   :  { %2752 = vmatpush.bf16.msra.mxu3 %v7719_v51  ;;  %v11173_v0 = vld [vmem:[#allocation5 + $0xb64] sm:$0xf0]  ;;  %2727 = vmatpush.bf16.msra.mxu1 %v8707_v58  ;;  %v7524_v58 = vld [vmem:[#allocation5 + $0x268] sm:$0xf0] }
  0xdb   :  { %v8675_v6 = vor.u32 %v11173_v0, %v8674_v62  ;;  %v8386_v8 = vld [vmem:[#allocation5 + $0x908] sm:$0xf]  ;;  %v7527_v3 = vor.u32 %v10881_v57, %v7524_v58  ;;  %v8196_v30 = vld [vmem:[#allocation5 + $0x7a8] sm:$0xf0] }
  0xdc   :  { %2740 = vmatpush.bf16.msra.mxu2 %v7431_v59  ;;  %v11101_v9 = vld [vmem:[#allocation5 + $0x924] sm:$0xf0]  ;;  %2715 = vmatpush.bf16.msra.mxu0 %v8419_v5  ;;  %v10873_v5 = vld [vmem:[#allocation5 + $0x20c] sm:$0xf] }
  0xdd   :  { %v8642_v10 = vld [vmem:[#allocation5 + $0xb08] sm:$0xf]  ;;  %v8387_v17 = vor.u32 %v11101_v9, %v8386_v8  ;;  %v7972_v8 = vld [vmem:[#allocation5 + $0x5e8] sm:$0xf0] }
  0xde   :  { %2753 = vmatpush.bf16.msra.mxu3 %v7687_v63  ;;  %v11165_v12 = vld [vmem:[#allocation5 + $0xb24] sm:$0xf0]  ;;  %2728 = vmatpush.bf16.msra.mxu1 %v8675_v6  ;;  %v7271_v63 = vor.u32 %v10817_v55, %v7268_v56  ;;  %v7492_v6 = vld [vmem:[#allocation5 + $0x228] sm:$0xf0] }
  0xdf   :  { %v8643_v21 = vor.u32 %v11165_v12, %v8642_v10  ;;  %v8354_v24 = vld [vmem:[#allocation5 + $0x8c8] sm:$0xf]  ;;  %v11057_v9 = vld [vmem:[#allocation5 + $0x7cc] sm:$0xf] }
  0xe0   :  { %2741 = vmatpush.bf16.msra.mxu2 %v7399_v7  ;;  %v11093_v25 = vld [vmem:[#allocation5 + $0x8e4] sm:$0xf0]  ;;  %2716 = vmatpush.bf16.msra.mxu0 %v8387_v17  ;;  %v10993_v7 = vld [vmem:[#allocation5 + $0x5cc] sm:$0xf] }
  0xe1   :  { %v8610_v26 = vld [vmem:[#allocation5 + $0xac8] sm:$0xf]  ;;  %v8355_v33 = vor.u32 %v11093_v25, %v8354_v24  ;;  %v11121_v12 = vld [vmem:[#allocation5 + $0x9cc] sm:$0xf] }
  0xe2   :  { %2754 = vmatpush.bf16.msra.mxu3 %v7655_v11  ;;  %v11157_v28 = vld [vmem:[#allocation5 + $0xae4] sm:$0xf0]  ;;  %2729 = vmatpush.bf16.msra.mxu1 %v8643_v21  ;;  %v8228_v11 = vld [vmem:[#allocation5 + $0x7e8] sm:$0xf0]  ;;  %v7495_v21 = vor.u32 %v10873_v5, %v7492_v6  ;;  %v8487_v25 = vor.u32 %v11121_v12, %v8484_v13 }
  0xe3   :  { %v8611_v34 = vor.u32 %v11157_v28, %v8610_v26  ;;  %v8322_v37 = vld [vmem:[#allocation5 + $0x888] sm:$0xf]  ;;  %v8740_v17 = vld [vmem:[#allocation5 + $0xbe8] sm:$0xf0]  ;;  %v8231_v24 = vor.u32 %v11057_v9, %v8228_v11 }
  0xe4   :  { %2742 = vmatpush.bf16.msra.mxu2 %v7367_v23  ;;  %v11085_v39 = vld [vmem:[#allocation5 + $0x8a4] sm:$0xf0]  ;;  %2717 = vmatpush.bf16.msra.mxu0 %v8355_v33  ;;  %v7975_v23 = vor.u32 %v10993_v7, %v7972_v8  ;;  %v10985_v26 = vld [vmem:[#allocation5 + $0x58c] sm:$0xf]  ;;  %v8743_v29 = vor.u32 %v11185_v16, %v8740_v17  ;;  %v12098_v7 = vld [vmem:[#allocation7] sm:$0xff] }
  0xe5   :  { %v8578_v40 = vld [vmem:[#allocation5 + $0xa88] sm:$0xf]  ;;  %v8323_v47 = vor.u32 %v11085_v39, %v8322_v37  ;;  %v11049_v28 = vld [vmem:[#allocation5 + $0x78c] sm:$0xf]  ;;  %v548_v16 = vperm.slane %v12098_v7, 0 }
  0xe6   :  { %2755 = vmatpush.bf16.msra.mxu3 %v7623_v27  ;;  %v11149_v42 = vld [vmem:[#allocation5 + $0xaa4] sm:$0xf0]  ;;  %2730 = vmatpush.bf16.msra.mxu1 %v8611_v34  ;;  %v7940_v27 = vld [vmem:[#allocation5 + $0x5a8] sm:$0xf0]  ;;  %v8199_v37 = vor.u32 %v11049_v28, %v8196_v30  ;;  %v2514_v28 = vpop.f32.mrf.mxu0 }
  0xe7   :  { %v8579_v48 = vor.u32 %v11149_v42, %v8578_v40  ;;  %v8290_v50 = vld [vmem:[#allocation5 + $0x848] sm:$0xf]  ;;  %v11113_v31 = vld [vmem:[#allocation5 + $0x98c] sm:$0xf] }
  0xe8   :  { %2743 = vmatpush.bf16.msra.mxu2 %v7335_v36  ;;  %v11077_v51 = vld [vmem:[#allocation5 + $0x864] sm:$0xf0]  ;;  %2718 = vmatpush.bf16.msra.mxu0 %v8323_v47  ;;  %v8452_v32 = vld [vmem:[#allocation5 + $0x9a8] sm:$0xf0]  ;;  %v7943_v36 = vor.u32 %v10985_v26, %v7940_v27 }
  0xe9   :  { %v8546_v52 = vld [vmem:[#allocation5 + $0xa48] sm:$0xf]  ;;  %v8291_v59 = vor.u32 %v11077_v51, %v8290_v50  ;;  %v11177_v33 = vld [vmem:[#allocation5 + $0xb8c] sm:$0xf]  ;;  %v8455_v39 = vor.u32 %v11113_v31, %v8452_v32 }
  0xea   :  { %2756 = vmatpush.bf16.msra.mxu3 %v7591_v41  ;;  %v11141_v54 = vld [vmem:[#allocation5 + $0xa64] sm:$0xf0]  ;;  %2731 = vmatpush.bf16.msra.mxu1 %v8579_v48  ;;  %v8708_v34 = vld [vmem:[#allocation5 + $0xba8] sm:$0xf0] }
  0xeb   :  { %v8258_v60 = vld [vmem:[#allocation5 + $0x808] sm:$0xf]  ;;  %v8547_v62 = vor.u32 %v11141_v54, %v8546_v52  ;;  %v10977_v40 = vld [vmem:[#allocation5 + $0x54c] sm:$0xf]  ;;  %v8711_v43 = vor.u32 %v11177_v33, %v8708_v34  ;;  %v2515_v34 = vadd.f32 %v2514_v28, %v548_v16  ;;  %v10862_v16 = vld [vmem:[#allocation5 + $0x1ac] sm:$0xf0] }
  0xec   :  { %v11069_v61 = vld [vmem:[#allocation5 + $0x824] sm:$0xf0]  ;;  %2744 = vmatpush.bf16.msra.mxu2 %v7303_v49  ;;  %2719 = vmatpush.bf16.msra.mxu0 %v8291_v59  ;;  %v7908_v41 = vld [vmem:[#allocation5 + $0x568] sm:$0xf0] }
  0xed   :  { %v8514_v0 = vld [vmem:[#allocation5 + $0xa08] sm:$0xf]  ;;  %v8259_v10 = vor.u32 %v11069_v61, %v8258_v60  ;;  %v11041_v42 = vld [vmem:[#allocation5 + $0x74c] sm:$0xf]  ;;  %v7911_v49 = vor.u32 %v10977_v40, %v7908_v41 }
  0xee   :  { %v11133_v1 = vld [vmem:[#allocation5 + $0xa24] sm:$0xf0]  ;;  %2757 = vmatpush.bf16.msra.mxu3 %v7559_v53  ;;  %2732 = vmatpush.bf16.msra.mxu1 %v8547_v62  ;;  %v8164_v44 = vld [vmem:[#allocation5 + $0x768] sm:$0xf0] }
  0xef   :  { %v8515_v14 = vor.u32 %v11133_v1, %v8514_v0  ;;  %v11105_v45 = vld [vmem:[#allocation5 + $0x94c] sm:$0xf]  ;;  %v8167_v50 = vor.u32 %v11041_v42, %v8164_v44 }
  0xf0   :  { %2745 = vmatpush.bf16.msra.mxu2 %v7271_v63  ;;  %2720 = vmatpush.bf16.msra.mxu0 %v8259_v10  ;;  %v8420_v46 = vld [vmem:[#allocation5 + $0x968] sm:$0xf0] }
  0xf1   :  { %v11169_v47 = vld [vmem:[#allocation5 + $0xb4c] sm:$0xf]  ;;  %v8423_v51 = vor.u32 %v11105_v45, %v8420_v46 }
  0xf2   :  { %2758 = vmatpush.bf16.msra.mxu3 %v7527_v3  ;;  %2733 = vmatpush.bf16.msra.mxu1 %v8515_v14  ;;  %v8676_v48 = vld [vmem:[#allocation5 + $0xb68] sm:$0xf0] }
  0xf3   :  { %2721 = vmatmul.bf16.vlgmr.msra.gmra.mxu0 %v12078_v35  ;;  %v10969_v52 = vld [vmem:[#allocation5 + $0x50c] sm:$0xf]  ;;  %v8679_v55 = vor.u32 %v11169_v47, %v8676_v48 }
  0xf4   :  { %2746 = vmatpush.bf16.msra.mxu2 %v7239_v15  ;;  %2765 = vmatpush.bf16.msrb.mxu0 %v7975_v23  ;;  %v7876_v53 = vld [vmem:[#allocation5 + $0x528] sm:$0xf0] }
  0xf5   :  { %2734 = vmatmul.bf16.vlgmr.msra.gmra.mxu1 %v12080_v38  ;;  %v11033_v54 = vld [vmem:[#allocation5 + $0x70c] sm:$0xf]  ;;  %v7879_v61 = vor.u32 %v10969_v52, %v7876_v53  ;;  %v2540_v53 = vpop.f32.mrf.mxu2 }
  0xf6   :  { %2759 = vmatpush.bf16.msra.mxu3 %v7495_v21  ;;  %2778 = vmatpush.bf16.msrb.mxu1 %v8231_v24  ;;  %v8132_v56 = vld [vmem:[#allocation5 + $0x728] sm:$0xf0] }
  0xf7   :  { %2747 = vmatmul.bf16.vlgmr.msra.gmra.mxu2 %v12068_v19  ;;  %v11097_v57 = vld [vmem:[#allocation5 + $0x90c] sm:$0xf]  ;;  %v8135_v63 = vor.u32 %v11033_v54, %v8132_v56 }
  0xf8   :  { %2791 = vmatpush.bf16.msrb.mxu2 %v8487_v25  ;;  %2766 = vmatpush.bf16.msrb.mxu0 %v7943_v36  ;;  %v8388_v58 = vld [vmem:[#allocation5 + $0x928] sm:$0xf0]  ;;  %v2527_v36 = vpop.f32.mrf.mxu1 }
  0xf9   :  { %2760 = vmatmul.bf16.vlgmr.msra.gmra.mxu3 %v12072_v22  ;;  %v11161_v59 = vld [vmem:[#allocation5 + $0xb0c] sm:$0xf]  ;;  %v8391_v0 = vor.u32 %v11097_v57, %v8388_v58  ;;  %v2528_v44 = vadd.f32 %v2527_v36, %v2515_v34  ;;  %v10854_v34 = vld [vmem:[#allocation5 + $0x16c] sm:$0xf0] }
  0xfa   :  { %2804 = vmatpush.bf16.msrb.mxu3 %v8743_v29  ;;  %2779 = vmatpush.bf16.msrb.mxu1 %v8199_v37  ;;  %v8644_v60 = vld [vmem:[#allocation5 + $0xb28] sm:$0xf0]  ;;  %v7658_v36 = vld [vmem:[#allocation5 + $0x350] sm:$0xf] }
  0xfb   :  { %v10961_v62 = vld [vmem:[#allocation5 + $0x4cc] sm:$0xf]  ;;  %v8647_v4 = vor.u32 %v11161_v59, %v8644_v60  ;;  %v2541_v58 = vadd.f32 %v2540_v53, %v2528_v44  ;;  %v2553_v59 = vpop.f32.mrf.mxu3  ;;  %v7466_v60 = vld [vmem:[#allocation5 + $0x1d0] sm:$0xf] }
  0xfc   :  { %2792 = vmatpush.bf16.msrb.mxu2 %v8455_v39  ;;  %2767 = vmatpush.bf16.msrb.mxu0 %v7911_v49  ;;  %v7844_v1 = vld [vmem:[#allocation5 + $0x4e8] sm:$0xf0]  ;;  %v10974_v53 = vld [vmem:[#allocation5 + $0x52c] sm:$0xf0] }
  0xfd   :  { %v11025_v2 = vld [vmem:[#allocation5 + $0x6cc] sm:$0xf]  ;;  %v7847_v10 = vor.u32 %v10961_v62, %v7844_v1  ;;  %v7722_v62 = vld [vmem:[#allocation5 + $0x3d0] sm:$0xf]  ;;  %v2542_v28 = vpop.f32.mrf.mxu2 }
  0xfe   :  { %2805 = vmatpush.bf16.msrb.mxu3 %v8711_v43  ;;  %2780 = vmatpush.bf16.msrb.mxu1 %v8167_v50  ;;  %v8100_v3 = vld [vmem:[#allocation5 + $0x6e8] sm:$0xf0]  ;;  %v7978_v1 = vld [vmem:[#allocation5 + $0x5d0] sm:$0xf] }
  0xff   :  { %v11089_v5 = vld [vmem:[#allocation5 + $0x8cc] sm:$0xf]  ;;  %v8103_v12 = vor.u32 %v11025_v2, %v8100_v3  ;;  %v10998_v2 = vld [vmem:[#allocation5 + $0x5ec] sm:$0xf0]  ;;  %v12101_v3 = vadd.f32 %v2553_v59, %v2541_v58 }
 0x100   :  { %2793 = vmatpush.bf16.msrb.mxu2 %v8423_v51  ;;  %v8356_v6 = vld [vmem:[#allocation5 + $0x8e8] sm:$0xf0]  ;;  %2768 = vmatpush.bf16.msrb.mxu0 %v7879_v61  ;;  %v10870_v61 = vld [vmem:[#allocation5 + $0x1ec] sm:$0xf0] }
 0x101   :  { %v11153_v8 = vld [vmem:[#allocation5 + $0xacc] sm:$0xf]  ;;  %v8359_v13 = vor.u32 %v11089_v5, %v8356_v6 }
 0x102   :  { %2806 = vmatpush.bf16.msrb.mxu3 %v8679_v55  ;;  %v8612_v9 = vld [vmem:[#allocation5 + $0xae8] sm:$0xf0]  ;;  %2781 = vmatpush.bf16.msrb.mxu1 %v8135_v63 }
 0x103   :  { %v10953_v11 = vld [vmem:[#allocation5 + $0x48c] sm:$0xf]  ;;  %v8615_v17 = vor.u32 %v11153_v8, %v8612_v9  ;;  %v8234_v8 = vld [vmem:[#allocation5 + $0x7d0] sm:$0xf] }
 0x104   :  { %2794 = vmatpush.bf16.msrb.mxu2 %v8391_v0  ;;  %v7812_v14 = vld [vmem:[#allocation5 + $0x4a8] sm:$0xf0]  ;;  %2769 = vmatpush.bf16.msrb.mxu0 %v7847_v10  ;;  %v10934_v0 = vld [vmem:[#allocation5 + $0x3ec] sm:$0xf0]  ;;  %v2529_v10 = vpop.f32.mrf.mxu1 }
 0x105   :  { %v11017_v15 = vld [vmem:[#allocation5 + $0x68c] sm:$0xf]  ;;  %v7815_v27 = vor.u32 %v10953_v11, %v7812_v14  ;;  %v11062_v9 = vld [vmem:[#allocation5 + $0x7ec] sm:$0xf0]  ;;  %v7979_v14 = vor.u32 %v10998_v2, %v7978_v1  ;;  %v549_v10 = vperm.slane %v12098_v7, 1 }
 0x106   :  { %2807 = vmatpush.bf16.msrb.mxu3 %v8647_v4  ;;  %v8068_v21 = vld [vmem:[#allocation5 + $0x6a8] sm:$0xf0]  ;;  %2782 = vmatpush.bf16.msrb.mxu1 %v8103_v12  ;;  %v2516_v4 = vpop.f32.mrf.mxu0  ;;  %v7467_v12 = vor.u32 %v10870_v61, %v7466_v60  ;;  %v10902_v2 = vld [vmem:[#allocation5 + $0x2ec] sm:$0xf0] }
 0x107   :  { %v11081_v23 = vld [vmem:[#allocation5 + $0x88c] sm:$0xf]  ;;  %v8071_v29 = vor.u32 %v11017_v15, %v8068_v21  ;;  %v7434_v15 = vld [vmem:[#allocation5 + $0x190] sm:$0xf]  ;;  %v8235_v21 = vor.u32 %v11062_v9, %v8234_v8 }
 0x108   :  { %v8324_v24 = vld [vmem:[#allocation5 + $0x8a8] sm:$0xf0]  ;;  %2795 = vmatpush.bf16.msrb.mxu2 %v8359_v13  ;;  %2770 = vmatpush.bf16.msrb.mxu0 %v7815_v27  ;;  %v7723_v13 = vor.u32 %v10934_v0, %v7722_v62  ;;  %v11054_v27 = vld [vmem:[#allocation5 + $0x7ac] sm:$0xf0] }
 0x109   :  { %v11145_v25 = vld [vmem:[#allocation5 + $0xa8c] sm:$0xf]  ;;  %v8327_v30 = vor.u32 %v11081_v23, %v8324_v24  ;;  %v10926_v23 = vld [vmem:[#allocation5 + $0x3ac] sm:$0xf0] }
 0x10a   :  { %v8580_v26 = vld [vmem:[#allocation5 + $0xaa8] sm:$0xf0]  ;;  %2808 = vmatpush.bf16.msrb.mxu3 %v8615_v17  ;;  %2783 = vmatpush.bf16.msrb.mxu1 %v8071_v29  ;;  %v7690_v17 = vld [vmem:[#allocation5 + $0x390] sm:$0xf]  ;;  %v7435_v29 = vor.u32 %v10862_v16, %v7434_v15 }
 0x10b   :  { %v10945_v31 = vld [vmem:[#allocation5 + $0x44c] sm:$0xf]  ;;  %v8583_v37 = vor.u32 %v11145_v25, %v8580_v26  ;;  %v7946_v24 = vld [vmem:[#allocation5 + $0x590] sm:$0xf] }
 0x10c   :  { %v7780_v32 = vld [vmem:[#allocation5 + $0x468] sm:$0xf0]  ;;  %2796 = vmatpush.bf16.msrb.mxu2 %v8327_v30  ;;  %v10990_v25 = vld [vmem:[#allocation5 + $0x5ac] sm:$0xf0]  ;;  %v2555_v30 = vpop.f32.mrf.mxu3  ;;  %v2579_v59 = vpop.f32.mrf.mxu1 }
 0x10d   :  { %v11009_v33 = vld [vmem:[#allocation5 + $0x64c] sm:$0xf]  ;;  %v7783_v45 = vor.u32 %v10945_v31, %v7780_v32  ;;  %v8202_v26 = vld [vmem:[#allocation5 + $0x790] sm:$0xf]  ;;  %v7691_v31 = vor.u32 %v10926_v23, %v7690_v17  ;;  %v7947_v32 = vor.u32 %v10990_v25, %v7946_v24  ;;  %v2592_v24 = vpop.f32.mrf.mxu2 }
 0x10e   :  { %v8036_v39 = vld [vmem:[#allocation5 + $0x668] sm:$0xf0]  ;;  %2809 = vmatpush.bf16.msrb.mxu3 %v8583_v37  ;;  %v8203_v37 = vor.u32 %v11054_v27, %v8202_v26  ;;  %v7338_v62 = vld [vmem:[#allocation5 + $0xd0] sm:$0xf]  ;;  %v2593_v27 = vadd.f32 %v2592_v24, %v549_v10  ;;  %v10922_v24 = vld [vmem:[#allocation5 + $0x394] sm:$0xf] }
 0x10f   :  { %v11073_v40 = vld [vmem:[#allocation5 + $0x84c] sm:$0xf]  ;;  %v8039_v48 = vor.u32 %v11009_v33, %v8036_v39  ;;  %2771 = vmatpush.bf16.msrb.mxu0 %v7783_v45  ;;  %v7402_v33 = vld [vmem:[#allocation5 + $0x150] sm:$0xf] }
 0x110   :  { %v8292_v41 = vld [vmem:[#allocation5 + $0x868] sm:$0xf0]  ;;  %v10918_v39 = vld [vmem:[#allocation5 + $0x36c] sm:$0xf0]  ;;  %v7403_v44 = vor.u32 %v10854_v34, %v7402_v33 }
 0x111   :  { %v11137_v42 = vld [vmem:[#allocation5 + $0xa4c] sm:$0xf]  ;;  %v8295_v49 = vor.u32 %v11073_v40, %v8292_v41  ;;  %2784 = vmatpush.bf16.msrb.mxu1 %v8039_v48  ;;  %v7914_v40 = vld [vmem:[#allocation5 + $0x550] sm:$0xf]  ;;  %v7659_v45 = vor.u32 %v10918_v39, %v7658_v36 }
 0x112   :  { %v8548_v43 = vld [vmem:[#allocation5 + $0xa68] sm:$0xf0]  ;;  %v10982_v41 = vld [vmem:[#allocation5 + $0x56c] sm:$0xf0] }
 0x113   :  { %v10937_v46 = vld [vmem:[#allocation5 + $0x40c] sm:$0xf]  ;;  %v8551_v54 = vor.u32 %v11137_v42, %v8548_v43  ;;  %2797 = vmatpush.bf16.msrb.mxu2 %v8295_v49  ;;  %v8170_v42 = vld [vmem:[#allocation5 + $0x750] sm:$0xf] }
 0x114   :  { %v7748_v47 = vld [vmem:[#allocation5 + $0x428] sm:$0xf0]  ;;  %v11046_v43 = vld [vmem:[#allocation5 + $0x76c] sm:$0xf0]  ;;  %v2605_v28 = vpop.f32.mrf.mxu3 }
 0x115   :  { %v11001_v50 = vld [vmem:[#allocation5 + $0x60c] sm:$0xf]  ;;  %v7751_v63 = vor.u32 %v10937_v46, %v7748_v47  ;;  %2810 = vmatpush.bf16.msrb.mxu3 %v8551_v54  ;;  %v7915_v46 = vor.u32 %v10982_v41, %v7914_v40  ;;  %v7370_v47 = vld [vmem:[#allocation5 + $0x110] sm:$0xf]  ;;  %v12111_v39 = vadd.f32 %v2605_v28, %v2593_v27 }
 0x116   :  { %v8004_v51 = vld [vmem:[#allocation5 + $0x628] sm:$0xf0]  ;;  %v10846_v48 = vld [vmem:[#allocation5 + $0x12c] sm:$0xf0] }
 0x117   :  { %v11065_v52 = vld [vmem:[#allocation5 + $0x80c] sm:$0xf]  ;;  %v8007_v5 = vor.u32 %v11001_v50, %v8004_v51  ;;  %2772 = vmatpush.bf16.msrb.mxu0 %v7751_v63  ;;  %v7626_v49 = vld [vmem:[#allocation5 + $0x310] sm:$0xf]  ;;  %v8171_v50 = vor.u32 %v11046_v43, %v8170_v42 }
 0x118   :  { %v8260_v55 = vld [vmem:[#allocation5 + $0x828] sm:$0xf0]  ;;  %v10910_v51 = vld [vmem:[#allocation5 + $0x32c] sm:$0xf0] }
 0x119   :  { %v11129_v56 = vld [vmem:[#allocation5 + $0xa0c] sm:$0xf]  ;;  %v8263_v6 = vor.u32 %v11065_v52, %v8260_v55  ;;  %2785 = vmatpush.bf16.msrb.mxu1 %v8007_v5  ;;  %v7882_v52 = vld [vmem:[#allocation5 + $0x510] sm:$0xf]  ;;  %v7627_v60 = vor.u32 %v10910_v51, %v7626_v49 }
 0x11a   :  { %v8516_v57 = vld [vmem:[#allocation5 + $0xa28] sm:$0xf0]  ;;  %2773 = vmatmul.bf16.vlgmr.msrb.gmra.mxu0 %v12066_v18  ;;  %v8138_v54 = vld [vmem:[#allocation5 + $0x710] sm:$0xf]  ;;  %v7883_v61 = vor.u32 %v10974_v53, %v7882_v52 }
 0x11b   :  { %v8519_v11 = vor.u32 %v11129_v56, %v8516_v57  ;;  %2798 = vmatpush.bf16.msrb.mxu2 %v8263_v6  ;;  %2817 = vmatpush.bf16.msra.mxu0 %v7467_v12  ;;  %v11038_v55 = vld [vmem:[#allocation5 + $0x72c] sm:$0xf0]  ;;  %v2566_v56 = vpop.f32.mrf.mxu0  ;;  %v7371_v57 = vor.u32 %v10846_v48, %v7370_v47 }
 0x11c   :  { %2786 = vmatmul.bf16.vlgmr.msrb.gmra.mxu1 %v12070_v20  ;;  %v2567_v58 = vadd.f32 %v2566_v56, %v12101_v3  ;;  %v10838_v63 = vld [vmem:[#allocation5 + $0xec] sm:$0xf0]  ;;  %v8139_v1 = vor.u32 %v11038_v55, %v8138_v54 }
 0x11d   :  { %2811 = vmatpush.bf16.msrb.mxu3 %v8519_v11  ;;  %2830 = vmatpush.bf16.msra.mxu1 %v7723_v13  ;;  %v7594_v0 = vld [vmem:[#allocation5 + $0x2d0] sm:$0xf]  ;;  %v7339_v3 = vor.u32 %v10838_v63, %v7338_v62  ;;  %v2607_v62 = vpop.f32.mrf.mxu3 }
 0x11e   :  { %2799 = vmatmul.bf16.vlgmr.msrb.gmra.mxu2 %v12078_v35  ;;  %v7850_v4 = vld [vmem:[#allocation5 + $0x4d0] sm:$0xf]  ;;  %v12108_v6 = vadd.f32 %v2579_v59, %v2567_v58  ;;  %v7595_v11 = vor.u32 %v10902_v2, %v7594_v0  ;;  %v2594_v58 = vpop.f32.mrf.mxu2  ;;  %v7468_v2 = vld [vmem:[#allocation5 + $0x1f0] sm:$0xf0] }
 0x11f   :  { %2843 = vmatpush.bf16.msra.mxu2 %v7979_v14  ;;  %2818 = vmatpush.bf16.msra.mxu0 %v7435_v29  ;;  %v10966_v5 = vld [vmem:[#allocation5 + $0x4ec] sm:$0xf0] }
 0x120   :  { %2812 = vmatmul.bf16.vlgmr.msrb.gmra.mxu3 %v12080_v38  ;;  %v8106_v8 = vld [vmem:[#allocation5 + $0x6d0] sm:$0xf]  ;;  %v7851_v12 = vor.u32 %v10966_v5, %v7850_v4 }
 0x121   :  { %2856 = vmatpush.bf16.msra.mxu3 %v8235_v21  ;;  %2831 = vmatpush.bf16.msra.mxu1 %v7691_v31  ;;  %v11030_v9 = vld [vmem:[#allocation5 + $0x6ec] sm:$0xf0]  ;;  %v2581_v31 = vpop.f32.mrf.mxu1 }
 0x122   :  { %v7306_v13 = vld [vmem:[#allocation5 + $0x90] sm:$0xf]  ;;  %v8107_v16 = vor.u32 %v11030_v9, %v8106_v8  ;;  %v10930_v8 = vld [vmem:[#allocation5 + $0x3d4] sm:$0xf] }
 0x123   :  { %2844 = vmatpush.bf16.msra.mxu2 %v7947_v32  ;;  %2819 = vmatpush.bf16.msra.mxu0 %v7403_v44  ;;  %v10830_v14 = vld [vmem:[#allocation5 + $0xac] sm:$0xf0]  ;;  %v2568_v29 = vpop.f32.mrf.mxu0  ;;  %v7724_v9 = vld [vmem:[#allocation5 + $0x3f0] sm:$0xf0] }
 0x124   :  { %v7562_v15 = vld [vmem:[#allocation5 + $0x290] sm:$0xf]  ;;  %v7307_v30 = vor.u32 %v10830_v14, %v7306_v13 }
 0x125   :  { %2857 = vmatpush.bf16.msra.mxu3 %v8203_v37  ;;  %2832 = vmatpush.bf16.msra.mxu1 %v7659_v45  ;;  %v10894_v17 = vld [vmem:[#allocation5 + $0x2ac] sm:$0xf0] }
 0x126   :  { %v7818_v21 = vld [vmem:[#allocation5 + $0x490] sm:$0xf]  ;;  %v7563_v32 = vor.u32 %v10894_v17, %v7562_v15 }
 0x127   :  { %2845 = vmatpush.bf16.msra.mxu2 %v7915_v46  ;;  %2820 = vmatpush.bf16.msra.mxu0 %v7371_v57  ;;  %v10958_v23 = vld [vmem:[#allocation5 + $0x4ac] sm:$0xf0] }
 0x128   :  { %v8074_v25 = vld [vmem:[#allocation5 + $0x690] sm:$0xf]  ;;  %v7819_v33 = vor.u32 %v10958_v23, %v7818_v21  ;;  %v10858_v21 = vld [vmem:[#allocation5 + $0x194] sm:$0xf] }
 0x129   :  { %2858 = vmatpush.bf16.msra.mxu3 %v8171_v50  ;;  %2833 = vmatpush.bf16.msra.mxu1 %v7627_v60  ;;  %v11022_v26 = vld [vmem:[#allocation5 + $0x6ac] sm:$0xf0]  ;;  %v7436_v23 = vld [vmem:[#allocation5 + $0x1b0] sm:$0xf0] }
 0x12a   :  { %v7274_v34 = vld [vmem:[#allocation5 + $0x50] sm:$0xf]  ;;  %v8075_v40 = vor.u32 %v11022_v26, %v8074_v25  ;;  %v7692_v25 = vld [vmem:[#allocation5 + $0x3b0] sm:$0xf0]  ;;  %v7439_v28 = vor.u32 %v10858_v21, %v7436_v23 }
 0x12b   :  { %2846 = vmatpush.bf16.msra.mxu2 %v7883_v61  ;;  %2821 = vmatpush.bf16.msra.mxu0 %v7339_v3  ;;  %v10822_v36 = vld [vmem:[#allocation5 + $0x6c] sm:$0xf0]  ;;  %v10890_v23 = vld [vmem:[#allocation5 + $0x294] sm:$0xf] }
 0x12c   :  { %v7530_v37 = vld [vmem:[#allocation5 + $0x250] sm:$0xf]  ;;  %v7275_v46 = vor.u32 %v10822_v36, %v7274_v34  ;;  %v10850_v34 = vld [vmem:[#allocation5 + $0x154] sm:$0xf] }
 0x12d   :  { %2859 = vmatpush.bf16.msra.mxu3 %v8139_v1  ;;  %2834 = vmatpush.bf16.msra.mxu1 %v7595_v11  ;;  %v10886_v41 = vld [vmem:[#allocation5 + $0x26c] sm:$0xf0]  ;;  %v10866_v1 = vld [vmem:[#allocation5 + $0x1d4] sm:$0xf] }
 0x12e   :  { %v7786_v42 = vld [vmem:[#allocation5 + $0x450] sm:$0xf]  ;;  %v7531_v49 = vor.u32 %v10886_v41, %v7530_v37  ;;  %v7404_v36 = vld [vmem:[#allocation5 + $0x170] sm:$0xf0] }
 0x12f   :  { %2847 = vmatpush.bf16.msra.mxu2 %v7851_v12  ;;  %v10950_v43 = vld [vmem:[#allocation5 + $0x46c] sm:$0xf0]  ;;  %2822 = vmatpush.bf16.msra.mxu0 %v7307_v30  ;;  %v7471_v12 = vor.u32 %v10866_v1, %v7468_v2  ;;  %v10914_v37 = vld [vmem:[#allocation5 + $0x354] sm:$0xf] }
 0x130   :  { %v8042_v44 = vld [vmem:[#allocation5 + $0x650] sm:$0xf]  ;;  %v7787_v50 = vor.u32 %v10950_v43, %v7786_v42  ;;  %v7407_v43 = vor.u32 %v10850_v34, %v7404_v36  ;;  %v7340_v1 = vld [vmem:[#allocation5 + $0xf0] sm:$0xf0] }
 0x131   :  { %2860 = vmatpush.bf16.msra.mxu3 %v8107_v16  ;;  %v11014_v45 = vld [vmem:[#allocation5 + $0x66c] sm:$0xf0]  ;;  %2835 = vmatpush.bf16.msra.mxu1 %v7563_v32  ;;  %v7727_v16 = vor.u32 %v10930_v8, %v7724_v9  ;;  %v7695_v32 = vor.u32 %v10922_v24, %v7692_v25  ;;  %v10898_v2 = vld [vmem:[#allocation5 + $0x2d4] sm:$0xf] }
 0x132   :  { %v7242_v47 = vld [vmem:[#allocation5 + $0x10] sm:$0xf]  ;;  %v8043_v54 = vor.u32 %v11014_v45, %v8042_v44  ;;  %v7564_v24 = vld [vmem:[#allocation5 + $0x2b0] sm:$0xf0] }
 0x133   :  { %v10814_v48 = vld [vmem:[#allocation5 + $0x2c] sm:$0xf0]  ;;  %2848 = vmatpush.bf16.msra.mxu2 %v7819_v33  ;;  %2823 = vmatpush.bf16.msra.mxu0 %v7275_v46  ;;  %v7567_v34 = vor.u32 %v10890_v23, %v7564_v24 }
 0x134   :  { %v7498_v51 = vld [vmem:[#allocation5 + $0x210] sm:$0xf]  ;;  %v7243_v63 = vor.u32 %v10814_v48, %v7242_v47 }
 0x135   :  { %v10878_v52 = vld [vmem:[#allocation5 + $0x22c] sm:$0xf0]  ;;  %2861 = vmatpush.bf16.msra.mxu3 %v8075_v40  ;;  %2836 = vmatpush.bf16.msra.mxu1 %v7531_v49  ;;  %v7660_v40 = vld [vmem:[#allocation5 + $0x370] sm:$0xf0] }
 0x136   :  { %v7754_v53 = vld [vmem:[#allocation5 + $0x410] sm:$0xf]  ;;  %v7499_v4 = vor.u32 %v10878_v52, %v7498_v51  ;;  %v7663_v47 = vor.u32 %v10914_v37, %v7660_v40  ;;  %v10842_v49 = vld [vmem:[#allocation5 + $0x114] sm:$0xf] }
 0x137   :  { %v10942_v55 = vld [vmem:[#allocation5 + $0x42c] sm:$0xf0]  ;;  %2849 = vmatpush.bf16.msra.mxu2 %v7787_v50  ;;  %2824 = vmatpush.bf16.msra.mxu0 %v7243_v63  ;;  %v7372_v50 = vld [vmem:[#allocation5 + $0x130] sm:$0xf0] }
 0x138   :  { %v8010_v56 = vld [vmem:[#allocation5 + $0x610] sm:$0xf]  ;;  %v7755_v5 = vor.u32 %v10942_v55, %v7754_v53  ;;  %v10906_v51 = vld [vmem:[#allocation5 + $0x314] sm:$0xf] }
 0x139   :  { %v11006_v57 = vld [vmem:[#allocation5 + $0x62c] sm:$0xf0]  ;;  %2862 = vmatpush.bf16.msra.mxu3 %v8043_v54  ;;  %2837 = vmatpush.bf16.msra.mxu1 %v7499_v4  ;;  %v7628_v52 = vld [vmem:[#allocation5 + $0x330] sm:$0xf0]  ;;  %v2618_v54 = vpop.f32.mrf.mxu0 }
 0x13a   :  { %v8490_v59 = vld [vmem:[#allocation5 + $0x9d0] sm:$0xf]  ;;  %v8011_v10 = vor.u32 %v11006_v57, %v8010_v56  ;;  %2825 = vmatmul.bf16.vlgmr.msra.gmra.mxu0 %v12068_v19  ;;  %v7375_v56 = vor.u32 %v10842_v49, %v7372_v50  ;;  %v7631_v62 = vor.u32 %v10906_v51, %v7628_v52  ;;  %v7596_v4 = vld [vmem:[#allocation5 + $0x2f0] sm:$0xf0] }
 0x13b   :  { %v11126_v60 = vld [vmem:[#allocation5 + $0x9ec] sm:$0xf0]  ;;  %2850 = vmatpush.bf16.msra.mxu2 %v7755_v5  ;;  %v10818_v37 = vld [vmem:[#allocation5 + $0x54] sm:$0xf] }
 0x13c   :  { %v8746_v61 = vld [vmem:[#allocation5 + $0xbd0] sm:$0xf]  ;;  %v8491_v3 = vor.u32 %v11126_v60, %v8490_v59  ;;  %2838 = vmatmul.bf16.vlgmr.msra.gmra.mxu1 %v12072_v22  ;;  %v2619_v60 = vadd.f32 %v2618_v54, %v12111_v39  ;;  %v7599_v39 = vor.u32 %v10898_v2, %v7596_v4  ;;  %v2657_v21 = vpop.f32.mrf.mxu3  ;;  %v7276_v40 = vld [vmem:[#allocation5 + $0x70] sm:$0xf0] }
 0x13d   :  { %v11190_v0 = vld [vmem:[#allocation5 + $0xbec] sm:$0xf0]  ;;  %2863 = vmatpush.bf16.msra.mxu3 %v8011_v10  ;;  %v10810_v50 = vld [vmem:[#allocation5 + $0x14] sm:$0xf] }
 0x13e   :  { %v8747_v11 = vor.u32 %v11190_v0, %v8746_v61  ;;  %v8458_v13 = vld [vmem:[#allocation5 + $0x990] sm:$0xf]  ;;  %2869 = vmatpush.bf16.msrb.mxu0 %v8491_v3  ;;  %2851 = vmatmul.bf16.vlgmr.msra.gmra.mxu2 %v12066_v18  ;;  %v2631_v61 = vpop.f32.mrf.mxu1  ;;  %v10834_v0 = vld [vmem:[#allocation5 + $0xd4] sm:$0xf] }
 0x13f   :  { %v11118_v14 = vld [vmem:[#allocation5 + $0x9ac] sm:$0xf0]  ;;  %2895 = vmatpush.bf16.msrb.mxu2 %v7471_v12  ;;  %v2632_v5 = vadd.f32 %v2631_v61, %v2619_v60  ;;  %v7343_v10 = vor.u32 %v10834_v0, %v7340_v1  ;;  %v10874_v54 = vld [vmem:[#allocation5 + $0x214] sm:$0xf] }
 0x140   :  { %v8714_v15 = vld [vmem:[#allocation5 + $0xb90] sm:$0xf]  ;;  %v8459_v26 = vor.u32 %v11118_v14, %v8458_v13  ;;  %2882 = vmatpush.bf16.msrb.mxu1 %v8747_v11  ;;  %2864 = vmatmul.bf16.vlgmr.msra.gmra.mxu3 %v12070_v20  ;;  %v2644_v13 = vpop.f32.mrf.mxu2  ;;  %v8236_v61 = vld [vmem:[#allocation5 + $0x7f0] sm:$0xf0] }
 0x141   :  { %v11182_v17 = vld [vmem:[#allocation5 + $0xbac] sm:$0xf0]  ;;  %2908 = vmatpush.bf16.msrb.mxu3 %v7727_v16  ;;  %v7308_v16 = vld [vmem:[#allocation5 + $0xb0] sm:$0xf0] }
 0x142   :  { %v8715_v27 = vor.u32 %v11182_v17, %v8714_v15  ;;  %v8426_v29 = vld [vmem:[#allocation5 + $0x950] sm:$0xf]  ;;  %2870 = vmatpush.bf16.msrb.mxu0 %v8459_v26  ;;  %v10826_v15 = vld [vmem:[#allocation5 + $0x94] sm:$0xf]  ;;  %v2645_v17 = vadd.f32 %v2644_v13, %v2632_v5 }
 0x143   :  { %v11110_v30 = vld [vmem:[#allocation5 + $0x96c] sm:$0xf0]  ;;  %2896 = vmatpush.bf16.msrb.mxu2 %v7439_v28  ;;  %v11186_v2 = vld [vmem:[#allocation5 + $0xbd4] sm:$0xf] }
 0x144   :  { %v8682_v31 = vld [vmem:[#allocation5 + $0xb50] sm:$0xf]  ;;  %v8427_v41 = vor.u32 %v11110_v30, %v8426_v29  ;;  %2883 = vmatpush.bf16.msrb.mxu1 %v8715_v27  ;;  %v12118_v26 = vadd.f32 %v2657_v21, %v2645_v17  ;;  %v2620_v27 = vpop.f32.mrf.mxu0  ;;  %v7311_v29 = vor.u32 %v10826_v15, %v7308_v16  ;;  %v8748_v4 = vld [vmem:[#allocation5 + $0xbf0] sm:$0xf0] }
 0x145   :  { %v11174_v33 = vld [vmem:[#allocation5 + $0xb6c] sm:$0xf0]  ;;  %2909 = vmatpush.bf16.msrb.mxu3 %v7695_v32  ;;  %v8751_v13 = vor.u32 %v11186_v2, %v8748_v4  ;;  %v8460_v15 = vld [vmem:[#allocation5 + $0x9b0] sm:$0xf0] }
 0x146   :  { %v8683_v42 = vor.u32 %v11174_v33, %v8682_v31  ;;  %v8394_v44 = vld [vmem:[#allocation5 + $0x910] sm:$0xf]  ;;  %2871 = vmatpush.bf16.msrb.mxu0 %v8427_v41  ;;  %v2633_v33 = vpop.f32.mrf.mxu1  ;;  %v10882_v41 = vld [vmem:[#allocation5 + $0x254] sm:$0xf] }
 0x147   :  { %v11102_v45 = vld [vmem:[#allocation5 + $0x92c] sm:$0xf0]  ;;  %2897 = vmatpush.bf16.msrb.mxu2 %v7407_v43  ;;  %v11178_v16 = vld [vmem:[#allocation5 + $0xb94] sm:$0xf] }
 0x148   :  { %v8650_v46 = vld [vmem:[#allocation5 + $0xb10] sm:$0xf]  ;;  %v8395_v53 = vor.u32 %v11102_v45, %v8394_v44  ;;  %2884 = vmatpush.bf16.msrb.mxu1 %v8683_v42  ;;  %v7532_v42 = vld [vmem:[#allocation5 + $0x270] sm:$0xf0]  ;;  %v2646_v51 = vpop.f32.mrf.mxu2 }
 0x149   :  { %v11166_v48 = vld [vmem:[#allocation5 + $0xb2c] sm:$0xf0]  ;;  %2910 = vmatpush.bf16.msrb.mxu3 %v7663_v47  ;;  %v7279_v47 = vor.u32 %v10818_v37, %v7276_v40  ;;  %v7535_v52 = vor.u32 %v10882_v41, %v7532_v42  ;;  %v8716_v17 = vld [vmem:[#allocation5 + $0xbb0] sm:$0xf0] }
 0x14a   :  { %v8651_v55 = vor.u32 %v11166_v48, %v8650_v46  ;;  %v8362_v57 = vld [vmem:[#allocation5 + $0x8d0] sm:$0xf]  ;;  %2872 = vmatpush.bf16.msrb.mxu0 %v8395_v53  ;;  %v7244_v53 = vld [vmem:[#allocation5 + $0x30] sm:$0xf0] }
 0x14b   :  { %v11094_v58 = vld [vmem:[#allocation5 + $0x8ec] sm:$0xf0]  ;;  %2898 = vmatpush.bf16.msrb.mxu2 %v7375_v56  ;;  %v2659_v56 = vpop.f32.mrf.mxu3  ;;  %v7247_v1 = vor.u32 %v10810_v50, %v7244_v53  ;;  %v7916_v27 = vld [vmem:[#allocation5 + $0x570] sm:$0xf0] }
 0x14c   :  { %v8618_v59 = vld [vmem:[#allocation5 + $0xad0] sm:$0xf]  ;;  %v8363_v8 = vor.u32 %v11094_v58, %v8362_v57  ;;  %2885 = vmatpush.bf16.msrb.mxu1 %v8651_v55  ;;  %v7500_v55 = vld [vmem:[#allocation5 + $0x230] sm:$0xf0] }
 0x14d   :  { %v11158_v63 = vld [vmem:[#allocation5 + $0xaec] sm:$0xf0]  ;;  %2911 = vmatpush.bf16.msrb.mxu3 %v7631_v62  ;;  %v10994_v57 = vld [vmem:[#allocation5 + $0x5d4] sm:$0xf]  ;;  %v7503_v5 = vor.u32 %v10874_v54, %v7500_v55 }
 0x14e   :  { %v8619_v9 = vor.u32 %v11158_v63, %v8618_v59  ;;  %v8330_v3 = vld [vmem:[#allocation5 + $0x890] sm:$0xf]  ;;  %2873 = vmatpush.bf16.msrb.mxu0 %v8363_v8  ;;  %v7980_v58 = vld [vmem:[#allocation5 + $0x5f0] sm:$0xf0] }
 0x14f   :  { %v11086_v11 = vld [vmem:[#allocation5 + $0x8ac] sm:$0xf0]  ;;  %2899 = vmatpush.bf16.msrb.mxu2 %v7343_v10  ;;  %v11058_v59 = vld [vmem:[#allocation5 + $0x7d4] sm:$0xf]  ;;  %v7983_v8 = vor.u32 %v10994_v57, %v7980_v58 }
 0x150   :  { %v8586_v12 = vld [vmem:[#allocation5 + $0xa90] sm:$0xf]  ;;  %v8331_v25 = vor.u32 %v11086_v11, %v8330_v3  ;;  %2886 = vmatpush.bf16.msrb.mxu1 %v8619_v9  ;;  %v11122_v62 = vld [vmem:[#allocation5 + $0x9d4] sm:$0xf]  ;;  %v8239_v9 = vor.u32 %v11058_v59, %v8236_v61 }
 0x151   :  { %v11150_v14 = vld [vmem:[#allocation5 + $0xaac] sm:$0xf0]  ;;  %2912 = vmatpush.bf16.msrb.mxu3 %v7599_v39  ;;  %v8492_v63 = vld [vmem:[#allocation5 + $0x9f0] sm:$0xf0] }
 0x152   :  { %v8587_v28 = vor.u32 %v11150_v14, %v8586_v12  ;;  %v8298_v30 = vld [vmem:[#allocation5 + $0x850] sm:$0xf]  ;;  %2874 = vmatpush.bf16.msrb.mxu0 %v8331_v25  ;;  %v8495_v10 = vor.u32 %v11122_v62, %v8492_v63  ;;  %v10986_v3 = vld [vmem:[#allocation5 + $0x594] sm:$0xf]  ;;  %v2683_v59 = vpop.f32.mrf.mxu1 }
 0x153   :  { %v11078_v31 = vld [vmem:[#allocation5 + $0x86c] sm:$0xf0]  ;;  %2900 = vmatpush.bf16.msrb.mxu2 %v7311_v29  ;;  %v7948_v11 = vld [vmem:[#allocation5 + $0x5b0] sm:$0xf0]  ;;  %v8719_v29 = vor.u32 %v11178_v16, %v8716_v17 }
 0x154   :  { %v8554_v32 = vld [vmem:[#allocation5 + $0xa50] sm:$0xf]  ;;  %v8299_v43 = vor.u32 %v11078_v31, %v8298_v30  ;;  %2887 = vmatpush.bf16.msrb.mxu1 %v8587_v28  ;;  %v11050_v12 = vld [vmem:[#allocation5 + $0x794] sm:$0xf]  ;;  %v7951_v21 = vor.u32 %v10986_v3, %v7948_v11 }
 0x155   :  { %v11142_v36 = vld [vmem:[#allocation5 + $0xa6c] sm:$0xf0]  ;;  %2913 = vmatpush.bf16.msrb.mxu3 %v7567_v34  ;;  %v8204_v39 = vld [vmem:[#allocation5 + $0x7b0] sm:$0xf0] }
 0x156   :  { %v8266_v44 = vld [vmem:[#allocation5 + $0x810] sm:$0xf]  ;;  %v8555_v46 = vor.u32 %v11142_v36, %v8554_v32  ;;  %2875 = vmatpush.bf16.msrb.mxu0 %v8299_v43  ;;  %v11114_v14 = vld [vmem:[#allocation5 + $0x994] sm:$0xf]  ;;  %v8207_v23 = vor.u32 %v11050_v12, %v8204_v39 }
 0x157   :  { %v11070_v45 = vld [vmem:[#allocation5 + $0x82c] sm:$0xf0]  ;;  %2901 = vmatpush.bf16.msrb.mxu2 %v7279_v47  ;;  %v8463_v24 = vor.u32 %v11114_v14, %v8460_v15  ;;  %v10978_v25 = vld [vmem:[#allocation5 + $0x554] sm:$0xf] }
 0x158   :  { %v8522_v48 = vld [vmem:[#allocation5 + $0xa10] sm:$0xf]  ;;  %v8267_v60 = vor.u32 %v11070_v45, %v8266_v44  ;;  %2888 = vmatpush.bf16.msrb.mxu1 %v8555_v46  ;;  %v11042_v28 = vld [vmem:[#allocation5 + $0x754] sm:$0xf]  ;;  %v7919_v36 = vor.u32 %v10978_v25, %v7916_v27  ;;  %v550_v44 = vperm.slane %v12098_v7, 2 }
 0x159   :  { %v11134_v49 = vld [vmem:[#allocation5 + $0xa2c] sm:$0xf0]  ;;  %2914 = vmatpush.bf16.msrb.mxu3 %v7535_v52  ;;  %v8172_v30 = vld [vmem:[#allocation5 + $0x770] sm:$0xf0]  ;;  %v2670_v52 = vpop.f32.mrf.mxu0 }
 0x15a   :  { %v8523_v0 = vor.u32 %v11134_v49, %v8522_v48  ;;  %2876 = vmatpush.bf16.msrb.mxu0 %v8267_v60  ;;  %v11106_v31 = vld [vmem:[#allocation5 + $0x954] sm:$0xf]  ;;  %v8175_v40 = vor.u32 %v11042_v28, %v8172_v30  ;;  %v2671_v58 = vadd.f32 %v2670_v52, %v550_v44  ;;  %v2696_v3 = vpop.f32.mrf.mxu2 }
 0x15b   :  { %2902 = vmatpush.bf16.msrb.mxu2 %v7247_v1  ;;  %v8428_v32 = vld [vmem:[#allocation5 + $0x970] sm:$0xf0] }
 0x15c   :  { %2889 = vmatpush.bf16.msrb.mxu1 %v8523_v0  ;;  %v11170_v33 = vld [vmem:[#allocation5 + $0xb54] sm:$0xf]  ;;  %v8431_v41 = vor.u32 %v11106_v31, %v8428_v32  ;;  %v2684_v1 = vadd.f32 %v2683_v59, %v2671_v58  ;;  %v2709_v15 = vpop.f32.mrf.mxu3  ;;  %v2685_v31 = vpop.f32.mrf.mxu1  ;;  %v10935_v59 = vld [vmem:[#allocation5 + $0x3f4] sm:$0xf0] }
 0x15d   :  { %2915 = vmatpush.bf16.msrb.mxu3 %v7503_v5  ;;  %2877 = vmatmul.bf16.vlgmr.msrb.gmra.mxu0 %v12078_v35  ;;  %v8684_v34 = vld [vmem:[#allocation5 + $0xb70] sm:$0xf0]  ;;  %v8178_v31 = vld [vmem:[#allocation5 + $0x758] sm:$0xf] }
 0x15e   :  { %2921 = vmatpush.bf16.msra.mxu0 %v7983_v8  ;;  %2903 = vmatmul.bf16.vlgmr.msrb.gmra.mxu2 %v12068_v19  ;;  %v10970_v37 = vld [vmem:[#allocation5 + $0x514] sm:$0xf]  ;;  %v8687_v45 = vor.u32 %v11170_v33, %v8684_v34  ;;  %v2697_v14 = vadd.f32 %v2696_v3, %v2684_v1 }
 0x15f   :  { %2947 = vmatpush.bf16.msra.mxu2 %v8495_v10  ;;  %2890 = vmatmul.bf16.vlgmr.msrb.gmra.mxu1 %v12080_v38  ;;  %v7884_v42 = vld [vmem:[#allocation5 + $0x530] sm:$0xf0] }
 0x160   :  { %2934 = vmatpush.bf16.msra.mxu1 %v8239_v9  ;;  %2916 = vmatmul.bf16.vlgmr.msrb.gmra.mxu3 %v12072_v22  ;;  %v11034_v43 = vld [vmem:[#allocation5 + $0x714] sm:$0xf]  ;;  %v7887_v51 = vor.u32 %v10970_v37, %v7884_v42 }
 0x161   :  { %2960 = vmatpush.bf16.msra.mxu3 %v8751_v13  ;;  %v8140_v46 = vld [vmem:[#allocation5 + $0x730] sm:$0xf0] }
 0x162   :  { %2922 = vmatpush.bf16.msra.mxu0 %v7951_v21  ;;  %v11098_v47 = vld [vmem:[#allocation5 + $0x914] sm:$0xf]  ;;  %v8143_v53 = vor.u32 %v11034_v43, %v8140_v46 }
 0x163   :  { %2948 = vmatpush.bf16.msra.mxu2 %v8463_v24  ;;  %v8396_v48 = vld [vmem:[#allocation5 + $0x930] sm:$0xf0]  ;;  %v2672_v24 = vpop.f32.mrf.mxu0 }
 0x164   :  { %2935 = vmatpush.bf16.msra.mxu1 %v8207_v23  ;;  %v11162_v49 = vld [vmem:[#allocation5 + $0xb14] sm:$0xf]  ;;  %v8399_v54 = vor.u32 %v11098_v47, %v8396_v48  ;;  %v12125_v23 = vadd.f32 %v2709_v15, %v2697_v14  ;;  %v11055_v14 = vld [vmem:[#allocation5 + $0x7b4] sm:$0xf0] }
 0x165   :  { %2961 = vmatpush.bf16.msra.mxu3 %v8719_v29  ;;  %v8652_v50 = vld [vmem:[#allocation5 + $0xb30] sm:$0xf0]  ;;  %v10855_v24 = vld [vmem:[#allocation5 + $0x174] sm:$0xf0] }
 0x166   :  { %2923 = vmatpush.bf16.msra.mxu0 %v7919_v36  ;;  %v10962_v55 = vld [vmem:[#allocation5 + $0x4d4] sm:$0xf]  ;;  %v8655_v7 = vor.u32 %v11162_v49, %v8652_v50  ;;  %v2698_v49 = vpop.f32.mrf.mxu2 }
 0x167   :  { %2949 = vmatpush.bf16.msra.mxu2 %v8431_v41  ;;  %v7852_v56 = vld [vmem:[#allocation5 + $0x4f0] sm:$0xf0] }
 0x168   :  { %2936 = vmatpush.bf16.msra.mxu1 %v8175_v40  ;;  %v11026_v57 = vld [vmem:[#allocation5 + $0x6d4] sm:$0xf]  ;;  %v7855_v2 = vor.u32 %v10962_v55, %v7852_v56  ;;  %v7474_v55 = vld [vmem:[#allocation5 + $0x1d8] sm:$0xf] }
 0x169   :  { %2962 = vmatpush.bf16.msra.mxu3 %v8687_v45  ;;  %v8108_v60 = vld [vmem:[#allocation5 + $0x6f0] sm:$0xf0]  ;;  %v10871_v56 = vld [vmem:[#allocation5 + $0x1f4] sm:$0xf0] }
 0x16a   :  { %v11090_v61 = vld [vmem:[#allocation5 + $0x8d4] sm:$0xf]  ;;  %2924 = vmatpush.bf16.msra.mxu0 %v7887_v51  ;;  %v8111_v4 = vor.u32 %v11026_v57, %v8108_v60  ;;  %v7730_v57 = vld [vmem:[#allocation5 + $0x3d8] sm:$0xf] }
 0x16b   :  { %v8364_v62 = vld [vmem:[#allocation5 + $0x8f0] sm:$0xf0]  ;;  %2950 = vmatpush.bf16.msra.mxu2 %v8399_v54  ;;  %v2711_v54 = vpop.f32.mrf.mxu3  ;;  %v10999_v60 = vld [vmem:[#allocation5 + $0x5f4] sm:$0xf0] }
 0x16c   :  { %v11154_v63 = vld [vmem:[#allocation5 + $0xad4] sm:$0xf]  ;;  %2937 = vmatpush.bf16.msra.mxu1 %v8143_v53  ;;  %v8367_v5 = vor.u32 %v11090_v61, %v8364_v62  ;;  %v7346_v54 = vld [vmem:[#allocation5 + $0xd8] sm:$0xf] }
 0x16d   :  { %v8620_v0 = vld [vmem:[#allocation5 + $0xaf0] sm:$0xf0]  ;;  %2963 = vmatpush.bf16.msra.mxu3 %v8655_v7  ;;  %v7986_v7 = vld [vmem:[#allocation5 + $0x5d8] sm:$0xf] }
 0x16e   :  { %v10954_v8 = vld [vmem:[#allocation5 + $0x494] sm:$0xf]  ;;  %v8623_v11 = vor.u32 %v11154_v63, %v8620_v0  ;;  %2925 = vmatpush.bf16.msra.mxu0 %v7855_v2  ;;  %v8242_v63 = vld [vmem:[#allocation5 + $0x7d8] sm:$0xf]  ;;  %v7475_v2 = vor.u32 %v10871_v56, %v7474_v55 }
 0x16f   :  { %v7820_v9 = vld [vmem:[#allocation5 + $0x4b0] sm:$0xf0]  ;;  %2951 = vmatpush.bf16.msra.mxu2 %v8367_v5  ;;  %v11063_v0 = vld [vmem:[#allocation5 + $0x7f4] sm:$0xf0]  ;;  %v7987_v5 = vor.u32 %v10999_v60, %v7986_v7 }
 0x170   :  { %v11018_v10 = vld [vmem:[#allocation5 + $0x694] sm:$0xf]  ;;  %v7823_v21 = vor.u32 %v10954_v8, %v7820_v9  ;;  %2938 = vmatpush.bf16.msra.mxu1 %v8111_v4  ;;  %v7731_v4 = vor.u32 %v10935_v59, %v7730_v57  ;;  %v7442_v8 = vld [vmem:[#allocation5 + $0x198] sm:$0xf]  ;;  %v8243_v3 = vor.u32 %v11063_v0, %v8242_v63  ;;  %v12134_v63 = vld [vmem:[#allocation7] sm:$0xff] }
 0x171   :  { %v8076_v12 = vld [vmem:[#allocation5 + $0x6b0] sm:$0xf0]  ;;  %2964 = vmatpush.bf16.msra.mxu3 %v8623_v11  ;;  %v10863_v9 = vld [vmem:[#allocation5 + $0x1b4] sm:$0xf0] }
 0x172   :  { %v11082_v13 = vld [vmem:[#allocation5 + $0x894] sm:$0xf]  ;;  %v8079_v25 = vor.u32 %v11018_v10, %v8076_v12  ;;  %2926 = vmatpush.bf16.msra.mxu0 %v7823_v21  ;;  %v7698_v10 = vld [vmem:[#allocation5 + $0x398] sm:$0xf]  ;;  %v7443_v15 = vor.u32 %v10863_v9, %v7442_v8 }
 0x173   :  { %v8332_v39 = vld [vmem:[#allocation5 + $0x8b0] sm:$0xf0]  ;;  %v10927_v11 = vld [vmem:[#allocation5 + $0x3b4] sm:$0xf0] }
 0x174   :  { %v11146_v16 = vld [vmem:[#allocation5 + $0xa94] sm:$0xf]  ;;  %v8335_v27 = vor.u32 %v11082_v13, %v8332_v39  ;;  %2939 = vmatpush.bf16.msra.mxu1 %v8079_v25  ;;  %v7954_v12 = vld [vmem:[#allocation5 + $0x598] sm:$0xf] }
 0x175   :  { %v8588_v17 = vld [vmem:[#allocation5 + $0xab0] sm:$0xf0]  ;;  %v10991_v13 = vld [vmem:[#allocation5 + $0x5b4] sm:$0xf0] }
 0x176   :  { %v10946_v28 = vld [vmem:[#allocation5 + $0x454] sm:$0xf]  ;;  %v8591_v32 = vor.u32 %v11146_v16, %v8588_v17  ;;  %2952 = vmatpush.bf16.msra.mxu2 %v8335_v27  ;;  %v8210_v39 = vld [vmem:[#allocation5 + $0x798] sm:$0xf]  ;;  %v7699_v16 = vor.u32 %v10927_v11, %v7698_v10  ;;  %v7955_v17 = vor.u32 %v10991_v13, %v7954_v12 }
 0x177   :  { %v7788_v29 = vld [vmem:[#allocation5 + $0x470] sm:$0xf0]  ;;  %v7410_v21 = vld [vmem:[#allocation5 + $0x158] sm:$0xf]  ;;  %v8211_v27 = vor.u32 %v11055_v14, %v8210_v39 }
 0x178   :  { %v11010_v30 = vld [vmem:[#allocation5 + $0x654] sm:$0xf]  ;;  %v7791_v41 = vor.u32 %v10946_v28, %v7788_v29  ;;  %2965 = vmatpush.bf16.msra.mxu3 %v8591_v32  ;;  %v7666_v25 = vld [vmem:[#allocation5 + $0x358] sm:$0xf] }
 0x179   :  { %v8044_v33 = vld [vmem:[#allocation5 + $0x670] sm:$0xf0]  ;;  %v10919_v28 = vld [vmem:[#allocation5 + $0x374] sm:$0xf0] }
 0x17a   :  { %v11074_v34 = vld [vmem:[#allocation5 + $0x854] sm:$0xf]  ;;  %v8047_v44 = vor.u32 %v11010_v30, %v8044_v33  ;;  %2927 = vmatpush.bf16.msra.mxu0 %v7791_v41  ;;  %v7922_v29 = vld [vmem:[#allocation5 + $0x558] sm:$0xf]  ;;  %v7411_v33 = vor.u32 %v10855_v24, %v7410_v21  ;;  %v2748_v12 = vpop.f32.mrf.mxu2 }
 0x17b   :  { %v8300_v36 = vld [vmem:[#allocation5 + $0x870] sm:$0xf0]  ;;  %v10983_v30 = vld [vmem:[#allocation5 + $0x574] sm:$0xf0] }
 0x17c   :  { %v11138_v37 = vld [vmem:[#allocation5 + $0xa54] sm:$0xf]  ;;  %v8303_v45 = vor.u32 %v11074_v34, %v8300_v36  ;;  %2940 = vmatpush.bf16.msra.mxu1 %v8047_v44  ;;  %v11047_v32 = vld [vmem:[#allocation5 + $0x774] sm:$0xf0]  ;;  %v7667_v34 = vor.u32 %v10919_v28, %v7666_v25  ;;  %v7923_v36 = vor.u32 %v10983_v30, %v7922_v29 }
 0x17d   :  { %v8556_v40 = vld [vmem:[#allocation5 + $0xa70] sm:$0xf0]  ;;  %v7634_v41 = vld [vmem:[#allocation5 + $0x318] sm:$0xf] }
 0x17e   :  { %v10938_v42 = vld [vmem:[#allocation5 + $0x414] sm:$0xf]  ;;  %v8559_v50 = vor.u32 %v11138_v37, %v8556_v40  ;;  %2953 = vmatpush.bf16.msra.mxu2 %v8303_v45  ;;  %v7378_v37 = vld [vmem:[#allocation5 + $0x118] sm:$0xf] }
 0x17f   :  { %v7756_v43 = vld [vmem:[#allocation5 + $0x430] sm:$0xf0]  ;;  %v10847_v40 = vld [vmem:[#allocation5 + $0x134] sm:$0xf0] }
 0x180   :  { %v11002_v46 = vld [vmem:[#allocation5 + $0x614] sm:$0xf]  ;;  %v7759_v58 = vor.u32 %v10938_v42, %v7756_v43  ;;  %2966 = vmatpush.bf16.msra.mxu3 %v8559_v50  ;;  %v8179_v42 = vor.u32 %v11047_v32, %v8178_v31  ;;  %v10911_v43 = vld [vmem:[#allocation5 + $0x334] sm:$0xf0]  ;;  %v7379_v49 = vor.u32 %v10847_v40, %v7378_v37 }
 0x181   :  { %v8012_v47 = vld [vmem:[#allocation5 + $0x630] sm:$0xf0]  ;;  %v7890_v44 = vld [vmem:[#allocation5 + $0x518] sm:$0xf] }
 0x182   :  { %v11066_v48 = vld [vmem:[#allocation5 + $0x814] sm:$0xf]  ;;  %v8015_v61 = vor.u32 %v11002_v46, %v8012_v47  ;;  %2928 = vmatpush.bf16.msra.mxu0 %v7759_v58  ;;  %v10975_v45 = vld [vmem:[#allocation5 + $0x534] sm:$0xf0] }
 0x183   :  { %v8268_v51 = vld [vmem:[#allocation5 + $0x830] sm:$0xf0]  ;;  %v8146_v46 = vld [vmem:[#allocation5 + $0x718] sm:$0xf] }
 0x184   :  { %v11130_v52 = vld [vmem:[#allocation5 + $0xa14] sm:$0xf]  ;;  %v8271_v62 = vor.u32 %v11066_v48, %v8268_v51  ;;  %2941 = vmatpush.bf16.msra.mxu1 %v8015_v61  ;;  %v11039_v47 = vld [vmem:[#allocation5 + $0x734] sm:$0xf0]  ;;  %v2722_v48 = vpop.f32.mrf.mxu0  ;;  %v2735_v51 = vpop.f32.mrf.mxu1 }
 0x185   :  { %v8524_v53 = vld [vmem:[#allocation5 + $0xa30] sm:$0xf0]  ;;  %2929 = vmatmul.bf16.vlgmr.msra.gmra.mxu0 %v12066_v18  ;;  %v2723_v50 = vadd.f32 %v2722_v48, %v12125_v23  ;;  %v10839_v55 = vld [vmem:[#allocation5 + $0xf4] sm:$0xf0]  ;;  %v8147_v57 = vor.u32 %v11039_v47, %v8146_v46  ;;  %v551_v23 = vperm.slane %v12134_v63, 3 }
 0x186   :  { %v8527_v1 = vor.u32 %v11130_v52, %v8524_v53  ;;  %2954 = vmatpush.bf16.msra.mxu2 %v8271_v62  ;;  %2973 = vmatpush.bf16.msrb.mxu0 %v7475_v2  ;;  %v7635_v52 = vor.u32 %v10911_v43, %v7634_v41  ;;  %v7891_v53 = vor.u32 %v10975_v45, %v7890_v44  ;;  %v7602_v56 = vld [vmem:[#allocation5 + $0x2d8] sm:$0xf] }
 0x187   :  { %2942 = vmatmul.bf16.vlgmr.msra.gmra.mxu1 %v12070_v20  ;;  %v10903_v58 = vld [vmem:[#allocation5 + $0x2f4] sm:$0xf0]  ;;  %v12132_v60 = vadd.f32 %v2735_v51, %v2723_v50  ;;  %v7347_v0 = vor.u32 %v10839_v55, %v7346_v54  ;;  %v2749_v14 = vadd.f32 %v2748_v12, %v551_v23  ;;  %v10931_v23 = vld [vmem:[#allocation5 + $0x3dc] sm:$0xf] }
 0x188   :  { %2967 = vmatpush.bf16.msra.mxu3 %v8527_v1  ;;  %2986 = vmatpush.bf16.msrb.mxu1 %v7731_v4  ;;  %v7858_v59 = vld [vmem:[#allocation5 + $0x4d8] sm:$0xf]  ;;  %v7603_v1 = vor.u32 %v10903_v58, %v7602_v56  ;;  %v10859_v12 = vld [vmem:[#allocation5 + $0x19c] sm:$0xf] }
 0x189   :  { %2955 = vmatmul.bf16.vlgmr.msra.gmra.mxu2 %v12078_v35  ;;  %v10967_v7 = vld [vmem:[#allocation5 + $0x4f4] sm:$0xf0] }
 0x18a   :  { %2999 = vmatpush.bf16.msrb.mxu2 %v7987_v5  ;;  %2974 = vmatpush.bf16.msrb.mxu0 %v7443_v15  ;;  %v8114_v61 = vld [vmem:[#allocation5 + $0x6d8] sm:$0xf]  ;;  %v7859_v2 = vor.u32 %v10967_v7, %v7858_v59  ;;  %v2761_v15 = vpop.f32.mrf.mxu3  ;;  %v10867_v59 = vld [vmem:[#allocation5 + $0x1dc] sm:$0xf] }
 0x18b   :  { %2968 = vmatmul.bf16.vlgmr.msra.gmra.mxu3 %v12080_v38  ;;  %v11031_v62 = vld [vmem:[#allocation5 + $0x6f4] sm:$0xf0]  ;;  %v12137_v30 = vadd.f32 %v2761_v15, %v2749_v14  ;;  %v7476_v7 = vld [vmem:[#allocation5 + $0x1f8] sm:$0xf0] }
 0x18c   :  { %3012 = vmatpush.bf16.msrb.mxu3 %v8243_v3  ;;  %2987 = vmatpush.bf16.msrb.mxu1 %v7699_v16  ;;  %v7314_v4 = vld [vmem:[#allocation5 + $0x98] sm:$0xf]  ;;  %v8115_v9 = vor.u32 %v11031_v62, %v8114_v61  ;;  %v2724_v16 = vpop.f32.mrf.mxu0  ;;  %v2737_v21 = vpop.f32.mrf.mxu1  ;;  %v7700_v14 = vld [vmem:[#allocation5 + $0x3b8] sm:$0xf0] }
 0x18d   :  { %v10831_v5 = vld [vmem:[#allocation5 + $0xb4] sm:$0xf0] }
 0x18e   :  { %3000 = vmatpush.bf16.msrb.mxu2 %v7955_v17  ;;  %2975 = vmatpush.bf16.msrb.mxu0 %v7411_v33  ;;  %v7570_v8 = vld [vmem:[#allocation5 + $0x298] sm:$0xf]  ;;  %v7315_v17 = vor.u32 %v10831_v5, %v7314_v4  ;;  %v7479_v5 = vor.u32 %v10867_v59, %v7476_v7  ;;  %v10835_v7 = vld [vmem:[#allocation5 + $0xdc] sm:$0xf] }
 0x18f   :  { %v10895_v10 = vld [vmem:[#allocation5 + $0x2b4] sm:$0xf0] }
 0x190   :  { %3013 = vmatpush.bf16.msrb.mxu3 %v8211_v27  ;;  %2988 = vmatpush.bf16.msrb.mxu1 %v7667_v34  ;;  %v7826_v3 = vld [vmem:[#allocation5 + $0x498] sm:$0xf]  ;;  %v7571_v24 = vor.u32 %v10895_v10, %v7570_v8 }
 0x191   :  { %v10959_v11 = vld [vmem:[#allocation5 + $0x4b4] sm:$0xf0] }
 0x192   :  { %3001 = vmatpush.bf16.msrb.mxu2 %v7923_v36  ;;  %2976 = vmatpush.bf16.msrb.mxu0 %v7379_v49  ;;  %v8082_v13 = vld [vmem:[#allocation5 + $0x698] sm:$0xf]  ;;  %v7827_v25 = vor.u32 %v10959_v11, %v7826_v3  ;;  %v2763_v56 = vpop.f32.mrf.mxu3 }
 0x193   :  { %v11023_v39 = vld [vmem:[#allocation5 + $0x6b4] sm:$0xf0] }
 0x194   :  { %3014 = vmatpush.bf16.msrb.mxu3 %v8179_v42  ;;  %2989 = vmatpush.bf16.msrb.mxu1 %v7635_v52  ;;  %v7282_v27 = vld [vmem:[#allocation5 + $0x58] sm:$0xf]  ;;  %v8083_v31 = vor.u32 %v11023_v39, %v8082_v13  ;;  %v2750_v52 = vpop.f32.mrf.mxu2  ;;  %v7444_v13 = vld [vmem:[#allocation5 + $0x1b8] sm:$0xf0] }
 0x195   :  { %v10823_v28 = vld [vmem:[#allocation5 + $0x74] sm:$0xf0]  ;;  %v10923_v39 = vld [vmem:[#allocation5 + $0x39c] sm:$0xf] }
 0x196   :  { %3002 = vmatpush.bf16.msrb.mxu2 %v7891_v53  ;;  %2977 = vmatpush.bf16.msrb.mxu0 %v7347_v0  ;;  %v7538_v29 = vld [vmem:[#allocation5 + $0x258] sm:$0xf]  ;;  %v7283_v40 = vor.u32 %v10823_v28, %v7282_v27  ;;  %v7732_v0 = vld [vmem:[#allocation5 + $0x3f8] sm:$0xf0]  ;;  %v7703_v27 = vor.u32 %v10923_v39, %v7700_v14 }
 0x197   :  { %v10887_v32 = vld [vmem:[#allocation5 + $0x274] sm:$0xf0]  ;;  %v7735_v3 = vor.u32 %v10931_v23, %v7732_v0  ;;  %v7604_v23 = vld [vmem:[#allocation5 + $0x2f8] sm:$0xf0] }
 0x198   :  { %3015 = vmatpush.bf16.msrb.mxu3 %v8147_v57  ;;  %2990 = vmatpush.bf16.msrb.mxu1 %v7603_v1  ;;  %v7794_v33 = vld [vmem:[#allocation5 + $0x458] sm:$0xf]  ;;  %v7539_v43 = vor.u32 %v10887_v32, %v7538_v29  ;;  %v10851_v29 = vld [vmem:[#allocation5 + $0x15c] sm:$0xf] }
 0x199   :  { %v10951_v34 = vld [vmem:[#allocation5 + $0x474] sm:$0xf0]  ;;  %v10915_v32 = vld [vmem:[#allocation5 + $0x35c] sm:$0xf] }
 0x19a   :  { %3003 = vmatpush.bf16.msrb.mxu2 %v7859_v2  ;;  %v8050_v36 = vld [vmem:[#allocation5 + $0x658] sm:$0xf]  ;;  %2978 = vmatpush.bf16.msrb.mxu0 %v7315_v17  ;;  %v7795_v44 = vor.u32 %v10951_v34, %v7794_v33  ;;  %v7447_v17 = vor.u32 %v10859_v12, %v7444_v13  ;;  %v7668_v33 = vld [vmem:[#allocation5 + $0x378] sm:$0xf0] }
 0x19b   :  { %v11015_v37 = vld [vmem:[#allocation5 + $0x674] sm:$0xf0]  ;;  %v7316_v12 = vld [vmem:[#allocation5 + $0xb8] sm:$0xf0] }
 0x19c   :  { %3016 = vmatpush.bf16.msrb.mxu3 %v8115_v9  ;;  %v7250_v41 = vld [vmem:[#allocation5 + $0x18] sm:$0xf]  ;;  %2991 = vmatpush.bf16.msrb.mxu1 %v7571_v24  ;;  %v8051_v48 = vor.u32 %v11015_v37, %v8050_v36  ;;  %v10891_v14 = vld [vmem:[#allocation5 + $0x29c] sm:$0xf] }
 0x19d   :  { %v10815_v42 = vld [vmem:[#allocation5 + $0x34] sm:$0xf0] }
 0x19e   :  { %3004 = vmatpush.bf16.msrb.mxu2 %v7827_v25  ;;  %v7506_v45 = vld [vmem:[#allocation5 + $0x218] sm:$0xf]  ;;  %2979 = vmatpush.bf16.msrb.mxu0 %v7283_v40  ;;  %v7251_v57 = vor.u32 %v10815_v42, %v7250_v41 }
 0x19f   :  { %v10879_v46 = vld [vmem:[#allocation5 + $0x234] sm:$0xf0] }
 0x1a0   :  { %v7762_v47 = vld [vmem:[#allocation5 + $0x418] sm:$0xf]  ;;  %3017 = vmatpush.bf16.msrb.mxu3 %v8083_v31  ;;  %2992 = vmatpush.bf16.msrb.mxu1 %v7539_v43  ;;  %v7507_v61 = vor.u32 %v10879_v46, %v7506_v45  ;;  %v7412_v31 = vld [vmem:[#allocation5 + $0x178] sm:$0xf0]  ;;  %v7671_v43 = vor.u32 %v10915_v32, %v7668_v33 }
 0x1a1   :  { %v10943_v49 = vld [vmem:[#allocation5 + $0x434] sm:$0xf0]  ;;  %v7415_v37 = vor.u32 %v10851_v29, %v7412_v31  ;;  %v10843_v45 = vld [vmem:[#allocation5 + $0x11c] sm:$0xf] }
 0x1a2   :  { %v8018_v50 = vld [vmem:[#allocation5 + $0x618] sm:$0xf]  ;;  %3005 = vmatpush.bf16.msrb.mxu2 %v7795_v44  ;;  %v7763_v62 = vor.u32 %v10943_v49, %v7762_v47  ;;  %2980 = vmatpush.bf16.msrb.mxu0 %v7251_v57  ;;  %v7380_v46 = vld [vmem:[#allocation5 + $0x138] sm:$0xf0]  ;;  %v2787_v57 = vpop.f32.mrf.mxu1 }
 0x1a3   :  { %v11007_v51 = vld [vmem:[#allocation5 + $0x634] sm:$0xf0]  ;;  %v10907_v47 = vld [vmem:[#allocation5 + $0x31c] sm:$0xf]  ;;  %v7383_v52 = vor.u32 %v10843_v45, %v7380_v46  ;;  %v2813_v39 = vpop.f32.mrf.mxu3 }
 0x1a4   :  { %v8498_v53 = vld [vmem:[#allocation5 + $0x9d8] sm:$0xf]  ;;  %3018 = vmatpush.bf16.msrb.mxu3 %v8051_v48  ;;  %v8019_v1 = vor.u32 %v11007_v51, %v8018_v50  ;;  %2993 = vmatpush.bf16.msrb.mxu1 %v7507_v61  ;;  %v7636_v48 = vld [vmem:[#allocation5 + $0x338] sm:$0xf0]  ;;  %v2774_v50 = vpop.f32.mrf.mxu0 }
 0x1a5   :  { %v11127_v54 = vld [vmem:[#allocation5 + $0x9f4] sm:$0xf0]  ;;  %2981 = vmatmul.bf16.vlgmr.msrb.gmra.mxu0 %v12068_v19  ;;  %v2775_v56 = vadd.f32 %v2774_v50, %v12137_v30  ;;  %v7348_v61 = vld [vmem:[#allocation5 + $0xf8] sm:$0xf0] }
 0x1a6   :  { %v8754_v55 = vld [vmem:[#allocation5 + $0xbd8] sm:$0xf]  ;;  %v8499_v2 = vor.u32 %v11127_v54, %v8498_v53  ;;  %3006 = vmatpush.bf16.msrb.mxu2 %v7763_v62  ;;  %v10899_v62 = vld [vmem:[#allocation5 + $0x2dc] sm:$0xf] }
 0x1a7   :  { %v11191_v58 = vld [vmem:[#allocation5 + $0xbf4] sm:$0xf0]  ;;  %2994 = vmatmul.bf16.vlgmr.msrb.gmra.mxu1 %v12072_v22  ;;  %v2788_v0 = vadd.f32 %v2787_v57, %v2775_v56  ;;  %v7607_v30 = vor.u32 %v10899_v62, %v7604_v23  ;;  %v7988_v56 = vld [vmem:[#allocation5 + $0x5f8] sm:$0xf0] }
 0x1a8   :  { %v8755_v4 = vor.u32 %v11191_v58, %v8754_v55  ;;  %v8466_v8 = vld [vmem:[#allocation5 + $0x998] sm:$0xf]  ;;  %3019 = vmatpush.bf16.msrb.mxu3 %v8019_v1  ;;  %3025 = vmatpush.bf16.msra.mxu0 %v8499_v2  ;;  %v7639_v58 = vor.u32 %v10907_v47, %v7636_v48  ;;  %v10811_v48 = vld [vmem:[#allocation5 + $0x1c] sm:$0xf] }
 0x1a9   :  { %v11119_v9 = vld [vmem:[#allocation5 + $0x9b4] sm:$0xf0]  ;;  %3007 = vmatmul.bf16.vlgmr.msrb.gmra.mxu2 %v12066_v18  ;;  %v11059_v57 = vld [vmem:[#allocation5 + $0x7dc] sm:$0xf] }
 0x1aa   :  { %v8722_v10 = vld [vmem:[#allocation5 + $0xb98] sm:$0xf]  ;;  %v8467_v15 = vor.u32 %v11119_v9, %v8466_v8  ;;  %3038 = vmatpush.bf16.msra.mxu1 %v8755_v4  ;;  %3051 = vmatpush.bf16.msra.mxu2 %v7479_v5  ;;  %v7351_v4 = vor.u32 %v10835_v7, %v7348_v61  ;;  %v2789_v31 = vpop.f32.mrf.mxu1  ;;  %v11123_v7 = vld [vmem:[#allocation5 + $0x9dc] sm:$0xf] }
 0x1ab   :  { %v11183_v11 = vld [vmem:[#allocation5 + $0xbb4] sm:$0xf0]  ;;  %3020 = vmatmul.bf16.vlgmr.msrb.gmra.mxu3 %v12070_v20  ;;  %v8500_v61 = vld [vmem:[#allocation5 + $0x9f8] sm:$0xf0] }
 0x1ac   :  { %v8723_v16 = vor.u32 %v11183_v11, %v8722_v10  ;;  %v8434_v21 = vld [vmem:[#allocation5 + $0x958] sm:$0xf]  ;;  %3064 = vmatpush.bf16.msra.mxu3 %v7735_v3  ;;  %3026 = vmatpush.bf16.msra.mxu0 %v8467_v15  ;;  %v2800_v10 = vpop.f32.mrf.mxu2  ;;  %v10827_v11 = vld [vmem:[#allocation5 + $0x9c] sm:$0xf] }
 0x1ad   :  { %v11111_v24 = vld [vmem:[#allocation5 + $0x974] sm:$0xf0]  ;;  %v2801_v13 = vadd.f32 %v2800_v10, %v2788_v0  ;;  %v7572_v15 = vld [vmem:[#allocation5 + $0x2b8] sm:$0xf0] }
 0x1ae   :  { %v8690_v25 = vld [vmem:[#allocation5 + $0xb58] sm:$0xf]  ;;  %v8435_v34 = vor.u32 %v11111_v24, %v8434_v21  ;;  %3039 = vmatpush.bf16.msra.mxu1 %v8723_v16  ;;  %3052 = vmatpush.bf16.msra.mxu2 %v7447_v17  ;;  %v2776_v21 = vpop.f32.mrf.mxu0  ;;  %v7575_v32 = vor.u32 %v10891_v14, %v7572_v15  ;;  %v11187_v0 = vld [vmem:[#allocation5 + $0xbdc] sm:$0xf] }
 0x1af   :  { %v11175_v28 = vld [vmem:[#allocation5 + $0xb74] sm:$0xf0]  ;;  %v12144_v17 = vadd.f32 %v2813_v39, %v2801_v13  ;;  %v7956_v10 = vld [vmem:[#allocation5 + $0x5b8] sm:$0xf0] }
 0x1b0   :  { %v8691_v36 = vor.u32 %v11175_v28, %v8690_v25  ;;  %v8402_v40 = vld [vmem:[#allocation5 + $0x918] sm:$0xf]  ;;  %3065 = vmatpush.bf16.msra.mxu3 %v7703_v27  ;;  %3027 = vmatpush.bf16.msra.mxu0 %v8435_v34  ;;  %v7319_v25 = vor.u32 %v10827_v11, %v7316_v12  ;;  %v10819_v34 = vld [vmem:[#allocation5 + $0x5c] sm:$0xf] }
 0x1b1   :  { %v11103_v41 = vld [vmem:[#allocation5 + $0x934] sm:$0xf0]  ;;  %v8212_v11 = vld [vmem:[#allocation5 + $0x7b8] sm:$0xf0] }
 0x1b2   :  { %v8658_v42 = vld [vmem:[#allocation5 + $0xb18] sm:$0xf]  ;;  %v8403_v49 = vor.u32 %v11103_v41, %v8402_v40  ;;  %3040 = vmatpush.bf16.msra.mxu1 %v8691_v36  ;;  %3053 = vmatpush.bf16.msra.mxu2 %v7415_v37  ;;  %v7284_v36 = vld [vmem:[#allocation5 + $0x78] sm:$0xf0] }
 0x1b3   :  { %v11167_v44 = vld [vmem:[#allocation5 + $0xb34] sm:$0xf0]  ;;  %v10883_v37 = vld [vmem:[#allocation5 + $0x25c] sm:$0xf]  ;;  %v7287_v45 = vor.u32 %v10819_v34, %v7284_v36 }
 0x1b4   :  { %v8659_v51 = vor.u32 %v11167_v44, %v8658_v42  ;;  %v8370_v53 = vld [vmem:[#allocation5 + $0x8d8] sm:$0xf]  ;;  %3066 = vmatpush.bf16.msra.mxu3 %v7671_v43  ;;  %3028 = vmatpush.bf16.msra.mxu0 %v8403_v49  ;;  %v7540_v40 = vld [vmem:[#allocation5 + $0x278] sm:$0xf0]  ;;  %v2802_v49 = vpop.f32.mrf.mxu2 }
 0x1b5   :  { %v11095_v54 = vld [vmem:[#allocation5 + $0x8f4] sm:$0xf0]  ;;  %v7543_v50 = vor.u32 %v10883_v37, %v7540_v40  ;;  %v11115_v12 = vld [vmem:[#allocation5 + $0x99c] sm:$0xf] }
 0x1b6   :  { %v8626_v55 = vld [vmem:[#allocation5 + $0xad8] sm:$0xf]  ;;  %v8371_v1 = vor.u32 %v11095_v54, %v8370_v53  ;;  %3041 = vmatpush.bf16.msra.mxu1 %v8659_v51  ;;  %3054 = vmatpush.bf16.msra.mxu2 %v7383_v52  ;;  %v7252_v51 = vld [vmem:[#allocation5 + $0x38] sm:$0xf0]  ;;  %v2815_v54 = vpop.f32.mrf.mxu3 }
 0x1b7   :  { %v11159_v59 = vld [vmem:[#allocation5 + $0xaf4] sm:$0xf0]  ;;  %v10875_v52 = vld [vmem:[#allocation5 + $0x21c] sm:$0xf]  ;;  %v7255_v23 = vor.u32 %v10811_v48, %v7252_v51 }
 0x1b8   :  { %v8627_v2 = vor.u32 %v11159_v59, %v8626_v55  ;;  %v8338_v5 = vld [vmem:[#allocation5 + $0x898] sm:$0xf]  ;;  %3067 = vmatpush.bf16.msra.mxu3 %v7639_v58  ;;  %3029 = vmatpush.bf16.msra.mxu0 %v8371_v1  ;;  %v7508_v53 = vld [vmem:[#allocation5 + $0x238] sm:$0xf0] }
 0x1b9   :  { %v11087_v8 = vld [vmem:[#allocation5 + $0x8b4] sm:$0xf0]  ;;  %v10995_v55 = vld [vmem:[#allocation5 + $0x5dc] sm:$0xf] }
 0x1ba   :  { %v8594_v9 = vld [vmem:[#allocation5 + $0xa98] sm:$0xf]  ;;  %v8339_v16 = vor.u32 %v11087_v8, %v8338_v5  ;;  %3042 = vmatpush.bf16.msra.mxu1 %v8627_v2  ;;  %3055 = vmatpush.bf16.msra.mxu2 %v7351_v4  ;;  %v8244_v59 = vld [vmem:[#allocation5 + $0x7f8] sm:$0xf0]  ;;  %v7511_v2 = vor.u32 %v10875_v52, %v7508_v53  ;;  %v7991_v4 = vor.u32 %v10995_v55, %v7988_v56  ;;  %v12152_v55 = vpop.f32.mrf.mxu1 }
 0x1bb   :  { %v11151_v3 = vld [vmem:[#allocation5 + $0xab4] sm:$0xf0]  ;;  %v8756_v1 = vld [vmem:[#allocation5 + $0xbf8] sm:$0xf0]  ;;  %v8247_v5 = vor.u32 %v11059_v57, %v8244_v59  ;;  %v8503_v8 = vor.u32 %v11123_v7, %v8500_v61 }
 0x1bc   :  { %v8595_v24 = vor.u32 %v11151_v3, %v8594_v9  ;;  %v8306_v27 = vld [vmem:[#allocation5 + $0x858] sm:$0xf]  ;;  %3068 = vmatpush.bf16.msra.mxu3 %v7607_v30  ;;  %3030 = vmatpush.bf16.msra.mxu0 %v8339_v16  ;;  %v10987_v9 = vld [vmem:[#allocation5 + $0x59c] sm:$0xf]  ;;  %v8759_v3 = vor.u32 %v11187_v0, %v8756_v1 }
 0x1bd   :  { %v11079_v28 = vld [vmem:[#allocation5 + $0x874] sm:$0xf0]  ;;  %v11051_v30 = vld [vmem:[#allocation5 + $0x79c] sm:$0xf]  ;;  %v7959_v15 = vor.u32 %v10987_v9, %v7956_v10 }
 0x1be   :  { %v8562_v29 = vld [vmem:[#allocation5 + $0xa58] sm:$0xf]  ;;  %v8307_v41 = vor.u32 %v11079_v28, %v8306_v27  ;;  %3043 = vmatpush.bf16.msra.mxu1 %v8595_v24  ;;  %3056 = vmatpush.bf16.msra.mxu2 %v7319_v25  ;;  %v8468_v13 = vld [vmem:[#allocation5 + $0x9b8] sm:$0xf0]  ;;  %v8215_v16 = vor.u32 %v11051_v30, %v8212_v11 }
 0x1bf   :  { %v11143_v33 = vld [vmem:[#allocation5 + $0xa74] sm:$0xf0]  ;;  %v11179_v39 = vld [vmem:[#allocation5 + $0xb9c] sm:$0xf]  ;;  %v8471_v21 = vor.u32 %v11115_v12, %v8468_v13 }
 0x1c0   :  { %v8274_v42 = vld [vmem:[#allocation5 + $0x818] sm:$0xf]  ;;  %v8563_v44 = vor.u32 %v11143_v33, %v8562_v29  ;;  %3069 = vmatpush.bf16.msra.mxu3 %v7575_v32  ;;  %3031 = vmatpush.bf16.msra.mxu0 %v8307_v41  ;;  %v8724_v14 = vld [vmem:[#allocation5 + $0xbb8] sm:$0xf0] }
 0x1c1   :  { %v11071_v43 = vld [vmem:[#allocation5 + $0x834] sm:$0xf0]  ;;  %v10979_v24 = vld [vmem:[#allocation5 + $0x55c] sm:$0xf]  ;;  %v8727_v28 = vor.u32 %v11179_v39, %v8724_v14 }
 0x1c2   :  { %v8530_v46 = vld [vmem:[#allocation5 + $0xa18] sm:$0xf]  ;;  %v8275_v58 = vor.u32 %v11071_v43, %v8274_v42  ;;  %3044 = vmatpush.bf16.msra.mxu1 %v8563_v44  ;;  %3057 = vmatpush.bf16.msra.mxu2 %v7287_v45  ;;  %v7924_v25 = vld [vmem:[#allocation5 + $0x578] sm:$0xf0] }
 0x1c3   :  { %v11135_v47 = vld [vmem:[#allocation5 + $0xa34] sm:$0xf0]  ;;  %v11043_v27 = vld [vmem:[#allocation5 + $0x75c] sm:$0xf]  ;;  %v7927_v36 = vor.u32 %v10979_v24, %v7924_v25  ;;  %v2841_v25 = vpop.f32.mrf.mxu1 }
 0x1c4   :  { %v8531_v62 = vor.u32 %v11135_v47, %v8530_v46  ;;  %3070 = vmatpush.bf16.msra.mxu3 %v7543_v50  ;;  %3032 = vmatpush.bf16.msra.mxu0 %v8275_v58  ;;  %v8180_v29 = vld [vmem:[#allocation5 + $0x778] sm:$0xf0]  ;;  %v12150_v50 = vpop.f32.mrf.mxu0 }
 0x1c5   :  { %v11107_v31 = vld [vmem:[#allocation5 + $0x95c] sm:$0xf]  ;;  %v8183_v37 = vor.u32 %v11043_v27, %v8180_v29 }
 0x1c6   :  { %3045 = vmatpush.bf16.msra.mxu1 %v8531_v62  ;;  %3058 = vmatpush.bf16.msra.mxu2 %v7255_v23  ;;  %v8436_v32 = vld [vmem:[#allocation5 + $0x978] sm:$0xf0] }
 0x1c7   :  { %3033 = vmatmul.bf16.vlgmr.msra.gmra.mxu0 %v12078_v35  ;;  %v11171_v33 = vld [vmem:[#allocation5 + $0xb5c] sm:$0xf]  ;;  %v8439_v40 = vor.u32 %v11107_v31, %v8436_v32 }
 0x1c8   :  { %3071 = vmatpush.bf16.msra.mxu3 %v7511_v2  ;;  %3077 = vmatpush.bf16.msrb.mxu0 %v7991_v4  ;;  %v8692_v34 = vld [vmem:[#allocation5 + $0xb78] sm:$0xf0] }
 0x1c9   :  { %3046 = vmatmul.bf16.vlgmr.msra.gmra.mxu1 %v12080_v38  ;;  %3059 = vmatmul.bf16.vlgmr.msra.gmra.mxu2 %v12068_v19  ;;  %v10971_v41 = vld [vmem:[#allocation5 + $0x51c] sm:$0xf]  ;;  %v8695_v44 = vor.u32 %v11171_v33, %v8692_v34 }
 0x1ca   :  { %3090 = vmatpush.bf16.msrb.mxu1 %v8247_v5  ;;  %3103 = vmatpush.bf16.msrb.mxu2 %v8503_v8  ;;  %v7892_v42 = vld [vmem:[#allocation5 + $0x538] sm:$0xf0]  ;;  %v12154_v5 = vpop.f32.mrf.mxu2 }
 0x1cb   :  { %3072 = vmatmul.bf16.vlgmr.msra.gmra.mxu3 %v12072_v22  ;;  %v11035_v43 = vld [vmem:[#allocation5 + $0x71c] sm:$0xf]  ;;  %v7895_v49 = vor.u32 %v10971_v41, %v7892_v42 }
 0x1cc   :  { %3116 = vmatpush.bf16.msrb.mxu3 %v8759_v3  ;;  %3078 = vmatpush.bf16.msrb.mxu0 %v7959_v15  ;;  %v8148_v45 = vld [vmem:[#allocation5 + $0x738] sm:$0xf0]  ;;  %v12156_v3 = vpop.f32.mrf.mxu3  ;;  %v2828_v39 = vpop.f32.mrf.mxu0 }
 0x1cd   :  { %v11099_v46 = vld [vmem:[#allocation5 + $0x91c] sm:$0xf]  ;;  %v8151_v22 = vor.u32 %v11035_v43, %v8148_v45 }
 0x1ce   :  { %3091 = vmatpush.bf16.msrb.mxu1 %v8215_v16  ;;  %3104 = vmatpush.bf16.msrb.mxu2 %v8471_v21  ;;  %v8404_v47 = vld [vmem:[#allocation5 + $0x938] sm:$0xf0] }
 0x1cf   :  { %v11163_v48 = vld [vmem:[#allocation5 + $0xb1c] sm:$0xf]  ;;  %v8407_v51 = vor.u32 %v11099_v46, %v8404_v47 }
 0x1d0   :  { %3117 = vmatpush.bf16.msrb.mxu3 %v8727_v28  ;;  %v8660_v19 = vld [vmem:[#allocation5 + $0xb38] sm:$0xf0]  ;;  %3079 = vmatpush.bf16.msrb.mxu0 %v7927_v36 }
 0x1d1   :  { %v10963_v52 = vld [vmem:[#allocation5 + $0x4dc] sm:$0xf]  ;;  %v8663_v56 = vor.u32 %v11163_v48, %v8660_v19 }
 0x1d2   :  { %3092 = vmatpush.bf16.msrb.mxu1 %v8183_v37  ;;  %3105 = vmatpush.bf16.msrb.mxu2 %v8439_v40  ;;  %v7860_v53 = vld [vmem:[#allocation5 + $0x4f8] sm:$0xf0]  ;;  %v2854_v45 = vpop.f32.mrf.mxu2 }
 0x1d3   :  { %v11027_v54 = vld [vmem:[#allocation5 + $0x6dc] sm:$0xf]  ;;  %v7863_v62 = vor.u32 %v10963_v52, %v7860_v53  ;;  %v9242_v52 = vld [vmem:[#allocation11 + $0x3c0] sm:$0xf] }
 0x1d4   :  { %3118 = vmatpush.bf16.msrb.mxu3 %v8695_v44  ;;  %v8116_v57 = vld [vmem:[#allocation5 + $0x6f8] sm:$0xf0]  ;;  %3080 = vmatpush.bf16.msrb.mxu0 %v7895_v49  ;;  %v2867_v49 = vpop.f32.mrf.mxu3  ;;  %v11420_v45 = vld [vmem:[#allocation11 + $0x71c] sm:$0xf0] }
 0x1d5   :  { %v11091_v58 = vld [vmem:[#allocation5 + $0x8dc] sm:$0xf]  ;;  %v8119_v23 = vor.u32 %v11027_v54, %v8116_v57  ;;  %v11316_v54 = vld [vmem:[#allocation11 + $0x3dc] sm:$0xf0] }
 0x1d6   :  { %v8372_v59 = vld [vmem:[#allocation5 + $0x8f8] sm:$0xf0]  ;;  %3093 = vmatpush.bf16.msrb.mxu1 %v8151_v22  ;;  %3106 = vmatpush.bf16.msrb.mxu2 %v8407_v51  ;;  %v8986_v22 = vld [vmem:[#allocation11 + $0x1c0] sm:$0xf] }
 0x1d7   :  { %v11155_v7 = vld [vmem:[#allocation5 + $0xadc] sm:$0xf]  ;;  %v8375_v0 = vor.u32 %v11091_v58, %v8372_v59  ;;  %v11252_v51 = vld [vmem:[#allocation11 + $0x1dc] sm:$0xf0] }
 0x1d8   :  { %v8628_v61 = vld [vmem:[#allocation5 + $0xaf8] sm:$0xf0]  ;;  %3119 = vmatpush.bf16.msrb.mxu3 %v8663_v56  ;;  %3081 = vmatpush.bf16.msrb.mxu0 %v7863_v62  ;;  %v9498_v56 = vld [vmem:[#allocation11 + $0x5c0] sm:$0xf] }
 0x1d9   :  { %v10955_v1 = vld [vmem:[#allocation5 + $0x49c] sm:$0xf]  ;;  %v8631_v8 = vor.u32 %v11155_v7, %v8628_v61  ;;  %v11380_v57 = vld [vmem:[#allocation11 + $0x5dc] sm:$0xf0] }
 0x1da   :  { %v7828_v2 = vld [vmem:[#allocation5 + $0x4b8] sm:$0xf0]  ;;  %3094 = vmatpush.bf16.msrb.mxu1 %v8119_v23  ;;  %3107 = vmatpush.bf16.msrb.mxu2 %v8375_v0  ;;  %v9754_v7 = vld [vmem:[#allocation11 + $0x7c0] sm:$0xf]  ;;  %v8987_v23 = vor.u32 %v11252_v51, %v8986_v22  ;;  %v9243_v0 = vor.u32 %v11316_v54, %v9242_v52 }
 0x1db   :  { %v11019_v4 = vld [vmem:[#allocation5 + $0x69c] sm:$0xf]  ;;  %v7831_v13 = vor.u32 %v10955_v1, %v7828_v2  ;;  %v11444_v61 = vld [vmem:[#allocation11 + $0x7dc] sm:$0xf0]  ;;  %v9499_v1 = vor.u32 %v11380_v57, %v9498_v56 }
 0x1dc   :  { %v8084_v9 = vld [vmem:[#allocation5 + $0x6b8] sm:$0xf0]  ;;  %3120 = vmatpush.bf16.msrb.mxu3 %v8631_v8  ;;  %v8954_v2 = vld [vmem:[#allocation11 + $0x180] sm:$0xf]  ;;  %v12169_v49 = vpop.f32.mrf.mxu1 }
 0x1dd   :  { %v11083_v10 = vld [vmem:[#allocation5 + $0x89c] sm:$0xf]  ;;  %v8087_v14 = vor.u32 %v11019_v4, %v8084_v9  ;;  %3082 = vmatpush.bf16.msrb.mxu0 %v7831_v13  ;;  %v11244_v4 = vld [vmem:[#allocation11 + $0x19c] sm:$0xf0]  ;;  %v9755_v9 = vor.u32 %v11444_v61, %v9754_v7 }
 0x1de   :  { %v8340_v30 = vld [vmem:[#allocation5 + $0x8b8] sm:$0xf0]  ;;  %v9210_v8 = vld [vmem:[#allocation11 + $0x380] sm:$0xf]  ;;  %v8955_v39 = vor.u32 %v11244_v4, %v8954_v2 }
 0x1df   :  { %v11147_v11 = vld [vmem:[#allocation5 + $0xa9c] sm:$0xf]  ;;  %v8343_v15 = vor.u32 %v11083_v10, %v8340_v30  ;;  %3095 = vmatpush.bf16.msrb.mxu1 %v8087_v14  ;;  %v11308_v10 = vld [vmem:[#allocation11 + $0x39c] sm:$0xf0] }
 0x1e0   :  { %v8596_v12 = vld [vmem:[#allocation5 + $0xab8] sm:$0xf0]  ;;  %v9466_v30 = vld [vmem:[#allocation11 + $0x580] sm:$0xf]  ;;  %v9211_v14 = vor.u32 %v11308_v10, %v9210_v8 }
 0x1e1   :  { %v10947_v16 = vld [vmem:[#allocation5 + $0x45c] sm:$0xf]  ;;  %v8599_v27 = vor.u32 %v11147_v11, %v8596_v12  ;;  %3108 = vmatpush.bf16.msrb.mxu2 %v8343_v15  ;;  %v11372_v11 = vld [vmem:[#allocation11 + $0x59c] sm:$0xf0] }
 0x1e2   :  { %v7796_v21 = vld [vmem:[#allocation5 + $0x478] sm:$0xf0]  ;;  %v9722_v12 = vld [vmem:[#allocation11 + $0x780] sm:$0xf]  ;;  %v9467_v15 = vor.u32 %v11372_v11, %v9466_v30 }
 0x1e3   :  { %v11011_v24 = vld [vmem:[#allocation5 + $0x65c] sm:$0xf]  ;;  %v7799_v34 = vor.u32 %v10947_v16, %v7796_v21  ;;  %3121 = vmatpush.bf16.msrb.mxu3 %v8599_v27  ;;  %v11436_v13 = vld [vmem:[#allocation11 + $0x79c] sm:$0xf0] }
 0x1e4   :  { %v8052_v28 = vld [vmem:[#allocation5 + $0x678] sm:$0xf0]  ;;  %v8922_v16 = vld [vmem:[#allocation11 + $0x140] sm:$0xf]  ;;  %v9723_v25 = vor.u32 %v11436_v13, %v9722_v12 }
 0x1e5   :  { %v11075_v29 = vld [vmem:[#allocation5 + $0x85c] sm:$0xf]  ;;  %v8055_v40 = vor.u32 %v11011_v24, %v8052_v28  ;;  %3083 = vmatpush.bf16.msrb.mxu0 %v7799_v34  ;;  %v11236_v21 = vld [vmem:[#allocation11 + $0x15c] sm:$0xf0] }
 0x1e6   :  { %v8308_v31 = vld [vmem:[#allocation5 + $0x878] sm:$0xf0]  ;;  %v9178_v24 = vld [vmem:[#allocation11 + $0x340] sm:$0xf]  ;;  %v8923_v34 = vor.u32 %v11236_v21, %v8922_v16 }
 0x1e7   :  { %v11139_v32 = vld [vmem:[#allocation5 + $0xa5c] sm:$0xf]  ;;  %v8311_v41 = vor.u32 %v11075_v29, %v8308_v31  ;;  %3096 = vmatpush.bf16.msrb.mxu1 %v8055_v40  ;;  %v11300_v27 = vld [vmem:[#allocation11 + $0x35c] sm:$0xf0] }
 0x1e8   :  { %v8564_v33 = vld [vmem:[#allocation5 + $0xa78] sm:$0xf0]  ;;  %v9434_v28 = vld [vmem:[#allocation11 + $0x540] sm:$0xf] }
 0x1e9   :  { %v10939_v36 = vld [vmem:[#allocation5 + $0x41c] sm:$0xf]  ;;  %v8567_v46 = vor.u32 %v11139_v32, %v8564_v33  ;;  %3109 = vmatpush.bf16.msrb.mxu2 %v8311_v41  ;;  %v11364_v29 = vld [vmem:[#allocation11 + $0x55c] sm:$0xf0]  ;;  %v12161_v33 = vld [vmem:[#allocation8] sm:$0xff] }
 0x1ea   :  { %v7764_v37 = vld [vmem:[#allocation5 + $0x438] sm:$0xf0]  ;;  %v9690_v31 = vld [vmem:[#allocation11 + $0x740] sm:$0xf]  ;;  %v3141_v7 = vperm.slane %v12161_v33, 2  ;;  %v3142_v2 = vperm.slane %v12161_v33, 3 }
 0x1eb   :  { %v11003_v42 = vld [vmem:[#allocation5 + $0x61c] sm:$0xf]  ;;  %v7767_v53 = vor.u32 %v10939_v36, %v7764_v37  ;;  %3122 = vmatpush.bf16.msrb.mxu3 %v8567_v46  ;;  %v11428_v32 = vld [vmem:[#allocation11 + $0x75c] sm:$0xf0]  ;;  %v9179_v36 = vor.u32 %v11300_v27, %v9178_v24  ;;  %v12164_v46 = vpop.f32.mrf.mxu0  ;;  %v12182_v24 = vpop.f32.mrf.mxu3 }
 0x1ec   :  { %v8020_v43 = vld [vmem:[#allocation5 + $0x638] sm:$0xf0]  ;;  %v8890_v37 = vld [vmem:[#allocation11 + $0x100] sm:$0xf] }
 0x1ed   :  { %v11067_v44 = vld [vmem:[#allocation5 + $0x81c] sm:$0xf]  ;;  %v8023_v58 = vor.u32 %v11003_v42, %v8020_v43  ;;  %3084 = vmatpush.bf16.msrb.mxu0 %v7767_v53  ;;  %v11228_v40 = vld [vmem:[#allocation11 + $0x11c] sm:$0xf0]  ;;  %v9691_v42 = vor.u32 %v11428_v32, %v9690_v31  ;;  %v2893_v32 = vpop.f32.mrf.mxu1 }
 0x1ee   :  { %v8276_v47 = vld [vmem:[#allocation5 + $0x838] sm:$0xf0]  ;;  %v9146_v41 = vld [vmem:[#allocation11 + $0x300] sm:$0xf] }
 0x1ef   :  { %v11131_v48 = vld [vmem:[#allocation5 + $0xa1c] sm:$0xf]  ;;  %v8279_v59 = vor.u32 %v11067_v44, %v8276_v47  ;;  %3097 = vmatpush.bf16.msrb.mxu1 %v8023_v58  ;;  %v9402_v43 = vld [vmem:[#allocation11 + $0x500] sm:$0xf]  ;;  %v3139_v47 = vperm.slane %v12161_v33, 0 }
 0x1f0   :  { %v8532_v19 = vld [vmem:[#allocation5 + $0xa38] sm:$0xf0]  ;;  %3085 = vmatmul.bf16.vlgmr.msrb.gmra.mxu0 %v12066_v18  ;;  %v9435_v18 = vor.u32 %v11364_v29, %v9434_v28  ;;  %v9658_v44 = vld [vmem:[#allocation11 + $0x700] sm:$0xf] }
 0x1f1   :  { %v8535_v62 = vor.u32 %v11131_v48, %v8532_v19  ;;  %3110 = vmatpush.bf16.msrb.mxu2 %v8279_v59  ;;  %6295 = vmatpush.bf16.msra.mxu0 %v8987_v23  ;;  %v3140_v48 = vperm.slane %v12161_v33, 1  ;;  %v8891_v19 = vor.u32 %v11228_v40, %v8890_v37  ;;  %v8858_v52 = vld [vmem:[#allocation11 + $0xc0] sm:$0xf]  ;;  %v9659_v56 = vor.u32 %v11420_v45, %v9658_v44  ;;  %v12173_v23 = vld [vmem:[#allocation10] sm:$0xff] }
 0x1f2   :  { %3098 = vmatmul.bf16.vlgmr.msrb.gmra.mxu1 %v12070_v20  ;;  %v11292_v20 = vld [vmem:[#allocation11 + $0x31c] sm:$0xf0]  ;;  %v3130_v59 = vmax.f32 %v12118_v26, 0.0  ;;  %v3166_v27 = vperm.slane %v12173_v23, 1  ;;  %v3167_v28 = vperm.slane %v12173_v23, 2  ;;  %v3168_v29 = vperm.slane %v12173_v23, 3 }
 0x1f3   :  { %3123 = vmatpush.bf16.msrb.mxu3 %v8535_v62  ;;  %6308 = vmatpush.bf16.msra.mxu1 %v9243_v0  ;;  %v9147_v22 = vor.u32 %v11292_v20, %v9146_v41  ;;  %v11220_v53 = vld [vmem:[#allocation11 + $0xdc] sm:$0xf0]  ;;  %v3131_v0 = vmax.f32 %v12132_v60, 0.0 }
 0x1f4   :  { %3111 = vmatmul.bf16.vlgmr.msrb.gmra.mxu2 %v12078_v35  ;;  %v11356_v35 = vld [vmem:[#allocation11 + $0x51c] sm:$0xf0]  ;;  %v8859_v4 = vor.u32 %v11220_v53, %v8858_v52 }
 0x1f5   :  { %6321 = vmatpush.bf16.msra.mxu2 %v9499_v1  ;;  %6296 = vmatpush.bf16.msra.mxu0 %v8955_v39  ;;  %v9403_v51 = vor.u32 %v11356_v35, %v9402_v43  ;;  %v9114_v54 = vld [vmem:[#allocation11 + $0x2c0] sm:$0xf]  ;;  %v3132_v1 = vmax.f32 %v12144_v17, 0.0  ;;  %v3165_v17 = vperm.slane %v12173_v23, 0  ;;  %v3157_v41 = vmul.f32 %v3141_v7, %v3131_v0 }
 0x1f6   :  { %3124 = vmatmul.bf16.vlgmr.msrb.gmra.mxu3 %v12080_v38  ;;  %v3129_v38 = vmax.f32 %v12108_v6, 0.0  ;;  %v11284_v57 = vld [vmem:[#allocation11 + $0x2dc] sm:$0xf0] }
 0x1f7   :  { %6334 = vmatpush.bf16.msra.mxu3 %v9755_v9  ;;  %6309 = vmatpush.bf16.msra.mxu1 %v9211_v14  ;;  %v9370_v58 = vld [vmem:[#allocation11 + $0x4c0] sm:$0xf]  ;;  %v9115_v8 = vor.u32 %v11284_v57, %v9114_v54  ;;  %v12178_v14 = vpop.f32.mrf.mxu2 }
 0x1f8   :  { %v11348_v6 = vld [vmem:[#allocation11 + $0x4dc] sm:$0xf0]  ;;  %v3155_v60 = vmul.f32 %v3139_v47, %v3129_v38 }
 0x1f9   :  { %6322 = vmatpush.bf16.msra.mxu2 %v9467_v15  ;;  %6297 = vmatpush.bf16.msra.mxu0 %v8923_v34  ;;  %v9626_v61 = vld [vmem:[#allocation11 + $0x6c0] sm:$0xf]  ;;  %v9371_v9 = vor.u32 %v11348_v6, %v9370_v58  ;;  %v552_v15 = vperm.slane %v12134_v63, 4  ;;  %v3156_v34 = vmul.f32 %v3140_v48, %v3130_v59  ;;  %v3183_v58 = vadd.f32 %v3167_v28, %v3157_v41 }
 0x1fa   :  { %v11412_v62 = vld [vmem:[#allocation11 + $0x6dc] sm:$0xf0] }
 0x1fb   :  { %6335 = vmatpush.bf16.msra.mxu3 %v9723_v25  ;;  %6310 = vmatpush.bf16.msra.mxu1 %v9179_v36  ;;  %v8826_v10 = vld [vmem:[#allocation11 + $0x80] sm:$0xf]  ;;  %v9627_v11 = vor.u32 %v11412_v62, %v9626_v61  ;;  %v2880_v25 = vpop.f32.mrf.mxu0  ;;  %v2827_v45 = vadd.f32 %v12150_v50, %v552_v15 }
 0x1fc   :  { %v11212_v26 = vld [vmem:[#allocation11 + $0x9c] sm:$0xf0] }
 0x1fd   :  { %6323 = vmatpush.bf16.msra.mxu2 %v9435_v18  ;;  %6298 = vmatpush.bf16.msra.mxu0 %v8891_v19  ;;  %v9082_v30 = vld [vmem:[#allocation11 + $0x280] sm:$0xf]  ;;  %v8827_v31 = vor.u32 %v11212_v26, %v8826_v10  ;;  %v3181_v19 = vadd.f32 %v3165_v17, %v3155_v60  ;;  %v2840_v0 = vadd.f32 %v12152_v55, %v2827_v45 }
 0x1fe   :  { %v11276_v12 = vld [vmem:[#allocation11 + $0x29c] sm:$0xf0] }
 0x1ff   :  { %6336 = vmatpush.bf16.msra.mxu3 %v9691_v42  ;;  %6311 = vmatpush.bf16.msra.mxu1 %v9147_v22  ;;  %v9338_v13 = vld [vmem:[#allocation11 + $0x480] sm:$0xf]  ;;  %v9083_v36 = vor.u32 %v11276_v12, %v9082_v30  ;;  %v3158_v42 = vmul.f32 %v3142_v2, %v3132_v1  ;;  %v2906_v62 = vpop.f32.mrf.mxu2  ;;  %v3189_v30 = vmax.f32 %v3181_v19, 0.0 }
 0x200   :  { %v11340_v39 = vld [vmem:[#allocation11 + $0x49c] sm:$0xf0] }
 0x201   :  { %6324 = vmatpush.bf16.msra.mxu2 %v9403_v51  ;;  %v9594_v16 = vld [vmem:[#allocation11 + $0x680] sm:$0xf]  ;;  %6299 = vmatpush.bf16.msra.mxu0 %v8859_v4  ;;  %v9339_v18 = vor.u32 %v11340_v39, %v9338_v13  ;;  %v3182_v51 = vadd.f32 %v3166_v27, %v3156_v34  ;;  %v3184_v6 = vadd.f32 %v3168_v29, %v3158_v42  ;;  %v3191_v39 = vmax.f32 %v3183_v58, 0.0  ;;  %v12190_v27 = vld [vmem:[#allocation7] sm:$0xff] }
 0x202   :  { %v11404_v21 = vld [vmem:[#allocation11 + $0x69c] sm:$0xf0]  ;;  %v553_v28 = vperm.slane %v12190_v27, 5 }
 0x203   :  { %6337 = vmatpush.bf16.msra.mxu3 %v9659_v56  ;;  %6312 = vmatpush.bf16.msra.mxu1 %v9115_v8  ;;  %v8794_v63 = vld [vmem:[#allocation11 + $0x40] sm:$0xf]  ;;  %v9595_v20 = vor.u32 %v11404_v21, %v9594_v16  ;;  %v2919_v8 = vpop.f32.mrf.mxu3  ;;  %v3192_v60 = vmax.f32 %v3184_v6, 0.0  ;;  %v2853_v21 = vadd.f32 %v12154_v5, %v2840_v0 }
 0x204   :  { %v11204_v37 = vld [vmem:[#allocation11 + $0x5c] sm:$0xf0]  ;;  %v2943_v0 = vpop.f32.mrf.mxu1 }
 0x205   :  { %6325 = vmatpush.bf16.msra.mxu2 %v9371_v9  ;;  %v9050_v40 = vld [vmem:[#allocation11 + $0x240] sm:$0xf]  ;;  %6300 = vmatpush.bf16.msra.mxu0 %v8827_v31  ;;  %v8795_v48 = vor.u32 %v11204_v37, %v8794_v63  ;;  %v12197_v37 = vpack.c.bf16 %v3191_v39, %v3191_v39  ;;  %v12199_v5 = vpack.c.bf16 %v3192_v60, %v3192_v60 }
 0x206   :  { %v11268_v43 = vld [vmem:[#allocation11 + $0x25c] sm:$0xf0] }
 0x207   :  { %6338 = vmatpush.bf16.msra.mxu3 %v9627_v11  ;;  %v9306_v35 = vld [vmem:[#allocation11 + $0x440] sm:$0xf]  ;;  %6313 = vmatpush.bf16.msra.mxu1 %v9083_v36  ;;  %v9051_v52 = vor.u32 %v11268_v43, %v9050_v40  ;;  %v3190_v11 = vmax.f32 %v3182_v51, 0.0  ;;  %v12193_v36 = vpack.c.bf16 %v3189_v30, %v3189_v30  ;;  %v2905_v43 = vadd.f32 %v12178_v14, %v553_v28 }
 0x208   :  { %v11332_v44 = vld [vmem:[#allocation11 + $0x45c] sm:$0xf0]  ;;  %v3144_v28 = vperm.slane %v12161_v33, 5 }
 0x209   :  { %v9562_v38 = vld [vmem:[#allocation11 + $0x640] sm:$0xf]  ;;  %6326 = vmatpush.bf16.msra.mxu2 %v9339_v18  ;;  %v9307_v53 = vor.u32 %v11332_v44, %v9306_v35  ;;  %6301 = vmatpush.bf16.msra.mxu0 %v8795_v48  ;;  %v12195_v18 = vpack.c.bf16 %v3190_v11, %v3190_v11  ;;  %v2918_v51 = vadd.f32 %v12182_v24, %v2905_v43 }
 0x20a   :  { %v11396_v47 = vld [vmem:[#allocation11 + $0x65c] sm:$0xf0] }
 0x20b   :  { %v8762_v22 = vld [vmem:[#allocation11] sm:$0xf]  ;;  %6339 = vmatpush.bf16.msra.mxu3 %v9595_v20  ;;  %v9563_v59 = vor.u32 %v11396_v47, %v9562_v38  ;;  %6314 = vmatpush.bf16.msra.mxu1 %v9051_v52  ;;  %v2866_v20 = vadd.f32 %v12156_v3, %v2853_v21 }
 0x20c   :  { %v11196_v54 = vld [vmem:[#allocation11 + $0x1c] sm:$0xf0]  ;;  %v2945_v43 = vpop.f32.mrf.mxu1 }
 0x20d   :  { %v9018_v56 = vld [vmem:[#allocation11 + $0x200] sm:$0xf]  ;;  %v8763_v9 = vor.u32 %v11196_v54, %v8762_v22  ;;  %6327 = vmatpush.bf16.msra.mxu2 %v9307_v53  ;;  %v2879_v14 = vadd.f32 %v12164_v46, %v2866_v20 }
 0x20e   :  { %v11260_v57 = vld [vmem:[#allocation11 + $0x21c] sm:$0xf0] }
 0x20f   :  { %v9274_v7 = vld [vmem:[#allocation11 + $0x400] sm:$0xf]  ;;  %v9019_v12 = vor.u32 %v11260_v57, %v9018_v56  ;;  %6340 = vmatpush.bf16.msra.mxu3 %v9563_v59  ;;  %6302 = vmatpush.bf16.msra.mxu0 %v8763_v9  ;;  %v2930_v59 = vpop.f32.mrf.mxu0 }
 0x210   :  { %v11324_v50 = vld [vmem:[#allocation11 + $0x41c] sm:$0xf0]  ;;  %v2931_v46 = vadd.f32 %v2930_v59, %v2918_v51  ;;  %v8988_v59 = vld [vmem:[#allocation11 + $0x1e0] sm:$0xf0] }
 0x211   :  { %v9530_v61 = vld [vmem:[#allocation11 + $0x600] sm:$0xf]  ;;  %v9275_v13 = vor.u32 %v11324_v50, %v9274_v7  ;;  %6315 = vmatpush.bf16.msra.mxu1 %v9019_v12  ;;  %v3143_v12 = vperm.slane %v12161_v33, 4 }
 0x212   :  { %v11388_v1 = vld [vmem:[#allocation11 + $0x61c] sm:$0xf0]  ;;  %6303 = vmatmul.bf16.vlgmr.msra.gmra.mxu0 %v12193_v36  ;;  %v2944_v8 = vadd.f32 %v2943_v0, %v2931_v46 }
 0x213   :  { %v10010_v2 = vld [vmem:[#allocation11 + $0x9c0] sm:$0xf]  ;;  %v9531_v17 = vor.u32 %v11388_v1, %v9530_v61  ;;  %6328 = vmatpush.bf16.msra.mxu2 %v9275_v13  ;;  %v2892_v61 = vadd.f32 %v12169_v49, %v2879_v14  ;;  %v2956_v13 = vpop.f32.mrf.mxu2 }
 0x214   :  { %v11508_v4 = vld [vmem:[#allocation11 + $0x9dc] sm:$0xf0]  ;;  %6316 = vmatmul.bf16.vlgmr.msra.gmra.mxu1 %v12195_v18 }
 0x215   :  { %v10266_v10 = vld [vmem:[#allocation11 + $0xbc0] sm:$0xf]  ;;  %v10011_v15 = vor.u32 %v11508_v4, %v10010_v2  ;;  %6341 = vmatpush.bf16.msra.mxu3 %v9531_v17  ;;  %v3133_v11 = vmax.f32 %v2892_v61, 0.0  ;;  %v2957_v17 = vadd.f32 %v2956_v13, %v2944_v8  ;;  %v9244_v61 = vld [vmem:[#allocation11 + $0x3e0] sm:$0xf0] }
 0x216   :  { %v11572_v26 = vld [vmem:[#allocation11 + $0xbdc] sm:$0xf0]  ;;  %6329 = vmatmul.bf16.vlgmr.msra.gmra.mxu2 %v12197_v37 }
 0x217   :  { %v10522_v55 = vld [vmem:[#allocation11 + $0xdc0] sm:$0xf]  ;;  %v10267_v25 = vor.u32 %v11572_v26, %v10266_v10  ;;  %6347 = vmatpush.bf16.msrb.mxu0 %v10011_v15  ;;  %v2969_v15 = vpop.f32.mrf.mxu3 }
 0x218   :  { %v11636_v16 = vld [vmem:[#allocation11 + $0xddc] sm:$0xf0]  ;;  %6342 = vmatmul.bf16.vlgmr.msra.gmra.mxu3 %v12199_v5 }
 0x219   :  { %v9978_v29 = vld [vmem:[#allocation11 + $0x980] sm:$0xf]  ;;  %v10523_v63 = vor.u32 %v11636_v16, %v10522_v55  ;;  %6360 = vmatpush.bf16.msrb.mxu1 %v10267_v25  ;;  %v2970_v25 = vadd.f32 %v2969_v15, %v2957_v17 }
 0x21a   :  { %v11500_v31 = vld [vmem:[#allocation11 + $0x99c] sm:$0xf0] }
 0x21b   :  { %v10234_v32 = vld [vmem:[#allocation11 + $0xb80] sm:$0xf]  ;;  %v9979_v40 = vor.u32 %v11500_v31, %v9978_v29  ;;  %6373 = vmatpush.bf16.msrb.mxu2 %v10523_v63  ;;  %v2932_v31 = vpop.f32.mrf.mxu0  ;;  %v3159_v63 = vmul.f32 %v3143_v12, %v3133_v11  ;;  %v8956_v11 = vld [vmem:[#allocation11 + $0x1a0] sm:$0xf0] }
 0x21c   :  { %v11564_v34 = vld [vmem:[#allocation11 + $0xb9c] sm:$0xf0]  ;;  %v11304_v12 = vld [vmem:[#allocation11 + $0x384] sm:$0xf] }
 0x21d   :  { %v10490_v41 = vld [vmem:[#allocation11 + $0xd80] sm:$0xf]  ;;  %v10235_v35 = vor.u32 %v11564_v34, %v10234_v32  ;;  %6348 = vmatpush.bf16.msrb.mxu0 %v9979_v40  ;;  %v3169_v40 = vperm.slane %v12173_v23, 4  ;;  %v11232_v31 = vld [vmem:[#allocation11 + $0x144] sm:$0xf] }
 0x21e   :  { %v11628_v42 = vld [vmem:[#allocation11 + $0xd9c] sm:$0xf0] }
 0x21f   :  { %v9946_v44 = vld [vmem:[#allocation11 + $0x940] sm:$0xf]  ;;  %v10491_v19 = vor.u32 %v11628_v42, %v10490_v41  ;;  %6361 = vmatpush.bf16.msrb.mxu1 %v10235_v35  ;;  %v3134_v35 = vmax.f32 %v2970_v25, 0.0  ;;  %v3185_v14 = vadd.f32 %v3169_v40, %v3159_v63  ;;  %v11368_v25 = vld [vmem:[#allocation11 + $0x584] sm:$0xf] }
 0x220   :  { %v11492_v45 = vld [vmem:[#allocation11 + $0x95c] sm:$0xf0]  ;;  %v9180_v63 = vld [vmem:[#allocation11 + $0x360] sm:$0xf0] }
 0x221   :  { %v10202_v38 = vld [vmem:[#allocation11 + $0xb40] sm:$0xf]  ;;  %v9947_v3 = vor.u32 %v11492_v45, %v9946_v44  ;;  %6374 = vmatpush.bf16.msrb.mxu2 %v10491_v19  ;;  %v3170_v44 = vperm.slane %v12173_v23, 5  ;;  %v3160_v19 = vmul.f32 %v3144_v28, %v3134_v35  ;;  %v9468_v28 = vld [vmem:[#allocation11 + $0x5a0] sm:$0xf0] }
 0x222   :  { %v11556_v47 = vld [vmem:[#allocation11 + $0xb5c] sm:$0xf0]  ;;  %v11360_v35 = vld [vmem:[#allocation11 + $0x544] sm:$0xf] }
 0x223   :  { %v10458_v48 = vld [vmem:[#allocation11 + $0xd40] sm:$0xf]  ;;  %v10203_v52 = vor.u32 %v11556_v47, %v10202_v38  ;;  %6349 = vmatpush.bf16.msrb.mxu0 %v9947_v3 }
 0x224   :  { %v11620_v22 = vld [vmem:[#allocation11 + $0xd5c] sm:$0xf0] }
 0x225   :  { %v9914_v53 = vld [vmem:[#allocation11 + $0x900] sm:$0xf]  ;;  %v10459_v58 = vor.u32 %v11620_v22, %v10458_v48  ;;  %6362 = vmatpush.bf16.msrb.mxu1 %v10203_v52 }
 0x226   :  { %v11484_v54 = vld [vmem:[#allocation11 + $0x91c] sm:$0xf0] }
 0x227   :  { %v10170_v56 = vld [vmem:[#allocation11 + $0xb00] sm:$0xf]  ;;  %v9915_v6 = vor.u32 %v11484_v54, %v9914_v53  ;;  %6375 = vmatpush.bf16.msrb.mxu2 %v10459_v58 }
 0x228   :  { %v11548_v57 = vld [vmem:[#allocation11 + $0xb1c] sm:$0xf0] }
 0x229   :  { %v10426_v7 = vld [vmem:[#allocation11 + $0xd00] sm:$0xf]  ;;  %v10171_v62 = vor.u32 %v11548_v57, %v10170_v56  ;;  %6350 = vmatpush.bf16.msrb.mxu0 %v9915_v6  ;;  %v2958_v56 = vpop.f32.mrf.mxu2  ;;  %v3186_v57 = vadd.f32 %v3170_v44, %v3160_v19  ;;  %v11248_v6 = vld [vmem:[#allocation11 + $0x1c4] sm:$0xf] }
 0x22a   :  { %v11612_v50 = vld [vmem:[#allocation11 + $0xd1c] sm:$0xf0]  ;;  %v8991_v8 = vor.u32 %v11248_v6, %v8988_v59  ;;  %v9436_v44 = vld [vmem:[#allocation11 + $0x560] sm:$0xf0] }
 0x22b   :  { %v9882_v24 = vld [vmem:[#allocation11 + $0x8c0] sm:$0xf]  ;;  %v10427_v9 = vor.u32 %v11612_v50, %v10426_v7  ;;  %6363 = vmatpush.bf16.msrb.mxu1 %v10171_v62  ;;  %v2971_v7 = vpop.f32.mrf.mxu3  ;;  %v11312_v50 = vld [vmem:[#allocation11 + $0x3c4] sm:$0xf]  ;;  %v3194_v46 = vmax.f32 %v3186_v57, 0.0 }
 0x22c   :  { %v11476_v1 = vld [vmem:[#allocation11 + $0x8dc] sm:$0xf0]  ;;  %v11288_v19 = vld [vmem:[#allocation11 + $0x304] sm:$0xf]  ;;  %v12222_v7 = vpop.f32.mrf.mxu1 }
 0x22d   :  { %v10138_v2 = vld [vmem:[#allocation11 + $0xac0] sm:$0xf]  ;;  %v9883_v10 = vor.u32 %v11476_v1, %v9882_v24  ;;  %6376 = vmatpush.bf16.msrb.mxu2 %v10427_v9  ;;  %v11376_v9 = vld [vmem:[#allocation11 + $0x5c4] sm:$0xf]  ;;  %v12214_v17 = vpack.c.bf16 %v3194_v46, %v3194_v46 }
 0x22e   :  { %v11540_v4 = vld [vmem:[#allocation11 + $0xadc] sm:$0xf0]  ;;  %v9404_v56 = vld [vmem:[#allocation11 + $0x520] sm:$0xf0] }
 0x22f   :  { %v10394_v26 = vld [vmem:[#allocation11 + $0xcc0] sm:$0xf]  ;;  %v10139_v49 = vor.u32 %v11540_v4, %v10138_v2  ;;  %6351 = vmatpush.bf16.msrb.mxu0 %v9883_v10  ;;  %v3193_v2 = vmax.f32 %v3185_v14, 0.0  ;;  %v9500_v10 = vld [vmem:[#allocation11 + $0x5e0] sm:$0xf0]  ;;  %v9439_v14 = vor.u32 %v11360_v35, %v9436_v44 }
 0x230   :  { %v11604_v30 = vld [vmem:[#allocation11 + $0xcdc] sm:$0xf0]  ;;  %v9503_v15 = vor.u32 %v11376_v9, %v9500_v10  ;;  %v8860_v6 = vld [vmem:[#allocation11 + $0xe0] sm:$0xf0] }
 0x231   :  { %v9850_v39 = vld [vmem:[#allocation11 + $0x880] sm:$0xf]  ;;  %v10395_v21 = vor.u32 %v11604_v30, %v10394_v26  ;;  %6364 = vmatpush.bf16.msrb.mxu1 %v10139_v49  ;;  %v9247_v26 = vor.u32 %v11312_v50, %v9244_v61  ;;  %v11240_v30 = vld [vmem:[#allocation11 + $0x184] sm:$0xf] }
 0x232   :  { %v11468_v60 = vld [vmem:[#allocation11 + $0x89c] sm:$0xf0]  ;;  %v9212_v49 = vld [vmem:[#allocation11 + $0x3a0] sm:$0xf0] }
 0x233   :  { %v10106_v55 = vld [vmem:[#allocation11 + $0xa80] sm:$0xf]  ;;  %v9851_v29 = vor.u32 %v11468_v60, %v9850_v39  ;;  %6377 = vmatpush.bf16.msrb.mxu2 %v10395_v21  ;;  %v8959_v21 = vor.u32 %v11240_v30, %v8956_v11  ;;  %v11280_v59 = vld [vmem:[#allocation11 + $0x2c4] sm:$0xf] }
 0x234   :  { %v11532_v16 = vld [vmem:[#allocation11 + $0xa9c] sm:$0xf0]  ;;  %v9116_v50 = vld [vmem:[#allocation11 + $0x2e0] sm:$0xf0] }
 0x235   :  { %v10362_v32 = vld [vmem:[#allocation11 + $0xc80] sm:$0xf]  ;;  %v10107_v41 = vor.u32 %v11532_v16, %v10106_v55  ;;  %6352 = vmatpush.bf16.msrb.mxu0 %v9851_v29  ;;  %v12216_v16 = vpack.c.bf16 %v3193_v2, %v3193_v2  ;;  %v9215_v29 = vor.u32 %v11304_v12, %v9212_v49  ;;  %v9372_v2 = vld [vmem:[#allocation11 + $0x4e0] sm:$0xf0]  ;;  %v12224_v12 = vpop.f32.mrf.mxu2 }
 0x236   :  { %v11596_v34 = vld [vmem:[#allocation11 + $0xc9c] sm:$0xf0]  ;;  %v8828_v9 = vld [vmem:[#allocation11 + $0xa0] sm:$0xf0] }
 0x237   :  { %v9818_v42 = vld [vmem:[#allocation11 + $0x840] sm:$0xf]  ;;  %v10363_v47 = vor.u32 %v11596_v34, %v10362_v32  ;;  %6365 = vmatpush.bf16.msrb.mxu1 %v10107_v41  ;;  %v8924_v32 = vld [vmem:[#allocation11 + $0x160] sm:$0xf0] }
 0x238   :  { %v11460_v20 = vld [vmem:[#allocation11 + $0x85c] sm:$0xf0]  ;;  %v11296_v34 = vld [vmem:[#allocation11 + $0x344] sm:$0xf]  ;;  %v8927_v43 = vor.u32 %v11232_v31, %v8924_v32  ;;  %v2997_v32 = vpop.f32.mrf.mxu1 }
 0x239   :  { %v10074_v45 = vld [vmem:[#allocation11 + $0xa40] sm:$0xf]  ;;  %v9819_v3 = vor.u32 %v11460_v20, %v9818_v42  ;;  %6378 = vmatpush.bf16.msrb.mxu2 %v10363_v47  ;;  %v9471_v42 = vor.u32 %v11368_v25, %v9468_v28  ;;  %v8892_v47 = vld [vmem:[#allocation11 + $0x120] sm:$0xf0] }
 0x23a   :  { %v11524_v38 = vld [vmem:[#allocation11 + $0xa5c] sm:$0xf0]  ;;  %v11272_v10 = vld [vmem:[#allocation11 + $0x284] sm:$0xf] }
 0x23b   :  { %v10330_v48 = vld [vmem:[#allocation11 + $0xc40] sm:$0xf]  ;;  %v10075_v51 = vor.u32 %v11524_v38, %v10074_v45  ;;  %6353 = vmatpush.bf16.msrb.mxu0 %v9819_v3  ;;  %v9183_v45 = vor.u32 %v11296_v34, %v9180_v63  ;;  %v11224_v38 = vld [vmem:[#allocation11 + $0x104] sm:$0xf] }
 0x23c   :  { %v11588_v22 = vld [vmem:[#allocation11 + $0xc5c] sm:$0xf0]  ;;  %v9148_v3 = vld [vmem:[#allocation11 + $0x320] sm:$0xf0] }
 0x23d   :  { %v9786_v52 = vld [vmem:[#allocation11 + $0x800] sm:$0xf]  ;;  %v10331_v62 = vor.u32 %v11588_v22, %v10330_v48  ;;  %6366 = vmatpush.bf16.msrb.mxu1 %v10075_v51  ;;  %v9151_v57 = vor.u32 %v11288_v19, %v9148_v3  ;;  %v11200_v28 = vld [vmem:[#allocation11 + $0x44] sm:$0xf] }
 0x23e   :  { %v11452_v53 = vld [vmem:[#allocation11 + $0x81c] sm:$0xf0]  ;;  %v11264_v31 = vld [vmem:[#allocation11 + $0x244] sm:$0xf] }
 0x23f   :  { %v10042_v54 = vld [vmem:[#allocation11 + $0xa00] sm:$0xf]  ;;  %v9787_v0 = vor.u32 %v11452_v53, %v9786_v52  ;;  %6379 = vmatpush.bf16.msrb.mxu2 %v10331_v62  ;;  %v8895_v52 = vor.u32 %v11224_v38, %v8892_v47  ;;  %v12220_v53 = vpop.f32.mrf.mxu0  ;;  %v9052_v34 = vld [vmem:[#allocation11 + $0x260] sm:$0xf0] }
 0x240   :  { %v11516_v58 = vld [vmem:[#allocation11 + $0xa1c] sm:$0xf0]  ;;  %v8764_v44 = vld [vmem:[#allocation11 + $0x20] sm:$0xf0]  ;;  %v9055_v47 = vor.u32 %v11264_v31, %v9052_v34 }
 0x241   :  { %v10298_v24 = vld [vmem:[#allocation11 + $0xc00] sm:$0xf]  ;;  %v10043_v4 = vor.u32 %v11516_v58, %v10042_v54  ;;  %6354 = vmatpush.bf16.msrb.mxu0 %v9787_v0  ;;  %v11352_v54 = vld [vmem:[#allocation11 + $0x504] sm:$0xf] }
 0x242   :  { %v11580_v1 = vld [vmem:[#allocation11 + $0xc1c] sm:$0xf0]  ;;  %v11216_v58 = vld [vmem:[#allocation11 + $0xc4] sm:$0xf]  ;;  %v9407_v46 = vor.u32 %v11352_v54, %v9404_v56 }
 0x243   :  { %v10299_v13 = vor.u32 %v11580_v1, %v10298_v24  ;;  %v10778_v39 = vld [vmem:[#allocation11 + $0xfc0] sm:$0xf]  ;;  %6367 = vmatpush.bf16.msrb.mxu1 %v10043_v4  ;;  %v8863_v24 = vor.u32 %v11216_v58, %v8860_v6  ;;  %v11344_v1 = vld [vmem:[#allocation11 + $0x4c4] sm:$0xf]  ;;  %v9119_v4 = vor.u32 %v11280_v59, %v9116_v50 }
 0x244   :  { %v11700_v60 = vld [vmem:[#allocation11 + $0xfdc] sm:$0xf0]  ;;  %6355 = vmatmul.bf16.vlgmr.msrb.gmra.mxu0 %v12216_v16  ;;  %v9375_v49 = vor.u32 %v11344_v1, %v9372_v2  ;;  %v9308_v38 = vld [vmem:[#allocation11 + $0x460] sm:$0xf0] }
 0x245   :  { %v10779_v55 = vor.u32 %v11700_v60, %v10778_v39  ;;  %6399 = vmatpush.bf16.msra.mxu0 %v8991_v8  ;;  %6380 = vmatpush.bf16.msrb.mxu2 %v10299_v13  ;;  %v10746_v40 = vld [vmem:[#allocation11 + $0xf80] sm:$0xf]  ;;  %v11208_v8 = vld [vmem:[#allocation11 + $0x84] sm:$0xf] }
 0x246   :  { %v11692_v41 = vld [vmem:[#allocation11 + $0xf9c] sm:$0xf0]  ;;  %6368 = vmatmul.bf16.vlgmr.msrb.gmra.mxu1 %v12214_v17  ;;  %v8831_v39 = vor.u32 %v11208_v8, %v8828_v9  ;;  %v11256_v19 = vld [vmem:[#allocation11 + $0x204] sm:$0xf] }
 0x247   :  { %6412 = vmatpush.bf16.msra.mxu1 %v9247_v26  ;;  %6386 = vmatpush.bf16.msrb.mxu3 %v10779_v55  ;;  %v10747_v20 = vor.u32 %v11692_v41, %v10746_v40  ;;  %v10714_v48 = vld [vmem:[#allocation11 + $0xf40] sm:$0xf]  ;;  %v9084_v26 = vld [vmem:[#allocation11 + $0x2a0] sm:$0xf0]  ;;  %v2984_v60 = vpop.f32.mrf.mxu0  ;;  %v554_v41 = vperm.slane %v12190_v27, 6 }
 0x248   :  { %v11684_v22 = vld [vmem:[#allocation11 + $0xf5c] sm:$0xf0]  ;;  %v11336_v55 = vld [vmem:[#allocation11 + $0x484] sm:$0xf]  ;;  %v9087_v25 = vor.u32 %v11272_v10, %v9084_v26 }
 0x249   :  { %6425 = vmatpush.bf16.msra.mxu2 %v9503_v15  ;;  %6400 = vmatpush.bf16.msra.mxu0 %v8959_v21  ;;  %v10715_v51 = vor.u32 %v11684_v22, %v10714_v48  ;;  %v10682_v61 = vld [vmem:[#allocation11 + $0xf00] sm:$0xf]  ;;  %v12226_v15 = vpop.f32.mrf.mxu3  ;;  %v9340_v21 = vld [vmem:[#allocation11 + $0x4a0] sm:$0xf0] }
 0x24a   :  { %v11676_v62 = vld [vmem:[#allocation11 + $0xf1c] sm:$0xf0]  ;;  %v9020_v3 = vld [vmem:[#allocation11 + $0x220] sm:$0xf0] }
 0x24b   :  { %6413 = vmatpush.bf16.msra.mxu1 %v9215_v29  ;;  %6387 = vmatpush.bf16.msrb.mxu3 %v10747_v20  ;;  %v10683_v0 = vor.u32 %v11676_v62, %v10682_v61  ;;  %v10650_v30 = vld [vmem:[#allocation11 + $0xec0] sm:$0xf]  ;;  %v8796_v29 = vld [vmem:[#allocation11 + $0x60] sm:$0xf0]  ;;  %v9343_v20 = vor.u32 %v11336_v55, %v9340_v21 }
 0x24c   :  { %v11668_v11 = vld [vmem:[#allocation11 + $0xedc] sm:$0xf0]  ;;  %v8799_v35 = vor.u32 %v11200_v28, %v8796_v29  ;;  %v11504_v48 = vld [vmem:[#allocation11 + $0x9c4] sm:$0xf] }
 0x24d   :  { %6426 = vmatpush.bf16.msra.mxu2 %v9471_v42  ;;  %6401 = vmatpush.bf16.msra.mxu0 %v8927_v43  ;;  %v10651_v13 = vor.u32 %v11668_v11, %v10650_v30  ;;  %v10618_v63 = vld [vmem:[#allocation11 + $0xe80] sm:$0xf]  ;;  %v11192_v42 = vld [vmem:[#allocation11 + $0x4] sm:$0xf] }
 0x24e   :  { %v11660_v40 = vld [vmem:[#allocation11 + $0xe9c] sm:$0xf0]  ;;  %v10012_v22 = vld [vmem:[#allocation11 + $0x9e0] sm:$0xf0]  ;;  %v8767_v59 = vor.u32 %v11192_v42, %v8764_v44 }
 0x24f   :  { %6414 = vmatpush.bf16.msra.mxu1 %v9183_v45  ;;  %6388 = vmatpush.bf16.msrb.mxu3 %v10715_v51  ;;  %v10619_v43 = vor.u32 %v11660_v40, %v10618_v63  ;;  %v11328_v45 = vld [vmem:[#allocation11 + $0x444] sm:$0xf]  ;;  %v11652_v51 = vld [vmem:[#allocation11 + $0xe5c] sm:$0xf0] }
 0x250   :  { %v11568_v54 = vld [vmem:[#allocation11 + $0xbc4] sm:$0xf]  ;;  %v9311_v58 = vor.u32 %v11328_v45, %v9308_v38  ;;  %v11644_v8 = vld [vmem:[#allocation11 + $0xe1c] sm:$0xf0]  ;;  %v3034_v38 = vpop.f32.mrf.mxu0 }
 0x251   :  { %6427 = vmatpush.bf16.msra.mxu2 %v9439_v14  ;;  %6402 = vmatpush.bf16.msra.mxu0 %v8895_v52  ;;  %v10586_v14 = vld [vmem:[#allocation11 + $0xe40] sm:$0xf]  ;;  %v2983_v52 = vadd.f32 %v12220_v53, %v554_v41  ;;  %v10268_v56 = vld [vmem:[#allocation11 + $0xbe0] sm:$0xf0]  ;;  %v3023_v50 = vpop.f32.mrf.mxu3 }
 0x252   :  { %v10587_v6 = vor.u32 %v11652_v51, %v10586_v14  ;;  %v11320_v61 = vld [vmem:[#allocation11 + $0x404] sm:$0xf]  ;;  %v10271_v2 = vor.u32 %v11568_v54, %v10268_v56  ;;  %v10554_v53 = vld [vmem:[#allocation11 + $0xe00] sm:$0xf]  ;;  %v3047_v14 = vpop.f32.mrf.mxu1 }
 0x253   :  { %6415 = vmatpush.bf16.msra.mxu1 %v9151_v57  ;;  %6389 = vmatpush.bf16.msrb.mxu3 %v10683_v0  ;;  %v3010_v57 = vpop.f32.mrf.mxu2  ;;  %v9276_v62 = vld [vmem:[#allocation11 + $0x420] sm:$0xf0]  ;;  %v10015_v0 = vor.u32 %v11504_v48, %v10012_v22  ;;  %v2996_v9 = vadd.f32 %v12222_v7, %v2983_v52  ;;  %v10555_v30 = vor.u32 %v11644_v8, %v10554_v53 }
 0x254   :  { %v9980_v1 = vld [vmem:[#allocation11 + $0x9a0] sm:$0xf0]  ;;  %v9279_v26 = vor.u32 %v11320_v61, %v9276_v62  ;;  %v3145_v57 = vperm.slane %v12161_v33, 6 }
 0x255   :  { %6428 = vmatpush.bf16.msra.mxu2 %v9407_v46  ;;  %6403 = vmatpush.bf16.msra.mxu0 %v8863_v24  ;;  %v9023_v46 = vor.u32 %v11256_v19, %v9020_v3  ;;  %v11496_v24 = vld [vmem:[#allocation11 + $0x984] sm:$0xf]  ;;  %v3009_v7 = vadd.f32 %v12224_v12, %v2996_v9 }
 0x256   :  { %v10236_v10 = vld [vmem:[#allocation11 + $0xba0] sm:$0xf0] }
 0x257   :  { %6416 = vmatpush.bf16.msra.mxu1 %v9119_v4  ;;  %6390 = vmatpush.bf16.msrb.mxu3 %v10651_v13  ;;  %v11560_v4 = vld [vmem:[#allocation11 + $0xb84] sm:$0xf] }
 0x258   :  { %v11440_v11 = vld [vmem:[#allocation11 + $0x7c4] sm:$0xf]  ;;  %v10239_v60 = vor.u32 %v11560_v4, %v10236_v10 }
 0x259   :  { %6429 = vmatpush.bf16.msra.mxu2 %v9375_v49  ;;  %6404 = vmatpush.bf16.msra.mxu0 %v8831_v39  ;;  %v9756_v49 = vld [vmem:[#allocation11 + $0x7e0] sm:$0xf0]  ;;  %v9983_v39 = vor.u32 %v11496_v24, %v9980_v1 }
 0x25a   :  { %v9759_v13 = vor.u32 %v11440_v11, %v9756_v49  ;;  %v11488_v55 = vld [vmem:[#allocation11 + $0x944] sm:$0xf]  ;;  %v3036_v49 = vpop.f32.mrf.mxu0 }
 0x25b   :  { %6417 = vmatpush.bf16.msra.mxu1 %v9087_v25  ;;  %6391 = vmatpush.bf16.msrb.mxu3 %v10619_v43  ;;  %v9948_v21 = vld [vmem:[#allocation11 + $0x960] sm:$0xf0]  ;;  %v12237_v8 = vpop.f32.mrf.mxu2  ;;  %v11229_v49 = vld [vmem:[#allocation11 + $0x124] sm:$0xf0] }
 0x25c   :  { %v11552_v25 = vld [vmem:[#allocation11 + $0xb44] sm:$0xf]  ;;  %v9951_v34 = vor.u32 %v11488_v55, %v9948_v21 }
 0x25d   :  { %6430 = vmatpush.bf16.msra.mxu2 %v9343_v20  ;;  %6405 = vmatpush.bf16.msra.mxu0 %v8799_v35  ;;  %v10204_v28 = vld [vmem:[#allocation11 + $0xb60] sm:$0xf0]  ;;  %v3022_v20 = vadd.f32 %v12226_v15, %v3009_v7 }
 0x25e   :  { %v11432_v29 = vld [vmem:[#allocation11 + $0x784] sm:$0xf]  ;;  %v10207_v63 = vor.u32 %v11552_v25, %v10204_v28 }
 0x25f   :  { %6418 = vmatpush.bf16.msra.mxu1 %v9055_v47  ;;  %6392 = vmatpush.bf16.msrb.mxu3 %v10587_v6  ;;  %v9724_v31 = vld [vmem:[#allocation11 + $0x7a0] sm:$0xf0]  ;;  %v3035_v22 = vadd.f32 %v3034_v38, %v3022_v20 }
 0x260   :  { %v9727_v32 = vor.u32 %v11432_v29, %v9724_v31  ;;  %v11480_v40 = vld [vmem:[#allocation11 + $0x904] sm:$0xf] }
 0x261   :  { %6431 = vmatpush.bf16.msra.mxu2 %v9311_v58  ;;  %6406 = vmatpush.bf16.msra.mxu0 %v8767_v59  ;;  %v9916_v41 = vld [vmem:[#allocation11 + $0x920] sm:$0xf0]  ;;  %v3048_v56 = vadd.f32 %v3047_v14, %v3035_v22 }
 0x262   :  { %v11544_v42 = vld [vmem:[#allocation11 + $0xb04] sm:$0xf]  ;;  %v9919_v45 = vor.u32 %v11480_v40, %v9916_v41  ;;  %v8994_v41 = vld [vmem:[#allocation11 + $0x1c8] sm:$0xf] }
 0x263   :  { %6419 = vmatpush.bf16.msra.mxu1 %v9023_v46  ;;  %6393 = vmatpush.bf16.msrb.mxu3 %v10555_v30  ;;  %v10172_v43 = vld [vmem:[#allocation11 + $0xb20] sm:$0xf0]  ;;  %v3135_v46 = vmax.f32 %v3048_v56, 0.0  ;;  %v9218_v56 = vld [vmem:[#allocation11 + $0x388] sm:$0xf] }
 0x264   :  { %6407 = vmatmul.bf16.vlgmr.msra.gmra.mxu0 %v12193_v36  ;;  %v11424_v35 = vld [vmem:[#allocation11 + $0x744] sm:$0xf]  ;;  %v10175_v47 = vor.u32 %v11544_v42, %v10172_v43  ;;  %v11253_v42 = vld [vmem:[#allocation11 + $0x1e4] sm:$0xf0] }
 0x265   :  { %6451 = vmatpush.bf16.msrb.mxu0 %v10015_v0  ;;  %6432 = vmatpush.bf16.msra.mxu2 %v9279_v26  ;;  %v9692_v12 = vld [vmem:[#allocation11 + $0x760] sm:$0xf0]  ;;  %v3171_v0 = vperm.slane %v12173_v23, 6  ;;  %v3161_v4 = vmul.f32 %v3145_v57, %v3135_v46  ;;  %v12239_v26 = vpop.f32.mrf.mxu3  ;;  %v9250_v43 = vld [vmem:[#allocation11 + $0x3c8] sm:$0xf]  ;;  %v8995_v22 = vor.u32 %v11253_v42, %v8994_v41 }
 0x266   :  { %6420 = vmatmul.bf16.vlgmr.msra.gmra.mxu1 %v12195_v18  ;;  %v9695_v44 = vor.u32 %v11424_v35, %v9692_v12  ;;  %v11472_v19 = vld [vmem:[#allocation11 + $0x8c4] sm:$0xf]  ;;  %v11317_v35 = vld [vmem:[#allocation11 + $0x3e4] sm:$0xf0] }
 0x267   :  { %6464 = vmatpush.bf16.msrb.mxu1 %v10271_v2  ;;  %6438 = vmatpush.bf16.msra.mxu3 %v9759_v13  ;;  %v9884_v3 = vld [vmem:[#allocation11 + $0x8e0] sm:$0xf0]  ;;  %v3187_v23 = vadd.f32 %v3171_v0, %v3161_v4  ;;  %v11309_v57 = vld [vmem:[#allocation11 + $0x3a4] sm:$0xf0] }
 0x268   :  { %v11536_v48 = vld [vmem:[#allocation11 + $0xac4] sm:$0xf]  ;;  %v9887_v58 = vor.u32 %v11472_v19, %v9884_v3  ;;  %v3062_v19 = vpop.f32.mrf.mxu2  ;;  %v9219_v0 = vor.u32 %v11309_v57, %v9218_v56  ;;  %v9186_v4 = vld [vmem:[#allocation11 + $0x348] sm:$0xf] }
 0x269   :  { %6452 = vmatpush.bf16.msrb.mxu0 %v9983_v39  ;;  %v10140_v51 = vld [vmem:[#allocation11 + $0xae0] sm:$0xf0]  ;;  %v3195_v28 = vmax.f32 %v3187_v23, 0.0 }
 0x26a   :  { %v11416_v52 = vld [vmem:[#allocation11 + $0x704] sm:$0xf]  ;;  %v10143_v59 = vor.u32 %v11536_v48, %v10140_v51  ;;  %v8962_v51 = vld [vmem:[#allocation11 + $0x188] sm:$0xf] }
 0x26b   :  { %6465 = vmatpush.bf16.msrb.mxu1 %v10239_v60  ;;  %6439 = vmatpush.bf16.msra.mxu3 %v9727_v32  ;;  %v9660_v54 = vld [vmem:[#allocation11 + $0x720] sm:$0xf0]  ;;  %v3049_v60 = vpop.f32.mrf.mxu1  ;;  %v12241_v20 = vpack.c.bf16 %v3195_v28, %v3195_v28  ;;  %v8866_v28 = vld [vmem:[#allocation11 + $0xc8] sm:$0xf] }
 0x26c   :  { %v9663_v15 = vor.u32 %v11416_v52, %v9660_v54  ;;  %v11464_v6 = vld [vmem:[#allocation11 + $0x884] sm:$0xf]  ;;  %v11245_v52 = vld [vmem:[#allocation11 + $0x1a4] sm:$0xf0]  ;;  %v9251_v54 = vor.u32 %v11317_v35, %v9250_v43 }
 0x26d   :  { %6453 = vmatpush.bf16.msrb.mxu0 %v9951_v34  ;;  %v9852_v50 = vld [vmem:[#allocation11 + $0x8a0] sm:$0xf0]  ;;  %6381 = vmatmul.bf16.vlgmr.msrb.gmra.mxu2 %v12241_v20  ;;  %v3075_v14 = vpop.f32.mrf.mxu3  ;;  %v8963_v46 = vor.u32 %v11245_v52, %v8962_v51  ;;  %v8802_v52 = vld [vmem:[#allocation11 + $0x48] sm:$0xf] }
 0x26e   :  { %v11528_v61 = vld [vmem:[#allocation11 + $0xa84] sm:$0xf]  ;;  %v9855_v53 = vor.u32 %v11464_v6, %v9852_v50 }
 0x26f   :  { %6466 = vmatpush.bf16.msrb.mxu1 %v10207_v63  ;;  %6440 = vmatpush.bf16.msra.mxu3 %v9695_v44  ;;  %v10108_v62 = vld [vmem:[#allocation11 + $0xaa0] sm:$0xf0] }
 0x270   :  { %v11408_v24 = vld [vmem:[#allocation11 + $0x6c4] sm:$0xf]  ;;  %v10111_v10 = vor.u32 %v11528_v61, %v10108_v62  ;;  %v555_v62 = vperm.slane %v12190_v27, 7 }
 0x271   :  { %6454 = vmatpush.bf16.msrb.mxu0 %v9919_v45  ;;  %v9628_v1 = vld [vmem:[#allocation11 + $0x6e0] sm:$0xf0] }
 0x272   :  { %v9631_v2 = vor.u32 %v11408_v24, %v9628_v1  ;;  %v11456_v33 = vld [vmem:[#allocation11 + $0x844] sm:$0xf]  ;;  %v8930_v1 = vld [vmem:[#allocation11 + $0x148] sm:$0xf]  ;;  %v3061_v23 = vadd.f32 %v12237_v8, %v555_v62 }
 0x273   :  { %6467 = vmatpush.bf16.msrb.mxu1 %v10175_v47  ;;  %6441 = vmatpush.bf16.msra.mxu3 %v9663_v15  ;;  %v9820_v9 = vld [vmem:[#allocation11 + $0x860] sm:$0xf0]  ;;  %v3099_v42 = vpop.f32.mrf.mxu1  ;;  %v9506_v62 = vld [vmem:[#allocation11 + $0x5c8] sm:$0xf] }
 0x274   :  { %v11520_v30 = vld [vmem:[#allocation11 + $0xa44] sm:$0xf]  ;;  %v9823_v29 = vor.u32 %v11456_v33, %v9820_v9 }
 0x275   :  { %6455 = vmatpush.bf16.msrb.mxu0 %v9887_v58  ;;  %v10076_v11 = vld [vmem:[#allocation11 + $0xa60] sm:$0xf0] }
 0x276   :  { %v11632_v13 = vld [vmem:[#allocation11 + $0xdc4] sm:$0xf]  ;;  %v10079_v34 = vor.u32 %v11520_v30, %v10076_v11  ;;  %v8898_v11 = vld [vmem:[#allocation11 + $0x108] sm:$0xf] }
 0x277   :  { %6468 = vmatpush.bf16.msrb.mxu1 %v10143_v59  ;;  %v10524_v39 = vld [vmem:[#allocation11 + $0xde0] sm:$0xf0]  ;;  %6442 = vmatpush.bf16.msra.mxu3 %v9631_v2  ;;  %v11237_v2 = vld [vmem:[#allocation11 + $0x164] sm:$0xf0] }
 0x278   :  { %v11400_v55 = vld [vmem:[#allocation11 + $0x684] sm:$0xf]  ;;  %v10527_v63 = vor.u32 %v11632_v13, %v10524_v39  ;;  %v8931_v27 = vor.u32 %v11237_v2, %v8930_v1  ;;  %v9154_v13 = vld [vmem:[#allocation11 + $0x308] sm:$0xf] }
 0x279   :  { %v9596_v21 = vld [vmem:[#allocation11 + $0x6a0] sm:$0xf0]  ;;  %6456 = vmatpush.bf16.msrb.mxu0 %v9855_v53  ;;  %v11301_v53 = vld [vmem:[#allocation11 + $0x364] sm:$0xf0]  ;;  %v3125_v57 = vpop.f32.mrf.mxu3 }
 0x27a   :  { %v11448_v25 = vld [vmem:[#allocation11 + $0x804] sm:$0xf]  ;;  %v9599_v7 = vor.u32 %v11400_v55, %v9596_v21  ;;  %6477 = vmatpush.bf16.msrb.mxu2 %v10527_v63  ;;  %v11293_v39 = vld [vmem:[#allocation11 + $0x324] sm:$0xf0]  ;;  %v8899_v21 = vor.u32 %v11229_v49, %v8898_v11  ;;  %v11719_v49 = vld [vmem:[#allocation10] sm:$0xff] }
 0x27b   :  { %v9788_v31 = vld [vmem:[#allocation11 + $0x820] sm:$0xf0]  ;;  %6469 = vmatpush.bf16.msrb.mxu1 %v10111_v10  ;;  %v9187_v10 = vor.u32 %v11301_v53, %v9186_v4  ;;  %v11285_v63 = vld [vmem:[#allocation11 + $0x2e4] sm:$0xf0] }
 0x27c   :  { %v11512_v32 = vld [vmem:[#allocation11 + $0xa04] sm:$0xf]  ;;  %6443 = vmatpush.bf16.msra.mxu3 %v9599_v7  ;;  %v9791_v47 = vor.u32 %v11448_v25, %v9788_v31  ;;  %v9155_v25 = vor.u32 %v11293_v39, %v9154_v13  ;;  %v9122_v31 = vld [vmem:[#allocation11 + $0x2c8] sm:$0xf]  ;;  %v3172_v13 = vperm.slane %v11719_v49, 7 }
 0x27d   :  { %v10044_v40 = vld [vmem:[#allocation11 + $0xa20] sm:$0xf0]  ;;  %6457 = vmatpush.bf16.msrb.mxu0 %v9823_v29  ;;  %v11221_v29 = vld [vmem:[#allocation11 + $0xe4] sm:$0xf0]  ;;  %6433 = vmatmul.bf16.vlgmr.msra.gmra.mxu2 %v12197_v37  ;;  %v9123_v35 = vor.u32 %v11285_v63, %v9122_v31 }
 0x27e   :  { %v11392_v12 = vld [vmem:[#allocation11 + $0x644] sm:$0xf]  ;;  %v10047_v48 = vor.u32 %v11512_v32, %v10044_v40  ;;  %v3074_v32 = vadd.f32 %v12239_v26, %v3061_v23  ;;  %v8867_v43 = vor.u32 %v11221_v29, %v8866_v28  ;;  %v8770_v4 = vld [vmem:[#allocation11 + $0x8] sm:$0xf] }
 0x27f   :  { %v11624_v44 = vld [vmem:[#allocation11 + $0xd84] sm:$0xf]  ;;  %6470 = vmatpush.bf16.msrb.mxu1 %v10079_v34  ;;  %v3086_v34 = vpop.f32.mrf.mxu0  ;;  %v11197_v53 = vld [vmem:[#allocation11 + $0x24] sm:$0xf0] }
 0x280   :  { %v10492_v45 = vld [vmem:[#allocation11 + $0xda0] sm:$0xf0]  ;;  %v3087_v8 = vadd.f32 %v3086_v34, %v3074_v32  ;;  %v11509_v39 = vld [vmem:[#allocation11 + $0x9e4] sm:$0xf0]  ;;  %v8771_v28 = vor.u32 %v11197_v53, %v8770_v4 }
 0x281   :  { %v9564_v38 = vld [vmem:[#allocation11 + $0x660] sm:$0xf0]  ;;  %v10495_v15 = vor.u32 %v11624_v44, %v10492_v45  ;;  %6458 = vmatpush.bf16.msrb.mxu0 %v9791_v47  ;;  %v8834_v44 = vld [vmem:[#allocation11 + $0x88] sm:$0xf] }
 0x282   :  { %v9567_v3 = vor.u32 %v11392_v12, %v9564_v38  ;;  %v11384_v58 = vld [vmem:[#allocation11 + $0x604] sm:$0xf]  ;;  %v11213_v45 = vld [vmem:[#allocation11 + $0xa4] sm:$0xf0] }
 0x283   :  { %v11616_v6 = vld [vmem:[#allocation11 + $0xd44] sm:$0xf]  ;;  %6471 = vmatpush.bf16.msrb.mxu1 %v10047_v48  ;;  %6478 = vmatpush.bf16.msrb.mxu2 %v10495_v15  ;;  %v9090_v38 = vld [vmem:[#allocation11 + $0x288] sm:$0xf]  ;;  %v8835_v48 = vor.u32 %v11213_v45, %v8834_v44 }
 0x284   :  { %v10460_v59 = vld [vmem:[#allocation11 + $0xd60] sm:$0xf0]  ;;  %6444 = vmatpush.bf16.msra.mxu3 %v9567_v3  ;;  %6459 = vmatmul.bf16.vlgmr.msrb.gmra.mxu0 %v12216_v16  ;;  %v11277_v47 = vld [vmem:[#allocation11 + $0x2a4] sm:$0xf0]  ;;  %v3100_v3 = vadd.f32 %v3099_v42, %v3087_v8 }
 0x285   :  { %v9532_v50 = vld [vmem:[#allocation11 + $0x620] sm:$0xf0]  ;;  %6503 = vmatpush.bf16.msra.mxu0 %v8995_v22  ;;  %v10463_v24 = vor.u32 %v11616_v6, %v10460_v59  ;;  %v3112_v22 = vpop.f32.mrf.mxu2  ;;  %v9091_v14 = vor.u32 %v11277_v47, %v9090_v38  ;;  %v9058_v15 = vld [vmem:[#allocation11 + $0x248] sm:$0xf] }
 0x286   :  { %v9535_v61 = vor.u32 %v11384_v58, %v9532_v50  ;;  %v11608_v33 = vld [vmem:[#allocation11 + $0xd04] sm:$0xf]  ;;  %6472 = vmatmul.bf16.vlgmr.msrb.gmra.mxu1 %v12214_v17  ;;  %v3113_v56 = vadd.f32 %v3112_v22, %v3100_v3  ;;  %v11269_v6 = vld [vmem:[#allocation11 + $0x264] sm:$0xf0] }
 0x287   :  { %6516 = vmatpush.bf16.msra.mxu1 %v9251_v54  ;;  %v10428_v9 = vld [vmem:[#allocation11 + $0xd20] sm:$0xf0]  ;;  %6479 = vmatpush.bf16.msrb.mxu2 %v10463_v24  ;;  %v11205_v54 = vld [vmem:[#allocation11 + $0x64] sm:$0xf0]  ;;  %v3088_v58 = vpop.f32.mrf.mxu0  ;;  %v11718_v24 = vld [vmem:[#allocation8] sm:$0xff] }
 0x288   :  { %6445 = vmatpush.bf16.msra.mxu3 %v9535_v61  ;;  %v10431_v30 = vor.u32 %v11608_v33, %v10428_v9  ;;  %v11600_v60 = vld [vmem:[#allocation11 + $0xcc4] sm:$0xf]  ;;  %v3101_v61 = vpop.f32.mrf.mxu1  ;;  %v3146_v1 = vperm.slane %v11718_v24, 7  ;;  %v8803_v2 = vor.u32 %v11205_v54, %v8802_v52  ;;  %v9059_v33 = vor.u32 %v11269_v6, %v9058_v15  ;;  %v11565_v44 = vld [vmem:[#allocation11 + $0xba4] sm:$0xf0] }
 0x289   :  { %6504 = vmatpush.bf16.msra.mxu0 %v8963_v46  ;;  %v10396_v55 = vld [vmem:[#allocation11 + $0xce0] sm:$0xf0]  ;;  %v11381_v46 = vld [vmem:[#allocation11 + $0x5e4] sm:$0xf0] }
 0x28a   :  { %v10399_v7 = vor.u32 %v11600_v60, %v10396_v55  ;;  %v11592_v40 = vld [vmem:[#allocation11 + $0xc84] sm:$0xf]  ;;  %v9507_v23 = vor.u32 %v11381_v46, %v9506_v62  ;;  %v10274_v60 = vld [vmem:[#allocation11 + $0xbc8] sm:$0xf] }
 0x28b   :  { %6517 = vmatpush.bf16.msra.mxu1 %v9219_v0  ;;  %6480 = vmatpush.bf16.msrb.mxu2 %v10431_v30  ;;  %v10364_v41 = vld [vmem:[#allocation11 + $0xca0] sm:$0xf0]  ;;  %v3126_v0 = vadd.f32 %v3125_v57, %v3113_v56  ;;  %v10018_v30 = vld [vmem:[#allocation11 + $0x9c8] sm:$0xf] }
 0x28c   :  { %v10367_v12 = vor.u32 %v11592_v40, %v10364_v41  ;;  %v11584_v19 = vld [vmem:[#allocation11 + $0xc44] sm:$0xf]  ;;  %v11573_v55 = vld [vmem:[#allocation11 + $0xbe4] sm:$0xf0]  ;;  %v10019_v32 = vor.u32 %v11509_v39, %v10018_v30  ;;  %v3127_v41 = vpop.f32.mrf.mxu3 }
 0x28d   :  { %6505 = vmatpush.bf16.msra.mxu0 %v8931_v27  ;;  %v10332_v26 = vld [vmem:[#allocation11 + $0xc60] sm:$0xf0]  ;;  %v9026_v27 = vld [vmem:[#allocation11 + $0x208] sm:$0xf]  ;;  %v3136_v11 = vmax.f32 %v3126_v0, 0.0  ;;  %v3114_v29 = vpop.f32.mrf.mxu2  ;;  %v10275_v42 = vor.u32 %v11573_v55, %v10274_v60 }
 0x28e   :  { %v10335_v51 = vor.u32 %v11584_v19, %v10332_v26  ;;  %v11576_v59 = vld [vmem:[#allocation11 + $0xc04] sm:$0xf]  ;;  %v9442_v45 = vld [vmem:[#allocation11 + $0x548] sm:$0xf] }
 0x28f   :  { %6518 = vmatpush.bf16.msra.mxu1 %v9187_v10  ;;  %6481 = vmatpush.bf16.msrb.mxu2 %v10399_v7  ;;  %v10300_v50 = vld [vmem:[#allocation11 + $0xc20] sm:$0xf0]  ;;  %v11261_v10 = vld [vmem:[#allocation11 + $0x224] sm:$0xf0]  ;;  %v3162_v7 = vmul.f32 %v3146_v1, %v3136_v11  ;;  %v6304_v55 = vpop.f32.mrf.mxu0 }
 0x290   :  { %v10303_v9 = vor.u32 %v11576_v59, %v10300_v50  ;;  %v9027_v31 = vor.u32 %v11261_v10, %v9026_v27  ;;  %v11696_v34 = vld [vmem:[#allocation11 + $0xfc4] sm:$0xf]  ;;  %v11365_v38 = vld [vmem:[#allocation11 + $0x564] sm:$0xf0] }
 0x291   :  { %6506 = vmatpush.bf16.msra.mxu0 %v8899_v21  ;;  %v9474_v21 = vld [vmem:[#allocation11 + $0x588] sm:$0xf]  ;;  %v10780_v63 = vld [vmem:[#allocation11 + $0xfe0] sm:$0xf0]  ;;  %v3188_v40 = vadd.f32 %v3172_v13, %v3162_v7  ;;  %v6317_v29 = vpop.f32.mrf.mxu1 }
 0x292   :  { %v10783_v19 = vor.u32 %v11696_v34, %v10780_v63  ;;  %v11688_v3 = vld [vmem:[#allocation11 + $0xf84] sm:$0xf]  ;;  %v9954_v52 = vld [vmem:[#allocation11 + $0x948] sm:$0xf] }
 0x293   :  { %6519 = vmatpush.bf16.msra.mxu1 %v9155_v25  ;;  %6482 = vmatpush.bf16.msrb.mxu2 %v10367_v12  ;;  %v11373_v25 = vld [vmem:[#allocation11 + $0x5a4] sm:$0xf0]  ;;  %v3196_v47 = vmax.f32 %v3188_v40, 0.0  ;;  %v12256_v50 = vld [vmem:[#allocation13] sm:$0xff] }
 0x294   :  { %v9475_v8 = vor.u32 %v11373_v25, %v9474_v21  ;;  %v10242_v12 = vld [vmem:[#allocation11 + $0xb88] sm:$0xf]  ;;  %v11680_v61 = vld [vmem:[#allocation11 + $0xf44] sm:$0xf] }
 0x295   :  { %6507 = vmatpush.bf16.msra.mxu0 %v8867_v43  ;;  %v9986_v43 = vld [vmem:[#allocation11 + $0x988] sm:$0xf]  ;;  %v12251_v22 = vpack.c.bf16 %v3196_v47, %v3196_v47  ;;  %v10716_v62 = vld [vmem:[#allocation11 + $0xf60] sm:$0xf0] }
 0x296   :  { %v11493_v54 = vld [vmem:[#allocation11 + $0x964] sm:$0xf0]  ;;  %v10719_v27 = vor.u32 %v11680_v61, %v10716_v62  ;;  %v11672_v30 = vld [vmem:[#allocation11 + $0xf04] sm:$0xf] }
 0x297   :  { %6520 = vmatpush.bf16.msra.mxu1 %v9123_v35  ;;  %6483 = vmatpush.bf16.msrb.mxu2 %v10335_v51  ;;  %v11501_v35 = vld [vmem:[#allocation11 + $0x9a4] sm:$0xf0]  ;;  %v9443_v51 = vor.u32 %v11365_v38, %v9442_v45  ;;  %v9955_v59 = vor.u32 %v11493_v54, %v9954_v52  ;;  %v10684_v11 = vld [vmem:[#allocation11 + $0xf20] sm:$0xf0] }
 0x298   :  { %v9987_v26 = vor.u32 %v11501_v35, %v9986_v43  ;;  %v10210_v15 = vld [vmem:[#allocation11 + $0xb48] sm:$0xf]  ;;  %6394 = vmatmul.bf16.vlgmr.msrb.gmra.mxu3 %v12251_v22  ;;  %v11664_v34 = vld [vmem:[#allocation11 + $0xec4] sm:$0xf] }
 0x299   :  { %6508 = vmatpush.bf16.msra.mxu0 %v8835_v48  ;;  %v10748_v48 = vld [vmem:[#allocation11 + $0xfa0] sm:$0xf0]  ;;  %v11557_v56 = vld [vmem:[#allocation11 + $0xb64] sm:$0xf0]  ;;  %6490 = vmatpush.bf16.msrb.mxu3 %v10783_v19  ;;  %v6319_v61 = vpop.f32.mrf.mxu1 }
 0x29a   :  { %v9410_v57 = vld [vmem:[#allocation11 + $0x508] sm:$0xf]  ;;  %v10751_v6 = vor.u32 %v11688_v3, %v10748_v48  ;;  %v10211_v46 = vor.u32 %v11557_v56, %v10210_v15  ;;  %v10652_v63 = vld [vmem:[#allocation11 + $0xee0] sm:$0xf0]  ;;  %v6330_v3 = vpop.f32.mrf.mxu2 }
 0x29b   :  { %6521 = vmatpush.bf16.msra.mxu1 %v9091_v14  ;;  %6484 = vmatpush.bf16.msrb.mxu2 %v10303_v9  ;;  %v10243_v14 = vor.u32 %v11565_v44, %v10242_v12  ;;  %v11357_v58 = vld [vmem:[#allocation11 + $0x524] sm:$0xf0]  ;;  %v3719_v9 = vperm.slane %v12256_v50, 0  ;;  %v10655_v38 = vor.u32 %v11664_v34, %v10652_v63  ;;  %v11656_v19 = vld [vmem:[#allocation11 + $0xe84] sm:$0xf]  ;;  %v6343_v56 = vpop.f32.mrf.mxu3 }
 0x29c   :  { %v9411_v0 = vor.u32 %v11357_v58, %v9410_v57  ;;  %v9922_v24 = vld [vmem:[#allocation11 + $0x908] sm:$0xf]  ;;  %v6306_v57 = vpop.f32.mrf.mxu0 }
 0x29d   :  { %6509 = vmatpush.bf16.msra.mxu0 %v8803_v2  ;;  %v11485_v1 = vld [vmem:[#allocation11 + $0x924] sm:$0xf0]  ;;  %6491 = vmatpush.bf16.msrb.mxu3 %v10751_v6 }
 0x29e   :  { %6485 = vmatmul.bf16.vlgmr.msrb.gmra.mxu2 %v12241_v20  ;;  %v10178_v2 = vld [vmem:[#allocation11 + $0xb08] sm:$0xf]  ;;  %v9923_v10 = vor.u32 %v11485_v1, %v9922_v24 }
 0x29f   :  { %6522 = vmatpush.bf16.msra.mxu1 %v9059_v33  ;;  %6529 = vmatpush.bf16.msra.mxu2 %v9507_v23  ;;  %v11549_v4 = vld [vmem:[#allocation11 + $0xb24] sm:$0xf0] }
 0x2a0   :  { %v9378_v53 = vld [vmem:[#allocation11 + $0x4c8] sm:$0xf]  ;;  %v10179_v49 = vor.u32 %v11549_v4, %v10178_v2  ;;  %v11648_v2 = vld [vmem:[#allocation11 + $0xe44] sm:$0xf] }
 0x2a1   :  { %6510 = vmatpush.bf16.msra.mxu0 %v8771_v28  ;;  %v11349_v33 = vld [vmem:[#allocation11 + $0x4e4] sm:$0xf0]  ;;  %v6305_v28 = vadd.f32 %v6304_v55, %v3719_v9  ;;  %6492 = vmatpush.bf16.msrb.mxu3 %v10719_v27 }
 0x2a2   :  { %v9379_v13 = vor.u32 %v11349_v33, %v9378_v53  ;;  %v9890_v23 = vld [vmem:[#allocation11 + $0x8c8] sm:$0xf]  ;;  %v10588_v33 = vld [vmem:[#allocation11 + $0xe60] sm:$0xf0] }
 0x2a3   :  { %6523 = vmatpush.bf16.msra.mxu1 %v9027_v31  ;;  %6530 = vmatpush.bf16.msra.mxu2 %v9475_v8  ;;  %v11477_v39 = vld [vmem:[#allocation11 + $0x8e4] sm:$0xf0]  ;;  %v10687_v31 = vor.u32 %v11672_v30, %v10684_v11  ;;  %v6318_v40 = vadd.f32 %v6317_v29, %v6305_v28  ;;  %v11640_v29 = vld [vmem:[#allocation11 + $0xe04] sm:$0xf] }
 0x2a4   :  { %6511 = vmatmul.bf16.vlgmr.msra.gmra.mxu0 %v12193_v36  ;;  %v10146_v60 = vld [vmem:[#allocation11 + $0xac8] sm:$0xf] }
 0x2a5   :  { %6555 = vmatpush.bf16.msrb.mxu0 %v10019_v32  ;;  %v11541_v21 = vld [vmem:[#allocation11 + $0xae4] sm:$0xf0]  ;;  %v9891_v32 = vor.u32 %v11477_v39, %v9890_v23  ;;  %6493 = vmatpush.bf16.msrb.mxu3 %v10687_v31  ;;  %v6331_v15 = vadd.f32 %v6330_v3, %v6318_v40  ;;  %v11313_v23 = vld [vmem:[#allocation11 + $0x3cc] sm:$0xf]  ;;  %v10556_v31 = vld [vmem:[#allocation11 + $0xe20] sm:$0xf0] }
 0x2a6   :  { %6524 = vmatmul.bf16.vlgmr.msra.gmra.mxu1 %v12195_v18  ;;  %v9346_v25 = vld [vmem:[#allocation11 + $0x488] sm:$0xf]  ;;  %v10147_v41 = vor.u32 %v11541_v21, %v10146_v60  ;;  %v9252_v39 = vld [vmem:[#allocation11 + $0x3e8] sm:$0xf0]  ;;  %v10591_v60 = vor.u32 %v11648_v2, %v10588_v33 }
 0x2a7   :  { %6568 = vmatpush.bf16.msrb.mxu1 %v10275_v42  ;;  %6531 = vmatpush.bf16.msra.mxu2 %v9443_v51  ;;  %v11341_v7 = vld [vmem:[#allocation11 + $0x4a4] sm:$0xf0]  ;;  %v9255_v63 = vor.u32 %v11313_v23, %v9252_v39  ;;  %v11289_v2 = vld [vmem:[#allocation11 + $0x30c] sm:$0xf] }
 0x2a8   :  { %v9347_v42 = vor.u32 %v11341_v7, %v9346_v25  ;;  %v9858_v8 = vld [vmem:[#allocation11 + $0x888] sm:$0xf]  ;;  %6446 = vmatmul.bf16.vlgmr.msra.gmra.mxu3 %v12199_v5  ;;  %v6332_v25 = vpop.f32.mrf.mxu2  ;;  %v8868_v23 = vld [vmem:[#allocation11 + $0xe8] sm:$0xf0] }
 0x2a9   :  { %6556 = vmatpush.bf16.msrb.mxu0 %v9987_v26  ;;  %v11469_v43 = vld [vmem:[#allocation11 + $0x8a4] sm:$0xf0]  ;;  %v10620_v26 = vld [vmem:[#allocation11 + $0xea0] sm:$0xf0]  ;;  %6494 = vmatpush.bf16.msrb.mxu3 %v10655_v38  ;;  %v11281_v39 = vld [vmem:[#allocation11 + $0x2cc] sm:$0xf] }
 0x2aa   :  { %v10114_v35 = vld [vmem:[#allocation11 + $0xa88] sm:$0xf]  ;;  %v9859_v47 = vor.u32 %v11469_v43, %v9858_v8  ;;  %v10623_v24 = vor.u32 %v11656_v19, %v10620_v26  ;;  %v8964_v43 = vld [vmem:[#allocation11 + $0x1a8] sm:$0xf0] }
 0x2ab   :  { %6569 = vmatpush.bf16.msrb.mxu1 %v10243_v14  ;;  %6532 = vmatpush.bf16.msra.mxu2 %v9411_v0  ;;  %v11533_v12 = vld [vmem:[#allocation11 + $0xaa4] sm:$0xf0]  ;;  %v12260_v0 = vadd.f32 %v6343_v56, %v6331_v15  ;;  %v9188_v15 = vld [vmem:[#allocation11 + $0x368] sm:$0xf0] }
 0x2ac   :  { %v9314_v44 = vld [vmem:[#allocation11 + $0x448] sm:$0xf]  ;;  %v10115_v48 = vor.u32 %v11533_v12, %v10114_v35  ;;  %v11305_v35 = vld [vmem:[#allocation11 + $0x38c] sm:$0xf] }
 0x2ad   :  { %6557 = vmatpush.bf16.msrb.mxu0 %v9955_v59  ;;  %v11333_v45 = vld [vmem:[#allocation11 + $0x464] sm:$0xf0]  ;;  %6495 = vmatpush.bf16.msrb.mxu3 %v10623_v24  ;;  %v9220_v12 = vld [vmem:[#allocation11 + $0x3a8] sm:$0xf0] }
 0x2ae   :  { %v9315_v14 = vor.u32 %v11333_v45, %v9314_v44  ;;  %v9826_v51 = vld [vmem:[#allocation11 + $0x848] sm:$0xf]  ;;  %v10559_v44 = vor.u32 %v11640_v29, %v10556_v31  ;;  %v9223_v26 = vor.u32 %v11305_v35, %v9220_v12  ;;  %v9092_v35 = vld [vmem:[#allocation11 + $0x2a8] sm:$0xf0] }
 0x2af   :  { %6570 = vmatpush.bf16.msrb.mxu1 %v10211_v46  ;;  %6533 = vmatpush.bf16.msra.mxu2 %v9379_v13  ;;  %v11461_v52 = vld [vmem:[#allocation11 + $0x864] sm:$0xf0]  ;;  %v8996_v13 = vld [vmem:[#allocation11 + $0x1e8] sm:$0xf0] }
 0x2b0   :  { %v10082_v54 = vld [vmem:[#allocation11 + $0xa48] sm:$0xf]  ;;  %v9827_v1 = vor.u32 %v11461_v52, %v9826_v51  ;;  %v8932_v52 = vld [vmem:[#allocation11 + $0x168] sm:$0xf0] }
 0x2b1   :  { %6558 = vmatpush.bf16.msrb.mxu0 %v9923_v10  ;;  %v11525_v58 = vld [vmem:[#allocation11 + $0xa64] sm:$0xf0]  ;;  %6496 = vmatpush.bf16.msrb.mxu3 %v10591_v60  ;;  %v9124_v60 = vld [vmem:[#allocation11 + $0x2e8] sm:$0xf0] }
 0x2b2   :  { %v9282_v6 = vld [vmem:[#allocation11 + $0x408] sm:$0xf]  ;;  %v10083_v4 = vor.u32 %v11525_v58, %v10082_v54  ;;  %v11297_v54 = vld [vmem:[#allocation11 + $0x34c] sm:$0xf] }
 0x2b3   :  { %6571 = vmatpush.bf16.msrb.mxu1 %v10179_v49  ;;  %6534 = vmatpush.bf16.msra.mxu2 %v9347_v42  ;;  %v11325_v59 = vld [vmem:[#allocation11 + $0x424] sm:$0xf0]  ;;  %v11249_v49 = vld [vmem:[#allocation11 + $0x1cc] sm:$0xf] }
 0x2b4   :  { %v10530_v62 = vld [vmem:[#allocation11 + $0xdc8] sm:$0xf]  ;;  %v9283_v53 = vor.u32 %v11325_v59, %v9282_v6  ;;  %v8999_v34 = vor.u32 %v11249_v49, %v8996_v13  ;;  %v11241_v42 = vld [vmem:[#allocation11 + $0x18c] sm:$0xf]  ;;  %v9191_v59 = vor.u32 %v11297_v54, %v9188_v15 }
 0x2b5   :  { %6559 = vmatpush.bf16.msrb.mxu0 %v9891_v32  ;;  %v11637_v46 = vld [vmem:[#allocation11 + $0xde4] sm:$0xf0]  ;;  %v6345_v32 = vpop.f32.mrf.mxu3  ;;  %v8967_v19 = vor.u32 %v11241_v42, %v8964_v43  ;;  %6497 = vmatpush.bf16.msrb.mxu3 %v10559_v44  ;;  %v11217_v49 = vld [vmem:[#allocation11 + $0xcc] sm:$0xf] }
 0x2b6   :  { %v9794_v9 = vld [vmem:[#allocation11 + $0x808] sm:$0xf]  ;;  %v10531_v10 = vor.u32 %v11637_v46, %v10530_v62  ;;  %v11225_v46 = vld [vmem:[#allocation11 + $0x10c] sm:$0xf]  ;;  %v8871_v31 = vor.u32 %v11217_v49, %v8868_v23  ;;  %v9127_v32 = vor.u32 %v11281_v39, %v9124_v60 }
 0x2b7   :  { %6572 = vmatpush.bf16.msrb.mxu1 %v10147_v41  ;;  %6535 = vmatpush.bf16.msra.mxu2 %v9315_v14  ;;  %v11453_v27 = vld [vmem:[#allocation11 + $0x824] sm:$0xf0]  ;;  %v11233_v14 = vld [vmem:[#allocation11 + $0x14c] sm:$0xf] }
 0x2b8   :  { %v10050_v30 = vld [vmem:[#allocation11 + $0xa08] sm:$0xf]  ;;  %v9795_v7 = vor.u32 %v11453_v27, %v9794_v9  ;;  %v8935_v6 = vor.u32 %v11233_v14, %v8932_v52  ;;  %6498 = vmatmul.bf16.vlgmr.msrb.gmra.mxu3 %v12251_v22  ;;  %v11273_v43 = vld [vmem:[#allocation11 + $0x28c] sm:$0xf] }
 0x2b9   :  { %6560 = vmatpush.bf16.msrb.mxu0 %v9859_v47  ;;  %v11517_v11 = vld [vmem:[#allocation11 + $0xa24] sm:$0xf0]  ;;  %v11265_v14 = vld [vmem:[#allocation11 + $0x24c] sm:$0xf] }
 0x2ba   :  { %v10498_v55 = vld [vmem:[#allocation11 + $0xd88] sm:$0xf]  ;;  %v10051_v28 = vor.u32 %v11517_v11, %v10050_v30  ;;  %v11369_v49 = vld [vmem:[#allocation11 + $0x58c] sm:$0xf] }
 0x2bb   :  { %6573 = vmatpush.bf16.msrb.mxu1 %v10115_v48  ;;  %v11629_v21 = vld [vmem:[#allocation11 + $0xda4] sm:$0xf0]  ;;  %6536 = vmatpush.bf16.msra.mxu2 %v9283_v53 }
 0x2bc   :  { %v9762_v40 = vld [vmem:[#allocation11 + $0x7c8] sm:$0xf]  ;;  %v10499_v8 = vor.u32 %v11629_v21, %v10498_v55 }
 0x2bd   :  { %6561 = vmatpush.bf16.msrb.mxu0 %v9827_v1  ;;  %v11445_v41 = vld [vmem:[#allocation11 + $0x7e4] sm:$0xf0]  ;;  %v8900_v1 = vld [vmem:[#allocation11 + $0x128] sm:$0xf0] }
 0x2be   :  { %6537 = vmatmul.bf16.vlgmr.msra.gmra.mxu2 %v12197_v37  ;;  %v10466_v45 = vld [vmem:[#allocation11 + $0xd48] sm:$0xf]  ;;  %v9763_v47 = vor.u32 %v11445_v41, %v9762_v40  ;;  %v8903_v27 = vor.u32 %v11225_v46, %v8900_v1  ;;  %v11209_v40 = vld [vmem:[#allocation11 + $0x8c] sm:$0xf] }
 0x2bf   :  { %6574 = vmatpush.bf16.msrb.mxu1 %v10083_v4  ;;  %6581 = vmatpush.bf16.msrb.mxu2 %v10531_v10  ;;  %v11621_v38 = vld [vmem:[#allocation11 + $0xd64] sm:$0xf0]  ;;  %v9156_v4 = vld [vmem:[#allocation11 + $0x328] sm:$0xf0] }
 0x2c0   :  { %v9730_v3 = vld [vmem:[#allocation11 + $0x788] sm:$0xf]  ;;  %v10467_v51 = vor.u32 %v11621_v38, %v10466_v45  ;;  %6542 = vmatpush.bf16.msra.mxu3 %v9763_v47  ;;  %v9159_v10 = vor.u32 %v11289_v2, %v9156_v4  ;;  %v9095_v38 = vor.u32 %v11273_v43, %v9092_v35  ;;  %v8772_v2 = vld [vmem:[#allocation11 + $0x28] sm:$0xf0] }
 0x2c1   :  { %6562 = vmatpush.bf16.msrb.mxu0 %v9795_v7  ;;  %v11437_v48 = vld [vmem:[#allocation11 + $0x7a4] sm:$0xf0]  ;;  %v6356_v55 = vpop.f32.mrf.mxu0  ;;  %v11257_v4 = vld [vmem:[#allocation11 + $0x20c] sm:$0xf] }
 0x2c2   :  { %v10434_v56 = vld [vmem:[#allocation11 + $0xd08] sm:$0xf]  ;;  %v9731_v58 = vor.u32 %v11437_v48, %v9730_v3  ;;  %v6357_v7 = vadd.f32 %v6356_v55, %v12260_v0  ;;  %v8804_v48 = vld [vmem:[#allocation11 + $0x68] sm:$0xf0] }
 0x2c3   :  { %6575 = vmatpush.bf16.msrb.mxu1 %v10051_v28  ;;  %6582 = vmatpush.bf16.msrb.mxu2 %v10499_v8  ;;  %v11613_v57 = vld [vmem:[#allocation11 + $0xd24] sm:$0xf0]  ;;  %v6369_v28 = vpop.f32.mrf.mxu1  ;;  %v8836_v8 = vld [vmem:[#allocation11 + $0xa8] sm:$0xf0] }
 0x2c4   :  { %6563 = vmatmul.bf16.vlgmr.msrb.gmra.mxu0 %v12216_v16  ;;  %v9698_v61 = vld [vmem:[#allocation11 + $0x748] sm:$0xf]  ;;  %v10435_v24 = vor.u32 %v11613_v57, %v10434_v56  ;;  %6543 = vmatpush.bf16.msra.mxu3 %v9731_v58  ;;  %v12267_v41 = vadd.f32 %v6369_v28, %v6357_v7  ;;  %v8839_v45 = vor.u32 %v11209_v40, %v8836_v8  ;;  %v11377_v58 = vld [vmem:[#allocation11 + $0x5cc] sm:$0xf] }
 0x2c5   :  { %6607 = vmatpush.bf16.msra.mxu0 %v8999_v34  ;;  %v11429_v62 = vld [vmem:[#allocation11 + $0x764] sm:$0xf0]  ;;  %v10244_v40 = vld [vmem:[#allocation11 + $0xba8] sm:$0xf0] }
 0x2c6   :  { %6576 = vmatmul.bf16.vlgmr.msrb.gmra.mxu1 %v12214_v17  ;;  %v10402_v53 = vld [vmem:[#allocation11 + $0xcc8] sm:$0xf]  ;;  %v9699_v9 = vor.u32 %v11429_v62, %v9698_v61  ;;  %v11361_v8 = vld [vmem:[#allocation11 + $0x54c] sm:$0xf] }
 0x2c7   :  { %6620 = vmatpush.bf16.msra.mxu1 %v9255_v63  ;;  %6583 = vmatpush.bf16.msrb.mxu2 %v10467_v51  ;;  %v11605_v33 = vld [vmem:[#allocation11 + $0xce4] sm:$0xf0]  ;;  %v9060_v51 = vld [vmem:[#allocation11 + $0x268] sm:$0xf0] }
 0x2c8   :  { %v9666_v30 = vld [vmem:[#allocation11 + $0x708] sm:$0xf]  ;;  %v10403_v13 = vor.u32 %v11605_v33, %v10402_v53  ;;  %6544 = vmatpush.bf16.msra.mxu3 %v9699_v9  ;;  %v9063_v61 = vor.u32 %v11265_v14, %v9060_v51  ;;  %v9028_v53 = vld [vmem:[#allocation11 + $0x228] sm:$0xf0] }
 0x2c9   :  { %6608 = vmatpush.bf16.msra.mxu0 %v8967_v19  ;;  %v11421_v11 = vld [vmem:[#allocation11 + $0x724] sm:$0xf0]  ;;  %v6358_v52 = vpop.f32.mrf.mxu0  ;;  %v11505_v9 = vld [vmem:[#allocation11 + $0x9cc] sm:$0xf]  ;;  %v9031_v55 = vor.u32 %v11257_v4, %v9028_v53 }
 0x2ca   :  { %v10370_v21 = vld [vmem:[#allocation11 + $0xc88] sm:$0xf]  ;;  %v9667_v29 = vor.u32 %v11421_v11, %v9666_v30  ;;  %v10276_v11 = vld [vmem:[#allocation11 + $0xbe8] sm:$0xf0] }
 0x2cb   :  { %6621 = vmatpush.bf16.msra.mxu1 %v9223_v26  ;;  %6584 = vmatpush.bf16.msrb.mxu2 %v10435_v24  ;;  %v11597_v25 = vld [vmem:[#allocation11 + $0xca4] sm:$0xf0]  ;;  %v11201_v26 = vld [vmem:[#allocation11 + $0x4c] sm:$0xf]  ;;  %v6371_v56 = vpop.f32.mrf.mxu1 }
 0x2cc   :  { %v9634_v34 = vld [vmem:[#allocation11 + $0x6c8] sm:$0xf]  ;;  %v10371_v42 = vor.u32 %v11597_v25, %v10370_v21  ;;  %6545 = vmatpush.bf16.msra.mxu3 %v9667_v29  ;;  %v11193_v24 = vld [vmem:[#allocation11 + $0xc] sm:$0xf] }
 0x2cd   :  { %6609 = vmatpush.bf16.msra.mxu0 %v8935_v6  ;;  %v11413_v63 = vld [vmem:[#allocation11 + $0x6e4] sm:$0xf0]  ;;  %v9508_v6 = vld [vmem:[#allocation11 + $0x5e8] sm:$0xf0]  ;;  %v8775_v23 = vor.u32 %v11193_v24, %v8772_v2 }
 0x2ce   :  { %v10338_v12 = vld [vmem:[#allocation11 + $0xc48] sm:$0xf]  ;;  %v9635_v0 = vor.u32 %v11413_v63, %v9634_v34  ;;  %v9511_v33 = vor.u32 %v11377_v58, %v9508_v6  ;;  %v11561_v63 = vld [vmem:[#allocation11 + $0xb8c] sm:$0xf] }
 0x2cf   :  { %6622 = vmatpush.bf16.msra.mxu1 %v9191_v59  ;;  %6585 = vmatpush.bf16.msrb.mxu2 %v10403_v13  ;;  %v11589_v44 = vld [vmem:[#allocation11 + $0xc64] sm:$0xf0]  ;;  %v8807_v59 = vor.u32 %v11201_v26, %v8804_v48  ;;  %v9476_v13 = vld [vmem:[#allocation11 + $0x5a8] sm:$0xf0] }
 0x2d0   :  { %v9602_v47 = vld [vmem:[#allocation11 + $0x688] sm:$0xf]  ;;  %v10339_v3 = vor.u32 %v11589_v44, %v10338_v12  ;;  %6546 = vmatpush.bf16.msra.mxu3 %v9635_v0  ;;  %v9479_v29 = vor.u32 %v11369_v49, %v9476_v13  ;;  %v9444_v43 = vld [vmem:[#allocation11 + $0x568] sm:$0xf0]  ;;  %v10247_v0 = vor.u32 %v11561_v63, %v10244_v40 }
 0x2d1   :  { %6610 = vmatpush.bf16.msra.mxu0 %v8903_v27  ;;  %v11405_v19 = vld [vmem:[#allocation11 + $0x6a4] sm:$0xf0]  ;;  %v10020_v27 = vld [vmem:[#allocation11 + $0x9e8] sm:$0xf0] }
 0x2d2   :  { %v10306_v54 = vld [vmem:[#allocation11 + $0xc08] sm:$0xf]  ;;  %v9603_v57 = vor.u32 %v11405_v19, %v9602_v47  ;;  %v10023_v21 = vor.u32 %v11505_v9, %v10020_v27  ;;  %v9447_v47 = vor.u32 %v11361_v8, %v9444_v43  ;;  %v11553_v19 = vld [vmem:[#allocation11 + $0xb4c] sm:$0xf] }
 0x2d3   :  { %6623 = vmatpush.bf16.msra.mxu1 %v9159_v10  ;;  %6586 = vmatpush.bf16.msrb.mxu2 %v10371_v42  ;;  %v11581_v15 = vld [vmem:[#allocation11 + $0xc24] sm:$0xf0]  ;;  %v11569_v10 = vld [vmem:[#allocation11 + $0xbcc] sm:$0xf] }
 0x2d4   :  { %v9570_v62 = vld [vmem:[#allocation11 + $0x648] sm:$0xf]  ;;  %v10307_v1 = vor.u32 %v11581_v15, %v10306_v54  ;;  %6547 = vmatpush.bf16.msra.mxu3 %v9603_v57  ;;  %v10279_v28 = vor.u32 %v11569_v10, %v10276_v11  ;;  %v10212_v26 = vld [vmem:[#allocation11 + $0xb68] sm:$0xf0] }
 0x2d5   :  { %6611 = vmatpush.bf16.msra.mxu0 %v8871_v31  ;;  %v11397_v46 = vld [vmem:[#allocation11 + $0x664] sm:$0xf0]  ;;  %v11497_v31 = vld [vmem:[#allocation11 + $0x98c] sm:$0xf]  ;;  %v10215_v15 = vor.u32 %v11553_v19, %v10212_v26 }
 0x2d6   :  { %v9571_v30 = vor.u32 %v11397_v46, %v9570_v62  ;;  %v9538_v39 = vld [vmem:[#allocation11 + $0x608] sm:$0xf]  ;;  %v11353_v48 = vld [vmem:[#allocation11 + $0x50c] sm:$0xf] }
 0x2d7   :  { %6624 = vmatpush.bf16.msra.mxu1 %v9127_v32  ;;  %6587 = vmatpush.bf16.msrb.mxu2 %v10339_v3  ;;  %v11389_v60 = vld [vmem:[#allocation11 + $0x624] sm:$0xf0]  ;;  %v9988_v32 = vld [vmem:[#allocation11 + $0x9a8] sm:$0xf0] }
 0x2d8   :  { %v10786_v25 = vld [vmem:[#allocation11 + $0xfc8] sm:$0xf]  ;;  %6548 = vmatpush.bf16.msra.mxu3 %v9571_v30  ;;  %v9539_v34 = vor.u32 %v11389_v60, %v9538_v39  ;;  %v9991_v35 = vor.u32 %v11497_v31, %v9988_v32  ;;  %v9412_v14 = vld [vmem:[#allocation11 + $0x528] sm:$0xf0] }
 0x2d9   :  { %6612 = vmatpush.bf16.msra.mxu0 %v8839_v45  ;;  %v11701_v7 = vld [vmem:[#allocation11 + $0xfe4] sm:$0xf0]  ;;  %v11489_v45 = vld [vmem:[#allocation11 + $0x94c] sm:$0xf]  ;;  %v9415_v58 = vor.u32 %v11353_v48, %v9412_v14 }
 0x2da   :  { %v10787_v42 = vor.u32 %v11701_v7, %v10786_v25  ;;  %v10754_v12 = vld [vmem:[#allocation11 + $0xf88] sm:$0xf]  ;;  %v11481_v56 = vld [vmem:[#allocation11 + $0x90c] sm:$0xf] }
 0x2db   :  { %6625 = vmatpush.bf16.msra.mxu1 %v9095_v38  ;;  %6588 = vmatpush.bf16.msrb.mxu2 %v10307_v1  ;;  %v11693_v44 = vld [vmem:[#allocation11 + $0xfa4] sm:$0xf0]  ;;  %v9956_v38 = vld [vmem:[#allocation11 + $0x968] sm:$0xf0] }
 0x2dc   :  { %6549 = vmatpush.bf16.msra.mxu3 %v9539_v34  ;;  %v10755_v3 = vor.u32 %v11693_v44, %v10754_v12  ;;  %v9959_v51 = vor.u32 %v11489_v45, %v9956_v38  ;;  %v10722_v52 = vld [vmem:[#allocation11 + $0xf48] sm:$0xf]  ;;  %v9924_v57 = vld [vmem:[#allocation11 + $0x928] sm:$0xf0] }
 0x2dd   :  { %6613 = vmatpush.bf16.msra.mxu0 %v8807_v59  ;;  %v11685_v54 = vld [vmem:[#allocation11 + $0xf64] sm:$0xf0]  ;;  %v11545_v6 = vld [vmem:[#allocation11 + $0xb0c] sm:$0xf]  ;;  %v9927_v1 = vor.u32 %v11481_v56, %v9924_v57 }
 0x2de   :  { %6589 = vmatmul.bf16.vlgmr.msrb.gmra.mxu2 %v12241_v20  ;;  %v10180_v59 = vld [vmem:[#allocation11 + $0xb28] sm:$0xf0]  ;;  %v10723_v62 = vor.u32 %v11685_v54, %v10722_v52  ;;  %v10690_v2 = vld [vmem:[#allocation11 + $0xf08] sm:$0xf] }
 0x2df   :  { %6626 = vmatpush.bf16.msra.mxu1 %v9063_v61  ;;  %6633 = vmatpush.bf16.msra.mxu2 %v9511_v33  ;;  %v3720_v61 = vperm.slane %v12256_v50, 1  ;;  %v11345_v46 = vld [vmem:[#allocation11 + $0x4cc] sm:$0xf]  ;;  %v11677_v4 = vld [vmem:[#allocation11 + $0xf24] sm:$0xf0]  ;;  %v10183_v53 = vor.u32 %v11545_v6, %v10180_v59 }
 0x2e0   :  { %6594 = vmatpush.bf16.msrb.mxu3 %v10787_v42  ;;  %v9380_v24 = vld [vmem:[#allocation11 + $0x4e8] sm:$0xf0]  ;;  %v10691_v50 = vor.u32 %v11677_v4, %v10690_v2  ;;  %v10626_v43 = vld [vmem:[#allocation11 + $0xe88] sm:$0xf]  ;;  %v9258_v4 = vld [vmem:[#allocation11 + $0x3d0] sm:$0xf] }
 0x2e1   :  { %6614 = vmatpush.bf16.msra.mxu0 %v8775_v23  ;;  %6550 = vmatmul.bf16.vlgmr.msra.gmra.mxu3 %v12199_v5  ;;  %v11473_v33 = vld [vmem:[#allocation11 + $0x8cc] sm:$0xf]  ;;  %v6408_v27 = vpop.f32.mrf.mxu0  ;;  %v9383_v10 = vor.u32 %v11345_v46, %v9380_v24  ;;  %v11653_v56 = vld [vmem:[#allocation11 + $0xe64] sm:$0xf0]  ;;  %v9002_v46 = vld [vmem:[#allocation11 + $0x1d0] sm:$0xf] }
 0x2e2   :  { %v9892_v9 = vld [vmem:[#allocation11 + $0x8e8] sm:$0xf0]  ;;  %v6409_v49 = vadd.f32 %v6408_v27, %v3720_v61  ;;  %v11254_v24 = vld [vmem:[#allocation11 + $0x1ec] sm:$0xf0] }
 0x2e3   :  { %6627 = vmatpush.bf16.msra.mxu1 %v9031_v55  ;;  %6634 = vmatpush.bf16.msra.mxu2 %v9479_v29  ;;  %v11537_v30 = vld [vmem:[#allocation11 + $0xacc] sm:$0xf]  ;;  %v6421_v13 = vpop.f32.mrf.mxu1  ;;  %v9895_v60 = vor.u32 %v11473_v33, %v9892_v9  ;;  %v10658_v55 = vld [vmem:[#allocation11 + $0xec8] sm:$0xf] }
 0x2e4   :  { %6615 = vmatmul.bf16.vlgmr.msra.gmra.mxu0 %v12193_v36  ;;  %6595 = vmatpush.bf16.msrb.mxu3 %v10755_v3  ;;  %v10148_v11 = vld [vmem:[#allocation11 + $0xae8] sm:$0xf0]  ;;  %v12274_v25 = vadd.f32 %v6421_v13, %v6409_v49  ;;  %v9003_v49 = vor.u32 %v11254_v24, %v9002_v46  ;;  %v8874_v46 = vld [vmem:[#allocation11 + $0xd0] sm:$0xf] }
 0x2e5   :  { %6659 = vmatpush.bf16.msrb.mxu0 %v10023_v21  ;;  %v11337_v23 = vld [vmem:[#allocation11 + $0x48c] sm:$0xf]  ;;  %v11669_v21 = vld [vmem:[#allocation11 + $0xee4] sm:$0xf0]  ;;  %v10151_v7 = vor.u32 %v11537_v30, %v10148_v11 }
 0x2e6   :  { %6628 = vmatmul.bf16.vlgmr.msra.gmra.mxu1 %v12195_v18  ;;  %v9348_v39 = vld [vmem:[#allocation11 + $0x4a8] sm:$0xf0]  ;;  %v10659_v63 = vor.u32 %v11669_v21, %v10658_v55  ;;  %v11645_v30 = vld [vmem:[#allocation11 + $0xe24] sm:$0xf0]  ;;  %v11246_v21 = vld [vmem:[#allocation11 + $0x1ac] sm:$0xf0] }
 0x2e7   :  { %6672 = vmatpush.bf16.msrb.mxu1 %v10279_v28  ;;  %6635 = vmatpush.bf16.msra.mxu2 %v9447_v47  ;;  %v11465_v28 = vld [vmem:[#allocation11 + $0x88c] sm:$0xf]  ;;  %v9351_v31 = vor.u32 %v11337_v23, %v9348_v39  ;;  %v8970_v39 = vld [vmem:[#allocation11 + $0x190] sm:$0xf] }
 0x2e8   :  { %6596 = vmatpush.bf16.msrb.mxu3 %v10723_v62  ;;  %v9860_v29 = vld [vmem:[#allocation11 + $0x8a8] sm:$0xf0] }
 0x2e9   :  { %6660 = vmatpush.bf16.msrb.mxu0 %v9991_v35  ;;  %v11529_v32 = vld [vmem:[#allocation11 + $0xa8c] sm:$0xf]  ;;  %v9863_v8 = vor.u32 %v11465_v28, %v9860_v29  ;;  %v11661_v35 = vld [vmem:[#allocation11 + $0xea4] sm:$0xf0]  ;;  %v6410_v45 = vpop.f32.mrf.mxu0  ;;  %v11310_v28 = vld [vmem:[#allocation11 + $0x3ac] sm:$0xf0] }
 0x2ea   :  { %v10116_v34 = vld [vmem:[#allocation11 + $0xaa8] sm:$0xf0]  ;;  %v10627_v3 = vor.u32 %v11661_v35, %v10626_v43  ;;  %v11238_v35 = vld [vmem:[#allocation11 + $0x16c] sm:$0xf0] }
 0x2eb   :  { %6673 = vmatpush.bf16.msrb.mxu1 %v10247_v0  ;;  %6636 = vmatpush.bf16.msra.mxu2 %v9415_v58  ;;  %v11329_v40 = vld [vmem:[#allocation11 + $0x44c] sm:$0xf]  ;;  %v10119_v12 = vor.u32 %v11529_v32, %v10116_v34  ;;  %v6423_v26 = vpop.f32.mrf.mxu1  ;;  %v8971_v34 = vor.u32 %v11246_v21, %v8970_v39  ;;  %v11214_v39 = vld [vmem:[#allocation11 + $0xac] sm:$0xf0] }
 0x2ec   :  { %6597 = vmatpush.bf16.msrb.mxu3 %v10691_v50  ;;  %v9316_v42 = vld [vmem:[#allocation11 + $0x468] sm:$0xf0] }
 0x2ed   :  { %6661 = vmatpush.bf16.msrb.mxu0 %v9959_v51  ;;  %v11457_v44 = vld [vmem:[#allocation11 + $0x84c] sm:$0xf]  ;;  %v9319_v38 = vor.u32 %v11329_v40, %v9316_v42 }
 0x2ee   :  { %v9828_v0 = vld [vmem:[#allocation11 + $0x868] sm:$0xf0] }
 0x2ef   :  { %6674 = vmatpush.bf16.msrb.mxu1 %v10215_v15  ;;  %6637 = vmatpush.bf16.msra.mxu2 %v9383_v10  ;;  %v11521_v47 = vld [vmem:[#allocation11 + $0xa4c] sm:$0xf]  ;;  %v9831_v52 = vor.u32 %v11457_v44, %v9828_v0  ;;  %v10594_v15 = vld [vmem:[#allocation11 + $0xe48] sm:$0xf]  ;;  %v11302_v44 = vld [vmem:[#allocation11 + $0x36c] sm:$0xf0] }
 0x2f0   :  { %v10084_v19 = vld [vmem:[#allocation11 + $0xa68] sm:$0xf0]  ;;  %6598 = vmatpush.bf16.msrb.mxu3 %v10659_v63  ;;  %v10595_v2 = vor.u32 %v11653_v56, %v10594_v15  ;;  %v10562_v10 = vld [vmem:[#allocation11 + $0xe08] sm:$0xf] }
 0x2f1   :  { %6662 = vmatpush.bf16.msrb.mxu0 %v9927_v1  ;;  %v11321_v48 = vld [vmem:[#allocation11 + $0x40c] sm:$0xf]  ;;  %v10087_v57 = vor.u32 %v11521_v47, %v10084_v19  ;;  %v10563_v55 = vor.u32 %v11645_v30, %v10562_v10 }
 0x2f2   :  { %v9284_v14 = vld [vmem:[#allocation11 + $0x428] sm:$0xf0] }
 0x2f3   :  { %6675 = vmatpush.bf16.msrb.mxu1 %v10183_v53  ;;  %6638 = vmatpush.bf16.msra.mxu2 %v9351_v31  ;;  %v11633_v51 = vld [vmem:[#allocation11 + $0xdcc] sm:$0xf]  ;;  %v9287_v61 = vor.u32 %v11321_v48, %v9284_v14  ;;  %v11318_v53 = vld [vmem:[#allocation11 + $0x3ec] sm:$0xf0] }
 0x2f4   :  { %v10532_v54 = vld [vmem:[#allocation11 + $0xde8] sm:$0xf0]  ;;  %6599 = vmatpush.bf16.msrb.mxu3 %v10627_v3  ;;  %v9259_v13 = vor.u32 %v11318_v53, %v9258_v4  ;;  %v8906_v48 = vld [vmem:[#allocation11 + $0x110] sm:$0xf] }
 0x2f5   :  { %6663 = vmatpush.bf16.msrb.mxu0 %v9895_v60  ;;  %v11449_v58 = vld [vmem:[#allocation11 + $0x80c] sm:$0xf]  ;;  %v10535_v1 = vor.u32 %v11633_v51, %v10532_v54  ;;  %v11230_v51 = vld [vmem:[#allocation11 + $0x12c] sm:$0xf0] }
 0x2f6   :  { %v9796_v6 = vld [vmem:[#allocation11 + $0x828] sm:$0xf0]  ;;  %v11294_v54 = vld [vmem:[#allocation11 + $0x32c] sm:$0xf0] }
 0x2f7   :  { %6676 = vmatpush.bf16.msrb.mxu1 %v10151_v7  ;;  %v11513_v59 = vld [vmem:[#allocation11 + $0xa0c] sm:$0xf]  ;;  %6639 = vmatpush.bf16.msra.mxu2 %v9319_v38  ;;  %v9799_v9 = vor.u32 %v11449_v58, %v9796_v6  ;;  %v9226_v7 = vld [vmem:[#allocation11 + $0x390] sm:$0xf]  ;;  %v12280_v58 = vpop.f32.mrf.mxu2  ;;  %v8907_v6 = vor.u32 %v11230_v51, %v8906_v48 }
 0x2f8   :  { %v10052_v62 = vld [vmem:[#allocation11 + $0xa28] sm:$0xf0]  ;;  %6600 = vmatpush.bf16.msrb.mxu3 %v10595_v2  ;;  %v9227_v63 = vor.u32 %v11310_v28, %v9226_v7  ;;  %v11222_v2 = vld [vmem:[#allocation11 + $0xec] sm:$0xf0] }
 0x2f9   :  { %6664 = vmatpush.bf16.msrb.mxu0 %v9863_v8  ;;  %v11625_v33 = vld [vmem:[#allocation11 + $0xd8c] sm:$0xf]  ;;  %v10055_v11 = vor.u32 %v11513_v59, %v10052_v62  ;;  %v8938_v8 = vld [vmem:[#allocation11 + $0x150] sm:$0xf]  ;;  %v8875_v30 = vor.u32 %v11222_v2, %v8874_v46 }
 0x2fa   :  { %v10500_v27 = vld [vmem:[#allocation11 + $0xda8] sm:$0xf0]  ;;  %v8939_v47 = vor.u32 %v11238_v35, %v8938_v8  ;;  %v9130_v4 = vld [vmem:[#allocation11 + $0x2d0] sm:$0xf] }
 0x2fb   :  { %6677 = vmatpush.bf16.msrb.mxu1 %v10119_v12  ;;  %6640 = vmatpush.bf16.msra.mxu2 %v9287_v61  ;;  %v11441_v50 = vld [vmem:[#allocation11 + $0x7cc] sm:$0xf]  ;;  %v10503_v60 = vor.u32 %v11625_v33, %v10500_v27  ;;  %v9194_v12 = vld [vmem:[#allocation11 + $0x350] sm:$0xf] }
 0x2fc   :  { %v9764_v23 = vld [vmem:[#allocation11 + $0x7e8] sm:$0xf0]  ;;  %6601 = vmatpush.bf16.msrb.mxu3 %v10563_v55  ;;  %v9195_v19 = vor.u32 %v11302_v44, %v9194_v12  ;;  %v11286_v53 = vld [vmem:[#allocation11 + $0x2ec] sm:$0xf0] }
 0x2fd   :  { %6665 = vmatpush.bf16.msrb.mxu0 %v9831_v52  ;;  %v11617_v29 = vld [vmem:[#allocation11 + $0xd4c] sm:$0xf]  ;;  %v9767_v32 = vor.u32 %v11441_v50, %v9764_v23  ;;  %v9162_v52 = vld [vmem:[#allocation11 + $0x310] sm:$0xf] }
 0x2fe   :  { %v10468_v31 = vld [vmem:[#allocation11 + $0xd68] sm:$0xf0]  ;;  %6641 = vmatmul.bf16.vlgmr.msra.gmra.mxu2 %v12197_v37  ;;  %v9163_v59 = vor.u32 %v11294_v54, %v9162_v52  ;;  %v8842_v50 = vld [vmem:[#allocation11 + $0x90] sm:$0xf] }
 0x2ff   :  { %6678 = vmatpush.bf16.msrb.mxu1 %v10087_v57  ;;  %6685 = vmatpush.bf16.msrb.mxu2 %v10535_v1  ;;  %v11433_v40 = vld [vmem:[#allocation11 + $0x78c] sm:$0xf]  ;;  %v10471_v43 = vor.u32 %v11617_v29, %v10468_v31  ;;  %v11278_v55 = vld [vmem:[#allocation11 + $0x2ac] sm:$0xf0]  ;;  %v6384_v29 = vpop.f32.mrf.mxu2  ;;  %v8843_v31 = vor.u32 %v11214_v39, %v8842_v50 }
 0x300   :  { %v9732_v42 = vld [vmem:[#allocation11 + $0x7a8] sm:$0xf0]  ;;  %6646 = vmatpush.bf16.msra.mxu3 %v9767_v32  ;;  %v9066_v35 = vld [vmem:[#allocation11 + $0x250] sm:$0xf] }
 0x301   :  { %6666 = vmatpush.bf16.msrb.mxu0 %v9799_v9  ;;  %v11609_v0 = vld [vmem:[#allocation11 + $0xd0c] sm:$0xf]  ;;  %v9735_v38 = vor.u32 %v11433_v40, %v9732_v42  ;;  %6602 = vmatmul.bf16.vlgmr.msrb.gmra.mxu3 %v12251_v22  ;;  %v12282_v24 = vpop.f32.mrf.mxu0  ;;  %v8810_v40 = vld [vmem:[#allocation11 + $0x50] sm:$0xf] }
 0x302   :  { %v10436_v45 = vld [vmem:[#allocation11 + $0xd28] sm:$0xf0]  ;;  %v11270_v12 = vld [vmem:[#allocation11 + $0x26c] sm:$0xf0] }
 0x303   :  { %6679 = vmatpush.bf16.msrb.mxu1 %v10055_v11  ;;  %6686 = vmatpush.bf16.msrb.mxu2 %v10503_v60  ;;  %v11425_v26 = vld [vmem:[#allocation11 + $0x74c] sm:$0xf]  ;;  %v10439_v14 = vor.u32 %v11609_v0, %v10436_v45  ;;  %v12284_v33 = vpop.f32.mrf.mxu1  ;;  %v9131_v11 = vor.u32 %v11286_v53, %v9130_v4  ;;  %v9098_v60 = vld [vmem:[#allocation11 + $0x290] sm:$0xf] }
 0x304   :  { %6667 = vmatmul.bf16.vlgmr.msrb.gmra.mxu0 %v12216_v16  ;;  %v9700_v3 = vld [vmem:[#allocation11 + $0x768] sm:$0xf0]  ;;  %6647 = vmatpush.bf16.msra.mxu3 %v9735_v38  ;;  %v9099_v32 = vor.u32 %v11278_v55, %v9098_v60  ;;  %v8778_v51 = vld [vmem:[#allocation11 + $0x10] sm:$0xf] }
 0x305   :  { %6711 = vmatpush.bf16.msra.mxu0 %v9003_v49  ;;  %v11601_v15 = vld [vmem:[#allocation11 + $0xccc] sm:$0xf]  ;;  %v9703_v57 = vor.u32 %v11425_v26, %v9700_v3  ;;  %v9067_v3 = vor.u32 %v11270_v12, %v9066_v35  ;;  %v11198_v54 = vld [vmem:[#allocation11 + $0x2c] sm:$0xf0] }
 0x306   :  { %6680 = vmatmul.bf16.vlgmr.msrb.gmra.mxu1 %v12214_v17  ;;  %v10404_v56 = vld [vmem:[#allocation11 + $0xce8] sm:$0xf0]  ;;  %v11574_v46 = vld [vmem:[#allocation11 + $0xbec] sm:$0xf0]  ;;  %v8779_v53 = vor.u32 %v11198_v54, %v8778_v51  ;;  %v12292_v51 = vld [vmem:[#allocation13] sm:$0xff] }
 0x307   :  { %6724 = vmatpush.bf16.msra.mxu1 %v9259_v13  ;;  %6687 = vmatpush.bf16.msrb.mxu2 %v10471_v43  ;;  %v11417_v61 = vld [vmem:[#allocation11 + $0x70c] sm:$0xf]  ;;  %v10407_v1 = vor.u32 %v11601_v15, %v10404_v56  ;;  %v11206_v43 = vld [vmem:[#allocation11 + $0x6c] sm:$0xf0]  ;;  %v12286_v4 = vpop.f32.mrf.mxu2 }
 0x308   :  { %v9668_v62 = vld [vmem:[#allocation11 + $0x728] sm:$0xf0]  ;;  %6648 = vmatpush.bf16.msra.mxu3 %v9703_v57  ;;  %v8811_v26 = vor.u32 %v11206_v43, %v8810_v40  ;;  %v9034_v15 = vld [vmem:[#allocation11 + $0x210] sm:$0xf] }
 0x309   :  { %6712 = vmatpush.bf16.msra.mxu0 %v8971_v34  ;;  %v11593_v9 = vld [vmem:[#allocation11 + $0xc8c] sm:$0xf]  ;;  %v9671_v10 = vor.u32 %v11417_v61, %v9668_v62  ;;  %v6462_v42 = vpop.f32.mrf.mxu0  ;;  %v11262_v56 = vld [vmem:[#allocation11 + $0x22c] sm:$0xf0] }
 0x30a   :  { %v10372_v27 = vld [vmem:[#allocation11 + $0xca8] sm:$0xf0]  ;;  %v10282_v61 = vld [vmem:[#allocation11 + $0xbd0] sm:$0xf] }
 0x30b   :  { %6725 = vmatpush.bf16.msra.mxu1 %v9227_v63  ;;  %6688 = vmatpush.bf16.msrb.mxu2 %v10439_v14  ;;  %v11409_v49 = vld [vmem:[#allocation11 + $0x6cc] sm:$0xf]  ;;  %v10375_v23 = vor.u32 %v11593_v9, %v10372_v27  ;;  %v6475_v44 = vpop.f32.mrf.mxu1  ;;  %v11374_v2 = vld [vmem:[#allocation11 + $0x5ac] sm:$0xf0] }
 0x30c   :  { %v9636_v13 = vld [vmem:[#allocation11 + $0x6e8] sm:$0xf0]  ;;  %6649 = vmatpush.bf16.msra.mxu3 %v9671_v10  ;;  %v9035_v10 = vor.u32 %v11262_v56, %v9034_v15  ;;  %v11502_v39 = vld [vmem:[#allocation11 + $0x9ac] sm:$0xf0] }
 0x30d   :  { %6713 = vmatpush.bf16.msra.mxu0 %v8939_v47  ;;  %v11585_v21 = vld [vmem:[#allocation11 + $0xc4c] sm:$0xf]  ;;  %v9639_v28 = vor.u32 %v11409_v49, %v9636_v13  ;;  %v9514_v47 = vld [vmem:[#allocation11 + $0x5d0] sm:$0xf]  ;;  %v10283_v13 = vor.u32 %v11574_v46, %v10282_v61 }
 0x30e   :  { %v10340_v7 = vld [vmem:[#allocation11 + $0xc68] sm:$0xf0]  ;;  %v10250_v55 = vld [vmem:[#allocation11 + $0xb90] sm:$0xf] }
 0x30f   :  { %6726 = vmatpush.bf16.msra.mxu1 %v9195_v19  ;;  %6689 = vmatpush.bf16.msrb.mxu2 %v10407_v1  ;;  %v11401_v34 = vld [vmem:[#allocation11 + $0x68c] sm:$0xf]  ;;  %v10343_v8 = vor.u32 %v11585_v21, %v10340_v7  ;;  %v11382_v19 = vld [vmem:[#allocation11 + $0x5ec] sm:$0xf0]  ;;  %v6436_v12 = vpop.f32.mrf.mxu2 }
 0x310   :  { %v9604_v63 = vld [vmem:[#allocation11 + $0x6a8] sm:$0xf0]  ;;  %6650 = vmatpush.bf16.msra.mxu3 %v9639_v28  ;;  %v9515_v57 = vor.u32 %v11382_v19, %v9514_v47  ;;  %v9482_v1 = vld [vmem:[#allocation11 + $0x590] sm:$0xf] }
 0x311   :  { %6714 = vmatpush.bf16.msra.mxu0 %v8907_v6  ;;  %v11577_v0 = vld [vmem:[#allocation11 + $0xc0c] sm:$0xf]  ;;  %v9607_v38 = vor.u32 %v11401_v34, %v9604_v63  ;;  %v10026_v6 = vld [vmem:[#allocation11 + $0x9d0] sm:$0xf]  ;;  %v9483_v50 = vor.u32 %v11374_v2, %v9482_v1 }
 0x312   :  { %v10308_v45 = vld [vmem:[#allocation11 + $0xc28] sm:$0xf0]  ;;  %v11566_v21 = vld [vmem:[#allocation11 + $0xbac] sm:$0xf0] }
 0x313   :  { %6727 = vmatpush.bf16.msra.mxu1 %v9163_v59  ;;  %6690 = vmatpush.bf16.msrb.mxu2 %v10375_v23  ;;  %v11393_v48 = vld [vmem:[#allocation11 + $0x64c] sm:$0xf]  ;;  %v10311_v52 = vor.u32 %v11577_v0, %v10308_v45  ;;  %v11510_v59 = vld [vmem:[#allocation11 + $0x9ec] sm:$0xf0]  ;;  %v10251_v63 = vor.u32 %v11566_v21, %v10250_v55 }
 0x314   :  { %v9572_v14 = vld [vmem:[#allocation11 + $0x668] sm:$0xf0]  ;;  %6651 = vmatpush.bf16.msra.mxu3 %v9607_v38  ;;  %v9994_v23 = vld [vmem:[#allocation11 + $0x990] sm:$0xf] }
 0x315   :  { %6715 = vmatpush.bf16.msra.mxu0 %v8875_v30  ;;  %v9575_v62 = vor.u32 %v11393_v48, %v9572_v14  ;;  %v11385_v9 = vld [vmem:[#allocation11 + $0x60c] sm:$0xf]  ;;  %v10027_v30 = vor.u32 %v11510_v59, %v10026_v6  ;;  %v9450_v28 = vld [vmem:[#allocation11 + $0x550] sm:$0xf] }
 0x316   :  { %v9540_v27 = vld [vmem:[#allocation11 + $0x628] sm:$0xf0]  ;;  %v11366_v29 = vld [vmem:[#allocation11 + $0x56c] sm:$0xf0] }
 0x317   :  { %6728 = vmatpush.bf16.msra.mxu1 %v9131_v11  ;;  %6691 = vmatpush.bf16.msrb.mxu2 %v10343_v8  ;;  %v11697_v11 = vld [vmem:[#allocation11 + $0xfcc] sm:$0xf]  ;;  %v9543_v60 = vor.u32 %v11385_v9, %v9540_v27  ;;  %v9962_v40 = vld [vmem:[#allocation11 + $0x950] sm:$0xf]  ;;  %v9451_v8 = vor.u32 %v11366_v29, %v9450_v28 }
 0x318   :  { %v10788_v49 = vld [vmem:[#allocation11 + $0xfe8] sm:$0xf0]  ;;  %6652 = vmatpush.bf16.msra.mxu3 %v9575_v62  ;;  %v11494_v42 = vld [vmem:[#allocation11 + $0x96c] sm:$0xf0] }
 0x319   :  { %6716 = vmatpush.bf16.msra.mxu0 %v8843_v31  ;;  %v10791_v7 = vor.u32 %v11697_v11, %v10788_v49  ;;  %v9995_v31 = vor.u32 %v11502_v39, %v9994_v23  ;;  %v10756_v34 = vld [vmem:[#allocation11 + $0xfa8] sm:$0xf0]  ;;  %v10218_v43 = vld [vmem:[#allocation11 + $0xb50] sm:$0xf]  ;;  %v9963_v38 = vor.u32 %v11494_v42, %v9962_v40  ;;  %v6383_v40 = vadd.f32 %v12280_v58, %v12267_v41 }
 0x31a   :  { %v11558_v35 = vld [vmem:[#allocation11 + $0xb6c] sm:$0xf0]  ;;  %v11681_v47 = vld [vmem:[#allocation11 + $0xf4c] sm:$0xf] }
 0x31b   :  { %6729 = vmatpush.bf16.msra.mxu1 %v9099_v32  ;;  %6692 = vmatpush.bf16.msrb.mxu2 %v10311_v52  ;;  %v11689_v32 = vld [vmem:[#allocation11 + $0xf8c] sm:$0xf]  ;;  %v9418_v0 = vld [vmem:[#allocation11 + $0x510] sm:$0xf]  ;;  %v3721_v52 = vperm.slane %v12292_v51, 2 }
 0x31c   :  { %6653 = vmatpush.bf16.msra.mxu3 %v9543_v60  ;;  %v10759_v44 = vor.u32 %v11689_v32, %v10756_v34  ;;  %v11358_v45 = vld [vmem:[#allocation11 + $0x52c] sm:$0xf0]  ;;  %v10724_v19 = vld [vmem:[#allocation11 + $0xf68] sm:$0xf0] }
 0x31d   :  { %6717 = vmatpush.bf16.msra.mxu0 %v8811_v26  ;;  %v10219_v26 = vor.u32 %v11558_v35, %v10218_v43  ;;  %v11486_v48 = vld [vmem:[#allocation11 + $0x92c] sm:$0xf0]  ;;  %v9419_v14 = vor.u32 %v11358_v45, %v9418_v0  ;;  %v10727_v56 = vor.u32 %v11681_v47, %v10724_v19  ;;  %v11673_v61 = vld [vmem:[#allocation11 + $0xf0c] sm:$0xf]  ;;  %v6395_v35 = vpop.f32.mrf.mxu3 }
 0x31e   :  { %6693 = vmatmul.bf16.vlgmr.msrb.gmra.mxu2 %v12241_v20  ;;  %v10186_v54 = vld [vmem:[#allocation11 + $0xb10] sm:$0xf]  ;;  %v10692_v62 = vld [vmem:[#allocation11 + $0xf28] sm:$0xf0] }
 0x31f   :  { %6730 = vmatpush.bf16.msra.mxu1 %v9067_v3  ;;  %6737 = vmatpush.bf16.msra.mxu2 %v9515_v57  ;;  %v9930_v3 = vld [vmem:[#allocation11 + $0x910] sm:$0xf]  ;;  %v10695_v49 = vor.u32 %v11673_v61, %v10692_v62  ;;  %v11665_v55 = vld [vmem:[#allocation11 + $0xecc] sm:$0xf] }
 0x320   :  { %6698 = vmatpush.bf16.msrb.mxu3 %v10791_v7  ;;  %v11550_v15 = vld [vmem:[#allocation11 + $0xb2c] sm:$0xf0]  ;;  %v9931_v59 = vor.u32 %v11486_v48, %v9930_v3  ;;  %v10660_v21 = vld [vmem:[#allocation11 + $0xee8] sm:$0xf0] }
 0x321   :  { %6718 = vmatpush.bf16.msra.mxu0 %v8779_v53  ;;  %6654 = vmatmul.bf16.vlgmr.msra.gmra.mxu3 %v12199_v5  ;;  %v9386_v57 = vld [vmem:[#allocation11 + $0x4d0] sm:$0xf]  ;;  %v6512_v46 = vpop.f32.mrf.mxu0  ;;  %v10187_v1 = vor.u32 %v11550_v15, %v10186_v54  ;;  %v12297_v39 = vpop.f32.mrf.mxu2  ;;  %v12299_v32 = vld [vmem:[#allocation14] sm:$0xff]  ;;  %v10663_v42 = vor.u32 %v11665_v55, %v10660_v21 }
 0x322   :  { %v11350_v6 = vld [vmem:[#allocation11 + $0x4ec] sm:$0xf0]  ;;  %v6513_v9 = vadd.f32 %v6512_v46, %v3721_v52  ;;  %v11657_v0 = vld [vmem:[#allocation11 + $0xe8c] sm:$0xf]  ;;  %v7137_v47 = vperm.slane %v12299_v32, 0 }
 0x323   :  { %6731 = vmatpush.bf16.msra.mxu1 %v9035_v10  ;;  %6738 = vmatpush.bf16.msra.mxu2 %v9483_v50  ;;  %v9898_v2 = vld [vmem:[#allocation11 + $0x8d0] sm:$0xf]  ;;  %v6525_v27 = vpop.f32.mrf.mxu1  ;;  %v9387_v10 = vor.u32 %v11350_v6, %v9386_v57  ;;  %v10628_v45 = vld [vmem:[#allocation11 + $0xea8] sm:$0xf0] }
 0x324   :  { %6719 = vmatmul.bf16.vlgmr.msra.gmra.mxu0 %v12193_v36  ;;  %6699 = vmatpush.bf16.msrb.mxu3 %v10759_v44  ;;  %v11478_v53 = vld [vmem:[#allocation11 + $0x8ec] sm:$0xf0]  ;;  %v12295_v23 = vadd.f32 %v6525_v27, %v6513_v9  ;;  %v10631_v57 = vor.u32 %v11657_v0, %v10628_v45 }
 0x325   :  { %6763 = vmatpush.bf16.msrb.mxu0 %v10027_v30  ;;  %v10154_v30 = vld [vmem:[#allocation11 + $0xad0] sm:$0xf]  ;;  %v9899_v60 = vor.u32 %v11478_v53, %v9898_v2  ;;  %v10596_v2 = vld [vmem:[#allocation11 + $0xe68] sm:$0xf0] }
 0x326   :  { %6732 = vmatmul.bf16.vlgmr.msra.gmra.mxu1 %v12195_v18  ;;  %v11542_v11 = vld [vmem:[#allocation11 + $0xaec] sm:$0xf0] }
 0x327   :  { %6776 = vmatpush.bf16.msrb.mxu1 %v10283_v13  ;;  %6739 = vmatpush.bf16.msra.mxu2 %v9451_v8  ;;  %v9354_v13 = vld [vmem:[#allocation11 + $0x490] sm:$0xf]  ;;  %v10155_v7 = vor.u32 %v11542_v11, %v10154_v30 }
 0x328   :  { %6700 = vmatpush.bf16.msrb.mxu3 %v10727_v56  ;;  %v11342_v50 = vld [vmem:[#allocation11 + $0x4ac] sm:$0xf0] }
 0x329   :  { %6764 = vmatpush.bf16.msrb.mxu0 %v9995_v31  ;;  %v9866_v28 = vld [vmem:[#allocation11 + $0x890] sm:$0xf]  ;;  %v9355_v31 = vor.u32 %v11342_v50, %v9354_v13  ;;  %v6514_v19 = vpop.f32.mrf.mxu0  ;;  %v6488_v61 = vpop.f32.mrf.mxu2  ;;  %v11250_v13 = vld [vmem:[#allocation11 + $0x1d4] sm:$0xf] }
 0x32a   :  { %v11470_v29 = vld [vmem:[#allocation11 + $0x8ac] sm:$0xf0]  ;;  %v9004_v50 = vld [vmem:[#allocation11 + $0x1f0] sm:$0xf0] }
 0x32b   :  { %6777 = vmatpush.bf16.msrb.mxu1 %v10251_v63  ;;  %6740 = vmatpush.bf16.msra.mxu2 %v9419_v14  ;;  %v10122_v34 = vld [vmem:[#allocation11 + $0xa90] sm:$0xf]  ;;  %v9867_v44 = vor.u32 %v11470_v29, %v9866_v28  ;;  %v6527_v41 = vpop.f32.mrf.mxu1  ;;  %v9260_v28 = vld [vmem:[#allocation11 + $0x3f0] sm:$0xf0] }
 0x32c   :  { %v11534_v63 = vld [vmem:[#allocation11 + $0xaac] sm:$0xf0]  ;;  %6701 = vmatpush.bf16.msrb.mxu3 %v10695_v49  ;;  %v11298_v61 = vld [vmem:[#allocation11 + $0x354] sm:$0xf] }
 0x32d   :  { %6765 = vmatpush.bf16.msrb.mxu0 %v9963_v38  ;;  %v9322_v8 = vld [vmem:[#allocation11 + $0x450] sm:$0xf]  ;;  %v6396_v38 = vadd.f32 %v6395_v35, %v6383_v40  ;;  %v11641_v40 = vld [vmem:[#allocation11 + $0xe0c] sm:$0xf] }
 0x32e   :  { %v11334_v43 = vld [vmem:[#allocation11 + $0x46c] sm:$0xf0] }
 0x32f   :  { %6778 = vmatpush.bf16.msrb.mxu1 %v10219_v26  ;;  %6741 = vmatpush.bf16.msra.mxu2 %v9387_v10  ;;  %v12303_v12 = vld [vmem:[#allocation16] sm:$0xff]  ;;  %v10123_v26 = vor.u32 %v11534_v63, %v10122_v34  ;;  %v9323_v58 = vor.u32 %v11334_v43, %v9322_v8  ;;  %v7127_v15 = vmax.f32 %v6396_v38, 0.0 }
 0x330   :  { %v9834_v3 = vld [vmem:[#allocation11 + $0x850] sm:$0xf]  ;;  %v7163_v56 = vperm.slane %v12303_v12, 0  ;;  %6702 = vmatpush.bf16.msrb.mxu3 %v10663_v42  ;;  %v10564_v42 = vld [vmem:[#allocation11 + $0xe28] sm:$0xf0] }
 0x331   :  { %6766 = vmatpush.bf16.msrb.mxu0 %v9931_v59  ;;  %v11462_v48 = vld [vmem:[#allocation11 + $0x86c] sm:$0xf0]  ;;  %v7153_v53 = vmul.f32 %v7137_v47, %v7127_v15  ;;  %v11242_v38 = vld [vmem:[#allocation11 + $0x194] sm:$0xf] }
 0x332   :  { %v10090_v14 = vld [vmem:[#allocation11 + $0xa50] sm:$0xf]  ;;  %v9835_v62 = vor.u32 %v11462_v48, %v9834_v3  ;;  %v8972_v47 = vld [vmem:[#allocation11 + $0x1b0] sm:$0xf0] }
 0x333   :  { %6779 = vmatpush.bf16.msrb.mxu1 %v10187_v1  ;;  %6742 = vmatpush.bf16.msra.mxu2 %v9355_v31  ;;  %v11526_v52 = vld [vmem:[#allocation11 + $0xa6c] sm:$0xf0]  ;;  %v11649_v1 = vld [vmem:[#allocation11 + $0xe4c] sm:$0xf]  ;;  %v6397_v31 = vpop.f32.mrf.mxu3  ;;  %v11306_v3 = vld [vmem:[#allocation11 + $0x394] sm:$0xf] }
 0x334   :  { %v9290_v54 = vld [vmem:[#allocation11 + $0x410] sm:$0xf]  ;;  %v10091_v9 = vor.u32 %v11526_v52, %v10090_v14  ;;  %6703 = vmatpush.bf16.msrb.mxu3 %v10631_v57  ;;  %v10599_v21 = vor.u32 %v11649_v1, %v10596_v2  ;;  %v9228_v48 = vld [vmem:[#allocation11 + $0x3b0] sm:$0xf0]  ;;  %v8975_v52 = vor.u32 %v11242_v38, %v8972_v47 }
 0x335   :  { %6767 = vmatpush.bf16.msrb.mxu0 %v9899_v60  ;;  %v11326_v6 = vld [vmem:[#allocation11 + $0x42c] sm:$0xf0]  ;;  %v7179_v60 = vadd.f32 %v7163_v56, %v7153_v53  ;;  %v11234_v57 = vld [vmem:[#allocation11 + $0x154] sm:$0xf]  ;;  %v6435_v53 = vadd.f32 %v12286_v4, %v12274_v25 }
 0x336   :  { %v10538_v59 = vld [vmem:[#allocation11 + $0xdd0] sm:$0xf]  ;;  %v9291_v11 = vor.u32 %v11326_v6, %v9290_v54  ;;  %v9231_v54 = vor.u32 %v11306_v3, %v9228_v48 }
 0x337   :  { %6780 = vmatpush.bf16.msrb.mxu1 %v10155_v7  ;;  %v11638_v46 = vld [vmem:[#allocation11 + $0xdec] sm:$0xf0]  ;;  %6743 = vmatpush.bf16.msra.mxu2 %v9323_v58  ;;  %v11314_v7 = vld [vmem:[#allocation11 + $0x3d4] sm:$0xf]  ;;  %v7187_v8 = vmax.f32 %v7179_v60, 0.0 }
 0x338   :  { %v9802_v27 = vld [vmem:[#allocation11 + $0x810] sm:$0xf]  ;;  %v10539_v55 = vor.u32 %v11638_v46, %v10538_v59  ;;  %v9263_v0 = vor.u32 %v11314_v7, %v9260_v28  ;;  %6704 = vmatpush.bf16.msrb.mxu3 %v10599_v21  ;;  %v8940_v59 = vld [vmem:[#allocation11 + $0x170] sm:$0xf0] }
 0x339   :  { %6768 = vmatpush.bf16.msrb.mxu0 %v9867_v44  ;;  %v11454_v10 = vld [vmem:[#allocation11 + $0x82c] sm:$0xf0]  ;;  %v9007_v44 = vor.u32 %v11250_v13, %v9004_v50  ;;  %7195 = vst [vmem:[#allocation17] sm:$0xff] %v7187_v8  ;;  %v8908_v60 = vld [vmem:[#allocation11 + $0x130] sm:$0xf0] }
 0x33a   :  { %v10058_v30 = vld [vmem:[#allocation11 + $0xa10] sm:$0xf]  ;;  %v9803_v34 = vor.u32 %v11454_v10, %v9802_v27  ;;  %v8943_v27 = vor.u32 %v11234_v57, %v8940_v59  ;;  %v9164_v21 = vld [vmem:[#allocation11 + $0x330] sm:$0xf0] }
 0x33b   :  { %6781 = vmatpush.bf16.msrb.mxu1 %v10123_v26  ;;  %v11518_v49 = vld [vmem:[#allocation11 + $0xa2c] sm:$0xf0]  ;;  %6744 = vmatpush.bf16.msra.mxu2 %v9291_v11  ;;  %v10567_v26 = vor.u32 %v11641_v40, %v10564_v42  ;;  %v6447_v46 = vpop.f32.mrf.mxu3 }
 0x33c   :  { %v10506_v29 = vld [vmem:[#allocation11 + $0xd90] sm:$0xf]  ;;  %v10059_v43 = vor.u32 %v11518_v49, %v10058_v30  ;;  %v11226_v49 = vld [vmem:[#allocation11 + $0x114] sm:$0xf]  ;;  %v6448_v13 = vadd.f32 %v6447_v46, %v6435_v53 }
 0x33d   :  { %6769 = vmatpush.bf16.msrb.mxu0 %v9835_v62  ;;  %v11630_v63 = vld [vmem:[#allocation11 + $0xdac] sm:$0xf0]  ;;  %6705 = vmatpush.bf16.msrb.mxu3 %v10567_v26  ;;  %v9196_v62 = vld [vmem:[#allocation11 + $0x370] sm:$0xf0]  ;;  %v8911_v4 = vor.u32 %v11226_v49, %v8908_v60 }
 0x33e   :  { %v9770_v35 = vld [vmem:[#allocation11 + $0x7d0] sm:$0xf]  ;;  %v10507_v19 = vor.u32 %v11630_v63, %v10506_v29  ;;  %6745 = vmatmul.bf16.vlgmr.msra.gmra.mxu2 %v12197_v37  ;;  %v9199_v10 = vor.u32 %v11298_v61, %v9196_v62  ;;  %v11218_v63 = vld [vmem:[#allocation11 + $0xd4] sm:$0xf]  ;;  %v6461_v40 = vadd.f32 %v12282_v24, %v6448_v13  ;;  %v7138_v13 = vperm.slane %v12299_v32, 1 }
 0x33f   :  { %6782 = vmatpush.bf16.msrb.mxu1 %v10091_v9  ;;  %v11446_v45 = vld [vmem:[#allocation11 + $0x7ec] sm:$0xf0]  ;;  %6789 = vmatpush.bf16.msrb.mxu2 %v10539_v55  ;;  %v11290_v55 = vld [vmem:[#allocation11 + $0x314] sm:$0xf] }
 0x340   :  { %v10474_v41 = vld [vmem:[#allocation11 + $0xd50] sm:$0xf]  ;;  %v9771_v14 = vor.u32 %v11446_v45, %v9770_v35  ;;  %6706 = vmatmul.bf16.vlgmr.msrb.gmra.mxu3 %v12251_v22  ;;  %v9167_v29 = vor.u32 %v11290_v55, %v9164_v21  ;;  %v11282_v35 = vld [vmem:[#allocation11 + $0x2d4] sm:$0xf] }
 0x341   :  { %6770 = vmatpush.bf16.msrb.mxu0 %v9803_v34  ;;  %v11622_v58 = vld [vmem:[#allocation11 + $0xd6c] sm:$0xf0]  ;;  %v12314_v42 = vpop.f32.mrf.mxu0 }
 0x342   :  { %v9738_v15 = vld [vmem:[#allocation11 + $0x790] sm:$0xf]  ;;  %v10475_v6 = vor.u32 %v11622_v58, %v10474_v41  ;;  %6750 = vmatpush.bf16.msra.mxu3 %v9771_v14  ;;  %v11210_v58 = vld [vmem:[#allocation11 + $0x94] sm:$0xf] }
 0x343   :  { %6783 = vmatpush.bf16.msrb.mxu1 %v10059_v43  ;;  %v11438_v56 = vld [vmem:[#allocation11 + $0x7ac] sm:$0xf0]  ;;  %6790 = vmatpush.bf16.msrb.mxu2 %v10507_v19  ;;  %v8876_v43 = vld [vmem:[#allocation11 + $0xf0] sm:$0xf0]  ;;  %v6449_v45 = vpop.f32.mrf.mxu3  ;;  %v12318_v19 = vpop.f32.mrf.mxu2 }
 0x344   :  { %6771 = vmatmul.bf16.vlgmr.msrb.gmra.mxu0 %v12216_v16  ;;  %v10442_v1 = vld [vmem:[#allocation11 + $0xd10] sm:$0xf]  ;;  %v9739_v9 = vor.u32 %v11438_v56, %v9738_v15  ;;  %v8879_v3 = vor.u32 %v11218_v63, %v8876_v43  ;;  %v9100_v15 = vld [vmem:[#allocation11 + $0x2b0] sm:$0xf0]  ;;  %v6474_v56 = vadd.f32 %v12284_v33, %v6461_v40 }
 0x345   :  { %6815 = vmatpush.bf16.msra.mxu0 %v9007_v44  ;;  %v11614_v2 = vld [vmem:[#allocation11 + $0xd2c] sm:$0xf0]  ;;  %v9132_v44 = vld [vmem:[#allocation11 + $0x2f0] sm:$0xf0] }
 0x346   :  { %6784 = vmatmul.bf16.vlgmr.msrb.gmra.mxu1 %v12214_v17  ;;  %v9706_v30 = vld [vmem:[#allocation11 + $0x750] sm:$0xf]  ;;  %v10443_v50 = vor.u32 %v11614_v2, %v10442_v1  ;;  %6751 = vmatpush.bf16.msra.mxu3 %v9739_v9  ;;  %v9135_v24 = vor.u32 %v11282_v35, %v9132_v44  ;;  %v11202_v2 = vld [vmem:[#allocation11 + $0x54] sm:$0xf]  ;;  %v6487_v9 = vadd.f32 %v12297_v39, %v6474_v56 }
 0x347   :  { %6828 = vmatpush.bf16.msra.mxu1 %v9263_v0  ;;  %v11430_v11 = vld [vmem:[#allocation11 + $0x76c] sm:$0xf0]  ;;  %6791 = vmatpush.bf16.msrb.mxu2 %v10475_v6  ;;  %v12316_v0 = vpop.f32.mrf.mxu1  ;;  %v8780_v63 = vld [vmem:[#allocation11 + $0x30] sm:$0xf0] }
 0x348   :  { %v10410_v7 = vld [vmem:[#allocation11 + $0xcd0] sm:$0xf]  ;;  %v9707_v25 = vor.u32 %v11430_v11, %v9706_v30  ;;  %v11266_v30 = vld [vmem:[#allocation11 + $0x254] sm:$0xf] }
 0x349   :  { %6816 = vmatpush.bf16.msra.mxu0 %v8975_v52  ;;  %v11606_v28 = vld [vmem:[#allocation11 + $0xcec] sm:$0xf0]  ;;  %v8844_v52 = vld [vmem:[#allocation11 + $0xb0] sm:$0xf0]  ;;  %v6566_v53 = vpop.f32.mrf.mxu0 }
 0x34a   :  { %v9674_v31 = vld [vmem:[#allocation11 + $0x710] sm:$0xf]  ;;  %v10411_v8 = vor.u32 %v11606_v28, %v10410_v7  ;;  %6752 = vmatpush.bf16.msra.mxu3 %v9707_v25  ;;  %v8847_v61 = vor.u32 %v11210_v58, %v8844_v52  ;;  %v9068_v11 = vld [vmem:[#allocation11 + $0x270] sm:$0xf0] }
 0x34b   :  { %6829 = vmatpush.bf16.msra.mxu1 %v9231_v54  ;;  %v11422_v34 = vld [vmem:[#allocation11 + $0x72c] sm:$0xf0]  ;;  %6792 = vmatpush.bf16.msrb.mxu2 %v10443_v50  ;;  %v11274_v54 = vld [vmem:[#allocation11 + $0x294] sm:$0xf]  ;;  %v6499_v49 = vpop.f32.mrf.mxu3  ;;  %v6540_v21 = vpop.f32.mrf.mxu2 }
 0x34c   :  { %v10378_v38 = vld [vmem:[#allocation11 + $0xc90] sm:$0xf]  ;;  %v9675_v26 = vor.u32 %v11422_v34, %v9674_v31  ;;  %v9103_v62 = vor.u32 %v11274_v54, %v9100_v15  ;;  %v6500_v55 = vadd.f32 %v6499_v49, %v6487_v9  ;;  %v11378_v28 = vld [vmem:[#allocation11 + $0x5d4] sm:$0xf] }
 0x34d   :  { %6817 = vmatpush.bf16.msra.mxu0 %v8943_v27  ;;  %v11598_v47 = vld [vmem:[#allocation11 + $0xcac] sm:$0xf0]  ;;  %v9516_v25 = vld [vmem:[#allocation11 + $0x5f0] sm:$0xf0] }
 0x34e   :  { %v9642_v48 = vld [vmem:[#allocation11 + $0x6d0] sm:$0xf]  ;;  %v10379_v14 = vor.u32 %v11598_v47, %v10378_v38  ;;  %6753 = vmatpush.bf16.msra.mxu3 %v9675_v26  ;;  %v11194_v34 = vld [vmem:[#allocation11 + $0x14] sm:$0xf]  ;;  %v7128_v40 = vmax.f32 %v6500_v55, 0.0  ;;  %v9519_v45 = vor.u32 %v11378_v28, %v9516_v25 }
 0x34f   :  { %6830 = vmatpush.bf16.msra.mxu1 %v9199_v10  ;;  %v11414_v41 = vld [vmem:[#allocation11 + $0x6ec] sm:$0xf0]  ;;  %6793 = vmatpush.bf16.msrb.mxu2 %v10411_v8  ;;  %v8812_v10 = vld [vmem:[#allocation11 + $0x70] sm:$0xf0]  ;;  %v6579_v33 = vpop.f32.mrf.mxu1  ;;  %v7164_v8 = vperm.slane %v12303_v12, 1 }
 0x350   :  { %v10346_v57 = vld [vmem:[#allocation11 + $0xc50] sm:$0xf]  ;;  %v9643_v59 = vor.u32 %v11414_v41, %v9642_v48  ;;  %v8815_v39 = vor.u32 %v11202_v2, %v8812_v10  ;;  %v11258_v35 = vld [vmem:[#allocation11 + $0x214] sm:$0xf] }
 0x351   :  { %6818 = vmatpush.bf16.msra.mxu0 %v8911_v4  ;;  %v11590_v6 = vld [vmem:[#allocation11 + $0xc6c] sm:$0xf0]  ;;  %v9036_v44 = vld [vmem:[#allocation11 + $0x230] sm:$0xf0] }
 0x352   :  { %v9610_v46 = vld [vmem:[#allocation11 + $0x690] sm:$0xf]  ;;  %v10347_v27 = vor.u32 %v11590_v6, %v10346_v57  ;;  %6754 = vmatpush.bf16.msra.mxu3 %v9643_v59  ;;  %v11506_v38 = vld [vmem:[#allocation11 + $0x9d4] sm:$0xf]  ;;  %v9039_v56 = vor.u32 %v11258_v35, %v9036_v44  ;;  %v3722_v44 = vperm.slane %v12292_v51, 3 }
 0x353   :  { %6831 = vmatpush.bf16.msra.mxu1 %v9167_v29  ;;  %v11406_v1 = vld [vmem:[#allocation11 + $0x6ac] sm:$0xf0]  ;;  %6794 = vmatpush.bf16.msrb.mxu2 %v10379_v14  ;;  %v9071_v29 = vor.u32 %v11266_v30, %v9068_v11  ;;  %v10028_v47 = vld [vmem:[#allocation11 + $0x9f0] sm:$0xf0]  ;;  %v8783_v14 = vor.u32 %v11194_v34, %v8780_v63 }
 0x354   :  { %v10314_v50 = vld [vmem:[#allocation11 + $0xc10] sm:$0xf]  ;;  %v9611_v7 = vor.u32 %v11406_v1, %v9610_v46  ;;  %v11570_v26 = vld [vmem:[#allocation11 + $0xbd4] sm:$0xf]  ;;  %v10031_v57 = vor.u32 %v11506_v38, %v10028_v47 }
 0x355   :  { %6819 = vmatpush.bf16.msra.mxu0 %v8879_v3  ;;  %v11582_v60 = vld [vmem:[#allocation11 + $0xc2c] sm:$0xf0]  ;;  %v7154_v3 = vmul.f32 %v7138_v13, %v7128_v40  ;;  %v10284_v48 = vld [vmem:[#allocation11 + $0xbf0] sm:$0xf0] }
 0x356   :  { %v9578_v4 = vld [vmem:[#allocation11 + $0x650] sm:$0xf]  ;;  %v10315_v43 = vor.u32 %v11582_v60, %v10314_v50  ;;  %6755 = vmatpush.bf16.msra.mxu3 %v9611_v7  ;;  %v11370_v41 = vld [vmem:[#allocation11 + $0x594] sm:$0xf] }
 0x357   :  { %6832 = vmatpush.bf16.msra.mxu1 %v9135_v24  ;;  %v11398_v31 = vld [vmem:[#allocation11 + $0x66c] sm:$0xf0]  ;;  %6795 = vmatpush.bf16.msrb.mxu2 %v10347_v27  ;;  %v9484_v58 = vld [vmem:[#allocation11 + $0x5b0] sm:$0xf0]  ;;  %v7180_v15 = vadd.f32 %v7164_v8, %v7154_v3 }
 0x358   :  { %v9579_v24 = vor.u32 %v11398_v31, %v9578_v4  ;;  %v9546_v52 = vld [vmem:[#allocation11 + $0x610] sm:$0xf]  ;;  %v9487_v46 = vor.u32 %v11370_v41, %v9484_v58  ;;  %v11498_v1 = vld [vmem:[#allocation11 + $0x994] sm:$0xf] }
 0x359   :  { %6820 = vmatpush.bf16.msra.mxu0 %v8847_v61  ;;  %v11390_v54 = vld [vmem:[#allocation11 + $0x62c] sm:$0xf0]  ;;  %v6501_v61 = vpop.f32.mrf.mxu3  ;;  %v9996_v2 = vld [vmem:[#allocation11 + $0x9b0] sm:$0xf0]  ;;  %v7188_v53 = vmax.f32 %v7180_v15, 0.0 }
 0x35a   :  { %v10794_v6 = vld [vmem:[#allocation11 + $0xfd0] sm:$0xf]  ;;  %6756 = vmatpush.bf16.msra.mxu3 %v9579_v24  ;;  %v9547_v9 = vor.u32 %v11390_v54, %v9546_v52  ;;  %v11562_v27 = vld [vmem:[#allocation11 + $0xb94] sm:$0xf]  ;;  %v9999_v49 = vor.u32 %v11498_v1, %v9996_v2 }
 0x35b   :  { %6833 = vmatpush.bf16.msra.mxu1 %v9103_v62  ;;  %6796 = vmatpush.bf16.msrb.mxu2 %v10315_v43  ;;  %v11702_v59 = vld [vmem:[#allocation11 + $0xfec] sm:$0xf0]  ;;  %v10287_v62 = vor.u32 %v11570_v26, %v10284_v48  ;;  %v10252_v10 = vld [vmem:[#allocation11 + $0xbb0] sm:$0xf0]  ;;  %7196 = vst [vmem:[#allocation17 + $0x8] sm:$0xff] %v7188_v53 }
 0x35c   :  { %v10795_v30 = vor.u32 %v11702_v59, %v10794_v6  ;;  %v11362_v11 = vld [vmem:[#allocation11 + $0x554] sm:$0xf]  ;;  %v10762_v13 = vld [vmem:[#allocation11 + $0xf90] sm:$0xf]  ;;  %v10255_v60 = vor.u32 %v11562_v27, %v10252_v10 }
 0x35d   :  { %6821 = vmatpush.bf16.msra.mxu0 %v8815_v39  ;;  %v9452_v33 = vld [vmem:[#allocation11 + $0x570] sm:$0xf0]  ;;  %v11694_v50 = vld [vmem:[#allocation11 + $0xfac] sm:$0xf0] }
 0x35e   :  { %6797 = vmatmul.bf16.vlgmr.msrb.gmra.mxu2 %v12241_v20  ;;  %v11490_v55 = vld [vmem:[#allocation11 + $0x954] sm:$0xf]  ;;  %6757 = vmatpush.bf16.msra.mxu3 %v9547_v9  ;;  %v9455_v7 = vor.u32 %v11362_v11, %v9452_v33  ;;  %v10763_v4 = vor.u32 %v11694_v50, %v10762_v13  ;;  %v10730_v34 = vld [vmem:[#allocation11 + $0xf50] sm:$0xf] }
 0x35f   :  { %6834 = vmatpush.bf16.msra.mxu1 %v9071_v29  ;;  %6841 = vmatpush.bf16.msra.mxu2 %v9519_v45  ;;  %v9964_v21 = vld [vmem:[#allocation11 + $0x970] sm:$0xf0]  ;;  %v11686_v63 = vld [vmem:[#allocation11 + $0xf6c] sm:$0xf0] }
 0x360   :  { %v11554_v28 = vld [vmem:[#allocation11 + $0xb54] sm:$0xf]  ;;  %v9967_v31 = vor.u32 %v11490_v55, %v9964_v21  ;;  %v10731_v47 = vor.u32 %v11686_v63, %v10730_v34  ;;  %v10698_v48 = vld [vmem:[#allocation11 + $0xf10] sm:$0xf] }
 0x361   :  { %6822 = vmatpush.bf16.msra.mxu0 %v8783_v14  ;;  %v10220_v25 = vld [vmem:[#allocation11 + $0xb70] sm:$0xf0]  ;;  %6758 = vmatmul.bf16.vlgmr.msra.gmra.mxu3 %v12199_v5  ;;  %v11678_v41 = vld [vmem:[#allocation11 + $0xf2c] sm:$0xf0]  ;;  %v6616_v58 = vpop.f32.mrf.mxu0  ;;  %v12331_v1 = vpop.f32.mrf.mxu2 }
 0x362   :  { %6802 = vmatpush.bf16.msrb.mxu3 %v10795_v30  ;;  %v11354_v39 = vld [vmem:[#allocation11 + $0x514] sm:$0xf]  ;;  %v10223_v40 = vor.u32 %v11554_v28, %v10220_v25  ;;  %v6617_v15 = vadd.f32 %v6616_v58, %v3722_v44  ;;  %v10699_v59 = vor.u32 %v11678_v41, %v10698_v48  ;;  %v10666_v53 = vld [vmem:[#allocation11 + $0xed0] sm:$0xf] }
 0x363   :  { %6835 = vmatpush.bf16.msra.mxu1 %v9039_v56  ;;  %6842 = vmatpush.bf16.msra.mxu2 %v9487_v46  ;;  %v9420_v29 = vld [vmem:[#allocation11 + $0x530] sm:$0xf0]  ;;  %v6629_v56 = vpop.f32.mrf.mxu1  ;;  %v11670_v9 = vld [vmem:[#allocation11 + $0xeec] sm:$0xf0] }
 0x364   :  { %6823 = vmatmul.bf16.vlgmr.msra.gmra.mxu0 %v12193_v36  ;;  %v11482_v8 = vld [vmem:[#allocation11 + $0x914] sm:$0xf]  ;;  %v9423_v35 = vor.u32 %v11354_v39, %v9420_v29  ;;  %v12329_v46 = vadd.f32 %v6629_v56, %v6617_v15  ;;  %v10667_v13 = vor.u32 %v11670_v9, %v10666_v53  ;;  %v10634_v21 = vld [vmem:[#allocation11 + $0xe90] sm:$0xf]  ;;  %v11255_v15 = vld [vmem:[#allocation11 + $0x1f4] sm:$0xf0] }
 0x365   :  { %6867 = vmatpush.bf16.msrb.mxu0 %v10031_v57  ;;  %v9932_v43 = vld [vmem:[#allocation11 + $0x930] sm:$0xf0]  ;;  %v11646_v53 = vld [vmem:[#allocation11 + $0xe2c] sm:$0xf0] }
 0x366   :  { %6836 = vmatmul.bf16.vlgmr.msra.gmra.mxu1 %v12195_v18  ;;  %v11546_v45 = vld [vmem:[#allocation11 + $0xb14] sm:$0xf]  ;;  %6803 = vmatpush.bf16.msrb.mxu3 %v10763_v4  ;;  %v9935_v24 = vor.u32 %v11482_v8, %v9932_v43 }
 0x367   :  { %6880 = vmatpush.bf16.msrb.mxu1 %v10287_v62  ;;  %6843 = vmatpush.bf16.msra.mxu2 %v9455_v7  ;;  %v10188_v38 = vld [vmem:[#allocation11 + $0xb30] sm:$0xf0]  ;;  %v11662_v7 = vld [vmem:[#allocation11 + $0xeac] sm:$0xf0] }
 0x368   :  { %v11346_v26 = vld [vmem:[#allocation11 + $0x4d4] sm:$0xf]  ;;  %v10191_v14 = vor.u32 %v11546_v45, %v10188_v38  ;;  %v10635_v8 = vor.u32 %v11662_v7, %v10634_v21  ;;  %v11311_v21 = vld [vmem:[#allocation11 + $0x3b4] sm:$0xf0] }
 0x369   :  { %6868 = vmatpush.bf16.msrb.mxu0 %v9999_v49  ;;  %v9388_v3 = vld [vmem:[#allocation11 + $0x4f0] sm:$0xf0]  ;;  %v6618_v28 = vpop.f32.mrf.mxu0  ;;  %v6592_v45 = vpop.f32.mrf.mxu2 }
 0x36a   :  { %v11474_v52 = vld [vmem:[#allocation11 + $0x8d4] sm:$0xf]  ;;  %v9391_v57 = vor.u32 %v11346_v26, %v9388_v3  ;;  %6804 = vmatpush.bf16.msrb.mxu3 %v10731_v47  ;;  %v10602_v26 = vld [vmem:[#allocation11 + $0xe50] sm:$0xf] }
 0x36b   :  { %6881 = vmatpush.bf16.msrb.mxu1 %v10255_v60  ;;  %v9900_v54 = vld [vmem:[#allocation11 + $0x8f0] sm:$0xf0]  ;;  %6844 = vmatpush.bf16.msra.mxu2 %v9423_v35  ;;  %v6631_v29 = vpop.f32.mrf.mxu1  ;;  %v11654_v3 = vld [vmem:[#allocation11 + $0xe6c] sm:$0xf0] }
 0x36c   :  { %v11538_v51 = vld [vmem:[#allocation11 + $0xad4] sm:$0xf]  ;;  %v9903_v2 = vor.u32 %v11474_v52, %v9900_v54  ;;  %v9010_v54 = vld [vmem:[#allocation11 + $0x1d8] sm:$0xf] }
 0x36d   :  { %6869 = vmatpush.bf16.msrb.mxu0 %v9967_v31  ;;  %v10156_v6 = vld [vmem:[#allocation11 + $0xaf0] sm:$0xf0]  ;;  %v12333_v31 = vpop.f32.mrf.mxu3 }
 0x36e   :  { %v11338_v61 = vld [vmem:[#allocation11 + $0x494] sm:$0xf]  ;;  %v10159_v27 = vor.u32 %v11538_v51, %v10156_v6  ;;  %6805 = vmatpush.bf16.msrb.mxu3 %v10699_v59  ;;  %v9266_v51 = vld [vmem:[#allocation11 + $0x3d8] sm:$0xf] }
 0x36f   :  { %6882 = vmatpush.bf16.msrb.mxu1 %v10223_v40  ;;  %v9356_v62 = vld [vmem:[#allocation11 + $0x4b0] sm:$0xf0]  ;;  %6845 = vmatpush.bf16.msra.mxu2 %v9391_v57  ;;  %v10603_v57 = vor.u32 %v11654_v3, %v10602_v26  ;;  %v11319_v6 = vld [vmem:[#allocation11 + $0x3f4] sm:$0xf0] }
 0x370   :  { %v11466_v10 = vld [vmem:[#allocation11 + $0x894] sm:$0xf]  ;;  %v9359_v11 = vor.u32 %v11338_v61, %v9356_v62 }
 0x371   :  { %6870 = vmatpush.bf16.msrb.mxu0 %v9935_v24  ;;  %v9868_v30 = vld [vmem:[#allocation11 + $0x8b0] sm:$0xf0] }
 0x372   :  { %v11530_v33 = vld [vmem:[#allocation11 + $0xa94] sm:$0xf]  ;;  %v9871_v55 = vor.u32 %v11466_v10, %v9868_v30  ;;  %6806 = vmatpush.bf16.msrb.mxu3 %v10667_v13  ;;  %v9011_v10 = vor.u32 %v11255_v15, %v9010_v54  ;;  %v9267_v30 = vor.u32 %v11319_v6, %v9266_v51  ;;  %v9170_v54 = vld [vmem:[#allocation11 + $0x318] sm:$0xf] }
 0x373   :  { %6883 = vmatpush.bf16.msrb.mxu1 %v10191_v14  ;;  %v10124_v49 = vld [vmem:[#allocation11 + $0xab0] sm:$0xf0]  ;;  %6846 = vmatpush.bf16.msra.mxu2 %v9359_v11  ;;  %v11295_v15 = vld [vmem:[#allocation11 + $0x334] sm:$0xf0] }
 0x374   :  { %v11330_v50 = vld [vmem:[#allocation11 + $0x454] sm:$0xf]  ;;  %v10127_v25 = vor.u32 %v11530_v33, %v10124_v49  ;;  %v8978_v49 = vld [vmem:[#allocation11 + $0x198] sm:$0xf]  ;;  %v9171_v51 = vor.u32 %v11295_v15, %v9170_v54 }
 0x375   :  { %v9324_v60 = vld [vmem:[#allocation11 + $0x470] sm:$0xf0]  ;;  %6871 = vmatpush.bf16.msrb.mxu0 %v9903_v2  ;;  %v10570_v2 = vld [vmem:[#allocation11 + $0xe10] sm:$0xf]  ;;  %v9522_v54 = vld [vmem:[#allocation11 + $0x5d8] sm:$0xf] }
 0x376   :  { %v11458_v4 = vld [vmem:[#allocation11 + $0x854] sm:$0xf]  ;;  %v9327_v34 = vor.u32 %v11330_v50, %v9324_v60  ;;  %6807 = vmatpush.bf16.msrb.mxu3 %v10635_v8  ;;  %v10571_v50 = vor.u32 %v11646_v53, %v10570_v2  ;;  %v11247_v60 = vld [vmem:[#allocation11 + $0x1b4] sm:$0xf0] }
 0x377   :  { %6884 = vmatpush.bf16.msrb.mxu1 %v10159_v27  ;;  %v9836_v39 = vld [vmem:[#allocation11 + $0x870] sm:$0xf0]  ;;  %v6553_v27 = vpop.f32.mrf.mxu3  ;;  %v11239_v8 = vld [vmem:[#allocation11 + $0x174] sm:$0xf0] }
 0x378   :  { %v11522_v63 = vld [vmem:[#allocation11 + $0xa54] sm:$0xf]  ;;  %v9839_v38 = vor.u32 %v11458_v4, %v9836_v39  ;;  %6847 = vmatpush.bf16.msra.mxu2 %v9327_v34  ;;  %v8979_v4 = vor.u32 %v11247_v60, %v8978_v49  ;;  %v9138_v27 = vld [vmem:[#allocation11 + $0x2d8] sm:$0xf] }
 0x379   :  { %v10092_v40 = vld [vmem:[#allocation11 + $0xa70] sm:$0xf0]  ;;  %6872 = vmatpush.bf16.msrb.mxu0 %v9871_v55  ;;  %v9234_v55 = vld [vmem:[#allocation11 + $0x398] sm:$0xf] }
 0x37a   :  { %v11322_v43 = vld [vmem:[#allocation11 + $0x414] sm:$0xf]  ;;  %v10095_v24 = vor.u32 %v11522_v63, %v10092_v40  ;;  %6808 = vmatpush.bf16.msrb.mxu3 %v10603_v57  ;;  %v9235_v39 = vor.u32 %v11311_v21, %v9234_v55  ;;  %v8946_v63 = vld [vmem:[#allocation11 + $0x158] sm:$0xf] }
 0x37b   :  { %v9292_v35 = vld [vmem:[#allocation11 + $0x430] sm:$0xf0]  ;;  %6885 = vmatpush.bf16.msrb.mxu1 %v10127_v25  ;;  %v8947_v26 = vor.u32 %v11239_v8, %v8946_v63  ;;  %v8850_v55 = vld [vmem:[#allocation11 + $0x98] sm:$0xf] }
 0x37c   :  { %v11634_v44 = vld [vmem:[#allocation11 + $0xdd4] sm:$0xf]  ;;  %v9295_v14 = vor.u32 %v11322_v43, %v9292_v35  ;;  %v9202_v43 = vld [vmem:[#allocation11 + $0x358] sm:$0xf] }
 0x37d   :  { %v10540_v47 = vld [vmem:[#allocation11 + $0xdf0] sm:$0xf0]  ;;  %6873 = vmatpush.bf16.msrb.mxu0 %v9839_v38  ;;  %v11303_v35 = vld [vmem:[#allocation11 + $0x374] sm:$0xf0]  ;;  %v6539_v38 = vadd.f32 %v12318_v19, %v12295_v23 }
 0x37e   :  { %v11450_v48 = vld [vmem:[#allocation11 + $0x814] sm:$0xf]  ;;  %v10543_v56 = vor.u32 %v11634_v44, %v10540_v47  ;;  %6848 = vmatpush.bf16.msra.mxu2 %v9295_v14  ;;  %6809 = vmatpush.bf16.msrb.mxu3 %v10571_v50  ;;  %v9203_v3 = vor.u32 %v11303_v35, %v9202_v43  ;;  %v8818_v35 = vld [vmem:[#allocation11 + $0x58] sm:$0xf] }
 0x37f   :  { %v9804_v41 = vld [vmem:[#allocation11 + $0x830] sm:$0xf0]  ;;  %6886 = vmatpush.bf16.msrb.mxu1 %v10095_v24  ;;  %v11383_v15 = vld [vmem:[#allocation11 + $0x5f4] sm:$0xf0] }
 0x380   :  { %v11514_v58 = vld [vmem:[#allocation11 + $0xa14] sm:$0xf]  ;;  %v9807_v61 = vor.u32 %v11450_v48, %v9804_v41  ;;  %v8914_v41 = vld [vmem:[#allocation11 + $0x118] sm:$0xf] }
 0x381   :  { %v10060_v52 = vld [vmem:[#allocation11 + $0xa30] sm:$0xf0]  ;;  %6849 = vmatmul.bf16.vlgmr.msra.gmra.mxu2 %v12197_v37  ;;  %6810 = vmatmul.bf16.vlgmr.msrb.gmra.mxu3 %v12251_v22  ;;  %v12347_v49 = vpop.f32.mrf.mxu2 }
 0x382   :  { %v11626_v59 = vld [vmem:[#allocation11 + $0xd94] sm:$0xf]  ;;  %v10063_v9 = vor.u32 %v11514_v58, %v10060_v52  ;;  %6893 = vmatpush.bf16.msrb.mxu2 %v10543_v56  ;;  %6874 = vmatpush.bf16.msrb.mxu0 %v9807_v61  ;;  %v6552_v58 = vadd.f32 %v12333_v31, %v6539_v38  ;;  %v11231_v52 = vld [vmem:[#allocation11 + $0x134] sm:$0xf0] }
 0x383   :  { %v10508_v62 = vld [vmem:[#allocation11 + $0xdb0] sm:$0xf0]  ;;  %v8915_v57 = vor.u32 %v11231_v52, %v8914_v41  ;;  %v8882_v61 = vld [vmem:[#allocation11 + $0xd8] sm:$0xf]  ;;  %v12345_v2 = vpop.f32.mrf.mxu1 }
 0x384   :  { %v11442_v11 = vld [vmem:[#allocation11 + $0x7d4] sm:$0xf]  ;;  %v10511_v13 = vor.u32 %v11626_v59, %v10508_v62  ;;  %6887 = vmatpush.bf16.msrb.mxu1 %v10063_v9  ;;  %v6565_v31 = vadd.f32 %v12314_v42, %v6552_v58  ;;  %v12343_v62 = vpop.f32.mrf.mxu0  ;;  %v11223_v9 = vld [vmem:[#allocation11 + $0xf4] sm:$0xf0] }
 0x385   :  { %v9772_v33 = vld [vmem:[#allocation11 + $0x7f0] sm:$0xf0]  ;;  %6875 = vmatmul.bf16.vlgmr.msrb.gmra.mxu0 %v12216_v16 }
 0x386   :  { %v11618_v7 = vld [vmem:[#allocation11 + $0xd54] sm:$0xf]  ;;  %v9775_v25 = vor.u32 %v11442_v11, %v9772_v33  ;;  %6919 = vmatpush.bf16.msra.mxu0 %v9011_v10  ;;  %6894 = vmatpush.bf16.msrb.mxu2 %v10511_v13  ;;  %v11287_v10 = vld [vmem:[#allocation11 + $0x2f4] sm:$0xf0]  ;;  %v8883_v13 = vor.u32 %v11223_v9, %v8882_v61  ;;  %v7165_v61 = vperm.slane %v12303_v12, 2  ;;  %v9523_v9 = vor.u32 %v11383_v15, %v9522_v54 }
 0x387   :  { %v10476_v28 = vld [vmem:[#allocation11 + $0xd70] sm:$0xf0]  ;;  %6888 = vmatmul.bf16.vlgmr.msrb.gmra.mxu1 %v12214_v17  ;;  %v9139_v50 = vor.u32 %v11287_v10, %v9138_v27  ;;  %v10034_v27 = vld [vmem:[#allocation11 + $0x9d8] sm:$0xf] }
 0x388   :  { %6932 = vmatpush.bf16.msra.mxu1 %v9267_v30  ;;  %v11434_v29 = vld [vmem:[#allocation11 + $0x794] sm:$0xf]  ;;  %v10479_v40 = vor.u32 %v11618_v7, %v10476_v28  ;;  %6854 = vmatpush.bf16.msra.mxu3 %v9775_v25  ;;  %v6578_v7 = vadd.f32 %v12316_v0, %v6565_v31  ;;  %v11215_v28 = vld [vmem:[#allocation11 + $0xb4] sm:$0xf0] }
 0x389   :  { %v9740_v34 = vld [vmem:[#allocation11 + $0x7b0] sm:$0xf0]  ;;  %v9106_v25 = vld [vmem:[#allocation11 + $0x298] sm:$0xf]  ;;  %v8851_v63 = vor.u32 %v11215_v28, %v8850_v55 }
 0x38a   :  { %v11610_v44 = vld [vmem:[#allocation11 + $0xd14] sm:$0xf]  ;;  %v9743_v47 = vor.u32 %v11434_v29, %v9740_v34  ;;  %6920 = vmatpush.bf16.msra.mxu0 %v8979_v4  ;;  %6895 = vmatpush.bf16.msrb.mxu2 %v10479_v40  ;;  %v11279_v4 = vld [vmem:[#allocation11 + $0x2b4] sm:$0xf0]  ;;  %v6591_v38 = vadd.f32 %v12331_v1, %v6578_v7 }
 0x38b   :  { %v10444_v45 = vld [vmem:[#allocation11 + $0xd30] sm:$0xf0]  ;;  %v9107_v40 = vor.u32 %v11279_v4, %v9106_v25  ;;  %v9042_v31 = vld [vmem:[#allocation11 + $0x218] sm:$0xf] }
 0x38c   :  { %6933 = vmatpush.bf16.msra.mxu1 %v9235_v39  ;;  %v11426_v24 = vld [vmem:[#allocation11 + $0x754] sm:$0xf]  ;;  %v10447_v14 = vor.u32 %v11610_v44, %v10444_v45  ;;  %6855 = vmatpush.bf16.msra.mxu3 %v9743_v47  ;;  %v6670_v44 = vpop.f32.mrf.mxu0  ;;  %v6683_v45 = vpop.f32.mrf.mxu1  ;;  %v11207_v47 = vld [vmem:[#allocation11 + $0x74] sm:$0xf0] }
 0x38d   :  { %v9708_v48 = vld [vmem:[#allocation11 + $0x770] sm:$0xf0]  ;;  %v11511_v10 = vld [vmem:[#allocation11 + $0x9f4] sm:$0xf0] }
 0x38e   :  { %v11602_v56 = vld [vmem:[#allocation11 + $0xcd4] sm:$0xf]  ;;  %v9711_v19 = vor.u32 %v11426_v24, %v9708_v48  ;;  %6921 = vmatpush.bf16.msra.mxu0 %v8947_v26  ;;  %6896 = vmatpush.bf16.msrb.mxu2 %v10447_v14  ;;  %v9074_v26 = vld [vmem:[#allocation11 + $0x258] sm:$0xf]  ;;  %v6603_v24 = vpop.f32.mrf.mxu3  ;;  %v7139_v48 = vperm.slane %v12299_v32, 2  ;;  %v10035_v28 = vor.u32 %v11511_v10, %v10034_v27 }
 0x38f   :  { %v10412_v23 = vld [vmem:[#allocation11 + $0xcf0] sm:$0xf0]  ;;  %v6604_v14 = vadd.f32 %v6603_v24, %v6591_v38  ;;  %v11567_v44 = vld [vmem:[#allocation11 + $0xbb4] sm:$0xf0] }
 0x390   :  { %6934 = vmatpush.bf16.msra.mxu1 %v9203_v3  ;;  %v11418_v6 = vld [vmem:[#allocation11 + $0x714] sm:$0xf]  ;;  %v10415_v53 = vor.u32 %v11602_v56, %v10412_v23  ;;  %6856 = vmatpush.bf16.msra.mxu3 %v9711_v19  ;;  %v11271_v3 = vld [vmem:[#allocation11 + $0x274] sm:$0xf0]  ;;  %v6644_v23 = vpop.f32.mrf.mxu2  ;;  %v8819_v19 = vor.u32 %v11207_v47, %v8818_v35 }
 0x391   :  { %v9676_v59 = vld [vmem:[#allocation11 + $0x730] sm:$0xf0]  ;;  %v9075_v1 = vor.u32 %v11271_v3, %v9074_v26  ;;  %v10258_v35 = vld [vmem:[#allocation11 + $0xb98] sm:$0xf] }
 0x392   :  { %v11594_v30 = vld [vmem:[#allocation11 + $0xc94] sm:$0xf]  ;;  %v9679_v33 = vor.u32 %v11418_v6, %v9676_v59  ;;  %6922 = vmatpush.bf16.msra.mxu0 %v8915_v57  ;;  %6897 = vmatpush.bf16.msrb.mxu2 %v10415_v53  ;;  %v11199_v6 = vld [vmem:[#allocation11 + $0x34] sm:$0xf0]  ;;  %v7129_v59 = vmax.f32 %v6604_v14, 0.0  ;;  %v10259_v24 = vor.u32 %v11567_v44, %v10258_v35 }
 0x393   :  { %v10380_v11 = vld [vmem:[#allocation11 + $0xcb0] sm:$0xf0]  ;;  %v11263_v53 = vld [vmem:[#allocation11 + $0x234] sm:$0xf0] }
 0x394   :  { %6935 = vmatpush.bf16.msra.mxu1 %v9171_v51  ;;  %v11410_v42 = vld [vmem:[#allocation11 + $0x6d4] sm:$0xf]  ;;  %v10383_v21 = vor.u32 %v11594_v30, %v10380_v11  ;;  %6857 = vmatpush.bf16.msra.mxu3 %v9679_v33  ;;  %v8786_v51 = vld [vmem:[#allocation11 + $0x18] sm:$0xf]  ;;  %v7155_v11 = vmul.f32 %v7139_v48, %v7129_v59  ;;  %v9043_v7 = vor.u32 %v11263_v53, %v9042_v31 }
 0x395   :  { %v9644_v60 = vld [vmem:[#allocation11 + $0x6f0] sm:$0xf0]  ;;  %v10290_v30 = vld [vmem:[#allocation11 + $0xbd8] sm:$0xf] }
 0x396   :  { %v11586_v39 = vld [vmem:[#allocation11 + $0xc54] sm:$0xf]  ;;  %v9647_v34 = vor.u32 %v11410_v42, %v9644_v60  ;;  %6923 = vmatpush.bf16.msra.mxu0 %v8883_v13  ;;  %6898 = vmatpush.bf16.msrb.mxu2 %v10383_v21  ;;  %v11575_v13 = vld [vmem:[#allocation11 + $0xbf4] sm:$0xf0]  ;;  %v8787_v60 = vor.u32 %v11199_v6, %v8786_v51  ;;  %v7181_v12 = vadd.f32 %v7165_v61, %v7155_v11  ;;  %v12357_v61 = vld [vmem:[#allocation13] sm:$0xff] }
 0x397   :  { %v10348_v29 = vld [vmem:[#allocation11 + $0xc70] sm:$0xf0]  ;;  %v11375_v42 = vld [vmem:[#allocation11 + $0x5b4] sm:$0xf0] }
 0x398   :  { %6936 = vmatpush.bf16.msra.mxu1 %v9139_v50  ;;  %v11402_v8 = vld [vmem:[#allocation11 + $0x694] sm:$0xf]  ;;  %v10351_v0 = vor.u32 %v11586_v39, %v10348_v29  ;;  %6858 = vmatpush.bf16.msra.mxu3 %v9647_v34  ;;  %v9490_v50 = vld [vmem:[#allocation11 + $0x598] sm:$0xf]  ;;  %v6605_v39 = vpop.f32.mrf.mxu3  ;;  %v10291_v29 = vor.u32 %v11575_v13, %v10290_v30 }
 0x399   :  { %v9612_v43 = vld [vmem:[#allocation11 + $0x6b0] sm:$0xf0]  ;;  %v9491_v34 = vor.u32 %v11375_v42, %v9490_v50  ;;  %v9458_v38 = vld [vmem:[#allocation11 + $0x558] sm:$0xf] }
 0x39a   :  { %v11578_v41 = vld [vmem:[#allocation11 + $0xc14] sm:$0xf]  ;;  %v9615_v52 = vor.u32 %v11402_v8, %v9612_v43  ;;  %6924 = vmatpush.bf16.msra.mxu0 %v8851_v63  ;;  %6899 = vmatpush.bf16.msrb.mxu2 %v10351_v0  ;;  %v10002_v63 = vld [vmem:[#allocation11 + $0x998] sm:$0xf]  ;;  %v7189_v8 = vmax.f32 %v7181_v12, 0.0 }
 0x39b   :  { %v10316_v58 = vld [vmem:[#allocation11 + $0xc30] sm:$0xf0]  ;;  %v11367_v0 = vld [vmem:[#allocation11 + $0x574] sm:$0xf0] }
 0x39c   :  { %v11394_v56 = vld [vmem:[#allocation11 + $0x654] sm:$0xf]  ;;  %6937 = vmatpush.bf16.msra.mxu1 %v9107_v40  ;;  %v10319_v32 = vor.u32 %v11578_v41, %v10316_v58  ;;  %6859 = vmatpush.bf16.msra.mxu3 %v9615_v52  ;;  %v11503_v40 = vld [vmem:[#allocation11 + $0x9b4] sm:$0xf0]  ;;  %7197 = vst [vmem:[#allocation17 + $0x10] sm:$0xff] %v7189_v8  ;;  %v9459_v58 = vor.u32 %v11367_v0, %v9458_v38 }
 0x39d   :  { %v9580_v57 = vld [vmem:[#allocation11 + $0x670] sm:$0xf0]  ;;  %v10003_v47 = vor.u32 %v11503_v40, %v10002_v63  ;;  %v9970_v48 = vld [vmem:[#allocation11 + $0x958] sm:$0xf] }
 0x39e   :  { %v9583_v33 = vor.u32 %v11394_v56, %v9580_v57  ;;  %6925 = vmatpush.bf16.msra.mxu0 %v8819_v19  ;;  %v11386_v55 = vld [vmem:[#allocation11 + $0x614] sm:$0xf]  ;;  %6900 = vmatpush.bf16.msrb.mxu2 %v10319_v32  ;;  %v11495_v41 = vld [vmem:[#allocation11 + $0x974] sm:$0xf0]  ;;  %v3723_v32 = vperm.slane %v12357_v61, 4 }
 0x39f   :  { %v9548_v21 = vld [vmem:[#allocation11 + $0x630] sm:$0xf0]  ;;  %v10226_v14 = vld [vmem:[#allocation11 + $0xb58] sm:$0xf]  ;;  %v9971_v23 = vor.u32 %v11495_v41, %v9970_v48 }
 0x3a0   :  { %6938 = vmatpush.bf16.msra.mxu1 %v9075_v1  ;;  %v11698_v25 = vld [vmem:[#allocation11 + $0xfd4] sm:$0xf]  ;;  %6860 = vmatpush.bf16.msra.mxu3 %v9583_v33  ;;  %v9551_v43 = vor.u32 %v11386_v55, %v9548_v21  ;;  %v11559_v52 = vld [vmem:[#allocation11 + $0xb74] sm:$0xf0] }
 0x3a1   :  { %v10796_v4 = vld [vmem:[#allocation11 + $0xff0] sm:$0xf0]  ;;  %6901 = vmatmul.bf16.vlgmr.msrb.gmra.mxu2 %v12241_v20  ;;  %v9426_v15 = vld [vmem:[#allocation11 + $0x518] sm:$0xf]  ;;  %v10227_v57 = vor.u32 %v11559_v52, %v10226_v14  ;;  %v6720_v13 = vpop.f32.mrf.mxu0 }
 0x3a2   :  { %6945 = vmatpush.bf16.msra.mxu2 %v9523_v9  ;;  %6926 = vmatpush.bf16.msra.mxu0 %v8787_v60  ;;  %v10799_v45 = vor.u32 %v11698_v25, %v10796_v4  ;;  %v11690_v26 = vld [vmem:[#allocation11 + $0xf94] sm:$0xf]  ;;  %v11359_v56 = vld [vmem:[#allocation11 + $0x534] sm:$0xf0]  ;;  %v6721_v55 = vadd.f32 %v6720_v13, %v3723_v32 }
 0x3a3   :  { %v10764_v3 = vld [vmem:[#allocation11 + $0xfb0] sm:$0xf0]  ;;  %v9938_v51 = vld [vmem:[#allocation11 + $0x918] sm:$0xf]  ;;  %v9427_v59 = vor.u32 %v11359_v56, %v9426_v15  ;;  %v6733_v21 = vpop.f32.mrf.mxu1 }
 0x3a4   :  { %6939 = vmatpush.bf16.msra.mxu1 %v9043_v7  ;;  %6861 = vmatpush.bf16.msra.mxu3 %v9551_v43  ;;  %v10767_v54 = vor.u32 %v11690_v26, %v10764_v3  ;;  %v11682_v19 = vld [vmem:[#allocation11 + $0xf54] sm:$0xf]  ;;  %v11487_v6 = vld [vmem:[#allocation11 + $0x934] sm:$0xf0] }
 0x3a5   :  { %6927 = vmatmul.bf16.vlgmr.msra.gmra.mxu0 %v12193_v36  ;;  %v10732_v1 = vld [vmem:[#allocation11 + $0xf70] sm:$0xf0]  ;;  %v10194_v31 = vld [vmem:[#allocation11 + $0xb18] sm:$0xf]  ;;  %v9939_v30 = vor.u32 %v11487_v6, %v9938_v51 }
 0x3a6   :  { %6971 = vmatpush.bf16.msrb.mxu0 %v10035_v28  ;;  %6946 = vmatpush.bf16.msra.mxu2 %v9491_v34  ;;  %v11551_v53 = vld [vmem:[#allocation11 + $0xb34] sm:$0xf0]  ;;  %v10735_v9 = vor.u32 %v11682_v19, %v10732_v1  ;;  %v11674_v11 = vld [vmem:[#allocation11 + $0xf14] sm:$0xf]  ;;  %v12362_v34 = vpop.f32.mrf.mxu2 }
 0x3a7   :  { %6940 = vmatmul.bf16.vlgmr.msra.gmra.mxu1 %v12195_v18  ;;  %6862 = vmatmul.bf16.vlgmr.msra.gmra.mxu3 %v12199_v5  ;;  %v9394_v27 = vld [vmem:[#allocation11 + $0x4d8] sm:$0xf]  ;;  %v10700_v33 = vld [vmem:[#allocation11 + $0xf30] sm:$0xf0]  ;;  %v10195_v50 = vor.u32 %v11551_v53, %v10194_v31 }
 0x3a8   :  { %6984 = vmatpush.bf16.msrb.mxu1 %v10291_v29  ;;  %6906 = vmatpush.bf16.msrb.mxu3 %v10799_v45  ;;  %v11351_v10 = vld [vmem:[#allocation11 + $0x4f4] sm:$0xf0]  ;;  %v10703_v25 = vor.u32 %v11674_v11, %v10700_v33  ;;  %v12360_v29 = vadd.f32 %v6733_v21, %v6721_v55  ;;  %v11666_v40 = vld [vmem:[#allocation11 + $0xed4] sm:$0xf]  ;;  %v9012_v55 = vld [vmem:[#allocation11 + $0x1f8] sm:$0xf0] }
 0x3a9   :  { %v9906_v42 = vld [vmem:[#allocation11 + $0x8d8] sm:$0xf]  ;;  %v9395_v12 = vor.u32 %v11351_v10, %v9394_v27  ;;  %v10668_v8 = vld [vmem:[#allocation11 + $0xef0] sm:$0xf0]  ;;  %v6722_v14 = vpop.f32.mrf.mxu0 }
 0x3aa   :  { %6972 = vmatpush.bf16.msrb.mxu0 %v10003_v47  ;;  %6947 = vmatpush.bf16.msra.mxu2 %v9459_v58  ;;  %v11479_v60 = vld [vmem:[#allocation11 + $0x8f4] sm:$0xf0]  ;;  %v10671_v47 = vor.u32 %v11666_v40, %v10668_v8  ;;  %v11658_v48 = vld [vmem:[#allocation11 + $0xe94] sm:$0xf]  ;;  %v6643_v58 = vadd.f32 %v12347_v49, %v12329_v46 }
 0x3ab   :  { %v10162_v7 = vld [vmem:[#allocation11 + $0xad8] sm:$0xf]  ;;  %v9907_v63 = vor.u32 %v11479_v60, %v9906_v42  ;;  %v10636_v41 = vld [vmem:[#allocation11 + $0xeb0] sm:$0xf0]  ;;  %v6735_v56 = vpop.f32.mrf.mxu1  ;;  %v11251_v60 = vld [vmem:[#allocation11 + $0x1dc] sm:$0xf] }
 0x3ac   :  { %6985 = vmatpush.bf16.msrb.mxu1 %v10259_v24  ;;  %6907 = vmatpush.bf16.msrb.mxu3 %v10767_v54  ;;  %v11543_v28 = vld [vmem:[#allocation11 + $0xaf4] sm:$0xf0]  ;;  %v10639_v6 = vor.u32 %v11658_v48, %v10636_v41  ;;  %v10604_v27 = vld [vmem:[#allocation11 + $0xe70] sm:$0xf0]  ;;  %v11235_v56 = vld [vmem:[#allocation11 + $0x15c] sm:$0xf] }
 0x3ad   :  { %v9362_v4 = vld [vmem:[#allocation11 + $0x498] sm:$0xf]  ;;  %v10163_v43 = vor.u32 %v11543_v28, %v10162_v7  ;;  %v11315_v7 = vld [vmem:[#allocation11 + $0x3dc] sm:$0xf]  ;;  %v10572_v40 = vld [vmem:[#allocation11 + $0xe30] sm:$0xf0] }
 0x3ae   :  { %6973 = vmatpush.bf16.msrb.mxu0 %v9971_v23  ;;  %6948 = vmatpush.bf16.msra.mxu2 %v9427_v59  ;;  %v11343_v39 = vld [vmem:[#allocation11 + $0x4b4] sm:$0xf0]  ;;  %v6655_v23 = vpop.f32.mrf.mxu3  ;;  %v6696_v53 = vpop.f32.mrf.mxu2  ;;  %v9268_v28 = vld [vmem:[#allocation11 + $0x3f8] sm:$0xf0] }
 0x3af   :  { %v9874_v35 = vld [vmem:[#allocation11 + $0x898] sm:$0xf]  ;;  %v9363_v45 = vor.u32 %v11343_v39, %v9362_v4  ;;  %v6656_v51 = vadd.f32 %v6655_v23, %v6643_v58 }
 0x3b0   :  { %6986 = vmatpush.bf16.msrb.mxu1 %v10227_v57  ;;  %6908 = vmatpush.bf16.msrb.mxu3 %v10735_v9  ;;  %v11471_v44 = vld [vmem:[#allocation11 + $0x8b4] sm:$0xf0]  ;;  %v11650_v9 = vld [vmem:[#allocation11 + $0xe54] sm:$0xf] }
 0x3b1   :  { %v10130_v38 = vld [vmem:[#allocation11 + $0xa98] sm:$0xf]  ;;  %v9875_v24 = vor.u32 %v11471_v44, %v9874_v35  ;;  %v6669_v10 = vadd.f32 %v12343_v62, %v6656_v51  ;;  %v9015_v35 = vor.u32 %v11251_v60, %v9012_v55  ;;  %v9271_v44 = vor.u32 %v11315_v7, %v9268_v28 }
 0x3b2   :  { %6974 = vmatpush.bf16.msrb.mxu0 %v9939_v30  ;;  %6949 = vmatpush.bf16.msra.mxu2 %v9395_v12  ;;  %v11535_v0 = vld [vmem:[#allocation11 + $0xab4] sm:$0xf0]  ;;  %v10607_v12 = vor.u32 %v11650_v9, %v10604_v27  ;;  %v8916_v27 = vld [vmem:[#allocation11 + $0x138] sm:$0xf0] }
 0x3b3   :  { %v9330_v26 = vld [vmem:[#allocation11 + $0x458] sm:$0xf]  ;;  %v10131_v52 = vor.u32 %v11535_v0, %v10130_v38  ;;  %v12368_v4 = vadd.f32 %v12345_v2, %v6669_v10  ;;  %v11243_v0 = vld [vmem:[#allocation11 + $0x19c] sm:$0xf] }
 0x3b4   :  { %6987 = vmatpush.bf16.msrb.mxu1 %v10195_v50  ;;  %6909 = vmatpush.bf16.msrb.mxu3 %v10703_v25  ;;  %v11335_v3 = vld [vmem:[#allocation11 + $0x474] sm:$0xf0]  ;;  %v8980_v2 = vld [vmem:[#allocation11 + $0x1b8] sm:$0xf0] }
 0x3b5   :  { %v9842_v54 = vld [vmem:[#allocation11 + $0x858] sm:$0xf]  ;;  %v9331_v19 = vor.u32 %v11335_v3, %v9330_v26  ;;  %v11307_v3 = vld [vmem:[#allocation11 + $0x39c] sm:$0xf]  ;;  %v8983_v14 = vor.u32 %v11243_v0, %v8980_v2 }
 0x3b6   :  { %6975 = vmatpush.bf16.msrb.mxu0 %v9907_v63  ;;  %v11463_v15 = vld [vmem:[#allocation11 + $0x874] sm:$0xf0]  ;;  %6950 = vmatpush.bf16.msra.mxu2 %v9363_v45  ;;  %v11642_v63 = vld [vmem:[#allocation11 + $0xe14] sm:$0xf]  ;;  %v11291_v10 = vld [vmem:[#allocation11 + $0x31c] sm:$0xf] }
 0x3b7   :  { %v10098_v1 = vld [vmem:[#allocation11 + $0xa58] sm:$0xf]  ;;  %v9843_v46 = vor.u32 %v11463_v15, %v9842_v54  ;;  %v10575_v26 = vor.u32 %v11642_v63, %v10572_v40  ;;  %v11211_v0 = vld [vmem:[#allocation11 + $0x9c] sm:$0xf] }
 0x3b8   :  { %6988 = vmatpush.bf16.msrb.mxu1 %v10163_v43  ;;  %v11527_v57 = vld [vmem:[#allocation11 + $0xa74] sm:$0xf0]  ;;  %6910 = vmatpush.bf16.msrb.mxu3 %v10671_v47  ;;  %v6657_v43 = vpop.f32.mrf.mxu3  ;;  %v11275_v2 = vld [vmem:[#allocation11 + $0x29c] sm:$0xf] }
 0x3b9   :  { %v9298_v59 = vld [vmem:[#allocation11 + $0x418] sm:$0xf]  ;;  %v10099_v30 = vor.u32 %v11527_v57, %v10098_v1  ;;  %v11299_v1 = vld [vmem:[#allocation11 + $0x35c] sm:$0xf] }
 0x3ba   :  { %v11327_v32 = vld [vmem:[#allocation11 + $0x434] sm:$0xf0]  ;;  %6976 = vmatpush.bf16.msrb.mxu0 %v9875_v24  ;;  %6951 = vmatpush.bf16.msra.mxu2 %v9331_v19  ;;  %v9236_v24 = vld [vmem:[#allocation11 + $0x3b8] sm:$0xf0] }
 0x3bb   :  { %v10546_v31 = vld [vmem:[#allocation11 + $0xdd8] sm:$0xf]  ;;  %v9299_v50 = vor.u32 %v11327_v32, %v9298_v59  ;;  %v8948_v19 = vld [vmem:[#allocation11 + $0x178] sm:$0xf0] }
 0x3bc   :  { %v11639_v49 = vld [vmem:[#allocation11 + $0xdf4] sm:$0xf0]  ;;  %6989 = vmatpush.bf16.msrb.mxu1 %v10131_v52  ;;  %6911 = vmatpush.bf16.msrb.mxu3 %v10639_v6  ;;  %v9239_v52 = vor.u32 %v11307_v3, %v9236_v24  ;;  %v9204_v57 = vld [vmem:[#allocation11 + $0x378] sm:$0xf0]  ;;  %v8951_v32 = vor.u32 %v11235_v56, %v8948_v19  ;;  %v6695_v19 = vadd.f32 %v12362_v34, %v12368_v4 }
 0x3bd   :  { %v9810_v11 = vld [vmem:[#allocation11 + $0x818] sm:$0xf]  ;;  %v10547_v21 = vor.u32 %v11639_v49, %v10546_v31  ;;  %v9207_v31 = vor.u32 %v11299_v1, %v9204_v57  ;;  %v11227_v49 = vld [vmem:[#allocation11 + $0x11c] sm:$0xf] }
 0x3be   :  { %v11455_v33 = vld [vmem:[#allocation11 + $0x834] sm:$0xf0]  ;;  %6977 = vmatpush.bf16.msrb.mxu0 %v9843_v46  ;;  %6952 = vmatpush.bf16.msra.mxu2 %v9299_v50  ;;  %v8919_v50 = vor.u32 %v11227_v49, %v8916_v27  ;;  %v9108_v3 = vld [vmem:[#allocation11 + $0x2b8] sm:$0xf0] }
 0x3bf   :  { %v10066_v13 = vld [vmem:[#allocation11 + $0xa18] sm:$0xf]  ;;  %v9811_v62 = vor.u32 %v11455_v33, %v9810_v11  ;;  %v8820_v57 = vld [vmem:[#allocation11 + $0x78] sm:$0xf0] }
 0x3c0   :  { %v11519_v42 = vld [vmem:[#allocation11 + $0xa34] sm:$0xf0]  ;;  %6990 = vmatpush.bf16.msrb.mxu1 %v10099_v30  ;;  %6912 = vmatpush.bf16.msrb.mxu3 %v10607_v12  ;;  %v9172_v30 = vld [vmem:[#allocation11 + $0x338] sm:$0xf0] }
 0x3c1   :  { %v10514_v25 = vld [vmem:[#allocation11 + $0xd98] sm:$0xf]  ;;  %v10067_v8 = vor.u32 %v11519_v42, %v10066_v13  ;;  %6953 = vmatmul.bf16.vlgmr.msra.gmra.mxu2 %v12197_v37  ;;  %v9175_v42 = vor.u32 %v11291_v10, %v9172_v30  ;;  %v12374_v12 = vpop.f32.mrf.mxu0  ;;  %v12378_v43 = vpop.f32.mrf.mxu2  ;;  %v11379_v27 = vld [vmem:[#allocation11 + $0x5dc] sm:$0xf] }
 0x3c2   :  { %v11631_v39 = vld [vmem:[#allocation11 + $0xdb4] sm:$0xf0]  ;;  %6997 = vmatpush.bf16.msrb.mxu2 %v10547_v21  ;;  %6978 = vmatpush.bf16.msrb.mxu0 %v9811_v62  ;;  %v11219_v21 = vld [vmem:[#allocation11 + $0xdc] sm:$0xf] }
 0x3c3   :  { %v9778_v45 = vld [vmem:[#allocation11 + $0x7d8] sm:$0xf]  ;;  %v10515_v47 = vor.u32 %v11631_v39, %v10514_v25  ;;  %v12376_v7 = vpop.f32.mrf.mxu1  ;;  %v8884_v25 = vld [vmem:[#allocation11 + $0xf8] sm:$0xf0] }
 0x3c4   :  { %v11447_v38 = vld [vmem:[#allocation11 + $0x7f4] sm:$0xf0]  ;;  %6991 = vmatpush.bf16.msrb.mxu1 %v10067_v8  ;;  %6913 = vmatpush.bf16.msrb.mxu3 %v10575_v26  ;;  %v11283_v62 = vld [vmem:[#allocation11 + $0x2dc] sm:$0xf] }
 0x3c5   :  { %v10482_v48 = vld [vmem:[#allocation11 + $0xd58] sm:$0xf]  ;;  %v9779_v58 = vor.u32 %v11447_v38, %v9778_v45  ;;  %6979 = vmatmul.bf16.vlgmr.msrb.gmra.mxu0 %v12216_v16  ;;  %v9140_v39 = vld [vmem:[#allocation11 + $0x2f8] sm:$0xf0] }
 0x3c6   :  { %v11623_v41 = vld [vmem:[#allocation11 + $0xd74] sm:$0xf0]  ;;  %7023 = vmatpush.bf16.msra.mxu0 %v9015_v35  ;;  %6998 = vmatpush.bf16.msrb.mxu2 %v10515_v47  ;;  %v8887_v35 = vor.u32 %v11219_v21, %v8884_v25  ;;  %v8852_v26 = vld [vmem:[#allocation11 + $0xb8] sm:$0xf0] }
 0x3c7   :  { %v9746_v54 = vld [vmem:[#allocation11 + $0x798] sm:$0xf]  ;;  %v10483_v23 = vor.u32 %v11623_v41, %v10482_v48  ;;  %6992 = vmatmul.bf16.vlgmr.msrb.gmra.mxu1 %v12214_v17  ;;  %6914 = vmatmul.bf16.vlgmr.msrb.gmra.mxu3 %v12251_v22  ;;  %v9524_v10 = vld [vmem:[#allocation11 + $0x5f8] sm:$0xf0] }
 0x3c8   :  { %7036 = vmatpush.bf16.msra.mxu1 %v9271_v44  ;;  %v11439_v15 = vld [vmem:[#allocation11 + $0x7b4] sm:$0xf0]  ;;  %6958 = vmatpush.bf16.msra.mxu3 %v9779_v58  ;;  %v9143_v44 = vor.u32 %v11283_v62, %v9140_v39  ;;  %v8855_v58 = vor.u32 %v11211_v0, %v8852_v26  ;;  %v9044_v25 = vld [vmem:[#allocation11 + $0x238] sm:$0xf0]  ;;  %v9527_v62 = vor.u32 %v11379_v27, %v9524_v10 }
 0x3c9   :  { %v10450_v51 = vld [vmem:[#allocation11 + $0xd18] sm:$0xf]  ;;  %v9747_v59 = vor.u32 %v11439_v15, %v9746_v54  ;;  %v11203_v15 = vld [vmem:[#allocation11 + $0x5c] sm:$0xf]  ;;  %v6774_v56 = vpop.f32.mrf.mxu0  ;;  %v6748_v34 = vpop.f32.mrf.mxu2 }
 0x3ca   :  { %v11615_v6 = vld [vmem:[#allocation11 + $0xd34] sm:$0xf0]  ;;  %7024 = vmatpush.bf16.msra.mxu0 %v8983_v14  ;;  %6999 = vmatpush.bf16.msrb.mxu2 %v10483_v23  ;;  %v9111_v14 = vor.u32 %v11275_v2, %v9108_v3  ;;  %v8823_v4 = vor.u32 %v11203_v15, %v8820_v57  ;;  %v11507_v39 = vld [vmem:[#allocation11 + $0x9dc] sm:$0xf] }
 0x3cb   :  { %v9714_v53 = vld [vmem:[#allocation11 + $0x758] sm:$0xf]  ;;  %v10451_v9 = vor.u32 %v11615_v6, %v10450_v51  ;;  %v6787_v23 = vpop.f32.mrf.mxu1  ;;  %v11267_v51 = vld [vmem:[#allocation11 + $0x25c] sm:$0xf] }
 0x3cc   :  { %7037 = vmatpush.bf16.msra.mxu1 %v9239_v52  ;;  %v11431_v46 = vld [vmem:[#allocation11 + $0x774] sm:$0xf0]  ;;  %6959 = vmatpush.bf16.msra.mxu3 %v9747_v59  ;;  %v9076_v6 = vld [vmem:[#allocation11 + $0x278] sm:$0xf0]  ;;  %v6707_v59 = vpop.f32.mrf.mxu3 }
 0x3cd   :  { %v10418_v11 = vld [vmem:[#allocation11 + $0xcd8] sm:$0xf]  ;;  %v9715_v13 = vor.u32 %v11431_v46, %v9714_v53  ;;  %v6708_v49 = vadd.f32 %v6707_v59, %v6695_v19  ;;  %v10004_v15 = vld [vmem:[#allocation11 + $0x9b8] sm:$0xf0] }
 0x3ce   :  { %v11607_v33 = vld [vmem:[#allocation11 + $0xcf4] sm:$0xf0]  ;;  %7025 = vmatpush.bf16.msra.mxu0 %v8951_v32  ;;  %7000 = vmatpush.bf16.msrb.mxu2 %v10451_v9  ;;  %v12382_v32 = vld [vmem:[#allocation14] sm:$0xff]  ;;  %v11563_v19 = vld [vmem:[#allocation11 + $0xb9c] sm:$0xf] }
 0x3cf   :  { %v9682_v60 = vld [vmem:[#allocation11 + $0x718] sm:$0xf]  ;;  %v10419_v28 = vor.u32 %v11607_v33, %v10418_v11  ;;  %v9079_v11 = vor.u32 %v11267_v51, %v9076_v6  ;;  %v11363_v51 = vld [vmem:[#allocation11 + $0x55c] sm:$0xf] }
 0x3d0   :  { %7038 = vmatpush.bf16.msra.mxu1 %v9207_v31  ;;  %v11423_v55 = vld [vmem:[#allocation11 + $0x734] sm:$0xf0]  ;;  %6960 = vmatpush.bf16.msra.mxu3 %v9715_v13  ;;  %v7140_v31 = vperm.slane %v12382_v32, 3  ;;  %v11195_v13 = vld [vmem:[#allocation11 + $0x1c] sm:$0xf] }
 0x3d1   :  { %v10386_v63 = vld [vmem:[#allocation11 + $0xc98] sm:$0xf]  ;;  %v9683_v8 = vor.u32 %v11423_v55, %v9682_v60  ;;  %v12385_v60 = vld [vmem:[#allocation16] sm:$0xff]  ;;  %v9460_v6 = vld [vmem:[#allocation11 + $0x578] sm:$0xf0] }
 0x3d2   :  { %v11599_v40 = vld [vmem:[#allocation11 + $0xcb4] sm:$0xf0]  ;;  %7026 = vmatpush.bf16.msra.mxu0 %v8919_v50  ;;  %7001 = vmatpush.bf16.msrb.mxu2 %v10419_v28  ;;  %v8788_v50 = vld [vmem:[#allocation11 + $0x38] sm:$0xf0]  ;;  %v7166_v55 = vperm.slane %v12385_v60, 3  ;;  %v9463_v27 = vor.u32 %v11363_v51, %v9460_v6 }
 0x3d3   :  { %v9650_v45 = vld [vmem:[#allocation11 + $0x6d8] sm:$0xf]  ;;  %v10387_v47 = vor.u32 %v11599_v40, %v10386_v63  ;;  %v11259_v28 = vld [vmem:[#allocation11 + $0x21c] sm:$0xf]  ;;  %v8791_v0 = vor.u32 %v11195_v13, %v8788_v50 }
 0x3d4   :  { %7039 = vmatpush.bf16.msra.mxu1 %v9175_v42  ;;  %v11415_v38 = vld [vmem:[#allocation11 + $0x6f4] sm:$0xf0]  ;;  %6961 = vmatpush.bf16.msra.mxu3 %v9683_v8  ;;  %v7130_v42 = vmax.f32 %v6708_v49, 0.0  ;;  %v10036_v63 = vld [vmem:[#allocation11 + $0x9f8] sm:$0xf0]  ;;  %v9047_v3 = vor.u32 %v11259_v28, %v9044_v25  ;;  %v3724_v28 = vperm.slane %v12357_v61, 5 }
 0x3d5   :  { %v10354_v24 = vld [vmem:[#allocation11 + $0xc58] sm:$0xf]  ;;  %v9651_v41 = vor.u32 %v11415_v38, %v9650_v45  ;;  %v11571_v40 = vld [vmem:[#allocation11 + $0xbdc] sm:$0xf] }
 0x3d6   :  { %v11591_v48 = vld [vmem:[#allocation11 + $0xc74] sm:$0xf0]  ;;  %7027 = vmatpush.bf16.msra.mxu0 %v8887_v35  ;;  %7002 = vmatpush.bf16.msrb.mxu2 %v10387_v47  ;;  %v7156_v8 = vmul.f32 %v7140_v31, %v7130_v42  ;;  %v11371_v45 = vld [vmem:[#allocation11 + $0x59c] sm:$0xf] }
 0x3d7   :  { %v9618_v52 = vld [vmem:[#allocation11 + $0x698] sm:$0xf]  ;;  %v10355_v1 = vor.u32 %v11591_v48, %v10354_v24  ;;  %v9492_v38 = vld [vmem:[#allocation11 + $0x5b8] sm:$0xf0]  ;;  %v10039_v24 = vor.u32 %v11507_v39, %v10036_v63 }
 0x3d8   :  { %7040 = vmatpush.bf16.msra.mxu1 %v9143_v44  ;;  %v11407_v54 = vld [vmem:[#allocation11 + $0x6b4] sm:$0xf0]  ;;  %6962 = vmatpush.bf16.msra.mxu3 %v9651_v41  ;;  %v10292_v44 = vld [vmem:[#allocation11 + $0xbf8] sm:$0xf0]  ;;  %v7182_v2 = vadd.f32 %v7166_v55, %v7156_v8 }
 0x3d9   :  { %v10322_v53 = vld [vmem:[#allocation11 + $0xc18] sm:$0xf]  ;;  %v9619_v9 = vor.u32 %v11407_v54, %v9618_v52  ;;  %v9495_v52 = vor.u32 %v11371_v45, %v9492_v38  ;;  %v11499_v54 = vld [vmem:[#allocation11 + $0x99c] sm:$0xf] }
 0x3da   :  { %v11583_v46 = vld [vmem:[#allocation11 + $0xc34] sm:$0xf0]  ;;  %7028 = vmatpush.bf16.msra.mxu0 %v8855_v58  ;;  %7003 = vmatpush.bf16.msrb.mxu2 %v10355_v1  ;;  %v6709_v58 = vpop.f32.mrf.mxu3  ;;  %v7190_v56 = vmax.f32 %v7182_v2, 0.0  ;;  %v10260_v1 = vld [vmem:[#allocation11 + $0xbb8] sm:$0xf0]  ;;  %v10007_v59 = vor.u32 %v11499_v54, %v10004_v15 }
 0x3db   :  { %v9586_v30 = vld [vmem:[#allocation11 + $0x658] sm:$0xf]  ;;  %v10323_v21 = vor.u32 %v11583_v46, %v10322_v53  ;;  %v10263_v46 = vor.u32 %v11563_v19, %v10260_v1  ;;  %v11491_v49 = vld [vmem:[#allocation11 + $0x95c] sm:$0xf] }
 0x3dc   :  { %7041 = vmatpush.bf16.msra.mxu1 %v9111_v14  ;;  %v11399_v33 = vld [vmem:[#allocation11 + $0x674] sm:$0xf0]  ;;  %6963 = vmatpush.bf16.msra.mxu3 %v9619_v9  ;;  %v10295_v14 = vor.u32 %v11571_v40, %v10292_v44  ;;  %7198 = vst [vmem:[#allocation17 + $0x18] sm:$0xff] %v7190_v56  ;;  %v9972_v9 = vld [vmem:[#allocation11 + $0x978] sm:$0xf0] }
 0x3dd   :  { %v9587_v35 = vor.u32 %v11399_v33, %v9586_v30  ;;  %v9554_v47 = vld [vmem:[#allocation11 + $0x618] sm:$0xf]  ;;  %v11555_v10 = vld [vmem:[#allocation11 + $0xb5c] sm:$0xf]  ;;  %v9975_v33 = vor.u32 %v11491_v49, %v9972_v9 }
 0x3de   :  { %7029 = vmatpush.bf16.msra.mxu0 %v8823_v4  ;;  %v11391_v26 = vld [vmem:[#allocation11 + $0x634] sm:$0xf0]  ;;  %7004 = vmatpush.bf16.msrb.mxu2 %v10323_v21  ;;  %v10228_v30 = vld [vmem:[#allocation11 + $0xb78] sm:$0xf0] }
 0x3df   :  { %v10802_v48 = vld [vmem:[#allocation11 + $0xfd8] sm:$0xf]  ;;  %v9555_v23 = vor.u32 %v11391_v26, %v9554_v47  ;;  %v11355_v4 = vld [vmem:[#allocation11 + $0x51c] sm:$0xf]  ;;  %v10231_v42 = vor.u32 %v11555_v10, %v10228_v30 }
 0x3e0   :  { %7042 = vmatpush.bf16.msra.mxu1 %v9079_v11  ;;  %v11703_v41 = vld [vmem:[#allocation11 + $0xff4] sm:$0xf0]  ;;  %6964 = vmatpush.bf16.msra.mxu3 %v9587_v35  ;;  %v9428_v11 = vld [vmem:[#allocation11 + $0x538] sm:$0xf0] }
 0x3e1   :  { %7005 = vmatmul.bf16.vlgmr.msrb.gmra.mxu2 %v12241_v20  ;;  %v10803_v57 = vor.u32 %v11703_v41, %v10802_v48  ;;  %v10770_v31 = vld [vmem:[#allocation11 + $0xf98] sm:$0xf]  ;;  %v11483_v55 = vld [vmem:[#allocation11 + $0x91c] sm:$0xf]  ;;  %v6824_v44 = vpop.f32.mrf.mxu0 }
 0x3e2   :  { %7049 = vmatpush.bf16.msra.mxu2 %v9527_v62  ;;  %7030 = vmatpush.bf16.msra.mxu0 %v8791_v0  ;;  %v11695_v53 = vld [vmem:[#allocation11 + $0xfb4] sm:$0xf0]  ;;  %v9940_v21 = vld [vmem:[#allocation11 + $0x938] sm:$0xf0]  ;;  %v6825_v47 = vadd.f32 %v6824_v44, %v3724_v28 }
 0x3e3   :  { %v10771_v34 = vor.u32 %v11695_v53, %v10770_v31  ;;  %v10738_v13 = vld [vmem:[#allocation11 + $0xf58] sm:$0xf]  ;;  %v11547_v25 = vld [vmem:[#allocation11 + $0xb1c] sm:$0xf]  ;;  %v9943_v40 = vor.u32 %v11483_v55, %v9940_v21  ;;  %v6837_v26 = vpop.f32.mrf.mxu1 }
 0x3e4   :  { %7043 = vmatpush.bf16.msra.mxu1 %v9047_v3  ;;  %6965 = vmatpush.bf16.msra.mxu3 %v9555_v23  ;;  %v11687_v50 = vld [vmem:[#allocation11 + $0xf74] sm:$0xf0]  ;;  %v11347_v39 = vld [vmem:[#allocation11 + $0x4dc] sm:$0xf] }
 0x3e5   :  { %7031 = vmatmul.bf16.vlgmr.msra.gmra.mxu0 %v12193_v36  ;;  %v9431_v36 = vor.u32 %v11355_v4, %v9428_v11  ;;  %v10739_v62 = vor.u32 %v11687_v50, %v10738_v13  ;;  %v9396_v63 = vld [vmem:[#allocation11 + $0x4f8] sm:$0xf0]  ;;  %v10706_v8 = vld [vmem:[#allocation11 + $0xf18] sm:$0xf] }
 0x3e6   :  { %7075 = vmatpush.bf16.msrb.mxu0 %v10039_v24  ;;  %7050 = vmatpush.bf16.msra.mxu2 %v9495_v52  ;;  %v11679_v35 = vld [vmem:[#allocation11 + $0xf34] sm:$0xf0]  ;;  %v11475_v38 = vld [vmem:[#allocation11 + $0x8dc] sm:$0xf]  ;;  %v9399_v2 = vor.u32 %v11347_v39, %v9396_v63  ;;  %v12395_v52 = vpop.f32.mrf.mxu2 }
 0x3e7   :  { %7044 = vmatmul.bf16.vlgmr.msra.gmra.mxu1 %v12195_v18  ;;  %6966 = vmatmul.bf16.vlgmr.msra.gmra.mxu3 %v12199_v5  ;;  %v10196_v18 = vld [vmem:[#allocation11 + $0xb38] sm:$0xf0]  ;;  %v10707_v48 = vor.u32 %v11679_v35, %v10706_v8  ;;  %v10674_v15 = vld [vmem:[#allocation11 + $0xed8] sm:$0xf] }
 0x3e8   :  { %7088 = vmatpush.bf16.msrb.mxu1 %v10295_v14  ;;  %7010 = vmatpush.bf16.msrb.mxu3 %v10803_v57  ;;  %v10199_v45 = vor.u32 %v11547_v25, %v10196_v18  ;;  %v9908_v0 = vld [vmem:[#allocation11 + $0x8f8] sm:$0xf0]  ;;  %v12393_v14 = vadd.f32 %v6837_v26, %v6825_v47  ;;  %v11671_v56 = vld [vmem:[#allocation11 + $0xef4] sm:$0xf0] }
 0x3e9   :  { %v11539_v3 = vld [vmem:[#allocation11 + $0xadc] sm:$0xf]  ;;  %v9911_v54 = vor.u32 %v11475_v38, %v9908_v0  ;;  %v10642_v49 = vld [vmem:[#allocation11 + $0xe98] sm:$0xf]  ;;  %v6826_v10 = vpop.f32.mrf.mxu0 }
 0x3ea   :  { %7076 = vmatpush.bf16.msrb.mxu0 %v10007_v59  ;;  %7051 = vmatpush.bf16.msra.mxu2 %v9463_v27  ;;  %v10164_v24 = vld [vmem:[#allocation11 + $0xaf8] sm:$0xf0]  ;;  %v10675_v59 = vor.u32 %v11671_v56, %v10674_v15  ;;  %v11663_v9 = vld [vmem:[#allocation11 + $0xeb4] sm:$0xf0]  ;;  %v6747_v27 = vadd.f32 %v12378_v43, %v12360_v29 }
 0x3eb   :  { %v11339_v41 = vld [vmem:[#allocation11 + $0x49c] sm:$0xf]  ;;  %v10167_v23 = vor.u32 %v11539_v3, %v10164_v24  ;;  %v6839_v11 = vpop.f32.mrf.mxu1  ;;  %v10643_v21 = vor.u32 %v11663_v9, %v10642_v49  ;;  %v11655_v39 = vld [vmem:[#allocation11 + $0xe74] sm:$0xf0] }
 0x3ec   :  { %7089 = vmatpush.bf16.msrb.mxu1 %v10263_v46  ;;  %7011 = vmatpush.bf16.msrb.mxu3 %v10771_v34  ;;  %v9364_v58 = vld [vmem:[#allocation11 + $0x4b8] sm:$0xf0] }
 0x3ed   :  { %v11467_v19 = vld [vmem:[#allocation11 + $0x89c] sm:$0xf]  ;;  %v9367_v57 = vor.u32 %v11339_v41, %v9364_v58 }
 0x3ee   :  { %7077 = vmatpush.bf16.msrb.mxu0 %v9975_v33  ;;  %7052 = vmatpush.bf16.msra.mxu2 %v9431_v36  ;;  %v9876_v1 = vld [vmem:[#allocation11 + $0x8b8] sm:$0xf0]  ;;  %v6759_v33 = vpop.f32.mrf.mxu3  ;;  %v6800_v18 = vpop.f32.mrf.mxu2 }
 0x3ef   :  { %v11531_v51 = vld [vmem:[#allocation11 + $0xa9c] sm:$0xf]  ;;  %v9879_v46 = vor.u32 %v11467_v19, %v9876_v1  ;;  %v6760_v55 = vadd.f32 %v6759_v33, %v6747_v27 }
 0x3f0   :  { %7090 = vmatpush.bf16.msrb.mxu1 %v10231_v42  ;;  %7012 = vmatpush.bf16.msrb.mxu3 %v10739_v62  ;;  %v10132_v6 = vld [vmem:[#allocation11 + $0xab8] sm:$0xf0]  ;;  %v10610_v62 = vld [vmem:[#allocation11 + $0xe58] sm:$0xf] }
 0x3f1   :  { %v11331_v31 = vld [vmem:[#allocation11 + $0x45c] sm:$0xf]  ;;  %v10135_v30 = vor.u32 %v11531_v51, %v10132_v6  ;;  %v6773_v63 = vadd.f32 %v12374_v12, %v6760_v55  ;;  %v10611_v47 = vor.u32 %v11655_v39, %v10610_v62  ;;  %v11647_v12 = vld [vmem:[#allocation11 + $0xe34] sm:$0xf0] }
 0x3f2   :  { %7078 = vmatpush.bf16.msrb.mxu0 %v9943_v40  ;;  %7053 = vmatpush.bf16.msra.mxu2 %v9399_v2  ;;  %v9332_v53 = vld [vmem:[#allocation11 + $0x478] sm:$0xf0] }
 0x3f3   :  { %v11459_v34 = vld [vmem:[#allocation11 + $0x85c] sm:$0xf]  ;;  %v9335_v13 = vor.u32 %v11331_v31, %v9332_v53  ;;  %v12401_v2 = vadd.f32 %v12376_v7, %v6773_v63 }
 0x3f4   :  { %7091 = vmatpush.bf16.msrb.mxu1 %v10199_v45  ;;  %7013 = vmatpush.bf16.msrb.mxu3 %v10707_v48  ;;  %v9844_v4 = vld [vmem:[#allocation11 + $0x878] sm:$0xf0]  ;;  %v10578_v48 = vld [vmem:[#allocation11 + $0xe18] sm:$0xf] }
 0x3f5   :  { %v11523_v50 = vld [vmem:[#allocation11 + $0xa5c] sm:$0xf]  ;;  %v9847_v29 = vor.u32 %v11459_v34, %v9844_v4  ;;  %v6799_v39 = vadd.f32 %v12395_v52, %v12401_v2 }
 0x3f6   :  { %7079 = vmatpush.bf16.msrb.mxu0 %v9911_v54  ;;  %7054 = vmatpush.bf16.msra.mxu2 %v9367_v57  ;;  %v10100_v42 = vld [vmem:[#allocation11 + $0xa78] sm:$0xf0]  ;;  %v6761_v58 = vpop.f32.mrf.mxu3 }
 0x3f7   :  { %v11323_v36 = vld [vmem:[#allocation11 + $0x41c] sm:$0xf]  ;;  %v10103_v40 = vor.u32 %v11523_v50, %v10100_v42 }
 0x3f8   :  { %7092 = vmatpush.bf16.msrb.mxu1 %v10167_v23  ;;  %7014 = vmatpush.bf16.msrb.mxu3 %v10675_v59  ;;  %v9300_v28 = vld [vmem:[#allocation11 + $0x438] sm:$0xf0]  ;;  %v10579_v23 = vor.u32 %v11647_v12, %v10578_v48 }
 0x3f9   :  { %v11635_v25 = vld [vmem:[#allocation11 + $0xddc] sm:$0xf]  ;;  %v9303_v44 = vor.u32 %v11323_v36, %v9300_v28 }
 0x3fa   :  { %7080 = vmatpush.bf16.msrb.mxu0 %v9879_v46  ;;  %v10548_v43 = vld [vmem:[#allocation11 + $0xdf8] sm:$0xf0]  ;;  %7055 = vmatpush.bf16.msra.mxu2 %v9335_v13 }
 0x3fb   :  { %v11451_v8 = vld [vmem:[#allocation11 + $0x81c] sm:$0xf]  ;;  %v10551_v0 = vor.u32 %v11635_v25, %v10548_v43 }
 0x3fc   :  { %7093 = vmatpush.bf16.msrb.mxu1 %v10135_v30  ;;  %v9812_v35 = vld [vmem:[#allocation11 + $0x838] sm:$0xf0]  ;;  %7015 = vmatpush.bf16.msrb.mxu3 %v10643_v21 }
 0x3fd   :  { %v11515_v45 = vld [vmem:[#allocation11 + $0xa1c] sm:$0xf]  ;;  %v9815_v3 = vor.u32 %v11451_v8, %v9812_v35 }
 0x3fe   :  { %v10068_v38 = vld [vmem:[#allocation11 + $0xa38] sm:$0xf0]  ;;  %7081 = vmatpush.bf16.msrb.mxu0 %v9847_v29  ;;  %7056 = vmatpush.bf16.msra.mxu2 %v9303_v44 }
 0x3ff   :  { %v11627_v26 = vld [vmem:[#allocation11 + $0xd9c] sm:$0xf]  ;;  %v10071_v41 = vor.u32 %v11515_v45, %v10068_v38  ;;  %v7141_v45 = vperm.slane %v12382_v32, 4 }
 0x400   :  { %v10516_v24 = vld [vmem:[#allocation11 + $0xdb8] sm:$0xf0]  ;;  %7094 = vmatpush.bf16.msrb.mxu1 %v10103_v40  ;;  %7016 = vmatpush.bf16.msrb.mxu3 %v10611_v47 }
 0x401   :  { %v11443_v54 = vld [vmem:[#allocation11 + $0x7dc] sm:$0xf]  ;;  %v10519_v56 = vor.u32 %v11627_v26, %v10516_v24  ;;  %7057 = vmatmul.bf16.vlgmr.msra.gmra.mxu2 %v12197_v37  ;;  %v7167_v24 = vperm.slane %v12385_v60, 4 }
 0x402   :  { %v9780_v15 = vld [vmem:[#allocation11 + $0x7f8] sm:$0xf0]  ;;  %7101 = vmatpush.bf16.msrb.mxu2 %v10551_v0  ;;  %7082 = vmatpush.bf16.msrb.mxu0 %v9815_v3 }
 0x403   :  { %v11619_v19 = vld [vmem:[#allocation11 + $0xd5c] sm:$0xf]  ;;  %v9783_v7 = vor.u32 %v11443_v54, %v9780_v15 }
 0x404   :  { %v10484_v1 = vld [vmem:[#allocation11 + $0xd78] sm:$0xf0]  ;;  %7095 = vmatpush.bf16.msrb.mxu1 %v10071_v41  ;;  %7017 = vmatpush.bf16.msrb.mxu3 %v10579_v23  ;;  %v12411_v50 = vpop.f32.mrf.mxu2  ;;  %v6811_v40 = vpop.f32.mrf.mxu3 }
 0x405   :  { %v11435_v57 = vld [vmem:[#allocation11 + $0x79c] sm:$0xf]  ;;  %v10487_v6 = vor.u32 %v11619_v19, %v10484_v1  ;;  %7083 = vmatmul.bf16.vlgmr.msrb.gmra.mxu0 %v12216_v16  ;;  %v12407_v16 = vpop.f32.mrf.mxu0  ;;  %v6812_v44 = vadd.f32 %v6811_v40, %v6799_v39 }
 0x406   :  { %v9748_v51 = vld [vmem:[#allocation11 + $0x7b8] sm:$0xf0]  ;;  %7102 = vmatpush.bf16.msrb.mxu2 %v10519_v56 }
 0x407   :  { %7096 = vmatmul.bf16.vlgmr.msrb.gmra.mxu1 %v12214_v17  ;;  %v11611_v59 = vld [vmem:[#allocation11 + $0xd1c] sm:$0xf]  ;;  %v9751_v53 = vor.u32 %v11435_v57, %v9748_v51  ;;  %7018 = vmatmul.bf16.vlgmr.msrb.gmra.mxu3 %v12251_v22  ;;  %v12409_v17 = vpop.f32.mrf.mxu1  ;;  %v7131_v3 = vmax.f32 %v6812_v44, 0.0 }
 0x408   :  { %v10452_v31 = vld [vmem:[#allocation11 + $0xd38] sm:$0xf0]  ;;  %7062 = vmatpush.bf16.msra.mxu3 %v9783_v7 }
 0x409   :  { %v11427_v46 = vld [vmem:[#allocation11 + $0x75c] sm:$0xf]  ;;  %v10455_v37 = vor.u32 %v11611_v59, %v10452_v31  ;;  %v7157_v12 = vmul.f32 %v7141_v45, %v7131_v3  ;;  %v3725_v31 = vperm.slane %v12357_v61, 6  ;;  %v7168_v3 = vperm.slane %v12385_v60, 5 }
 0x40a   :  { %v9716_v49 = vld [vmem:[#allocation11 + $0x778] sm:$0xf0]  ;;  %7103 = vmatpush.bf16.msrb.mxu2 %v10487_v6 }
 0x40b   :  { %v11603_v9 = vld [vmem:[#allocation11 + $0xcdc] sm:$0xf]  ;;  %v9719_v10 = vor.u32 %v11427_v46, %v9716_v49  ;;  %v7183_v58 = vadd.f32 %v7167_v24, %v7157_v12 }
 0x40c   :  { %v10420_v27 = vld [vmem:[#allocation11 + $0xcf8] sm:$0xf0]  ;;  %7063 = vmatpush.bf16.msra.mxu3 %v9751_v53  ;;  %v6852_v0 = vpop.f32.mrf.mxu2  ;;  %v6813_v56 = vpop.f32.mrf.mxu3 }
 0x40d   :  { %v11419_v30 = vld [vmem:[#allocation11 + $0x71c] sm:$0xf]  ;;  %v10423_v4 = vor.u32 %v11603_v9, %v10420_v27  ;;  %v6878_v43 = vpop.f32.mrf.mxu0  ;;  %v7191_v23 = vmax.f32 %v7183_v58, 0.0 }
 0x40e   :  { %v9684_v34 = vld [vmem:[#allocation11 + $0x738] sm:$0xf0]  ;;  %7104 = vmatpush.bf16.msrb.mxu2 %v10455_v37 }
 0x40f   :  { %v11595_v11 = vld [vmem:[#allocation11 + $0xc9c] sm:$0xf]  ;;  %v9687_v13 = vor.u32 %v11419_v30, %v9684_v34  ;;  %v6891_v62 = vpop.f32.mrf.mxu1  ;;  %7199 = vst [vmem:[#allocation17 + $0x20] sm:$0xff] %v7191_v23 }
 0x410   :  { %v10388_v33 = vld [vmem:[#allocation11 + $0xcb8] sm:$0xf0]  ;;  %7064 = vmatpush.bf16.msra.mxu3 %v9719_v10 }
 0x411   :  { %v11411_v42 = vld [vmem:[#allocation11 + $0x6dc] sm:$0xf]  ;;  %v10391_v21 = vor.u32 %v11595_v11, %v10388_v33 }
 0x412   :  { %v9652_v55 = vld [vmem:[#allocation11 + $0x6f8] sm:$0xf0]  ;;  %7105 = vmatpush.bf16.msrb.mxu2 %v10423_v4 }
 0x413   :  { %v11587_v36 = vld [vmem:[#allocation11 + $0xc5c] sm:$0xf]  ;;  %v9655_v25 = vor.u32 %v11411_v42, %v9652_v55 }
 0x414   :  { %v10356_v28 = vld [vmem:[#allocation11 + $0xc78] sm:$0xf0]  ;;  %7065 = vmatpush.bf16.msra.mxu3 %v9687_v13 }
 0x415   :  { %v11403_v18 = vld [vmem:[#allocation11 + $0x69c] sm:$0xf]  ;;  %v10359_v63 = vor.u32 %v11587_v36, %v10356_v28 }
 0x416   :  { %v9620_v29 = vld [vmem:[#allocation11 + $0x6b8] sm:$0xf0]  ;;  %7106 = vmatpush.bf16.msrb.mxu2 %v10391_v21 }
 0x417   :  { %v11579_v8 = vld [vmem:[#allocation11 + $0xc1c] sm:$0xf]  ;;  %v9623_v38 = vor.u32 %v11403_v18, %v9620_v29 }
 0x418   :  { %v10324_v35 = vld [vmem:[#allocation11 + $0xc38] sm:$0xf0]  ;;  %7066 = vmatpush.bf16.msra.mxu3 %v9655_v25 }
 0x419   :  { %v11395_v47 = vld [vmem:[#allocation11 + $0x65c] sm:$0xf]  ;;  %v10327_v48 = vor.u32 %v11579_v8, %v10324_v35 }
 0x41a   :  { %v9588_v26 = vld [vmem:[#allocation11 + $0x678] sm:$0xf0]  ;;  %7107 = vmatpush.bf16.msrb.mxu2 %v10359_v63 }
 0x41b   :  { %v9591_v52 = vor.u32 %v11395_v47, %v9588_v26  ;;  %v11387_v2 = vld [vmem:[#allocation11 + $0x61c] sm:$0xf]  ;;  %v7142_v47 = vperm.slane %v12382_v32, 5 }
 0x41c   :  { %7067 = vmatpush.bf16.msra.mxu3 %v9623_v38  ;;  %v9556_v41 = vld [vmem:[#allocation11 + $0x638] sm:$0xf0] }
 0x41d   :  { %v11699_v54 = vld [vmem:[#allocation11 + $0xfdc] sm:$0xf]  ;;  %v9559_v19 = vor.u32 %v11387_v2, %v9556_v41 }
 0x41e   :  { %7108 = vmatpush.bf16.msrb.mxu2 %v10327_v48  ;;  %v10804_v15 = vld [vmem:[#allocation11 + $0xff8] sm:$0xf0] }
 0x41f   :  { %v10807_v1 = vor.u32 %v11699_v54, %v10804_v15  ;;  %v11691_v7 = vld [vmem:[#allocation11 + $0xf9c] sm:$0xf] }
 0x420   :  { %7068 = vmatpush.bf16.msra.mxu3 %v9591_v52  ;;  %v10772_v57 = vld [vmem:[#allocation11 + $0xfb8] sm:$0xf0] }
 0x421   :  { %7109 = vmatmul.bf16.vlgmr.msrb.gmra.mxu2 %v12241_v20  ;;  %v10775_v51 = vor.u32 %v11691_v7, %v10772_v57  ;;  %v11683_v6 = vld [vmem:[#allocation11 + $0xf5c] sm:$0xf] }
 0x422   :  { %v10740_v59 = vld [vmem:[#allocation11 + $0xf78] sm:$0xf0]  ;;  %v6928_v37 = vpop.f32.mrf.mxu0 }
 0x423   :  { %v10743_v53 = vor.u32 %v11683_v6, %v10740_v59  ;;  %v11675_v46 = vld [vmem:[#allocation11 + $0xf1c] sm:$0xf]  ;;  %v6929_v9 = vadd.f32 %v6928_v37, %v3725_v31 }
 0x424   :  { %7069 = vmatpush.bf16.msra.mxu3 %v9559_v19  ;;  %v10708_v49 = vld [vmem:[#allocation11 + $0xf38] sm:$0xf0]  ;;  %v6941_v20 = vpop.f32.mrf.mxu1  ;;  %v6902_v30 = vpop.f32.mrf.mxu2 }
 0x425   :  { %v10711_v27 = vor.u32 %v11675_v46, %v10708_v49  ;;  %v6942_v10 = vadd.f32 %v6941_v20, %v6929_v9  ;;  %v11667_v34 = vld [vmem:[#allocation11 + $0xedc] sm:$0xf] }
 0x426   :  { %v10676_v4 = vld [vmem:[#allocation11 + $0xef8] sm:$0xf0] }
 0x427   :  { %7070 = vmatmul.bf16.vlgmr.msra.gmra.mxu3 %v12199_v5  ;;  %v10679_v11 = vor.u32 %v11667_v34, %v10676_v4  ;;  %v11659_v33 = vld [vmem:[#allocation11 + $0xe9c] sm:$0xf]  ;;  %v6851_v5 = vadd.f32 %v12411_v50, %v12393_v14  ;;  %v7143_v34 = vperm.slane %v12382_v32, 6 }
 0x428   :  { %7114 = vmatpush.bf16.msrb.mxu3 %v10807_v1  ;;  %v10644_v13 = vld [vmem:[#allocation11 + $0xeb8] sm:$0xf0] }
 0x429   :  { %v10647_v36 = vor.u32 %v11659_v33, %v10644_v13  ;;  %v11651_v25 = vld [vmem:[#allocation11 + $0xe5c] sm:$0xf] }
 0x42a   :  { %v6930_v61 = vpop.f32.mrf.mxu0  ;;  %v6863_v55 = vpop.f32.mrf.mxu3  ;;  %v10612_v18 = vld [vmem:[#allocation11 + $0xe78] sm:$0xf0] }
 0x42b   :  { %v6864_v21 = vadd.f32 %v6863_v55, %v6851_v5  ;;  %v10615_v43 = vor.u32 %v11651_v25, %v10612_v18  ;;  %v11643_v39 = vld [vmem:[#allocation11 + $0xe1c] sm:$0xf] }
 0x42c   :  { %7115 = vmatpush.bf16.msrb.mxu3 %v10775_v51  ;;  %v6943_v42 = vpop.f32.mrf.mxu1  ;;  %v6904_v28 = vpop.f32.mrf.mxu2  ;;  %v10580_v63 = vld [vmem:[#allocation11 + $0xe38] sm:$0xf0] }
 0x42d   :  { %v6877_v29 = vadd.f32 %v12407_v16, %v6864_v21  ;;  %v10583_v14 = vor.u32 %v11643_v39, %v10580_v63  ;;  %v7144_v63 = vperm.slane %v12382_v32, 7 }
 0x42f   :  { %v6890_v62 = vadd.f32 %v12409_v17, %v6877_v29 }
 0x430   :  { %7116 = vmatpush.bf16.msrb.mxu3 %v10743_v53 }
 0x431   :  { %v6903_v38 = vadd.f32 %v6902_v30, %v6890_v62 }
 0x432   :  { %v6865_v40 = vpop.f32.mrf.mxu3 }
 0x434   :  { %7117 = vmatpush.bf16.msrb.mxu3 %v10711_v27 }
 0x438   :  { %7118 = vmatpush.bf16.msrb.mxu3 %v10679_v11  ;;  %v7169_v11 = vperm.slane %v12385_v60, 6 }
 0x43c   :  { %7119 = vmatpush.bf16.msrb.mxu3 %v10647_v36 }
 0x440   :  { %7120 = vmatpush.bf16.msrb.mxu3 %v10615_v43 }
 0x442   :  { %v6980_v50 = vpop.f32.mrf.mxu0 }
 0x444   :  { %7121 = vmatpush.bf16.msrb.mxu3 %v10583_v14  ;;  %v6993_v8 = vpop.f32.mrf.mxu1  ;;  %v6954_v35 = vpop.f32.mrf.mxu2  ;;  %v7170_v14 = vperm.slane %v12385_v60, 7 }
 0x445   :  { %v6955_v23 = vadd.f32 %v6954_v35, %v6942_v10 }
 0x447   :  { %7122 = vmatmul.bf16.vlgmr.msrb.gmra.mxu3 %v12251_v22  ;;  %v11724_v22 = vld [vmem:[#allocation13] sm:$0xff] }
 0x448   :  { %v3726_v2 = vperm.slane %v11724_v22, 7 }
 0x44a   :  { %v6982_v44 = vpop.f32.mrf.mxu0  ;;  %v6915_v0 = vpop.f32.mrf.mxu3 }
 0x44b   :  { %v6916_v16 = vadd.f32 %v6915_v0, %v6903_v38 }
 0x44c   :  { %v6995_v45 = vpop.f32.mrf.mxu1  ;;  %v6956_v26 = vpop.f32.mrf.mxu2 }
 0x44d   :  { %v7132_v17 = vmax.f32 %v6916_v16, 0.0 }
 0x44f   :  { %v7158_v24 = vmul.f32 %v7142_v47, %v7132_v17 }
 0x451   :  { %v7184_v48 = vadd.f32 %v7168_v3, %v7158_v24 }
 0x452   :  { %v6917_v12 = vpop.f32.mrf.mxu3 }
 0x453   :  { %v7192_v52 = vmax.f32 %v7184_v48, 0.0 }
 0x455   :  { %7200 = vst [vmem:[#allocation17 + $0x28] sm:$0xff] %v7192_v52 }
 0x462   :  { %v7032_v41 = vpop.f32.mrf.mxu0 }
 0x463   :  { %v7033_v58 = vadd.f32 %v7032_v41, %v3726_v2 }
 0x464   :  { %v7045_v54 = vpop.f32.mrf.mxu1  ;;  %v7006_v56 = vpop.f32.mrf.mxu2 }
 0x465   :  { %v7046_v15 = vadd.f32 %v7045_v54, %v7033_v58 }
 0x46a   :  { %v7034_v19 = vpop.f32.mrf.mxu0  ;;  %v6967_v7 = vpop.f32.mrf.mxu3 }
 0x46b   :  { %v6968_v57 = vadd.f32 %v6967_v7, %v6955_v23 }
 0x46c   :  { %v7047_v1 = vpop.f32.mrf.mxu1  ;;  %v7008_v51 = vpop.f32.mrf.mxu2 }
 0x46d   :  { %v6981_v6 = vadd.f32 %v6980_v50, %v6968_v57 }
 0x46f   :  { %v6994_v59 = vadd.f32 %v6993_v8, %v6981_v6 }
 0x471   :  { %v7007_v20 = vadd.f32 %v7006_v56, %v6994_v59 }
 0x472   :  { %v6969_v31 = vpop.f32.mrf.mxu3 }
 0x482   :  { %v7084_v53 = vpop.f32.mrf.mxu0 }
 0x484   :  { %v7097_v46 = vpop.f32.mrf.mxu1  ;;  %v7058_v49 = vpop.f32.mrf.mxu2 }
 0x485   :  { %v7059_v28 = vadd.f32 %v7058_v49, %v7046_v15 }
 0x48a   :  { %v7086_v37 = vpop.f32.mrf.mxu0  ;;  %v7019_v27 = vpop.f32.mrf.mxu3 }
 0x48b   :  { %v7020_v30 = vadd.f32 %v7019_v27, %v7007_v20 }
 0x48c   :  { %v7099_v9 = vpop.f32.mrf.mxu1  ;;  %v7060_v4 = vpop.f32.mrf.mxu2 }
 0x48d   :  { %v7133_v10 = vmax.f32 %v7020_v30, 0.0 }
 0x48f   :  { %v7159_v33 = vmul.f32 %v7143_v34, %v7133_v10 }
 0x491   :  { %v7185_v13 = vadd.f32 %v7169_v11, %v7159_v33 }
 0x492   :  { %v7021_v5 = vpop.f32.mrf.mxu3 }
 0x493   :  { %v7193_v61 = vmax.f32 %v7185_v13, 0.0 }
 0x495   :  { %7201 = vst [vmem:[#allocation17 + $0x30] sm:$0xff] %v7193_v61 }
 0x4a4   :  { %v7110_v42 = vpop.f32.mrf.mxu2 }
 0x4aa   :  { %v7071_v55 = vpop.f32.mrf.mxu3 }
 0x4ab   :  { %v7072_v25 = vadd.f32 %v7071_v55, %v7059_v28 }
 0x4ac   :  { %v7112_v21 = vpop.f32.mrf.mxu2 }
 0x4ad   :  { %v7085_v18 = vadd.f32 %v7084_v53, %v7072_v25 }
 0x4af   :  { %v7098_v29 = vadd.f32 %v7097_v46, %v7085_v18 }
 0x4b1   :  { %v7111_v43 = vadd.f32 %v7110_v42, %v7098_v29 }
 0x4b2   :  { %v7073_v36 = vpop.f32.mrf.mxu3 }
 0x4ca   :  { %v7123_v62 = vpop.f32.mrf.mxu3 }
 0x4cb   :  { %v7124_v39 = vadd.f32 %v7123_v62, %v7111_v43 }
 0x4cd   :  { %v7134_v40 = vmax.f32 %v7124_v39, 0.0 }
 0x4cf   :  { %v7160_v50 = vmul.f32 %v7144_v63, %v7134_v40 }
 0x4d1   :  { %v7186_v8 = vadd.f32 %v7170_v14, %v7160_v50 }
 0x4d2   :  { %v7125_v35 = vpop.f32.mrf.mxu3 }
 0x4d3   :  { %v7194_v44 = vmax.f32 %v7186_v8, 0.0 }
 0x4d5   :  { %7202 = vst [vmem:[#allocation17 + $0x38] sm:$0xff] %v7194_v44 }
 0x4d6   :  { %7213 = dma.vmem_to_hbm [thread:$0]  %s7209_s8, 1024, %s7211_s28, [#allocation4]  }
 0x4d7   :  { %11975 = dma.done.wait [#allocation4], 1024  }
 0x4d8   :  { %11976 = vsyncadd [#allocation4], 4294966272 }
 0x4d9   :  { %7218 = vsyncpa [#allocation3], 1 }
 0x4da   :  { %7219 = vsyncpa [#allocation6], 1 }
 0x4db   :  { %7220 = vsyncpa [#allocation9], 1 }
 0x4dc   :  { %7221 = vsyncpa [#allocation12], 1 }
 0x4dd   :  { %7222 = vsyncpa [#allocation15], 1 }
 0x4de   :  { %7223 = vsyncpa [#allocation4], 1 }

</bundles_post_ra>
